<compile_context>
chip_gen: v7x
topology: tpu7x:2x2x1
jax: 0.10.0
libtpu: 0.0.40
codegen_flags: <defaults>
</compile_context>

<pallas_src>
import jax
import jax.numpy as jnp
from jax.experimental import pallas as pl
from jax.experimental.pallas import tpu as pltpu


def _round_up(a: int, b: int) -> int:
    return (a + b - 1) // b * b


def egnn_kernel(rc_ref, row_s_ref, efb_ref,
                tab_ref, cr_ref,
                w1sq_ref, w1r_ref, w1c_ref, b1_ref,
                w2p_ref, b2p_ref, wc1p_ref, bc1_ref, wc2r_ref, bc2_ref,
                wn1tp_ref, wn1mp_ref, bn1_ref, wn2p_ref, bn2p_ref,
                out_ref, acc_ref):
    f32, bf16 = jnp.float32, jnp.bfloat16
    TM = rc_ref.shape[0]
    N, Fp = tab_ref.shape

    m = pl.program_id(0)

    @pl.when(m == 0)
    def _init():
        acc_ref[...] = jnp.zeros_like(acc_ref)

    # --- one-hot gather / scatter operators built directly in bf16 (0/1 exact) ---
    rc = rc_ref[...]                                                         # [TM, 2] int32
    node_iota = jax.lax.broadcasted_iota(jnp.int32, (TM, N), 1)
    row_oh = (rc[:, 0:1] == node_iota).astype(bf16)                          # [TM, N]
    col_oh = (rc[:, 1:2] == node_iota).astype(bf16)                          # [TM, N]
    scat_iota = jax.lax.broadcasted_iota(jnp.int32, (N, TM), 0)
    scat_oh = (row_s_ref[...] == scat_iota).astype(bf16)                     # [N, TM] (pre-transposed)

    # --- fused gather of the node table [x | h] per edge endpoint (2 MXU passes) ---
    tab = tab_ref[...]                                                       # [N, Fp] bf16
    g_row = jnp.dot(row_oh, tab, preferred_element_type=f32)                 # [TM, Fp]
    g_col = jnp.dot(col_oh, tab, preferred_element_type=f32)                 # [TM, Fp]

    lane = jax.lax.broadcasted_iota(jnp.int32, (TM, Fp), 1)
    rij_w = jnp.where(lane < 3, g_row - g_col, 0.0)                          # rij in lanes 0:3
    sq = jnp.sum(rij_w * rij_w, axis=-1, keepdims=True)                      # [TM, 1] ||rij||^2

    # --- edge message MLP; concat realized via pre-split / padded weights, and the
    #     edge-feature contribution arrives as a precomputed per-edge bias (efb). ---
    z = (sq * w1sq_ref[...]                                                  # K=1 -> VPU broadcast
         + jnp.dot(g_row.astype(bf16), w1r_ref[...], preferred_element_type=f32)
         + jnp.dot(g_col.astype(bf16), w1c_ref[...], preferred_element_type=f32)
         + efb_ref[...]
         + b1_ref[...])
    z = jax.nn.silu(z)                                                       # [TM, H] f32
    # message produced directly in lanes [3, 3+H) of a lane-dense [TM, Fp] tile
    msg_w = jax.nn.silu(
        jnp.dot(z.astype(bf16), w2p_ref[...], preferred_element_type=f32) + b2p_ref[...])

    # --- coord net; the [H,1] Wc2 matmul is a VPU multiply + lane reduction ---
    c = jax.nn.silu(
        jnp.dot(msg_w.astype(bf16), wc1p_ref[...], preferred_element_type=f32) + bc1_ref[...])
    coord_msg = jnp.sum(c * wc2r_ref[...], axis=-1, keepdims=True) + bc2_ref[...]   # [TM, 1]

    # --- fused scatter payload: lanes 0:3 = f = rij*coord_msg, lanes 3:3+H = message ---
    # NOTE (v5e): this [N,Fp] read-modify-write is fixed cost per tile; larger TM
    # (fewer tiles) keeps it off the single v5e store slot's critical path.
    payload = (rij_w * coord_msg + msg_w).astype(bf16)                       # disjoint lanes
    acc_ref[...] += jnp.dot(scat_oh, payload, preferred_element_type=f32)    # [N, Fp]

    # --- finalize on the last edge tile: single lane-dense [N, Fp] output ---
    @pl.when(m == pl.num_programs(0) - 1)
    def _finalize():
        acc = acc_ref[...]                                                   # [N, Fp] f32
        out_lane = jax.lax.broadcasted_iota(jnp.int32, (N, Fp), 1)
        # lanes 0:3 -> tot_f = clip(mean-scatter(f)), other lanes zeroed
        tot_f = jnp.where(out_lane < 3,
                          jnp.clip(acc * cr_ref[...], -100.0, 100.0), 0.0)
        # node net on [h | tot_msg]; h is consumed from the bf16 node table and
        # tot_msg from the accumulator through zero-padded weights (no slicing).
        n1 = jax.nn.silu(
            jnp.dot(tab, wn1tp_ref[...], preferred_element_type=f32)
            + jnp.dot(acc.astype(bf16), wn1mp_ref[...], preferred_element_type=f32)
            + bn1_ref[...])                                                  # [N, H] f32
        # h_out lands in lanes 3:3+H via the padded Wn2 (lane-dense store)
        h_lanes = (jnp.dot(n1.astype(bf16), wn2p_ref[...],
                           preferred_element_type=f32) + bn2p_ref[...])      # [N, Fp]
        out_ref[...] = tot_f + h_lanes


def egnn_layer_pallas(x, h, row, col, edge_fea, params, *, tile_m=256):
    (w1, b1, w2, b2, wc1, bc1, wc2, bc2, wn1, bn1, wn2, bn2) = params
    f32, bf16 = jnp.float32, jnp.bfloat16
    N = x.shape[0]
    H = h.shape[1]
    M = row.shape[0]
    E = edge_fea.shape[1]
    Fp = _round_up(3 + H, 128)            # lane-dense width of node table / accumulator / output
    TM = tile_m                           # sweep 256-1024 per generation / VMEM budget
    Mp = _round_up(max(M, TM), TM)
    n_tiles = Mp // TM
    pad = Mp - M

    row = row.astype(jnp.int32)
    col = col.astype(jnp.int32)
    # Sentinel index N matches no node -> padded edges gather zeros and scatter nothing.
    row_p = jnp.concatenate([row, jnp.full((pad,), N, jnp.int32)])
    col_p = jnp.concatenate([col, jnp.full((pad,), N, jnp.int32)])
    rc_p = jnp.stack([row_p, col_p], axis=1)                                 # [Mp, 2] packed indices

    # Precompute the edge-feature contribution of the first edge-MLP layer (removes the
    # K=E MXU pass from the kernel); padded rows are zero.
    hp = jax.lax.Precision.HIGHEST
    efb = jnp.dot(edge_fea.astype(f32), w1[1 + 2 * H:1 + 2 * H + E, :], precision=hp)
    efb_p = jnp.concatenate([efb, jnp.zeros((pad, H), f32)], axis=0)         # [Mp, H]

    # Fused node gather table [x | h] (bf16; the one-hot gather returns these values exactly).
    tab = (jnp.zeros((N, Fp), f32)
           .at[:, 0:3].set(x.astype(f32))
           .at[:, 3:3 + H].set(h.astype(f32))
           .astype(bf16))

    # Per-node in-degree reciprocal for the mean aggregation (hoisted out of the kernel).
    deg = jax.ops.segment_sum(jnp.ones((M,), f32), row, num_segments=N)
    cr = (1.0 / jnp.maximum(deg, 1.0)).reshape(N, 1)

    # Pre-split / zero-padded weights: padded rows/cols are zero, so the x-lanes and the
    # padding lanes of the fused [., Fp] tiles contribute nothing.  No in-kernel slicing.
    w1_sq = w1[0:1, :]
    w1r = jnp.zeros((Fp, H), f32).at[3:3 + H, :].set(w1[1:1 + H, :]).astype(bf16)
    w1c = jnp.zeros((Fp, H), f32).at[3:3 + H, :].set(w1[1 + H:1 + 2 * H, :]).astype(bf16)
    w2p = jnp.zeros((H, Fp), f32).at[:, 3:3 + H].set(w2).astype(bf16)
    b2p = jnp.zeros((1, Fp), f32).at[:, 3:3 + H].set(b2)
    wc1p = jnp.zeros((Fp, H), f32).at[3:3 + H, :].set(wc1).astype(bf16)
    wc2r = wc2.reshape(1, H)
    wn1tp = jnp.zeros((Fp, H), f32).at[3:3 + H, :].set(wn1[0:H, :]).astype(bf16)   # consumes tab (h lanes)
    wn1mp = jnp.zeros((Fp, H), f32).at[3:3 + H, :].set(wn1[H:2 * H, :]).astype(bf16)  # consumes acc (msg lanes)
    wn2p = jnp.zeros((H, Fp), f32).at[:, 3:3 + H].set(wn2).astype(bf16)
    bn2p = jnp.zeros((1, Fp), f32).at[:, 3:3 + H].set(bn2)

    args = (rc_p, row_p.reshape(1, Mp), efb_p,
            tab, cr,
            w1_sq, w1r, w1c, b1,
            w2p, b2p, wc1p, bc1, wc2r, bc2,
            wn1tp, wn1mp, bn1, wn2p, bn2p)
    n_edge_args = 3

    # Generation-aware VMEM budget: ~75% of physical capacity, capped at 100 MiB
    # (v7x: 64 MiB physical -> ~48 MiB; v5e/v6e: 128 MiB -> 96 MiB).
    try:
        vmem_cap = int(getattr(pltpu.get_tpu_info(), "vmem_capacity_bytes",
                               128 * 1024 * 1024))
    except Exception:
        vmem_cap = 128 * 1024 * 1024
    vmem_limit = min(vmem_cap * 3 // 4, 100 * 1024 * 1024)

    flops = (2 * Mp * (3 * N * Fp + 2 * Fp * H + 2 * H * Fp + H)
             + 2 * N * (3 * Fp * H))
    trans = Mp * (2 * H + Fp) + N * H
    bytes_acc = sum(int(a.size) * a.dtype.itemsize for a in args) + N * Fp * 4

    def _run(single_buffer_consts: bool):
        if single_buffer_consts:
            # Grid-invariant operands: single-buffered (halves their resident VMEM).
            const = lambda s: pl.BlockSpec(s, lambda m: (0, 0),
                                           pipeline_mode=pl.Buffered(1))
        else:
            const = lambda s: pl.BlockSpec(s, lambda m: (0, 0))
        in_specs = [pl.BlockSpec((TM, 2), lambda m: (m, 0)),       # packed row|col
                    pl.BlockSpec((1, TM), lambda m: (0, m)),       # lane-major row (scatter)
                    pl.BlockSpec((TM, H), lambda m: (m, 0))] + \
                   [const(a.shape) for a in args[n_edge_args:]]
        return pl.pallas_call(
            egnn_kernel,
            out_shape=jax.ShapeDtypeStruct((N, Fp), f32),          # lane-dense [tot_f | h_out]
            grid=(n_tiles,),
            in_specs=in_specs,
            out_specs=pl.BlockSpec((N, Fp), lambda m: (0, 0)),
            scratch_shapes=[pltpu.VMEM((N, Fp), f32)],
            compiler_params=pltpu.CompilerParams(
                dimension_semantics=("arbitrary",),                # edge axis reduces into acc
                vmem_limit_bytes=int(vmem_limit)),
            cost_estimate=pl.CostEstimate(flops=int(flops), transcendentals=int(trans),
                                          bytes_accessed=int(bytes_acc)),
        )(*args)

    try:
        out = _run(True)
    except Exception:
        # TODO(synk): drop this fallback once pl.Buffered(1) single-buffering of
        #             constant operands is confirmed supported on all targets.
        out = _run(False)

    tot_f = out[:, 0:3]
    x_out = x.astype(f32) + tot_f            # x + clip(mean-scatter(f)); trivial fused XLA add
    h_out = out[:, 3:3 + H]
    return x_out, h_out


def egnn_layer_ref(x, h, row, col, edge_fea, params):
    """Pure-JAX reference (mirrors the PyTorch module), highest matmul precision."""
    (w1, b1, w2, b2, wc1, bc1, wc2, bc2, wn1, bn1, wn2, bn2) = params
    hp = jax.lax.Precision.HIGHEST
    dot = lambda a, b: jnp.dot(a, b, precision=hp)
    N = x.shape[0]
    rij = x[row] - x[col]
    sq = jnp.sum(rij * rij, axis=-1, keepdims=True)
    scalar = jnp.concatenate([sq, h[row], h[col], edge_fea], axis=-1)
    z = jax.nn.silu(dot(scalar, w1) + b1)
    message = jax.nn.silu(dot(z, w2) + b2)
    c = jax.nn.silu(dot(message, wc1) + bc1)
    coord_msg = dot(c, wc2) + bc2
    f = rij * coord_msg
    tot_f_sum = jax.ops.segment_sum(f, row, num_segments=N)
    count = jax.ops.segment_sum(jnp.ones_like(f), row, num_segments=N)
    tot_f = jnp.clip(tot_f_sum / jnp.maximum(count, 1.0), -100.0, 100.0)
    x_out = x + tot_f
    tot_msg = jax.ops.segment_sum(message, row, num_segments=N)
    node_in = jnp.concatenate([h, tot_msg], axis=-1)
    n1 = jax.nn.silu(dot(node_in, wn1) + bn1)
    h_out = dot(n1, wn2) + bn2
    return x_out, h_out


def make_params(key, hidden_nf, in_edge_nf):
    H, E = hidden_nf, in_edge_nf
    din = 1 + 2 * H + E
    shapes = [
        (din, H), (1, H), (H, H), (1, H),        # edge_message_net (Linear,SiLU,Linear,SiLU)
        (H, H), (1, H), (H, 1), (1, 1),          # coord_net
        (2 * H, H), (1, H), (H, H), (1, H),      # node_net
    ]
    keys = jax.random.split(key, len(shapes))
    return tuple(0.1 * jax.random.normal(k, s, dtype=jnp.float32)
                 for k, s in zip(keys, shapes))


if __name__ == "__main__":
    # N nodes, M directed edges (deliberately not a multiple of the edge tile),
    # hidden H, edge-feature dim E.
    N, M, H, E = 64, 200, 32, 4
    key = jax.random.PRNGKey(0)
    k_x, k_h, k_row, k_col, k_ef, k_p = jax.random.split(key, 6)

    x = jax.random.normal(k_x, (N, 3), dtype=jnp.float32)
    h = jax.random.normal(k_h, (N, H), dtype=jnp.float32)
    row = jax.random.randint(k_row, (M,), 0, N, dtype=jnp.int32)
    col = jax.random.randint(k_col, (M,), 0, N, dtype=jnp.int32)
    edge_fea = jax.random.normal(k_ef, (M, E), dtype=jnp.float32)
    params = make_params(k_p, H, E)

    x_out, h_out = egnn_layer_pallas(x, h, row, col, edge_fea, params, tile_m=256)
    jax.block_until_ready((x_out, h_out))

    x_ref, h_ref = egnn_layer_ref(x, h, row, col, edge_fea, params)
    # Gather/scatter, per-edge MLP and the finalize node-net MXU passes run in bf16 (per
    # perf review) with f32 accumulation; compare with a matching tolerance.
    assert jnp.allclose(x_out, x_ref, atol=4e-2, rtol=4e-2), "x mismatch"
    assert jnp.allclose(h_out, h_ref, atol=4e-2, rtol=4e-2), "h mismatch"

    print("KERNEL_OK")
</pallas_src>

<mosaic_0001>
module attributes {stable_mosaic.version = 11 : i64} {
  func.func @egnn_kernel(%arg0: i32, %arg1: memref<256x2xi32, #tpu.memory_space<vmem>>, %arg2: memref<1x256xi32, #tpu.memory_space<vmem>>, %arg3: memref<256x32xf32, #tpu.memory_space<vmem>>, %arg4: memref<64x128xbf16, #tpu.memory_space<vmem>>, %arg5: memref<64x1xf32, #tpu.memory_space<vmem>>, %arg6: memref<1x32xf32, #tpu.memory_space<vmem>>, %arg7: memref<128x32xbf16, #tpu.memory_space<vmem>>, %arg8: memref<128x32xbf16, #tpu.memory_space<vmem>>, %arg9: memref<1x32xf32, #tpu.memory_space<vmem>>, %arg10: memref<32x128xbf16, #tpu.memory_space<vmem>>, %arg11: memref<1x128xf32, #tpu.memory_space<vmem>>, %arg12: memref<128x32xbf16, #tpu.memory_space<vmem>>, %arg13: memref<1x32xf32, #tpu.memory_space<vmem>>, %arg14: memref<1x32xf32, #tpu.memory_space<vmem>>, %arg15: memref<1x1xf32, #tpu.memory_space<vmem>>, %arg16: memref<128x32xbf16, #tpu.memory_space<vmem>>, %arg17: memref<128x32xbf16, #tpu.memory_space<vmem>>, %arg18: memref<1x32xf32, #tpu.memory_space<vmem>>, %arg19: memref<32x128xbf16, #tpu.memory_space<vmem>>, %arg20: memref<1x128xf32, #tpu.memory_space<vmem>>, %arg21: memref<64x128xf32, #tpu.memory_space<vmem>>, %arg22: memref<64x128xf32, #tpu.memory_space<vmem>>) attributes {dimension_semantics = [#tpu.dimension_semantics<arbitrary>], iteration_bounds = array<i64: 1>, scalar_prefetch = 0 : i64, scratch_operands = 1 : i64, tpu.core_type = #tpu.core_type<tc>, window_params = [{transform_indices = @transform_0, window_bounds = array<i64: 256, 2>}, {transform_indices = @transform_1, window_bounds = array<i64: 1, 256>}, {transform_indices = @transform_2, window_bounds = array<i64: 256, 32>}, {pipeline_mode = #tpu.pipeline_mode<synchronous>, transform_indices = @transform_3, window_bounds = array<i64: 64, 128>}, {pipeline_mode = #tpu.pipeline_mode<synchronous>, transform_indices = @transform_4, window_bounds = array<i64: 64, 1>}, {pipeline_mode = #tpu.pipeline_mode<synchronous>, transform_indices = @transform_5, window_bounds = array<i64: 1, 32>}, {pipeline_mode = #tpu.pipeline_mode<synchronous>, transform_indices = @transform_6, window_bounds = array<i64: 128, 32>}, {pipeline_mode = #tpu.pipeline_mode<synchronous>, transform_indices = @transform_7, window_bounds = array<i64: 128, 32>}, {pipeline_mode = #tpu.pipeline_mode<synchronous>, transform_indices = @transform_8, window_bounds = array<i64: 1, 32>}, {pipeline_mode = #tpu.pipeline_mode<synchronous>, transform_indices = @transform_9, window_bounds = array<i64: 32, 128>}, {pipeline_mode = #tpu.pipeline_mode<synchronous>, transform_indices = @transform_10, window_bounds = array<i64: 1, 128>}, {pipeline_mode = #tpu.pipeline_mode<synchronous>, transform_indices = @transform_11, window_bounds = array<i64: 128, 32>}, {pipeline_mode = #tpu.pipeline_mode<synchronous>, transform_indices = @transform_12, window_bounds = array<i64: 1, 32>}, {pipeline_mode = #tpu.pipeline_mode<synchronous>, transform_indices = @transform_13, window_bounds = array<i64: 1, 32>}, {pipeline_mode = #tpu.pipeline_mode<synchronous>, transform_indices = @transform_14, window_bounds = array<i64: 1, 1>}, {pipeline_mode = #tpu.pipeline_mode<synchronous>, transform_indices = @transform_15, window_bounds = array<i64: 128, 32>}, {pipeline_mode = #tpu.pipeline_mode<synchronous>, transform_indices = @transform_16, window_bounds = array<i64: 128, 32>}, {pipeline_mode = #tpu.pipeline_mode<synchronous>, transform_indices = @transform_17, window_bounds = array<i64: 1, 32>}, {pipeline_mode = #tpu.pipeline_mode<synchronous>, transform_indices = @transform_18, window_bounds = array<i64: 32, 128>}, {pipeline_mode = #tpu.pipeline_mode<synchronous>, transform_indices = @transform_19, window_bounds = array<i64: 1, 128>}, {pipeline_mode = #tpu.pipeline_mode<synchronous>, transform_indices = @transform_20, window_bounds = array<i64: 64, 128>}]} {
    %c0_i32 = arith.constant 0 : i32
    %0 = arith.cmpi eq, %arg0, %c0_i32 : i32
    %1 = arith.extui %0 : i1 to i32
    %c0_i32_0 = arith.constant 0 : i32
    %2 = arith.cmpi ne, %1, %c0_i32_0 : i32
    scf.if %2 {
      %cst_46 = arith.constant 0.000000e+00 : f32
      %102 = vector.broadcast %cst_46 : f32 to vector<64x128xf32>
      %c0_47 = arith.constant 0 : index
      %c0_48 = arith.constant 0 : index
      %103 = vector.load %arg22[%c0_47, %c0_48] : memref<64x128xf32, #tpu.memory_space<vmem>>, vector<64x128xf32>
      tpu.vector_store %arg22[%c0_47, %c0_48], %102 {strides = array<i32>} : memref<64x128xf32, #tpu.memory_space<vmem>>, vector<64x128xf32>,
    } else {
    }
    %c0 = arith.constant 0 : index
    %c0_1 = arith.constant 0 : index
    %3 = vector.load %arg1[%c0, %c0_1] : memref<256x2xi32, #tpu.memory_space<vmem>>, vector<256x2xi32>
    %4 = tpu.iota {dimensions = array<i32: 1>} : vector<256x64xi32>
    %5 = vector.extract_strided_slice %3 {offsets = [0, 0], sizes = [256, 1], strides = [1, 1]} : vector<256x2xi32> to vector<256x1xi32>
    %6 = vector.broadcast %5 : vector<256x1xi32> to vector<256x64xi32>
    %7 = arith.cmpi eq, %6, %4 : vector<256x64xi32>
    %8 = arith.extui %7 : vector<256x64xi1> to vector<256x64xi32>
    %9 = arith.sitofp %8 : vector<256x64xi32> to vector<256x64xf32>
    %10 = arith.truncf %9 : vector<256x64xf32> to vector<256x64xbf16>
    %11 = vector.extract_strided_slice %3 {offsets = [0, 1], sizes = [256, 1], strides = [1, 1]} : vector<256x2xi32> to vector<256x1xi32>
    %12 = vector.broadcast %11 : vector<256x1xi32> to vector<256x64xi32>
    %13 = arith.cmpi eq, %12, %4 : vector<256x64xi32>
    %14 = arith.extui %13 : vector<256x64xi1> to vector<256x64xi32>
    %15 = arith.sitofp %14 : vector<256x64xi32> to vector<256x64xf32>
    %16 = arith.truncf %15 : vector<256x64xf32> to vector<256x64xbf16>
    %17 = tpu.iota {dimensions = array<i32: 0>} : vector<64x256xi32>
    %c0_2 = arith.constant 0 : index
    %c0_3 = arith.constant 0 : index
    %18 = vector.load %arg2[%c0_2, %c0_3] : memref<1x256xi32, #tpu.memory_space<vmem>>, vector<1x256xi32>
    %19 = vector.broadcast %18 : vector<1x256xi32> to vector<64x256xi32>
    %20 = arith.cmpi eq, %19, %17 : vector<64x256xi32>
    %21 = arith.extui %20 : vector<64x256xi1> to vector<64x256xi32>
    %22 = arith.sitofp %21 : vector<64x256xi32> to vector<64x256xf32>
    %23 = arith.truncf %22 : vector<64x256xf32> to vector<64x256xbf16>
    %c0_4 = arith.constant 0 : index
    %c0_5 = arith.constant 0 : index
    %24 = vector.load %arg4[%c0_4, %c0_5] : memref<64x128xbf16, #tpu.memory_space<vmem>>, vector<64x128xbf16>
    %cst = arith.constant dense<0.000000e+00> : vector<256x128xf32>
    %25 = tpu.matmul %10, %24, %cst {dimension_numbers = #tpu.dot_dimension_numbers<[1], [0], [0], [1], [0, 0, 1, 1], [], []>} : vector<256x64xbf16>, vector<64x128xbf16>, vector<256x128xf32> -> vector<256x128xf32>
    %cst_6 = arith.constant dense<0.000000e+00> : vector<256x128xf32>
    %26 = tpu.matmul %16, %24, %cst_6 {dimension_numbers = #tpu.dot_dimension_numbers<[1], [0], [0], [1], [0, 0, 1, 1], [], []>} : vector<256x64xbf16>, vector<64x128xbf16>, vector<256x128xf32> -> vector<256x128xf32>
    %27 = tpu.iota {dimensions = array<i32: 1>} : vector<256x128xi32>
    %c3_i32 = arith.constant 3 : i32
    %28 = vector.broadcast %c3_i32 : i32 to vector<256x128xi32>
    %29 = arith.cmpi slt, %27, %28 : vector<256x128xi32>
    %30 = arith.subf %25, %26 : vector<256x128xf32>
    %cst_7 = arith.constant 0.000000e+00 : f32
    %31 = vector.broadcast %cst_7 : f32 to vector<256x128xf32>
    %32 = arith.select %29, %30, %31 : vector<256x128xi1>, vector<256x128xf32>
    %33 = arith.mulf %32, %32 : vector<256x128xf32>
    %cst_8 = arith.constant dense<0.000000e+00> : vector<256xf32>
    %34 = vector.multi_reduction <add>, %33, %cst_8 [1] : vector<256x128xf32> to vector<256xf32>
    %35 = vector.shape_cast %34 : vector<256xf32> to vector<256x1xf32>
    %c0_9 = arith.constant 0 : index
    %c0_10 = arith.constant 0 : index
    %36 = vector.load %arg6[%c0_9, %c0_10] : memref<1x32xf32, #tpu.memory_space<vmem>>, vector<1x32xf32>
    %37 = vector.broadcast %35 : vector<256x1xf32> to vector<256x32xf32>
    %38 = vector.broadcast %36 : vector<1x32xf32> to vector<256x32xf32>
    %39 = arith.mulf %37, %38 : vector<256x32xf32>
    %40 = arith.truncf %25 : vector<256x128xf32> to vector<256x128xbf16>
    %c0_11 = arith.constant 0 : index
    %c0_12 = arith.constant 0 : index
    %41 = vector.load %arg7[%c0_11, %c0_12] : memref<128x32xbf16, #tpu.memory_space<vmem>>, vector<128x32xbf16>
    %cst_13 = arith.constant dense<0.000000e+00> : vector<256x32xf32>
    %42 = tpu.matmul %40, %41, %cst_13 {dimension_numbers = #tpu.dot_dimension_numbers<[1], [0], [0], [1], [0, 0, 1, 1], [], []>} : vector<256x128xbf16>, vector<128x32xbf16>, vector<256x32xf32> -> vector<256x32xf32>
    %43 = arith.addf %39, %42 : vector<256x32xf32>
    %44 = arith.truncf %26 : vector<256x128xf32> to vector<256x128xbf16>
    %c0_14 = arith.constant 0 : index
    %c0_15 = arith.constant 0 : index
    %45 = vector.load %arg8[%c0_14, %c0_15] : memref<128x32xbf16, #tpu.memory_space<vmem>>, vector<128x32xbf16>
    %cst_16 = arith.constant dense<0.000000e+00> : vector<256x32xf32>
    %46 = tpu.matmul %44, %45, %cst_16 {dimension_numbers = #tpu.dot_dimension_numbers<[1], [0], [0], [1], [0, 0, 1, 1], [], []>} : vector<256x128xbf16>, vector<128x32xbf16>, vector<256x32xf32> -> vector<256x32xf32>
    %47 = arith.addf %43, %46 : vector<256x32xf32>
    %c0_17 = arith.constant 0 : index
    %c0_18 = arith.constant 0 : index
    %48 = vector.load %arg3[%c0_17, %c0_18] : memref<256x32xf32, #tpu.memory_space<vmem>>, vector<256x32xf32>
    %49 = arith.addf %47, %48 : vector<256x32xf32>
    %c0_19 = arith.constant 0 : index
    %c0_20 = arith.constant 0 : index
    %50 = vector.load %arg9[%c0_19, %c0_20] : memref<1x32xf32, #tpu.memory_space<vmem>>, vector<1x32xf32>
    %51 = vector.broadcast %50 : vector<1x32xf32> to vector<256x32xf32>
    %52 = arith.addf %49, %51 : vector<256x32xf32>
    %53 = arith.negf %52 : vector<256x32xf32>
    %54 = math.exp %53 : vector<256x32xf32>
    %cst_21 = arith.constant 1.000000e+00 : f32
    %55 = vector.broadcast %cst_21 : f32 to vector<256x32xf32>
    %56 = arith.addf %55, %54 : vector<256x32xf32>
    %57 = arith.divf %55, %56 : vector<256x32xf32>
    %58 = arith.mulf %52, %57 : vector<256x32xf32>
    %59 = arith.truncf %58 : vector<256x32xf32> to vector<256x32xbf16>
    %c0_22 = arith.constant 0 : index
    %c0_23 = arith.constant 0 : index
    %60 = vector.load %arg10[%c0_22, %c0_23] : memref<32x128xbf16, #tpu.memory_space<vmem>>, vector<32x128xbf16>
    %cst_24 = arith.constant dense<0.000000e+00> : vector<256x128xf32>
    %61 = tpu.matmul %59, %60, %cst_24 {dimension_numbers = #tpu.dot_dimension_numbers<[1], [0], [0], [1], [0, 0, 1, 1], [], []>} : vector<256x32xbf16>, vector<32x128xbf16>, vector<256x128xf32> -> vector<256x128xf32>
    %c0_25 = arith.constant 0 : index
    %c0_26 = arith.constant 0 : index
    %62 = vector.load %arg11[%c0_25, %c0_26] : memref<1x128xf32, #tpu.memory_space<vmem>>, vector<1x128xf32>
    %63 = vector.broadcast %62 : vector<1x128xf32> to vector<256x128xf32>
    %64 = arith.addf %61, %63 : vector<256x128xf32>
    %65 = arith.negf %64 : vector<256x128xf32>
    %66 = math.exp %65 : vector<256x128xf32>
    %cst_27 = arith.constant 1.000000e+00 : f32
    %67 = vector.broadcast %cst_27 : f32 to vector<256x128xf32>
    %68 = arith.addf %67, %66 : vector<256x128xf32>
    %69 = arith.divf %67, %68 : vector<256x128xf32>
    %70 = arith.mulf %64, %69 : vector<256x128xf32>
    %71 = arith.truncf %70 : vector<256x128xf32> to vector<256x128xbf16>
    %c0_28 = arith.constant 0 : index
    %c0_29 = arith.constant 0 : index
    %72 = vector.load %arg12[%c0_28, %c0_29] : memref<128x32xbf16, #tpu.memory_space<vmem>>, vector<128x32xbf16>
    %cst_30 = arith.constant dense<0.000000e+00> : vector<256x32xf32>
    %73 = tpu.matmul %71, %72, %cst_30 {dimension_numbers = #tpu.dot_dimension_numbers<[1], [0], [0], [1], [0, 0, 1, 1], [], []>} : vector<256x128xbf16>, vector<128x32xbf16>, vector<256x32xf32> -> vector<256x32xf32>
    %c0_31 = arith.constant 0 : index
    %c0_32 = arith.constant 0 : index
    %74 = vector.load %arg13[%c0_31, %c0_32] : memref<1x32xf32, #tpu.memory_space<vmem>>, vector<1x32xf32>
    %75 = vector.broadcast %74 : vector<1x32xf32> to vector<256x32xf32>
    %76 = arith.addf %73, %75 : vector<256x32xf32>
    %77 = arith.negf %76 : vector<256x32xf32>
    %78 = math.exp %77 : vector<256x32xf32>
    %cst_33 = arith.constant 1.000000e+00 : f32
    %79 = vector.broadcast %cst_33 : f32 to vector<256x32xf32>
    %80 = arith.addf %79, %78 : vector<256x32xf32>
    %81 = arith.divf %79, %80 : vector<256x32xf32>
    %82 = arith.mulf %76, %81 : vector<256x32xf32>
    %c0_34 = arith.constant 0 : index
    %c0_35 = arith.constant 0 : index
    %83 = vector.load %arg14[%c0_34, %c0_35] : memref<1x32xf32, #tpu.memory_space<vmem>>, vector<1x32xf32>
    %84 = vector.broadcast %83 : vector<1x32xf32> to vector<256x32xf32>
    %85 = arith.mulf %82, %84 : vector<256x32xf32>
    %cst_36 = arith.constant dense<0.000000e+00> : vector<256xf32>
    %86 = vector.multi_reduction <add>, %85, %cst_36 [1] : vector<256x32xf32> to vector<256xf32>
    %87 = vector.shape_cast %86 : vector<256xf32> to vector<256x1xf32>
    %c0_37 = arith.constant 0 : index
    %c0_38 = arith.constant 0 : index
    %88 = vector.load %arg15[%c0_37, %c0_38] : memref<1x1xf32, #tpu.memory_space<vmem>>, vector<1x1xf32>
    %89 = vector.broadcast %88 : vector<1x1xf32> to vector<256x1xf32>
    %90 = arith.addf %87, %89 : vector<256x1xf32>
    %91 = vector.broadcast %90 : vector<256x1xf32> to vector<256x128xf32>
    %92 = arith.mulf %32, %91 : vector<256x128xf32>
    %93 = arith.addf %92, %70 : vector<256x128xf32>
    %94 = arith.truncf %93 : vector<256x128xf32> to vector<256x128xbf16>
    %c0_39 = arith.constant 0 : index
    %c0_40 = arith.constant 0 : index
    %95 = vector.load %arg22[%c0_39, %c0_40] : memref<64x128xf32, #tpu.memory_space<vmem>>, vector<64x128xf32>
    %cst_41 = arith.constant dense<0.000000e+00> : vector<64x128xf32>
    %96 = tpu.matmul %23, %94, %cst_41 {dimension_numbers = #tpu.dot_dimension_numbers<[1], [0], [0], [1], [0, 0, 1, 1], [], []>} : vector<64x256xbf16>, vector<256x128xbf16>, vector<64x128xf32> -> vector<64x128xf32>
    %97 = arith.addf %95, %96 : vector<64x128xf32>
    %c0_42 = arith.constant 0 : index
    %c0_43 = arith.constant 0 : index
    %98 = vector.load %arg22[%c0_42, %c0_43] : memref<64x128xf32, #tpu.memory_space<vmem>>, vector<64x128xf32>
    tpu.vector_store %arg22[%c0_42, %c0_43], %97 {strides = array<i32>} : memref<64x128xf32, #tpu.memory_space<vmem>>, vector<64x128xf32>,
    %c0_i32_44 = arith.constant 0 : i32
    %99 = arith.cmpi eq, %arg0, %c0_i32_44 : i32
    %100 = arith.extui %99 : i1 to i32
    %c0_i32_45 = arith.constant 0 : i32
    %101 = arith.cmpi ne, %100, %c0_i32_45 : i32
    scf.if %101 {
      %c0_46 = arith.constant 0 : index
      %c0_47 = arith.constant 0 : index
      %102 = vector.load %arg22[%c0_46, %c0_47] : memref<64x128xf32, #tpu.memory_space<vmem>>, vector<64x128xf32>
      %103 = tpu.iota {dimensions = array<i32: 1>} : vector<64x128xi32>
      %c3_i32_48 = arith.constant 3 : i32
      %104 = vector.broadcast %c3_i32_48 : i32 to vector<64x128xi32>
      %105 = arith.cmpi slt, %103, %104 : vector<64x128xi32>
      %c0_49 = arith.constant 0 : index
      %c0_50 = arith.constant 0 : index
      %106 = vector.load %arg5[%c0_49, %c0_50] : memref<64x1xf32, #tpu.memory_space<vmem>>, vector<64x1xf32>
      %107 = vector.broadcast %106 : vector<64x1xf32> to vector<64x128xf32>
      %108 = arith.mulf %102, %107 : vector<64x128xf32>
      %cst_51 = arith.constant -1.000000e+02 : f32
      %cst_52 = arith.constant 1.000000e+02 : f32
      %109 = vector.broadcast %cst_51 : f32 to vector<64x128xf32>
      %110 = arith.maximumf %109, %108 : vector<64x128xf32>
      %111 = vector.broadcast %cst_52 : f32 to vector<64x128xf32>
      %112 = arith.minimumf %111, %110 : vector<64x128xf32>
      %cst_53 = arith.constant 0.000000e+00 : f32
      %113 = vector.broadcast %cst_53 : f32 to vector<64x128xf32>
      %114 = arith.select %105, %112, %113 : vector<64x128xi1>, vector<64x128xf32>
      %c0_54 = arith.constant 0 : index
      %c0_55 = arith.constant 0 : index
      %115 = vector.load %arg16[%c0_54, %c0_55] : memref<128x32xbf16, #tpu.memory_space<vmem>>, vector<128x32xbf16>
      %cst_56 = arith.constant dense<0.000000e+00> : vector<64x32xf32>
      %116 = tpu.matmul %24, %115, %cst_56 {dimension_numbers = #tpu.dot_dimension_numbers<[1], [0], [0], [1], [0, 0, 1, 1], [], []>} : vector<64x128xbf16>, vector<128x32xbf16>, vector<64x32xf32> -> vector<64x32xf32>
      %117 = arith.truncf %102 : vector<64x128xf32> to vector<64x128xbf16>
      %c0_57 = arith.constant 0 : index
      %c0_58 = arith.constant 0 : index
      %118 = vector.load %arg17[%c0_57, %c0_58] : memref<128x32xbf16, #tpu.memory_space<vmem>>, vector<128x32xbf16>
      %cst_59 = arith.constant dense<0.000000e+00> : vector<64x32xf32>
      %119 = tpu.matmul %117, %118, %cst_59 {dimension_numbers = #tpu.dot_dimension_numbers<[1], [0], [0], [1], [0, 0, 1, 1], [], []>} : vector<64x128xbf16>, vector<128x32xbf16>, vector<64x32xf32> -> vector<64x32xf32>
      %120 = arith.addf %116, %119 : vector<64x32xf32>
      %c0_60 = arith.constant 0 : index
      %c0_61 = arith.constant 0 : index
      %121 = vector.load %arg18[%c0_60, %c0_61] : memref<1x32xf32, #tpu.memory_space<vmem>>, vector<1x32xf32>
      %122 = vector.broadcast %121 : vector<1x32xf32> to vector<64x32xf32>
      %123 = arith.addf %120, %122 : vector<64x32xf32>
      %124 = arith.negf %123 : vector<64x32xf32>
      %125 = math.exp %124 : vector<64x32xf32>
      %cst_62 = arith.constant 1.000000e+00 : f32
      %126 = vector.broadcast %cst_62 : f32 to vector<64x32xf32>
      %127 = arith.addf %126, %125 : vector<64x32xf32>
      %128 = arith.divf %126, %127 : vector<64x32xf32>
      %129 = arith.mulf %123, %128 : vector<64x32xf32>
      %130 = arith.truncf %129 : vector<64x32xf32> to vector<64x32xbf16>
      %c0_63 = arith.constant 0 : index
      %c0_64 = arith.constant 0 : index
      %131 = vector.load %arg19[%c0_63, %c0_64] : memref<32x128xbf16, #tpu.memory_space<vmem>>, vector<32x128xbf16>
      %cst_65 = arith.constant dense<0.000000e+00> : vector<64x128xf32>
      %132 = tpu.matmul %130, %131, %cst_65 {dimension_numbers = #tpu.dot_dimension_numbers<[1], [0], [0], [1], [0, 0, 1, 1], [], []>} : vector<64x32xbf16>, vector<32x128xbf16>, vector<64x128xf32> -> vector<64x128xf32>
      %c0_66 = arith.constant 0 : index
      %c0_67 = arith.constant 0 : index
      %133 = vector.load %arg20[%c0_66, %c0_67] : memref<1x128xf32, #tpu.memory_space<vmem>>, vector<1x128xf32>
      %134 = vector.broadcast %133 : vector<1x128xf32> to vector<64x128xf32>
      %135 = arith.addf %132, %134 : vector<64x128xf32>
      %136 = arith.addf %114, %135 : vector<64x128xf32>
      %c0_68 = arith.constant 0 : index
      %c0_69 = arith.constant 0 : index
      %137 = vector.load %arg21[%c0_68, %c0_69] : memref<64x128xf32, #tpu.memory_space<vmem>>, vector<64x128xf32>
      tpu.vector_store %arg21[%c0_68, %c0_69], %136 {strides = array<i32>} : memref<64x128xf32, #tpu.memory_space<vmem>>, vector<64x128xf32>,
    } else {
    }
    return
  }
  func.func @transform_0(%arg0: i32) -> (i32, i32) {
    %c0_i32 = arith.constant 0 : i32
    %c0_i32_0 = arith.constant 0 : i32
    return %arg0, %c0_i32 : i32, i32
  }
  func.func @transform_1(%arg0: i32) -> (i32, i32) {
    %c0_i32 = arith.constant 0 : i32
    %c0_i32_0 = arith.constant 0 : i32
    return %c0_i32, %arg0 : i32, i32
  }
  func.func @transform_2(%arg0: i32) -> (i32, i32) {
    %c0_i32 = arith.constant 0 : i32
    %c0_i32_0 = arith.constant 0 : i32
    return %arg0, %c0_i32 : i32, i32
  }
  func.func @transform_3(%arg0: i32) -> (i32, i32) {
    %c0_i32 = arith.constant 0 : i32
    %c0_i32_0 = arith.constant 0 : i32
    %c0_i32_1 = arith.constant 0 : i32
    return %c0_i32, %c0_i32_0 : i32, i32
  }
  func.func @transform_4(%arg0: i32) -> (i32, i32) {
    %c0_i32 = arith.constant 0 : i32
    %c0_i32_0 = arith.constant 0 : i32
    %c0_i32_1 = arith.constant 0 : i32
    return %c0_i32, %c0_i32_0 : i32, i32
  }
  func.func @transform_5(%arg0: i32) -> (i32, i32) {
    %c0_i32 = arith.constant 0 : i32
    %c0_i32_0 = arith.constant 0 : i32
    %c0_i32_1 = arith.constant 0 : i32
    return %c0_i32, %c0_i32_0 : i32, i32
  }
  func.func @transform_6(%arg0: i32) -> (i32, i32) {
    %c0_i32 = arith.constant 0 : i32
    %c0_i32_0 = arith.constant 0 : i32
    %c0_i32_1 = arith.constant 0 : i32
    return %c0_i32, %c0_i32_0 : i32, i32
  }
  func.func @transform_7(%arg0: i32) -> (i32, i32) {
    %c0_i32 = arith.constant 0 : i32
    %c0_i32_0 = arith.constant 0 : i32
    %c0_i32_1 = arith.constant 0 : i32
    return %c0_i32, %c0_i32_0 : i32, i32
  }
  func.func @transform_8(%arg0: i32) -> (i32, i32) {
    %c0_i32 = arith.constant 0 : i32
    %c0_i32_0 = arith.constant 0 : i32
    %c0_i32_1 = arith.constant 0 : i32
    return %c0_i32, %c0_i32_0 : i32, i32
  }
  func.func @transform_9(%arg0: i32) -> (i32, i32) {
    %c0_i32 = arith.constant 0 : i32
    %c0_i32_0 = arith.constant 0 : i32
    %c0_i32_1 = arith.constant 0 : i32
    return %c0_i32, %c0_i32_0 : i32, i32
  }
  func.func @transform_10(%arg0: i32) -> (i32, i32) {
    %c0_i32 = arith.constant 0 : i32
    %c0_i32_0 = arith.constant 0 : i32
    %c0_i32_1 = arith.constant 0 : i32
    return %c0_i32, %c0_i32_0 : i32, i32
  }
  func.func @transform_11(%arg0: i32) -> (i32, i32) {
    %c0_i32 = arith.constant 0 : i32
    %c0_i32_0 = arith.constant 0 : i32
    %c0_i32_1 = arith.constant 0 : i32
    return %c0_i32, %c0_i32_0 : i32, i32
  }
  func.func @transform_12(%arg0: i32) -> (i32, i32) {
    %c0_i32 = arith.constant 0 : i32
    %c0_i32_0 = arith.constant 0 : i32
    %c0_i32_1 = arith.constant 0 : i32
    return %c0_i32, %c0_i32_0 : i32, i32
  }
  func.func @transform_13(%arg0: i32) -> (i32, i32) {
    %c0_i32 = arith.constant 0 : i32
    %c0_i32_0 = arith.constant 0 : i32
    %c0_i32_1 = arith.constant 0 : i32
    return %c0_i32, %c0_i32_0 : i32, i32
  }
  func.func @transform_14(%arg0: i32) -> (i32, i32) {
    %c0_i32 = arith.constant 0 : i32
    %c0_i32_0 = arith.constant 0 : i32
    %c0_i32_1 = arith.constant 0 : i32
    return %c0_i32, %c0_i32_0 : i32, i32
  }
  func.func @transform_15(%arg0: i32) -> (i32, i32) {
    %c0_i32 = arith.constant 0 : i32
    %c0_i32_0 = arith.constant 0 : i32
    %c0_i32_1 = arith.constant 0 : i32
    return %c0_i32, %c0_i32_0 : i32, i32
  }
  func.func @transform_16(%arg0: i32) -> (i32, i32) {
    %c0_i32 = arith.constant 0 : i32
    %c0_i32_0 = arith.constant 0 : i32
    %c0_i32_1 = arith.constant 0 : i32
    return %c0_i32, %c0_i32_0 : i32, i32
  }
  func.func @transform_17(%arg0: i32) -> (i32, i32) {
    %c0_i32 = arith.constant 0 : i32
    %c0_i32_0 = arith.constant 0 : i32
    %c0_i32_1 = arith.constant 0 : i32
    return %c0_i32, %c0_i32_0 : i32, i32
  }
  func.func @transform_18(%arg0: i32) -> (i32, i32) {
    %c0_i32 = arith.constant 0 : i32
    %c0_i32_0 = arith.constant 0 : i32
    %c0_i32_1 = arith.constant 0 : i32
    return %c0_i32, %c0_i32_0 : i32, i32
  }
  func.func @transform_19(%arg0: i32) -> (i32, i32) {
    %c0_i32 = arith.constant 0 : i32
    %c0_i32_0 = arith.constant 0 : i32
    %c0_i32_1 = arith.constant 0 : i32
    return %c0_i32, %c0_i32_0 : i32, i32
  }
  func.func @transform_20(%arg0: i32) -> (i32, i32) {
    %c0_i32 = arith.constant 0 : i32
    %c0_i32_0 = arith.constant 0 : i32
    %c0_i32_1 = arith.constant 0 : i32
    return %c0_i32, %c0_i32_0 : i32, i32
  }
}

module attributes {stable_mosaic.version = 11 : i64} {
  func.func @egnn_kernel(%arg0: i32, %arg1: memref<256x2xi32, #tpu.memory_space<vmem>>, %arg2: memref<1x256xi32, #tpu.memory_space<vmem>>, %arg3: memref<256x32xf32, #tpu.memory_space<vmem>>, %arg4: memref<64x128xbf16, #tpu.memory_space<vmem>>, %arg5: memref<64x1xf32, #tpu.memory_space<vmem>>, %arg6: memref<1x32xf32, #tpu.memory_space<vmem>>, %arg7: memref<128x32xbf16, #tpu.memory_space<vmem>>, %arg8: memref<128x32xbf16, #tpu.memory_space<vmem>>, %arg9: memref<1x32xf32, #tpu.memory_space<vmem>>, %arg10: memref<32x128xbf16, #tpu.memory_space<vmem>>, %arg11: memref<1x128xf32, #tpu.memory_space<vmem>>, %arg12: memref<128x32xbf16, #tpu.memory_space<vmem>>, %arg13: memref<1x32xf32, #tpu.memory_space<vmem>>, %arg14: memref<1x32xf32, #tpu.memory_space<vmem>>, %arg15: memref<1x1xf32, #tpu.memory_space<vmem>>, %arg16: memref<128x32xbf16, #tpu.memory_space<vmem>>, %arg17: memref<128x32xbf16, #tpu.memory_space<vmem>>, %arg18: memref<1x32xf32, #tpu.memory_space<vmem>>, %arg19: memref<32x128xbf16, #tpu.memory_space<vmem>>, %arg20: memref<1x128xf32, #tpu.memory_space<vmem>>, %arg21: memref<64x128xf32, #tpu.memory_space<vmem>>, %arg22: memref<64x128xf32, #tpu.memory_space<vmem>>) attributes {dimension_semantics = [#tpu.dimension_semantics<arbitrary>], iteration_bounds = array<i64: 1>, scalar_prefetch = 0 : i64, scratch_operands = 1 : i64, tpu.core_type = #tpu.core_type<tc>, window_params = [{transform_indices = @transform_0, window_bounds = array<i64: 256, 2>}, {transform_indices = @transform_1, window_bounds = array<i64: 1, 256>}, {transform_indices = @transform_2, window_bounds = array<i64: 256, 32>}, {pipeline_mode = #tpu.pipeline_mode<synchronous>, transform_indices = @transform_3, window_bounds = array<i64: 64, 128>}, {pipeline_mode = #tpu.pipeline_mode<synchronous>, transform_indices = @transform_4, window_bounds = array<i64: 64, 1>}, {pipeline_mode = #tpu.pipeline_mode<synchronous>, transform_indices = @transform_5, window_bounds = array<i64: 1, 32>}, {pipeline_mode = #tpu.pipeline_mode<synchronous>, transform_indices = @transform_6, window_bounds = array<i64: 128, 32>}, {pipeline_mode = #tpu.pipeline_mode<synchronous>, transform_indices = @transform_7, window_bounds = array<i64: 128, 32>}, {pipeline_mode = #tpu.pipeline_mode<synchronous>, transform_indices = @transform_8, window_bounds = array<i64: 1, 32>}, {pipeline_mode = #tpu.pipeline_mode<synchronous>, transform_indices = @transform_9, window_bounds = array<i64: 32, 128>}, {pipeline_mode = #tpu.pipeline_mode<synchronous>, transform_indices = @transform_10, window_bounds = array<i64: 1, 128>}, {pipeline_mode = #tpu.pipeline_mode<synchronous>, transform_indices = @transform_11, window_bounds = array<i64: 128, 32>}, {pipeline_mode = #tpu.pipeline_mode<synchronous>, transform_indices = @transform_12, window_bounds = array<i64: 1, 32>}, {pipeline_mode = #tpu.pipeline_mode<synchronous>, transform_indices = @transform_13, window_bounds = array<i64: 1, 32>}, {pipeline_mode = #tpu.pipeline_mode<synchronous>, transform_indices = @transform_14, window_bounds = array<i64: 1, 1>}, {pipeline_mode = #tpu.pipeline_mode<synchronous>, transform_indices = @transform_15, window_bounds = array<i64: 128, 32>}, {pipeline_mode = #tpu.pipeline_mode<synchronous>, transform_indices = @transform_16, window_bounds = array<i64: 128, 32>}, {pipeline_mode = #tpu.pipeline_mode<synchronous>, transform_indices = @transform_17, window_bounds = array<i64: 1, 32>}, {pipeline_mode = #tpu.pipeline_mode<synchronous>, transform_indices = @transform_18, window_bounds = array<i64: 32, 128>}, {pipeline_mode = #tpu.pipeline_mode<synchronous>, transform_indices = @transform_19, window_bounds = array<i64: 1, 128>}, {pipeline_mode = #tpu.pipeline_mode<synchronous>, transform_indices = @transform_20, window_bounds = array<i64: 64, 128>}]} {
    %c0_i32 = arith.constant 0 : i32
    %0 = arith.cmpi eq, %arg0, %c0_i32 : i32
    %1 = arith.extui %0 : i1 to i32
    %c0_i32_0 = arith.constant 0 : i32
    %2 = arith.cmpi ne, %1, %c0_i32_0 : i32
    scf.if %2 {
      %cst_46 = arith.constant 0.000000e+00 : f32
      %102 = vector.broadcast %cst_46 : f32 to vector<64x128xf32>
      %c0_47 = arith.constant 0 : index
      %c0_48 = arith.constant 0 : index
      %103 = vector.load %arg22[%c0_47, %c0_48] : memref<64x128xf32, #tpu.memory_space<vmem>>, vector<64x128xf32>
      tpu.vector_store %arg22[%c0_47, %c0_48], %102 {strides = array<i32>} : memref<64x128xf32, #tpu.memory_space<vmem>>, vector<64x128xf32>,
    } else {
    }
    %c0 = arith.constant 0 : index
    %c0_1 = arith.constant 0 : index
    %3 = vector.load %arg1[%c0, %c0_1] : memref<256x2xi32, #tpu.memory_space<vmem>>, vector<256x2xi32>
    %4 = tpu.iota {dimensions = array<i32: 1>} : vector<256x64xi32>
    %5 = vector.extract_strided_slice %3 {offsets = [0, 0], sizes = [256, 1], strides = [1, 1]} : vector<256x2xi32> to vector<256x1xi32>
    %6 = vector.broadcast %5 : vector<256x1xi32> to vector<256x64xi32>
    %7 = arith.cmpi eq, %6, %4 : vector<256x64xi32>
    %8 = arith.extui %7 : vector<256x64xi1> to vector<256x64xi32>
    %9 = arith.sitofp %8 : vector<256x64xi32> to vector<256x64xf32>
    %10 = arith.truncf %9 : vector<256x64xf32> to vector<256x64xbf16>
    %11 = vector.extract_strided_slice %3 {offsets = [0, 1], sizes = [256, 1], strides = [1, 1]} : vector<256x2xi32> to vector<256x1xi32>
    %12 = vector.broadcast %11 : vector<256x1xi32> to vector<256x64xi32>
    %13 = arith.cmpi eq, %12, %4 : vector<256x64xi32>
    %14 = arith.extui %13 : vector<256x64xi1> to vector<256x64xi32>
    %15 = arith.sitofp %14 : vector<256x64xi32> to vector<256x64xf32>
    %16 = arith.truncf %15 : vector<256x64xf32> to vector<256x64xbf16>
    %17 = tpu.iota {dimensions = array<i32: 0>} : vector<64x256xi32>
    %c0_2 = arith.constant 0 : index
    %c0_3 = arith.constant 0 : index
    %18 = vector.load %arg2[%c0_2, %c0_3] : memref<1x256xi32, #tpu.memory_space<vmem>>, vector<1x256xi32>
    %19 = vector.broadcast %18 : vector<1x256xi32> to vector<64x256xi32>
    %20 = arith.cmpi eq, %19, %17 : vector<64x256xi32>
    %21 = arith.extui %20 : vector<64x256xi1> to vector<64x256xi32>
    %22 = arith.sitofp %21 : vector<64x256xi32> to vector<64x256xf32>
    %23 = arith.truncf %22 : vector<64x256xf32> to vector<64x256xbf16>
    %c0_4 = arith.constant 0 : index
    %c0_5 = arith.constant 0 : index
    %24 = vector.load %arg4[%c0_4, %c0_5] : memref<64x128xbf16, #tpu.memory_space<vmem>>, vector<64x128xbf16>
    %cst = arith.constant dense<0.000000e+00> : vector<256x128xf32>
    %25 = tpu.matmul %10, %24, %cst {dimension_numbers = #tpu.dot_dimension_numbers<[1], [0], [0], [1], [0, 0, 1, 1], [], []>} : vector<256x64xbf16>, vector<64x128xbf16>, vector<256x128xf32> -> vector<256x128xf32>
    %cst_6 = arith.constant dense<0.000000e+00> : vector<256x128xf32>
    %26 = tpu.matmul %16, %24, %cst_6 {dimension_numbers = #tpu.dot_dimension_numbers<[1], [0], [0], [1], [0, 0, 1, 1], [], []>} : vector<256x64xbf16>, vector<64x128xbf16>, vector<256x128xf32> -> vector<256x128xf32>
    %27 = tpu.iota {dimensions = array<i32: 1>} : vector<256x128xi32>
    %c3_i32 = arith.constant 3 : i32
    %28 = vector.broadcast %c3_i32 : i32 to vector<256x128xi32>
    %29 = arith.cmpi slt, %27, %28 : vector<256x128xi32>
    %30 = arith.subf %25, %26 : vector<256x128xf32>
    %cst_7 = arith.constant 0.000000e+00 : f32
    %31 = vector.broadcast %cst_7 : f32 to vector<256x128xf32>
    %32 = arith.select %29, %30, %31 : vector<256x128xi1>, vector<256x128xf32>
    %33 = arith.mulf %32, %32 : vector<256x128xf32>
    %cst_8 = arith.constant dense<0.000000e+00> : vector<256xf32>
    %34 = vector.multi_reduction <add>, %33, %cst_8 [1] : vector<256x128xf32> to vector<256xf32>
    %35 = vector.shape_cast %34 : vector<256xf32> to vector<256x1xf32>
    %c0_9 = arith.constant 0 : index
    %c0_10 = arith.constant 0 : index
    %36 = vector.load %arg6[%c0_9, %c0_10] : memref<1x32xf32, #tpu.memory_space<vmem>>, vector<1x32xf32>
    %37 = vector.broadcast %35 : vector<256x1xf32> to vector<256x32xf32>
    %38 = vector.broadcast %36 : vector<1x32xf32> to vector<256x32xf32>
    %39 = arith.mulf %37, %38 : vector<256x32xf32>
    %40 = arith.truncf %25 : vector<256x128xf32> to vector<256x128xbf16>
    %c0_11 = arith.constant 0 : index
    %c0_12 = arith.constant 0 : index
    %41 = vector.load %arg7[%c0_11, %c0_12] : memref<128x32xbf16, #tpu.memory_space<vmem>>, vector<128x32xbf16>
    %cst_13 = arith.constant dense<0.000000e+00> : vector<256x32xf32>
    %42 = tpu.matmul %40, %41, %cst_13 {dimension_numbers = #tpu.dot_dimension_numbers<[1], [0], [0], [1], [0, 0, 1, 1], [], []>} : vector<256x128xbf16>, vector<128x32xbf16>, vector<256x32xf32> -> vector<256x32xf32>
    %43 = arith.addf %39, %42 : vector<256x32xf32>
    %44 = arith.truncf %26 : vector<256x128xf32> to vector<256x128xbf16>
    %c0_14 = arith.constant 0 : index
    %c0_15 = arith.constant 0 : index
    %45 = vector.load %arg8[%c0_14, %c0_15] : memref<128x32xbf16, #tpu.memory_space<vmem>>, vector<128x32xbf16>
    %cst_16 = arith.constant dense<0.000000e+00> : vector<256x32xf32>
    %46 = tpu.matmul %44, %45, %cst_16 {dimension_numbers = #tpu.dot_dimension_numbers<[1], [0], [0], [1], [0, 0, 1, 1], [], []>} : vector<256x128xbf16>, vector<128x32xbf16>, vector<256x32xf32> -> vector<256x32xf32>
    %47 = arith.addf %43, %46 : vector<256x32xf32>
    %c0_17 = arith.constant 0 : index
    %c0_18 = arith.constant 0 : index
    %48 = vector.load %arg3[%c0_17, %c0_18] : memref<256x32xf32, #tpu.memory_space<vmem>>, vector<256x32xf32>
    %49 = arith.addf %47, %48 : vector<256x32xf32>
    %c0_19 = arith.constant 0 : index
    %c0_20 = arith.constant 0 : index
    %50 = vector.load %arg9[%c0_19, %c0_20] : memref<1x32xf32, #tpu.memory_space<vmem>>, vector<1x32xf32>
    %51 = vector.broadcast %50 : vector<1x32xf32> to vector<256x32xf32>
    %52 = arith.addf %49, %51 : vector<256x32xf32>
    %53 = arith.negf %52 : vector<256x32xf32>
    %54 = math.exp %53 : vector<256x32xf32>
    %cst_21 = arith.constant 1.000000e+00 : f32
    %55 = vector.broadcast %cst_21 : f32 to vector<256x32xf32>
    %56 = arith.addf %55, %54 : vector<256x32xf32>
    %57 = arith.divf %55, %56 : vector<256x32xf32>
    %58 = arith.mulf %52, %57 : vector<256x32xf32>
    %59 = arith.truncf %58 : vector<256x32xf32> to vector<256x32xbf16>
    %c0_22 = arith.constant 0 : index
    %c0_23 = arith.constant 0 : index
    %60 = vector.load %arg10[%c0_22, %c0_23] : memref<32x128xbf16, #tpu.memory_space<vmem>>, vector<32x128xbf16>
    %cst_24 = arith.constant dense<0.000000e+00> : vector<256x128xf32>
    %61 = tpu.matmul %59, %60, %cst_24 {dimension_numbers = #tpu.dot_dimension_numbers<[1], [0], [0], [1], [0, 0, 1, 1], [], []>} : vector<256x32xbf16>, vector<32x128xbf16>, vector<256x128xf32> -> vector<256x128xf32>
    %c0_25 = arith.constant 0 : index
    %c0_26 = arith.constant 0 : index
    %62 = vector.load %arg11[%c0_25, %c0_26] : memref<1x128xf32, #tpu.memory_space<vmem>>, vector<1x128xf32>
    %63 = vector.broadcast %62 : vector<1x128xf32> to vector<256x128xf32>
    %64 = arith.addf %61, %63 : vector<256x128xf32>
    %65 = arith.negf %64 : vector<256x128xf32>
    %66 = math.exp %65 : vector<256x128xf32>
    %cst_27 = arith.constant 1.000000e+00 : f32
    %67 = vector.broadcast %cst_27 : f32 to vector<256x128xf32>
    %68 = arith.addf %67, %66 : vector<256x128xf32>
    %69 = arith.divf %67, %68 : vector<256x128xf32>
    %70 = arith.mulf %64, %69 : vector<256x128xf32>
    %71 = arith.truncf %70 : vector<256x128xf32> to vector<256x128xbf16>
    %c0_28 = arith.constant 0 : index
    %c0_29 = arith.constant 0 : index
    %72 = vector.load %arg12[%c0_28, %c0_29] : memref<128x32xbf16, #tpu.memory_space<vmem>>, vector<128x32xbf16>
    %cst_30 = arith.constant dense<0.000000e+00> : vector<256x32xf32>
    %73 = tpu.matmul %71, %72, %cst_30 {dimension_numbers = #tpu.dot_dimension_numbers<[1], [0], [0], [1], [0, 0, 1, 1], [], []>} : vector<256x128xbf16>, vector<128x32xbf16>, vector<256x32xf32> -> vector<256x32xf32>
    %c0_31 = arith.constant 0 : index
    %c0_32 = arith.constant 0 : index
    %74 = vector.load %arg13[%c0_31, %c0_32] : memref<1x32xf32, #tpu.memory_space<vmem>>, vector<1x32xf32>
    %75 = vector.broadcast %74 : vector<1x32xf32> to vector<256x32xf32>
    %76 = arith.addf %73, %75 : vector<256x32xf32>
    %77 = arith.negf %76 : vector<256x32xf32>
    %78 = math.exp %77 : vector<256x32xf32>
    %cst_33 = arith.constant 1.000000e+00 : f32
    %79 = vector.broadcast %cst_33 : f32 to vector<256x32xf32>
    %80 = arith.addf %79, %78 : vector<256x32xf32>
    %81 = arith.divf %79, %80 : vector<256x32xf32>
    %82 = arith.mulf %76, %81 : vector<256x32xf32>
    %c0_34 = arith.constant 0 : index
    %c0_35 = arith.constant 0 : index
    %83 = vector.load %arg14[%c0_34, %c0_35] : memref<1x32xf32, #tpu.memory_space<vmem>>, vector<1x32xf32>
    %84 = vector.broadcast %83 : vector<1x32xf32> to vector<256x32xf32>
    %85 = arith.mulf %82, %84 : vector<256x32xf32>
    %cst_36 = arith.constant dense<0.000000e+00> : vector<256xf32>
    %86 = vector.multi_reduction <add>, %85, %cst_36 [1] : vector<256x32xf32> to vector<256xf32>
    %87 = vector.shape_cast %86 : vector<256xf32> to vector<256x1xf32>
    %c0_37 = arith.constant 0 : index
    %c0_38 = arith.constant 0 : index
    %88 = vector.load %arg15[%c0_37, %c0_38] : memref<1x1xf32, #tpu.memory_space<vmem>>, vector<1x1xf32>
    %89 = vector.broadcast %88 : vector<1x1xf32> to vector<256x1xf32>
    %90 = arith.addf %87, %89 : vector<256x1xf32>
    %91 = vector.broadcast %90 : vector<256x1xf32> to vector<256x128xf32>
    %92 = arith.mulf %32, %91 : vector<256x128xf32>
    %93 = arith.addf %92, %70 : vector<256x128xf32>
    %94 = arith.truncf %93 : vector<256x128xf32> to vector<256x128xbf16>
    %c0_39 = arith.constant 0 : index
    %c0_40 = arith.constant 0 : index
    %95 = vector.load %arg22[%c0_39, %c0_40] : memref<64x128xf32, #tpu.memory_space<vmem>>, vector<64x128xf32>
    %cst_41 = arith.constant dense<0.000000e+00> : vector<64x128xf32>
    %96 = tpu.matmul %23, %94, %cst_41 {dimension_numbers = #tpu.dot_dimension_numbers<[1], [0], [0], [1], [0, 0, 1, 1], [], []>} : vector<64x256xbf16>, vector<256x128xbf16>, vector<64x128xf32> -> vector<64x128xf32>
    %97 = arith.addf %95, %96 : vector<64x128xf32>
    %c0_42 = arith.constant 0 : index
    %c0_43 = arith.constant 0 : index
    %98 = vector.load %arg22[%c0_42, %c0_43] : memref<64x128xf32, #tpu.memory_space<vmem>>, vector<64x128xf32>
    tpu.vector_store %arg22[%c0_42, %c0_43], %97 {strides = array<i32>} : memref<64x128xf32, #tpu.memory_space<vmem>>, vector<64x128xf32>,
    %c0_i32_44 = arith.constant 0 : i32
    %99 = arith.cmpi eq, %arg0, %c0_i32_44 : i32
    %100 = arith.extui %99 : i1 to i32
    %c0_i32_45 = arith.constant 0 : i32
    %101 = arith.cmpi ne, %100, %c0_i32_45 : i32
    scf.if %101 {
      %c0_46 = arith.constant 0 : index
      %c0_47 = arith.constant 0 : index
      %102 = vector.load %arg22[%c0_46, %c0_47] : memref<64x128xf32, #tpu.memory_space<vmem>>, vector<64x128xf32>
      %103 = tpu.iota {dimensions = array<i32: 1>} : vector<64x128xi32>
      %c3_i32_48 = arith.constant 3 : i32
      %104 = vector.broadcast %c3_i32_48 : i32 to vector<64x128xi32>
      %105 = arith.cmpi slt, %103, %104 : vector<64x128xi32>
      %c0_49 = arith.constant 0 : index
      %c0_50 = arith.constant 0 : index
      %106 = vector.load %arg5[%c0_49, %c0_50] : memref<64x1xf32, #tpu.memory_space<vmem>>, vector<64x1xf32>
      %107 = vector.broadcast %106 : vector<64x1xf32> to vector<64x128xf32>
      %108 = arith.mulf %102, %107 : vector<64x128xf32>
      %cst_51 = arith.constant -1.000000e+02 : f32
      %cst_52 = arith.constant 1.000000e+02 : f32
      %109 = vector.broadcast %cst_51 : f32 to vector<64x128xf32>
      %110 = arith.maximumf %109, %108 : vector<64x128xf32>
      %111 = vector.broadcast %cst_52 : f32 to vector<64x128xf32>
      %112 = arith.minimumf %111, %110 : vector<64x128xf32>
      %cst_53 = arith.constant 0.000000e+00 : f32
      %113 = vector.broadcast %cst_53 : f32 to vector<64x128xf32>
      %114 = arith.select %105, %112, %113 : vector<64x128xi1>, vector<64x128xf32>
      %c0_54 = arith.constant 0 : index
      %c0_55 = arith.constant 0 : index
      %115 = vector.load %arg16[%c0_54, %c0_55] : memref<128x32xbf16, #tpu.memory_space<vmem>>, vector<128x32xbf16>
      %cst_56 = arith.constant dense<0.000000e+00> : vector<64x32xf32>
      %116 = tpu.matmul %24, %115, %cst_56 {dimension_numbers = #tpu.dot_dimension_numbers<[1], [0], [0], [1], [0, 0, 1, 1], [], []>} : vector<64x128xbf16>, vector<128x32xbf16>, vector<64x32xf32> -> vector<64x32xf32>
      %117 = arith.truncf %102 : vector<64x128xf32> to vector<64x128xbf16>
      %c0_57 = arith.constant 0 : index
      %c0_58 = arith.constant 0 : index
      %118 = vector.load %arg17[%c0_57, %c0_58] : memref<128x32xbf16, #tpu.memory_space<vmem>>, vector<128x32xbf16>
      %cst_59 = arith.constant dense<0.000000e+00> : vector<64x32xf32>
      %119 = tpu.matmul %117, %118, %cst_59 {dimension_numbers = #tpu.dot_dimension_numbers<[1], [0], [0], [1], [0, 0, 1, 1], [], []>} : vector<64x128xbf16>, vector<128x32xbf16>, vector<64x32xf32> -> vector<64x32xf32>
      %120 = arith.addf %116, %119 : vector<64x32xf32>
      %c0_60 = arith.constant 0 : index
      %c0_61 = arith.constant 0 : index
      %121 = vector.load %arg18[%c0_60, %c0_61] : memref<1x32xf32, #tpu.memory_space<vmem>>, vector<1x32xf32>
      %122 = vector.broadcast %121 : vector<1x32xf32> to vector<64x32xf32>
      %123 = arith.addf %120, %122 : vector<64x32xf32>
      %124 = arith.negf %123 : vector<64x32xf32>
      %125 = math.exp %124 : vector<64x32xf32>
      %cst_62 = arith.constant 1.000000e+00 : f32
      %126 = vector.broadcast %cst_62 : f32 to vector<64x32xf32>
      %127 = arith.addf %126, %125 : vector<64x32xf32>
      %128 = arith.divf %126, %127 : vector<64x32xf32>
      %129 = arith.mulf %123, %128 : vector<64x32xf32>
      %130 = arith.truncf %129 : vector<64x32xf32> to vector<64x32xbf16>
      %c0_63 = arith.constant 0 : index
      %c0_64 = arith.constant 0 : index
      %131 = vector.load %arg19[%c0_63, %c0_64] : memref<32x128xbf16, #tpu.memory_space<vmem>>, vector<32x128xbf16>
      %cst_65 = arith.constant dense<0.000000e+00> : vector<64x128xf32>
      %132 = tpu.matmul %130, %131, %cst_65 {dimension_numbers = #tpu.dot_dimension_numbers<[1], [0], [0], [1], [0, 0, 1, 1], [], []>} : vector<64x32xbf16>, vector<32x128xbf16>, vector<64x128xf32> -> vector<64x128xf32>
      %c0_66 = arith.constant 0 : index
      %c0_67 = arith.constant 0 : index
      %133 = vector.load %arg20[%c0_66, %c0_67] : memref<1x128xf32, #tpu.memory_space<vmem>>, vector<1x128xf32>
      %134 = vector.broadcast %133 : vector<1x128xf32> to vector<64x128xf32>
      %135 = arith.addf %132, %134 : vector<64x128xf32>
      %136 = arith.addf %114, %135 : vector<64x128xf32>
      %c0_68 = arith.constant 0 : index
      %c0_69 = arith.constant 0 : index
      %137 = vector.load %arg21[%c0_68, %c0_69] : memref<64x128xf32, #tpu.memory_space<vmem>>, vector<64x128xf32>
      tpu.vector_store %arg21[%c0_68, %c0_69], %136 {strides = array<i32>} : memref<64x128xf32, #tpu.memory_space<vmem>>, vector<64x128xf32>,
    } else {
    }
    return
  }
  func.func @transform_0(%arg0: i32) -> (i32, i32) {
    %c0_i32 = arith.constant 0 : i32
    %c0_i32_0 = arith.constant 0 : i32
    return %arg0, %c0_i32 : i32, i32
  }
  func.func @transform_1(%arg0: i32) -> (i32, i32) {
    %c0_i32 = arith.constant 0 : i32
    %c0_i32_0 = arith.constant 0 : i32
    return %c0_i32, %arg0 : i32, i32
  }
  func.func @transform_2(%arg0: i32) -> (i32, i32) {
    %c0_i32 = arith.constant 0 : i32
    %c0_i32_0 = arith.constant 0 : i32
    return %arg0, %c0_i32 : i32, i32
  }
  func.func @transform_3(%arg0: i32) -> (i32, i32) {
    %c0_i32 = arith.constant 0 : i32
    %c0_i32_0 = arith.constant 0 : i32
    %c0_i32_1 = arith.constant 0 : i32
    return %c0_i32, %c0_i32_0 : i32, i32
  }
  func.func @transform_4(%arg0: i32) -> (i32, i32) {
    %c0_i32 = arith.constant 0 : i32
    %c0_i32_0 = arith.constant 0 : i32
    %c0_i32_1 = arith.constant 0 : i32
    return %c0_i32, %c0_i32_0 : i32, i32
  }
  func.func @transform_5(%arg0: i32) -> (i32, i32) {
    %c0_i32 = arith.constant 0 : i32
    %c0_i32_0 = arith.constant 0 : i32
    %c0_i32_1 = arith.constant 0 : i32
    return %c0_i32, %c0_i32_0 : i32, i32
  }
  func.func @transform_6(%arg0: i32) -> (i32, i32) {
    %c0_i32 = arith.constant 0 : i32
    %c0_i32_0 = arith.constant 0 : i32
    %c0_i32_1 = arith.constant 0 : i32
    return %c0_i32, %c0_i32_0 : i32, i32
  }
  func.func @transform_7(%arg0: i32) -> (i32, i32) {
    %c0_i32 = arith.constant 0 : i32
    %c0_i32_0 = arith.constant 0 : i32
    %c0_i32_1 = arith.constant 0 : i32
    return %c0_i32, %c0_i32_0 : i32, i32
  }
  func.func @transform_8(%arg0: i32) -> (i32, i32) {
    %c0_i32 = arith.constant 0 : i32
    %c0_i32_0 = arith.constant 0 : i32
    %c0_i32_1 = arith.constant 0 : i32
    return %c0_i32, %c0_i32_0 : i32, i32
  }
  func.func @transform_9(%arg0: i32) -> (i32, i32) {
    %c0_i32 = arith.constant 0 : i32
    %c0_i32_0 = arith.constant 0 : i32
    %c0_i32_1 = arith.constant 0 : i32
    return %c0_i32, %c0_i32_0 : i32, i32
  }
  func.func @transform_10(%arg0: i32) -> (i32, i32) {
    %c0_i32 = arith.constant 0 : i32
    %c0_i32_0 = arith.constant 0 : i32
    %c0_i32_1 = arith.constant 0 : i32
    return %c0_i32, %c0_i32_0 : i32, i32
  }
  func.func @transform_11(%arg0: i32) -> (i32, i32) {
    %c0_i32 = arith.constant 0 : i32
    %c0_i32_0 = arith.constant 0 : i32
    %c0_i32_1 = arith.constant 0 : i32
    return %c0_i32, %c0_i32_0 : i32, i32
  }
  func.func @transform_12(%arg0: i32) -> (i32, i32) {
    %c0_i32 = arith.constant 0 : i32
    %c0_i32_0 = arith.constant 0 : i32
    %c0_i32_1 = arith.constant 0 : i32
    return %c0_i32, %c0_i32_0 : i32, i32
  }
  func.func @transform_13(%arg0: i32) -> (i32, i32) {
    %c0_i32 = arith.constant 0 : i32
    %c0_i32_0 = arith.constant 0 : i32
    %c0_i32_1 = arith.constant 0 : i32
    return %c0_i32, %c0_i32_0 : i32, i32
  }
  func.func @transform_14(%arg0: i32) -> (i32, i32) {
    %c0_i32 = arith.constant 0 : i32
    %c0_i32_0 = arith.constant 0 : i32
    %c0_i32_1 = arith.constant 0 : i32
    return %c0_i32, %c0_i32_0 : i32, i32
  }
  func.func @transform_15(%arg0: i32) -> (i32, i32) {
    %c0_i32 = arith.constant 0 : i32
    %c0_i32_0 = arith.constant 0 : i32
    %c0_i32_1 = arith.constant 0 : i32
    return %c0_i32, %c0_i32_0 : i32, i32
  }
  func.func @transform_16(%arg0: i32) -> (i32, i32) {
    %c0_i32 = arith.constant 0 : i32
    %c0_i32_0 = arith.constant 0 : i32
    %c0_i32_1 = arith.constant 0 : i32
    return %c0_i32, %c0_i32_0 : i32, i32
  }
  func.func @transform_17(%arg0: i32) -> (i32, i32) {
    %c0_i32 = arith.constant 0 : i32
    %c0_i32_0 = arith.constant 0 : i32
    %c0_i32_1 = arith.constant 0 : i32
    return %c0_i32, %c0_i32_0 : i32, i32
  }
  func.func @transform_18(%arg0: i32) -> (i32, i32) {
    %c0_i32 = arith.constant 0 : i32
    %c0_i32_0 = arith.constant 0 : i32
    %c0_i32_1 = arith.constant 0 : i32
    return %c0_i32, %c0_i32_0 : i32, i32
  }
  func.func @transform_19(%arg0: i32) -> (i32, i32) {
    %c0_i32 = arith.constant 0 : i32
    %c0_i32_0 = arith.constant 0 : i32
    %c0_i32_1 = arith.constant 0 : i32
    return %c0_i32, %c0_i32_0 : i32, i32
  }
  func.func @transform_20(%arg0: i32) -> (i32, i32) {
    %c0_i32 = arith.constant 0 : i32
    %c0_i32_0 = arith.constant 0 : i32
    %c0_i32_1 = arith.constant 0 : i32
    return %c0_i32, %c0_i32_0 : i32, i32
  }
}

</mosaic_0001>

<bundles_post_ra>
// kernel: tpu_custom_call.1
= control target key start
LH: loop header
LB: loop body
LE: loop exit
PB: predicated region body
PF: predicated region fallthrough
CT: control target
= control target key end

     0   :  { %s8255_s0 = inlined_call_operand.hbm [shape: s32[256,2], index: 0, kind: input, shape index: {}]   ;;  %s8256_s1 = inlined_call_operand.hbm [shape: s32[1,256], index: 1, kind: input, shape index: {}]   ;;  %s8257_s2 = inlined_call_operand.hbm [shape: f32[256,32], index: 2, kind: input, shape index: {}]   ;;  %s8258_s3 = inlined_call_operand.hbm [shape: bf16[64,128], index: 3, kind: input, shape index: {}]   ;;  %s8259_s4 = inlined_call_operand.hbm [shape: f32[64,1], index: 4, kind: input, shape index: {}]   ;;  %s8260_s5 = inlined_call_operand.hbm [shape: f32[1,32], index: 5, kind: input, shape index: {}]   ;;  %s8261_s6 = inlined_call_operand.hbm [shape: bf16[128,32], index: 6, kind: input, shape index: {}]   ;;  %s8262_s7 = inlined_call_operand.hbm [shape: bf16[128,32], index: 7, kind: input, shape index: {}]   ;;  %s8263_s8 = inlined_call_operand.hbm [shape: f32[1,32], index: 8, kind: input, shape index: {}]   ;;  %s8264_s9 = inlined_call_operand.hbm [shape: bf16[32,128], index: 9, kind: input, shape index: {}]   ;;  %s8265_s10 = inlined_call_operand.hbm [shape: f32[1,128], index: 10, kind: input, shape index: {}]   ;;  %s8266_s11 = inlined_call_operand.hbm [shape: bf16[128,32], index: 11, kind: input, shape index: {}]   ;;  %s8267_s12 = inlined_call_operand.hbm [shape: f32[1,32], index: 12, kind: input, shape index: {}]   ;;  %s8268_s13 = inlined_call_operand.hbm [shape: f32[1,32], index: 13, kind: input, shape index: {}]   ;;  %s8269_s14 = inlined_call_operand.<no memory space> [shape: f32[1,1], index: 14, kind: input, shape index: {}]   ;;  %s8270_s15 = inlined_call_operand.hbm [shape: bf16[128,32], index: 15, kind: input, shape index: {}]   ;;  %s8271_s16 = inlined_call_operand.hbm [shape: bf16[128,32], index: 16, kind: input, shape index: {}]   ;;  %s8272_s17 = inlined_call_operand.hbm [shape: f32[1,32], index: 17, kind: input, shape index: {}]   ;;  %s8273_s18 = inlined_call_operand.hbm [shape: bf16[32,128], index: 18, kind: input, shape index: {}]   ;;  %s8274_s19 = inlined_call_operand.hbm [shape: f32[1,128], index: 19, kind: input, shape index: {}]   ;;  %s8275_s20 = inlined_call_operand.hbm [shape: f32[64,128], index: 20, kind: output, shape index: {}]  }
   0x1   :  { %8322 = sst [smem:[#allocation83_spill]] %s8255_s0  ;;  %v25_v0 = vstv %s8269_s14 }
   0x2   :  { %8323 = sst [smem:[#allocation84_spill]] %s8256_s1  ;;  %26 = vst [vmem:[#allocation3] sm:$0x1] %v25_v0 }
   0x3   :  { %8324 = sst [smem:[#allocation85_spill]] %s8257_s2 }
   0x4   :  { %8325 = sst [smem:[#allocation86_spill]] %s8258_s3 }
   0x5   :  { %8326 = sst [smem:[#allocation87_spill]] %s8259_s4 }
   0x6   :  { %8327 = sst [smem:[#allocation88_spill]] %s8275_s20 }
   0x7   :  { %27 = vsyncpa [#allocation5], 0 }
   0x8   :  { %28 = vsyncpa [#allocation8], 0 }
   0x9   :  { %29 = vsyncpa [#allocation11], 0 }
   0xa   :  { %30 = vsyncpa [#allocation14], 0 }
   0xb   :  { %31 = vsyncpa [#allocation17], 0 }
   0xc   :  { %32 = vsyncpa [#allocation20], 0 }
   0xd   :  { %33 = vsyncpa [#allocation23], 0 }
   0xe   :  { %34 = vsyncpa [#allocation26], 0 }
   0xf   :  { %35 = vsyncpa [#allocation29], 0 }
  0x10   :  { %36 = vsyncpa [#allocation32], 0 }
  0x11   :  { %37 = vsyncpa [#allocation6], 0  ;;  %s6260_s23 = smov [#allocation7]   ;;  %s6261_s2 = smov [#allocation10]  }
  0x12   :  { %s56_s24 = sshll.u32 %s6260_s23, 4  ;;  %s77_s25 = sshll.u32 %s6261_s2, 4  ;;  %s57_s24 = int_to_ptr.vmem [resolvable:$true] %s56_s24  ;;  %s6396_s25 = int_to_ptr.vmem [resolvable:$true] %s77_s25 }
  0x13   :  { %s8328_s26 = sld [smem:[#allocation84_spill]] }
  0x19   :  { %s5798_s27 = scalar_lea.hbm %s8328_s26, 32 }
  0x1a   :  { %p5799_p0 = scmp.ne.s32.totalorder %s8328_s26, %s5798_s27  ;;  %p5802_p1 = scmp.lt.u32.totalorder %s5798_s27, %s8328_s26 }
  0x1c   :  { %p5804_p2 = pnand %p5802_p1, %p5799_p0 }
  0x1e   :  { %5807 = shalt.err (!%p5804_p2)
}
  0x1f   :  { %s5808_s0 = scalar_lea.vmem %s57_s24, 32  ;;  %p5813_p4 = scmp.lt.s32.totalorder %s57_s24, %s57_s24 }
  0x20   :  { %p5809_p3 = scmp.ne.s32.totalorder %s57_s24, %s5808_s0  ;;  %p5814_p5 = scmp.lt.s32.totalorder %s5808_s0, %s5808_s0 }
  0x22   :  { %p5815_p6 = por %p5814_p5, %p5813_p4 }
  0x24   :  { %p5816_p7 = pnand %p5815_p6, %p5809_p3 }
  0x26   :  { %5819 = shalt.err (!%p5816_p7)
}
  0x27   :  { %59 = dma.hbm_to_vmem [thread:$0]  %s8328_s26, 32, %s57_s24, [#allocation8]  }
  0x28   :  { %s8329_s2 = sld [smem:[#allocation86_spill]] }
  0x2e   :  { %s5820_s14 = scalar_lea.hbm %s8329_s2, 512 }
  0x2f   :  { %p5821_p8 = scmp.ne.s32.totalorder %s8329_s2, %s5820_s14  ;;  %p5824_p9 = scmp.lt.u32.totalorder %s5820_s14, %s8329_s2 }
  0x31   :  { %p5826_p10 = pnand %p5824_p9, %p5821_p8 }
  0x33   :  { %5829 = shalt.err (!%p5826_p10)
}
  0x34   :  { %s5830_s29 = scalar_lea.vmem %s6396_s25, 512  ;;  %p5835_p12 = scmp.lt.s32.totalorder %s6396_s25, %s6396_s25 }
  0x35   :  { %p5831_p11 = scmp.ne.s32.totalorder %s6396_s25, %s5830_s29  ;;  %p5836_p13 = scmp.lt.s32.totalorder %s5830_s29, %s5830_s29 }
  0x37   :  { %p5837_p0 = por %p5836_p13, %p5835_p12 }
  0x39   :  { %p5838_p1 = pnand %p5837_p0, %p5831_p11 }
  0x3b   :  { %5841 = shalt.err (!%p5838_p1)
}
  0x3c   :  { %s6262_s24 = smov 64   ;;  %s6263_s26 = smov 4  }
  0x3d   :  { %83 = dma.hbm_to_vmem [thread:$0]  %s8329_s2, 512, %s6396_s25, [#allocation11], %s6262_s24, %s6262_s24, %s6263_s26  }
  0x3e   :  { %s6264_s21 = smov [#allocation13]   ;;  %s6265_s22 = smov [#allocation16]  }
  0x3f   :  { %s102_s1 = sshll.u32 %s6264_s21, 4  ;;  %s123_s23 = sshll.u32 %s6265_s22, 4  ;;  %s103_s1 = int_to_ptr.vmem [resolvable:$true] %s102_s1  ;;  %s6430_s23 = int_to_ptr.vmem [resolvable:$true] %s123_s23 }
  0x40   :  { %s5842_s28 = scalar_lea.hbm %s8260_s5, 16 }
  0x41   :  { %p5843_p2 = scmp.ne.s32.totalorder %s8260_s5, %s5842_s28  ;;  %p5846_p3 = scmp.lt.u32.totalorder %s5842_s28, %s8260_s5 }
  0x43   :  { %p5848_p4 = pnand %p5846_p3, %p5843_p2 }
  0x45   :  { %5851 = shalt.err (!%p5848_p4)
}
  0x46   :  { %s5852_s25 = scalar_lea.vmem %s103_s1, 16  ;;  %s5856_s2 = scalar_lea.vmem %s103_s1, 32 }
  0x47   :  { %p5853_p5 = scmp.ne.s32.totalorder %s103_s1, %s5852_s25  ;;  %p5857_p6 = scmp.lt.s32.totalorder %s103_s1, %s103_s1 }
  0x48   :  { %p5858_p7 = scmp.lt.s32.totalorder %s5856_s2, %s5852_s25 }
  0x4a   :  { %p5859_p8 = por %p5858_p7, %p5857_p6 }
  0x4c   :  { %p5860_p9 = pnand %p5859_p8, %p5853_p5 }
  0x4e   :  { %5863 = shalt.err (!%p5860_p9)
}
  0x4f   :  { %105 = dma.hbm_to_vmem [thread:$0]  %s8260_s5, 16, %s103_s1, [#allocation14]  }
  0x50   :  { %s5864_s14 = scalar_lea.hbm %s8262_s7, 1024 }
  0x51   :  { %p5865_p10 = scmp.ne.s32.totalorder %s8262_s7, %s5864_s14  ;;  %p5868_p11 = scmp.lt.u32.totalorder %s5864_s14, %s8262_s7 }
  0x53   :  { %p5870_p12 = pnand %p5868_p11, %p5865_p10 }
  0x55   :  { %5873 = shalt.err (!%p5870_p12)
}
  0x56   :  { %s5874_s4 = scalar_lea.vmem %s6430_s23, 1024  ;;  %p5879_p0 = scmp.lt.s32.totalorder %s6430_s23, %s6430_s23 }
  0x57   :  { %p5875_p13 = scmp.ne.s32.totalorder %s6430_s23, %s5874_s4  ;;  %p5880_p1 = scmp.lt.s32.totalorder %s5874_s4, %s5874_s4 }
  0x59   :  { %p5881_p2 = por %p5880_p1, %p5879_p0 }
  0x5b   :  { %p5882_p3 = pnand %p5881_p2, %p5875_p13 }
  0x5d   :  { %5885 = shalt.err (!%p5882_p3)
}
  0x5e   :  { %129 = dma.hbm_to_vmem [thread:$0]  %s8262_s7, 1024, %s6430_s23, [#allocation17], %s6262_s24, %s6262_s24, %s6263_s26  }
  0x5f   :  { %s6266_s29 = smov [#allocation19]   ;;  %s6267_s2 = smov [#allocation22]  }
  0x60   :  { %s145_s25 = sshll.u32 %s6266_s29, 4  ;;  %s167_s30 = sshll.u32 %s6267_s2, 4  ;;  %s146_s25 = int_to_ptr.vmem [resolvable:$true] %s145_s25  ;;  %s6464_s30 = int_to_ptr.vmem [resolvable:$true] %s167_s30 }
  0x61   :  { %s5886_s22 = scalar_lea.hbm %s8264_s9, 256 }
  0x62   :  { %p5887_p4 = scmp.ne.s32.totalorder %s8264_s9, %s5886_s22  ;;  %p5890_p5 = scmp.lt.u32.totalorder %s5886_s22, %s8264_s9 }
  0x64   :  { %p5892_p6 = pnand %p5890_p5, %p5887_p4 }
  0x66   :  { %5895 = shalt.err (!%p5892_p6)
}
  0x67   :  { %s5896_s7 = scalar_lea.vmem %s146_s25, 256  ;;  %p5901_p8 = scmp.lt.s32.totalorder %s146_s25, %s146_s25 }
  0x68   :  { %p5897_p7 = scmp.ne.s32.totalorder %s146_s25, %s5896_s7  ;;  %p5902_p9 = scmp.lt.s32.totalorder %s5896_s7, %s5896_s7 }
  0x6a   :  { %p5903_p10 = por %p5902_p9, %p5901_p8 }
  0x6c   :  { %p5904_p11 = pnand %p5903_p10, %p5897_p7 }
  0x6e   :  { %5907 = shalt.err (!%p5904_p11)
}
  0x6f   :  { %151 = dma.hbm_to_vmem [thread:$0]  %s8264_s9, 256, %s146_s25, [#allocation20], %s6262_s24, %s6262_s24, %s6263_s26  }
  0x70   :  { %s5908_s1 = scalar_lea.hbm %s8266_s11, 1024 }
  0x71   :  { %p5909_p12 = scmp.ne.s32.totalorder %s8266_s11, %s5908_s1  ;;  %p5912_p13 = scmp.lt.u32.totalorder %s5908_s1, %s8266_s11 }
  0x73   :  { %p5914_p0 = pnand %p5912_p13, %p5909_p12 }
  0x75   :  { %5917 = shalt.err (!%p5914_p0)
}
  0x76   :  { %s5918_s22 = scalar_lea.vmem %s6464_s30, 1024  ;;  %p5923_p2 = scmp.lt.s32.totalorder %s6464_s30, %s6464_s30 }
  0x77   :  { %p5919_p1 = scmp.ne.s32.totalorder %s6464_s30, %s5918_s22  ;;  %p5924_p3 = scmp.lt.s32.totalorder %s5918_s22, %s5918_s22 }
  0x79   :  { %p5925_p4 = por %p5924_p3, %p5923_p2 }
  0x7b   :  { %p5926_p5 = pnand %p5925_p4, %p5919_p1 }
  0x7d   :  { %5929 = shalt.err (!%p5926_p5)
}
  0x7e   :  { %173 = dma.hbm_to_vmem [thread:$0]  %s8266_s11, 1024, %s6464_s30, [#allocation23], %s6262_s24, %s6262_s24, %s6263_s26  }
  0x7f   :  { %s6268_s14 = smov [#allocation25]   ;;  %s6269_s3 = smov [#allocation28]  }
  0x80   :  { %s190_s20 = sshll.u32 %s6268_s14, 4  ;;  %s213_s28 = sshll.u32 %s6269_s3, 4  ;;  %s191_s20 = int_to_ptr.vmem [resolvable:$true] %s190_s20  ;;  %s6501_s28 = int_to_ptr.vmem [resolvable:$true] %s213_s28 }
  0x81   :  { %s5930_s27 = scalar_lea.hbm %s8268_s13, 16 }
  0x82   :  { %p5931_p6 = scmp.ne.s32.totalorder %s8268_s13, %s5930_s27  ;;  %p5934_p7 = scmp.lt.u32.totalorder %s5930_s27, %s8268_s13 }
  0x84   :  { %p5936_p8 = pnand %p5934_p7, %p5931_p6 }
  0x86   :  { %5939 = shalt.err (!%p5936_p8)
}
  0x87   :  { %s5940_s11 = scalar_lea.vmem %s191_s20, 16  ;;  %s5944_s30 = scalar_lea.vmem %s191_s20, 32 }
  0x88   :  { %p5941_p9 = scmp.ne.s32.totalorder %s191_s20, %s5940_s11  ;;  %p5945_p10 = scmp.lt.s32.totalorder %s191_s20, %s191_s20 }
  0x89   :  { %p5946_p11 = scmp.lt.s32.totalorder %s5944_s30, %s5940_s11 }
  0x8b   :  { %p5947_p12 = por %p5946_p11, %p5945_p10 }
  0x8d   :  { %p5948_p13 = pnand %p5947_p12, %p5941_p9 }
  0x8f   :  { %5951 = shalt.err (!%p5948_p13)
}
  0x90   :  { %193 = dma.hbm_to_vmem [thread:$0]  %s8268_s13, 16, %s191_s20, [#allocation26]  }
  0x91   :  { %s5952_s9 = scalar_lea.hbm %s8271_s16, 1024 }
  0x92   :  { %p5953_p0 = scmp.ne.s32.totalorder %s8271_s16, %s5952_s9  ;;  %p5956_p1 = scmp.lt.u32.totalorder %s5952_s9, %s8271_s16 }
  0x94   :  { %p5958_p2 = pnand %p5956_p1, %p5953_p0 }
  0x96   :  { %5961 = shalt.err (!%p5958_p2)
}
  0x97   :  { %s5962_s23 = scalar_lea.vmem %s6501_s28, 1024  ;;  %p5967_p4 = scmp.lt.s32.totalorder %s6501_s28, %s6501_s28 }
  0x98   :  { %p5963_p3 = scmp.ne.s32.totalorder %s6501_s28, %s5962_s23  ;;  %p5968_p5 = scmp.lt.s32.totalorder %s5962_s23, %s5962_s23 }
  0x9a   :  { %p5969_p6 = por %p5968_p5, %p5967_p4 }
  0x9c   :  { %p5970_p7 = pnand %p5969_p6, %p5963_p3 }
  0x9e   :  { %5973 = shalt.err (!%p5970_p7)
}
  0x9f   :  { %219 = dma.hbm_to_vmem [thread:$0]  %s8271_s16, 1024, %s6501_s28, [#allocation29], %s6262_s24, %s6262_s24, %s6263_s26  }
  0xa0   :  { %s6270_s27 = smov [#allocation31]   ;;  %s6271_s5 = smov [#allocation4]  }
  0xa1   :  { %s235_s4 = sshll.u32 %s6270_s27, 4  ;;  %s43_s1 = sshll.u32 %s6271_s5, 4  ;;  %s236_s4 = int_to_ptr.vmem [resolvable:$true] %s235_s4  ;;  %s6535_s1 = int_to_ptr.vmem [resolvable:$true] %s43_s1 }
  0xa2   :  { %s5974_s30 = scalar_lea.hbm %s8273_s18, 256 }
  0xa3   :  { %p5975_p8 = scmp.ne.s32.totalorder %s8273_s18, %s5974_s30  ;;  %p5978_p9 = scmp.lt.u32.totalorder %s5974_s30, %s8273_s18 }
  0xa5   :  { %p5980_p10 = pnand %p5978_p9, %p5975_p8 }
  0xa7   :  { %5983 = shalt.err (!%p5980_p10)
}
  0xa8   :  { %s5984_s16 = scalar_lea.vmem %s236_s4, 256  ;;  %p5989_p12 = scmp.lt.s32.totalorder %s236_s4, %s236_s4 }
  0xa9   :  { %p5985_p11 = scmp.ne.s32.totalorder %s236_s4, %s5984_s16  ;;  %p5990_p13 = scmp.lt.s32.totalorder %s5984_s16, %s5984_s16 }
  0xab   :  { %p5991_p0 = por %p5990_p13, %p5989_p12 }
  0xad   :  { %p5992_p1 = pnand %p5991_p0, %p5985_p11 }
  0xaf   :  { %5995 = shalt.err (!%p5992_p1)
}
  0xb0   :  { %241 = dma.hbm_to_vmem [thread:$0]  %s8273_s18, 256, %s236_s4, [#allocation32], %s6262_s24, %s6262_s24, %s6263_s26  }
  0xb1   :  { %s8330_s3 = sld [smem:[#allocation83_spill]] }
  0xb7   :  { %s5996_s7 = scalar_lea.hbm %s8330_s3, 4096 }
  0xb8   :  { %p5997_p2 = scmp.ne.s32.totalorder %s8330_s3, %s5996_s7  ;;  %p6000_p3 = scmp.lt.u32.totalorder %s5996_s7, %s8330_s3 }
  0xba   :  { %p6002_p4 = pnand %p6000_p3, %p5997_p2 }
  0xbc   :  { %6005 = shalt.err (!%p6002_p4)
}
  0xbd   :  { %s6006_s5 = scalar_lea.vmem %s6535_s1, 4096  ;;  %p6011_p6 = scmp.lt.s32.totalorder %s6535_s1, %s6535_s1 }
  0xbe   :  { %p6007_p5 = scmp.ne.s32.totalorder %s6535_s1, %s6006_s5  ;;  %p6012_p7 = scmp.lt.s32.totalorder %s6006_s5, %s6006_s5 }
  0xc0   :  { %p6013_p8 = por %p6012_p7, %p6011_p6 }
  0xc2   :  { %p6014_p9 = pnand %p6013_p8, %p6007_p5 }
  0xc4   :  { %6017 = shalt.err (!%p6014_p9)
}
  0xc5   :  { %s6272_s18 = smov 128   ;;  %s6273_s4 = smov 8  }
  0xc6   :  { %49 = dma.hbm_to_vmem [thread:$0]  %s8330_s3, 4096, %s6535_s1, [#allocation5], %s6272_s18, %s6272_s18, %s6273_s4  }
  0xc7   :  { %s6274_s30 = smov [#allocation9]   ;;  %s6275_s0 = smov [#allocation12]  }
  0xc8   :  { %s65_s2 = sshll.u32 %s6274_s30, 4  ;;  %s89_s21 = sshll.u32 %s6275_s0, 4  ;;  %s66_s2 = int_to_ptr.vmem [resolvable:$true] %s65_s2  ;;  %s6572_s21 = int_to_ptr.vmem [resolvable:$true] %s89_s21 }
  0xc9   :  { %s8331_s28 = sld [smem:[#allocation85_spill]] }
  0xcf   :  { %s6018_s9 = scalar_lea.hbm %s8331_s28, 4096 }
  0xd0   :  { %p6019_p10 = scmp.ne.s32.totalorder %s8331_s28, %s6018_s9  ;;  %p6022_p11 = scmp.lt.u32.totalorder %s6018_s9, %s8331_s28 }
  0xd2   :  { %p6024_p12 = pnand %p6022_p11, %p6019_p10 }
  0xd4   :  { %6027 = shalt.err (!%p6024_p12)
}
  0xd5   :  { %s6028_s1 = scalar_lea.vmem %s66_s2, 4096  ;;  %p6033_p0 = scmp.lt.s32.totalorder %s66_s2, %s66_s2 }
  0xd6   :  { %p6029_p13 = scmp.ne.s32.totalorder %s66_s2, %s6028_s1  ;;  %p6034_p1 = scmp.lt.s32.totalorder %s6028_s1, %s6028_s1 }
  0xd8   :  { %p6035_p2 = por %p6034_p1, %p6033_p0 }
  0xda   :  { %p6036_p3 = pnand %p6035_p2, %p6029_p13 }
  0xdc   :  { %6039 = shalt.err (!%p6036_p3)
}
  0xdd   :  { %71 = dma.hbm_to_vmem [thread:$0]  %s8331_s28, 4096, %s66_s2, [#allocation8], %s6272_s18, %s6272_s18, %s6273_s4  }
  0xde   :  { %s8332_s5 = sld [smem:[#allocation87_spill]] }
  0xe4   :  { %s6040_s29 = scalar_lea.hbm %s8332_s5, 1024 }
  0xe5   :  { %p6041_p4 = scmp.ne.s32.totalorder %s8332_s5, %s6040_s29  ;;  %p6044_p5 = scmp.lt.u32.totalorder %s6040_s29, %s8332_s5 }
  0xe7   :  { %p6046_p6 = pnand %p6044_p5, %p6041_p4 }
  0xe9   :  { %6049 = shalt.err (!%p6046_p6)
}
  0xea   :  { %s6050_s16 = scalar_lea.vmem %s6572_s21, 1024  ;;  %p6055_p8 = scmp.lt.s32.totalorder %s6572_s21, %s6572_s21 }
  0xeb   :  { %p6051_p7 = scmp.ne.s32.totalorder %s6572_s21, %s6050_s16  ;;  %p6056_p9 = scmp.lt.s32.totalorder %s6050_s16, %s6050_s16 }
  0xed   :  { %p6057_p10 = por %p6056_p9, %p6055_p8 }
  0xef   :  { %p6058_p11 = pnand %p6057_p10, %p6051_p7 }
  0xf1   :  { %6061 = shalt.err (!%p6058_p11)
}
  0xf2   :  { %95 = dma.hbm_to_vmem [thread:$0]  %s8332_s5, 1024, %s6572_s21, [#allocation11], %s6272_s18, %s6272_s18, %s6273_s4  }
  0xf3   :  { %s6276_s9 = smov [#allocation15]   ;;  %s6277_s14 = smov [#allocation18]  }
  0xf4   :  { %s111_s25 = sshll.u32 %s6276_s9, 4  ;;  %s136_s7 = sshll.u32 %s6277_s14, 4  ;;  %s112_s25 = int_to_ptr.vmem [resolvable:$true] %s111_s25  ;;  %s137_s7 = int_to_ptr.vmem [resolvable:$true] %s136_s7 }
  0xf5   :  { %s6062_s3 = scalar_lea.hbm %s8261_s6, 1024 }
  0xf6   :  { %p6063_p12 = scmp.ne.s32.totalorder %s8261_s6, %s6062_s3  ;;  %p6066_p13 = scmp.lt.u32.totalorder %s6062_s3, %s8261_s6 }
  0xf8   :  { %p6068_p0 = pnand %p6066_p13, %p6063_p12 }
  0xfa   :  { %6071 = shalt.err (!%p6068_p0)
}
  0xfb   :  { %s6072_s21 = scalar_lea.vmem %s112_s25, 1024  ;;  %p6077_p2 = scmp.lt.s32.totalorder %s112_s25, %s112_s25 }
  0xfc   :  { %p6073_p1 = scmp.ne.s32.totalorder %s112_s25, %s6072_s21  ;;  %p6078_p3 = scmp.lt.s32.totalorder %s6072_s21, %s6072_s21 }
  0xfe   :  { %p6079_p4 = por %p6078_p3, %p6077_p2 }
 0x100   :  { %p6080_p5 = pnand %p6079_p4, %p6073_p1 }
 0x102   :  { %6083 = shalt.err (!%p6080_p5)
}
 0x103   :  { %117 = dma.hbm_to_vmem [thread:$0]  %s8261_s6, 1024, %s112_s25, [#allocation14], %s6262_s24, %s6262_s24, %s6263_s26  }
 0x104   :  { %s6084_s22 = scalar_lea.hbm %s8263_s8, 16 }
 0x105   :  { %p6085_p6 = scmp.ne.s32.totalorder %s8263_s8, %s6084_s22  ;;  %p6088_p7 = scmp.lt.u32.totalorder %s6084_s22, %s8263_s8 }
 0x107   :  { %p6090_p8 = pnand %p6088_p7, %p6085_p6 }
 0x109   :  { %6093 = shalt.err (!%p6090_p8)
}
 0x10a   :  { %s6094_s14 = scalar_lea.vmem %s137_s7, 16  ;;  %s6098_s23 = scalar_lea.vmem %s137_s7, 32 }
 0x10b   :  { %p6095_p9 = scmp.ne.s32.totalorder %s137_s7, %s6094_s14  ;;  %p6099_p10 = scmp.lt.s32.totalorder %s137_s7, %s137_s7 }
 0x10c   :  { %p6100_p11 = scmp.lt.s32.totalorder %s6098_s23, %s6094_s14 }
 0x10e   :  { %p6101_p12 = por %p6100_p11, %p6099_p10 }
 0x110   :  { %p6102_p13 = pnand %p6101_p12, %p6095_p9 }
 0x112   :  { %6105 = shalt.err (!%p6102_p13)
}
 0x113   :  { %139 = dma.hbm_to_vmem [thread:$0]  %s8263_s8, 16, %s137_s7, [#allocation17]  }
 0x114   :  { %s6278_s1 = smov [#allocation21]   ;;  %s6279_s13 = smov [#allocation24]  }
 0x115   :  { %s158_s3 = sshll.u32 %s6278_s1, 4  ;;  %s180_s20 = sshll.u32 %s6279_s13, 4  ;;  %s159_s3 = int_to_ptr.vmem [resolvable:$true] %s158_s3  ;;  %s181_s20 = int_to_ptr.vmem [resolvable:$true] %s180_s20 }
 0x116   :  { %s6106_s21 = scalar_lea.hbm %s8265_s10, 16 }
 0x117   :  { %p6107_p0 = scmp.ne.s32.totalorder %s8265_s10, %s6106_s21  ;;  %p6110_p1 = scmp.lt.u32.totalorder %s6106_s21, %s8265_s10 }
 0x119   :  { %p6112_p2 = pnand %p6110_p1, %p6107_p0 }
 0x11b   :  { %6115 = shalt.err (!%p6112_p2)
}
 0x11c   :  { %s6116_s8 = scalar_lea.vmem %s159_s3, 16  ;;  %s6120_s7 = scalar_lea.vmem %s159_s3, 32 }
 0x11d   :  { %p6117_p3 = scmp.ne.s32.totalorder %s159_s3, %s6116_s8  ;;  %p6121_p4 = scmp.lt.s32.totalorder %s159_s3, %s159_s3 }
 0x11e   :  { %p6122_p5 = scmp.lt.s32.totalorder %s6120_s7, %s6116_s8 }
 0x120   :  { %p6123_p6 = por %p6122_p5, %p6121_p4 }
 0x122   :  { %p6124_p7 = pnand %p6123_p6, %p6117_p3 }
 0x124   :  { %6127 = shalt.err (!%p6124_p7)
}
 0x125   :  { %161 = dma.hbm_to_vmem [thread:$0]  %s8265_s10, 16, %s159_s3, [#allocation20]  }
 0x126   :  { %s6128_s9 = scalar_lea.hbm %s8267_s12, 16 }
 0x127   :  { %p6129_p8 = scmp.ne.s32.totalorder %s8267_s12, %s6128_s9  ;;  %p6132_p9 = scmp.lt.u32.totalorder %s6128_s9, %s8267_s12 }
 0x129   :  { %p6134_p10 = pnand %p6132_p9, %p6129_p8 }
 0x12b   :  { %6137 = shalt.err (!%p6134_p10)
}
 0x12c   :  { %s6138_s1 = scalar_lea.vmem %s181_s20, 16  ;;  %s6142_s13 = scalar_lea.vmem %s181_s20, 32 }
 0x12d   :  { %p6139_p11 = scmp.ne.s32.totalorder %s181_s20, %s6138_s1  ;;  %p6143_p12 = scmp.lt.s32.totalorder %s181_s20, %s181_s20 }
 0x12e   :  { %p6144_p13 = scmp.lt.s32.totalorder %s6142_s13, %s6138_s1 }
 0x130   :  { %p6145_p0 = por %p6144_p13, %p6143_p12 }
 0x132   :  { %p6146_p1 = pnand %p6145_p0, %p6139_p11 }
 0x134   :  { %6149 = shalt.err (!%p6146_p1)
}
 0x135   :  { %183 = dma.hbm_to_vmem [thread:$0]  %s8267_s12, 16, %s181_s20, [#allocation23]  }
 0x136   :  { %s6280_s27 = smov [#allocation27]   ;;  %s6281_s21 = smov [#allocation30]  }
 0x137   :  { %s201_s29 = sshll.u32 %s6280_s27, 4  ;;  %s226_s5 = sshll.u32 %s6281_s21, 4  ;;  %s202_s29 = int_to_ptr.vmem [resolvable:$true] %s201_s29  ;;  %s227_s5 = int_to_ptr.vmem [resolvable:$true] %s226_s5 }
 0x138   :  { %s6150_s0 = scalar_lea.hbm %s8270_s15, 1024 }
 0x139   :  { %p6151_p2 = scmp.ne.s32.totalorder %s8270_s15, %s6150_s0  ;;  %p6154_p3 = scmp.lt.u32.totalorder %s6150_s0, %s8270_s15 }
 0x13b   :  { %p6156_p4 = pnand %p6154_p3, %p6151_p2 }
 0x13d   :  { %6159 = shalt.err (!%p6156_p4)
}
 0x13e   :  { %s6160_s12 = scalar_lea.vmem %s202_s29, 1024  ;;  %p6165_p6 = scmp.lt.s32.totalorder %s202_s29, %s202_s29 }
 0x13f   :  { %p6161_p5 = scmp.ne.s32.totalorder %s202_s29, %s6160_s12  ;;  %p6166_p7 = scmp.lt.s32.totalorder %s6160_s12, %s6160_s12 }
 0x141   :  { %p6167_p8 = por %p6166_p7, %p6165_p6 }
 0x143   :  { %p6168_p9 = pnand %p6167_p8, %p6161_p5 }
 0x145   :  { %6171 = shalt.err (!%p6168_p9)
}
 0x146   :  { %207 = dma.hbm_to_vmem [thread:$0]  %s8270_s15, 1024, %s202_s29, [#allocation26], %s6262_s24, %s6262_s24, %s6263_s26  }
 0x147   :  { %s6172_s14 = scalar_lea.hbm %s8272_s17, 16 }
 0x148   :  { %p6173_p10 = scmp.ne.s32.totalorder %s8272_s17, %s6172_s14  ;;  %p6176_p11 = scmp.lt.u32.totalorder %s6172_s14, %s8272_s17 }
 0x14a   :  { %p6178_p12 = pnand %p6176_p11, %p6173_p10 }
 0x14c   :  { %6181 = shalt.err (!%p6178_p12)
}
 0x14d   :  { %s6182_s13 = scalar_lea.vmem %s227_s5, 16  ;;  %s6186_s10 = scalar_lea.vmem %s227_s5, 32 }
 0x14e   :  { %p6183_p13 = scmp.ne.s32.totalorder %s227_s5, %s6182_s13  ;;  %p6187_p0 = scmp.lt.s32.totalorder %s227_s5, %s227_s5 }
 0x14f   :  { %p6188_p1 = scmp.lt.s32.totalorder %s6186_s10, %s6182_s13 }
 0x151   :  { %p6189_p2 = por %p6188_p1, %p6187_p0 }
 0x153   :  { %p6190_p3 = pnand %p6189_p2, %p6183_p13 }
 0x155   :  { %6193 = shalt.err (!%p6190_p3)
}
 0x156   :  { %229 = dma.hbm_to_vmem [thread:$0]  %s8272_s17, 16, %s227_s5, [#allocation29]  }
 0x157   :  { %s6282_s26 = smov [#allocation33]   ;;  %s6194_s21 = scalar_lea.hbm %s8274_s19, 16 }
 0x158   :  { %s248_s3 = sshll.u32 %s6282_s26, 4  ;;  %p6195_p4 = scmp.ne.s32.totalorder %s8274_s19, %s6194_s21  ;;  %s249_s3 = int_to_ptr.vmem [resolvable:$true] %s248_s3 }
 0x159   :  { %p6198_p5 = scmp.lt.u32.totalorder %s6194_s21, %s8274_s19 }
 0x15b   :  { %p6200_p6 = pnand %p6198_p5, %p6195_p4 }
 0x15d   :  { %6203 = shalt.err (!%p6200_p6)
}
 0x15e   :  { %s6204_s7 = scalar_lea.vmem %s249_s3, 16  ;;  %s6208_s17 = scalar_lea.vmem %s249_s3, 32 }
 0x15f   :  { %p6205_p7 = scmp.ne.s32.totalorder %s249_s3, %s6204_s7  ;;  %p6209_p8 = scmp.lt.s32.totalorder %s249_s3, %s249_s3 }
 0x160   :  { %p6210_p9 = scmp.lt.s32.totalorder %s6208_s17, %s6204_s7 }
 0x162   :  { %p6211_p10 = por %p6210_p9, %p6209_p8 }
 0x164   :  { %p6212_p11 = pnand %p6211_p10, %p6205_p7 }
 0x166   :  { %6215 = shalt.err (!%p6212_p11)
}
 0x167   :  { %251 = dma.hbm_to_vmem [thread:$0]  %s8274_s19, 16, %s249_s3, [#allocation32]  }
 0x168   :  { %6238 = dma.done.wait [#allocation5], 4096  }
 0x169   :  { %6239 = vsyncadd [#allocation5], 4294963200 }
 0x16a   :  { %6240 = dma.done.wait [#allocation8], 4128  }
 0x16b   :  { %6241 = vsyncadd [#allocation8], 4294963168 }
 0x16c   :  { %6242 = dma.done.wait [#allocation11], 1536  }
 0x16d   :  { %6243 = vsyncadd [#allocation11], 4294965760 }
 0x16e   :  { %6244 = dma.done.wait [#allocation14], 1040  }
 0x16f   :  { %6245 = vsyncadd [#allocation14], 4294966256 }
 0x170   :  { %6246 = dma.done.wait [#allocation17], 1040  }
 0x171   :  { %6247 = vsyncadd [#allocation17], 4294966256 }
 0x172   :  { %6248 = dma.done.wait [#allocation20], 272  }
 0x173   :  { %6249 = vsyncadd [#allocation20], 4294967024 }
 0x174   :  { %6250 = dma.done.wait [#allocation23], 1040  }
 0x175   :  { %6251 = vsyncadd [#allocation23], 4294966256 }
 0x176   :  { %6252 = dma.done.wait [#allocation26], 1040  }
 0x177   :  { %6253 = vsyncadd [#allocation26], 4294966256 }
 0x178   :  { %6254 = dma.done.wait [#allocation29], 1040  }
 0x179   :  { %6255 = vsyncadd [#allocation29], 4294966256 }
 0x17a   :  { %6256 = dma.done.wait [#allocation32], 272  }
 0x17b   :  { %6257 = vsyncadd [#allocation32], 4294967024  ;;  %v6283_v1 = vmov 0   ;;  %v6701_v2 = vld [vmem:[#allocation4 + $0x10] sm:$0xff]  ;;  %v6703_v3 = vld [vmem:[#allocation4] sm:$0xff]  ;;  %v6284_v38 = vmov 1   ;;  %v8282_v39 = vlaneseq }
 0x17c   :  { %5325 = vset.pattern.permute.xlu1 %v6283_v1  ;;  %5324 = vset.pattern.permute.xlu0 %v6283_v1  ;;  %v6707_v4 = vld [vmem:[#allocation4 + $0x18] sm:$0xff]  ;;  %v6709_v5 = vld [vmem:[#allocation4 + $0x8] sm:$0xff]  ;;  %v6715_v7 = vld [vmem:[#allocation4 + $0x20] sm:$0xff]  ;;  %vm878_vm4 = vcmask 523264   ;;  %v6285_v46 = vmov 0.0   ;;  %s6287_s19 = smov [#allocation34]  }
 0x17d   :  { %363 = vperm.xlu1 %5325, %v6701_v2   ;;  %357 = vperm.xlu0 %5324, %v6703_v3   ;;  %v6713_v6 = vld [vmem:[#allocation4 + $0x28] sm:$0xff]  ;;  %v6719_v8 = vld [vmem:[#allocation4 + $0x38] sm:$0xff]  ;;  %v6721_v9 = vld [vmem:[#allocation4 + $0x30] sm:$0xff]  ;;  %v6758_v40 = vand.u32 127, %v8282_v39  ;;  %s4367_s16 = sshll.u32 %s6287_s19, 4  ;;  %s4368_s16 = int_to_ptr.vmem [resolvable:$true] %s4367_s16 }
 0x17e   :  { %v5330_v10 = vld [vmem:[#allocation10] sm:$0xff]   ;;  %v5331_v12 = vld [vmem:[#allocation10 + $0x8] sm:$0xff]   ;;  %v5332_v14 = vld [vmem:[#allocation10 + $0x10] sm:$0xff]   ;;  %s6216_s12 = scalar_lea.vmem %s4368_s16, 1024  ;;  %p6221_p13 = scmp.lt.s32.totalorder %s4368_s16, %s4368_s16 }
 0x17f   :  { %v6723_v11 = vld [vmem:[#allocation4 + $0x48] sm:$0xff]  ;;  %v6727_v13 = vld [vmem:[#allocation4 + $0x40] sm:$0xff]  ;;  %4904 = vmatprep.subr.bf16.mxu0 %v5330_v10  ;;  %4944 = vmatprep.subr.bf16.mxu1 %v5330_v10  ;;  %v6729_v15 = vld [vmem:[#allocation4 + $0x58] sm:$0xff]  ;;  %8333 = vst [vmem:[#allocation46_spill] sm:$0xff] %v6758_v40  ;;  %p6217_p12 = scmp.ne.s32.totalorder %s4368_s16, %s6216_s12  ;;  %p6222_p0 = scmp.lt.s32.totalorder %s6216_s12, %s6216_s12 }
 0x180   :  { %4905 = vmatpush3.bf16.msra.mxu0 %v5330_v10  ;;  %4945 = vmatpush3.bf16.msra.mxu1 %v5330_v10  ;;  %v6731_v16 = vld [vmem:[#allocation4 + $0x50] sm:$0xff]  ;;  %v5333_v17 = vld [vmem:[#allocation10 + $0x18] sm:$0xff]   ;;  %v6735_v18 = vld [vmem:[#allocation4 + $0x68] sm:$0xff] }
 0x181   :  { %366 = vperm.xlu1 %5325, %v6707_v4   ;;  %360 = vperm.xlu0 %5324, %v6709_v5   ;;  %v6737_v19 = vld [vmem:[#allocation4 + $0x60] sm:$0xff]  ;;  %v337_v20 = vld [vmem:[#allocation4 + $0x78] sm:$0xff]  ;;  %v336_v21 = vld [vmem:[#allocation4 + $0x70] sm:$0xff]  ;;  %p6223_p1 = por %p6222_p0, %p6221_p13 }
 0x182   :  { %4906 = vmatprep.subr.bf16.mxu0 %v5331_v12  ;;  %4946 = vmatprep.subr.bf16.mxu1 %v5331_v12  ;;  %v339_v22 = vld [vmem:[#allocation4 + $0x88] sm:$0xff]  ;;  %v338_v23 = vld [vmem:[#allocation4 + $0x80] sm:$0xff]  ;;  %v341_v24 = vld [vmem:[#allocation4 + $0x98] sm:$0xff] }
 0x183   :  { %v340_v25 = vld [vmem:[#allocation4 + $0x90] sm:$0xff]  ;;  %v343_v26 = vld [vmem:[#allocation4 + $0xa8] sm:$0xff]  ;;  %v342_v27 = vld [vmem:[#allocation4 + $0xa0] sm:$0xff]  ;;  %p6224_p2 = pnand %p6223_p1, %p6217_p12 }
 0x184   :  { %4907 = vmatpush3.bf16.msra.mxu0 %v5331_v12  ;;  %4947 = vmatpush3.bf16.msra.mxu1 %v5331_v12  ;;  %v345_v28 = vld [vmem:[#allocation4 + $0xb8] sm:$0xff]  ;;  %v344_v29 = vld [vmem:[#allocation4 + $0xb0] sm:$0xff]  ;;  %v347_v30 = vld [vmem:[#allocation4 + $0xc8] sm:$0xff] }
 0x185   :  { %372 = vperm.xlu1 %5325, %v6713_v6   ;;  %369 = vperm.xlu0 %5324, %v6715_v7   ;;  %v346_v31 = vld [vmem:[#allocation4 + $0xc0] sm:$0xff]  ;;  %v349_v32 = vld [vmem:[#allocation4 + $0xd8] sm:$0xff]  ;;  %v348_v33 = vld [vmem:[#allocation4 + $0xd0] sm:$0xff] }
 0x186   :  { %4908 = vmatprep.subr.bf16.mxu0 %v5332_v14  ;;  %4948 = vmatprep.subr.bf16.mxu1 %v5332_v14  ;;  %v351_v34 = vld [vmem:[#allocation4 + $0xe8] sm:$0xff]  ;;  %v350_v35 = vld [vmem:[#allocation4 + $0xe0] sm:$0xff]  ;;  %v353_v36 = vld [vmem:[#allocation4 + $0xf8] sm:$0xff] }
 0x187   :  { %v352_v37 = vld [vmem:[#allocation4 + $0xf0] sm:$0xff]  ;;  %v5334_v43 = vld [vmem:[#allocation15] sm:$0xff]  }
 0x188   :  { %4909 = vmatpush3.bf16.msra.mxu0 %v5332_v14  ;;  %4949 = vmatpush3.bf16.msra.mxu1 %v5332_v14  ;;  %v5335_v55 = vld [vmem:[#allocation15 + $0x8] sm:$0xff]   ;;  %v5336_v61 = vld [vmem:[#allocation15 + $0x10] sm:$0xff]  }
 0x189   :  { %378 = vperm.xlu1 %5325, %v6719_v8   ;;  %375 = vperm.xlu0 %5324, %v6721_v9  }
 0x18a   :  { %4910 = vmatprep.subr.bf16.mxu0 %v5333_v17  ;;  %4950 = vmatprep.subr.bf16.mxu1 %v5333_v17 }
 0x18c   :  { %4911 = vmatpush3.bf16.msra.mxu0 %v5333_v17  ;;  %4951 = vmatpush3.bf16.msra.mxu1 %v5333_v17 }
 0x18d   :  { %384 = vperm.xlu1 %5325, %v6723_v11   ;;  %381 = vperm.xlu0 %5324, %v6727_v13  }
 0x18e   :  { %4984 = vmatprep.subr.bf16.mxu0 %v5334_v43 }
 0x191   :  { %390 = vperm.xlu1 %5325, %v6729_v15   ;;  %387 = vperm.xlu0 %5324, %v6731_v16  }
 0x195   :  { %396 = vperm.xlu1 %5325, %v6735_v18   ;;  %393 = vperm.xlu0 %5324, %v6737_v19  }
 0x199   :  { %402 = vperm.xlu1 %5325, %v337_v20   ;;  %399 = vperm.xlu0 %5324, %v336_v21  }
 0x19d   :  { %408 = vperm.xlu1 %5325, %v339_v22   ;;  %405 = vperm.xlu0 %5324, %v338_v23  }
 0x1a1   :  { %414 = vperm.xlu1 %5325, %v341_v24   ;;  %411 = vperm.xlu0 %5324, %v340_v25  }
 0x1a5   :  { %420 = vperm.xlu1 %5325, %v343_v26   ;;  %417 = vperm.xlu0 %5324, %v342_v27  }
 0x1a9   :  { %426 = vperm.xlu1 %5325, %v345_v28   ;;  %423 = vperm.xlu0 %5324, %v344_v29  }
 0x1ad   :  { %432 = vperm.xlu1 %5325, %v347_v30   ;;  %429 = vperm.xlu0 %5324, %v346_v31  }
 0x1b1   :  { %438 = vperm.xlu1 %5325, %v349_v32   ;;  %435 = vperm.xlu0 %5324, %v348_v33  }
 0x1b5   :  { %444 = vperm.xlu1 %5325, %v351_v34   ;;  %441 = vperm.xlu0 %5324, %v350_v35  }
 0x1b9   :  { %450 = vperm.xlu1 %5325, %v353_v36   ;;  %447 = vperm.xlu0 %5324, %v352_v37  }
 0x1bd   :  { %5327 = vset.pattern.permute.xlu1 %v6284_v38  ;;  %5326 = vset.pattern.permute.xlu0 %v6284_v38 }
 0x1be   :  { %568 = vperm.xlu1 %5327, %v6709_v5   ;;  %565 = vperm.xlu0 %5326, %v6703_v3   ;;  %v5337_v3 = vld [vmem:[#allocation15 + $0x18] sm:$0xff]  }
 0x1c2   :  { %571 = vperm.xlu1 %5327, %v6701_v2   ;;  %574 = vperm.xlu0 %5326, %v6707_v4  }
 0x1c6   :  { %577 = vperm.xlu1 %5327, %v6715_v7   ;;  %580 = vperm.xlu0 %5326, %v6713_v6  }
 0x1ca   :  { %583 = vperm.xlu1 %5327, %v6721_v9   ;;  %586 = vperm.xlu0 %5326, %v6719_v8   ;;  %v5338_v9 = vld [vmem:[#allocation15 + $0x20] sm:$0xff]  }
 0x1ce   :  { %589 = vperm.xlu1 %5327, %v6727_v13   ;;  %592 = vperm.xlu0 %5326, %v6723_v11  }
 0x1d2   :  { %595 = vperm.xlu1 %5327, %v6731_v16   ;;  %598 = vperm.xlu0 %5326, %v6729_v15   ;;  %v5339_v15 = vld [vmem:[#allocation15 + $0x28] sm:$0xff]  }
 0x1d6   :  { %601 = vperm.xlu1 %5327, %v6737_v19   ;;  %604 = vperm.xlu0 %5326, %v6735_v18  }
 0x1da   :  { %607 = vperm.xlu1 %5327, %v336_v21   ;;  %610 = vperm.xlu0 %5326, %v337_v20   ;;  %v5340_v21 = vld [vmem:[#allocation15 + $0x30] sm:$0xff]  }
 0x1de   :  { %613 = vperm.xlu1 %5327, %v338_v23   ;;  %616 = vperm.xlu0 %5326, %v339_v22  }
 0x1e2   :  { %619 = vperm.xlu1 %5327, %v340_v25   ;;  %622 = vperm.xlu0 %5326, %v341_v24  }
 0x1e6   :  { %625 = vperm.xlu1 %5327, %v342_v27   ;;  %628 = vperm.xlu0 %5326, %v343_v26  }
 0x1ea   :  { %631 = vperm.xlu1 %5327, %v344_v29   ;;  %634 = vperm.xlu0 %5326, %v345_v28  }
 0x1ee   :  { %637 = vperm.xlu1 %5327, %v346_v31   ;;  %640 = vperm.xlu0 %5326, %v347_v30  }
 0x1f2   :  { %643 = vperm.xlu1 %5327, %v348_v33   ;;  %646 = vperm.xlu0 %5326, %v349_v32  }
 0x1f6   :  { %649 = vperm.xlu1 %5327, %v350_v35   ;;  %652 = vperm.xlu0 %5326, %v351_v34  }
 0x1fa   :  { %655 = vperm.xlu1 %5327, %v352_v37   ;;  %658 = vperm.xlu0 %5326, %v353_v36  }
 0x1fc   :  { %v364_v41 = vpop.permute.xlu1 %363  ;;  %v358_v42 = vpop.permute.xlu0 %357 }
 0x1fd   :  { %vm454_vm0 = vcmp.eq.s32.totalorder %v364_v41, %v6758_v40  ;;  %vm452_vm1 = vcmp.eq.s32.totalorder %v358_v42, %v6758_v40 }
 0x1fe   :  { %5328 = vset.pattern.permute.xlu1 %v6283_v1  ;;  %5329 = vset.pattern.permute.xlu0 %v6283_v1  ;;  %v4390_v47 = vsel %vm454_vm0, 1.0, %v6285_v46  ;;  %v4388_v49 = vsel %vm452_vm1, 1.0, %v6285_v46 }
 0x200   :  { %v367_v44 = vpop.permute.xlu1 %366  ;;  %v361_v45 = vpop.permute.xlu0 %360 }
 0x201   :  { %vm455_vm2 = vcmp.eq.s32.totalorder %v367_v44, %v6758_v40  ;;  %vm453_vm3 = vcmp.eq.s32.totalorder %v361_v45, %v6758_v40 }
 0x202   :  { %v4391_v48 = vsel %vm455_vm2, 1.0, %v6285_v46  ;;  %v4389_v50 = vsel %vm453_vm3, 1.0, %v6285_v46 }
 0x203   :  { %v549_v51 = vpack.c.bf16 %v4391_v48, %v4390_v47  ;;  %v548_v52 = vpack.c.bf16 %v4389_v50, %v4388_v49 }
 0x204   :  { %v373_v53 = vpop.permute.xlu1 %372  ;;  %v370_v54 = vpop.permute.xlu0 %369 }
 0x205   :  { %vm457_vm5 = vcmp.eq.s32.totalorder %v373_v53, %v6758_v40  ;;  %vm456_vm6 = vcmp.eq.s32.totalorder %v370_v54, %v6758_v40  ;;  %4912 = vmatprep.mubr.msk.bf16.mxu0 %vm878_vm4, %v548_v52 }
 0x206   :  { %v4393_v56 = vsel %vm457_vm5, 1.0, %v6285_v46  ;;  %v4392_v57 = vsel %vm456_vm6, 1.0, %v6285_v46  ;;  %4913 = vmatmul.mubr.msk.bf16.vlgmr.msra.gmra.mrb[0].mxu0 %vm878_vm4, %v549_v51 }
 0x207   :  { %v550_v58 = vpack.c.bf16 %v4393_v56, %v4392_v57  ;;  %4985 = vmatpush3.bf16.msra.mxu0 %v5334_v43 }
 0x208   :  { %v379_v59 = vpop.permute.xlu1 %378  ;;  %v376_v60 = vpop.permute.xlu0 %375  ;;  %4986 = vmatprep.subr.bf16.mxu0 %v5335_v55 }
 0x209   :  { %vm459_vm7 = vcmp.eq.s32.totalorder %v379_v59, %v6758_v40  ;;  %vm458_vm8 = vcmp.eq.s32.totalorder %v376_v60, %v6758_v40  ;;  %4916 = vmatprep.mubr.msk.bf16.mxu0 %vm878_vm4, %v550_v58 }
 0x20a   :  { %v4395_v62 = vsel %vm459_vm7, 1.0, %v6285_v46  ;;  %v4394_v63 = vsel %vm458_vm8, 1.0, %v6285_v46 }
 0x20b   :  { %v551_v0 = vpack.c.bf16 %v4395_v62, %v4394_v63  ;;  %4987 = vmatpush3.bf16.msra.mxu0 %v5335_v55 }
 0x20c   :  { %v385_v1 = vpop.permute.xlu1 %384  ;;  %v382_v2 = vpop.permute.xlu0 %381  ;;  %4988 = vmatprep.subr.bf16.mxu0 %v5336_v61 }
 0x20d   :  { %vm461_vm9 = vcmp.eq.s32.totalorder %v385_v1, %v6758_v40  ;;  %vm460_vm10 = vcmp.eq.s32.totalorder %v382_v2, %v6758_v40 }
 0x20e   :  { %v4397_v4 = vsel %vm461_vm9, 1.0, %v6285_v46  ;;  %v4396_v5 = vsel %vm460_vm10, 1.0, %v6285_v46  ;;  %4917 = vmatmul.mubr.msk.bf16.gmra.mrb[4].mxu0 %vm878_vm4, %v551_v0 }
 0x20f   :  { %v552_v6 = vpack.c.bf16 %v4397_v4, %v4396_v5  ;;  %4989 = vmatpush3.bf16.msra.mxu0 %v5336_v61 }
 0x210   :  { %v391_v7 = vpop.permute.xlu1 %390  ;;  %v388_v8 = vpop.permute.xlu0 %387  ;;  %4990 = vmatprep.subr.bf16.mxu0 %v5337_v3 }
 0x211   :  { %vm463_vm11 = vcmp.eq.s32.totalorder %v391_v7, %v6758_v40  ;;  %vm462_vm12 = vcmp.eq.s32.totalorder %v388_v8, %v6758_v40  ;;  %4920 = vmatprep.mubr.msk.bf16.mxu0 %vm878_vm4, %v552_v6 }
 0x212   :  { %v4399_v10 = vsel %vm463_vm11, 1.0, %v6285_v46  ;;  %v4398_v11 = vsel %vm462_vm12, 1.0, %v6285_v46 }
 0x213   :  { %v553_v12 = vpack.c.bf16 %v4399_v10, %v4398_v11  ;;  %4991 = vmatpush3.bf16.msra.mxu0 %v5337_v3 }
 0x214   :  { %v397_v13 = vpop.permute.xlu1 %396  ;;  %v394_v14 = vpop.permute.xlu0 %393  ;;  %4992 = vmatprep.subr.bf16.mxu0 %v5338_v9 }
 0x215   :  { %vm465_vm13 = vcmp.eq.s32.totalorder %v397_v13, %v6758_v40  ;;  %vm464_vm14 = vcmp.eq.s32.totalorder %v394_v14, %v6758_v40 }
 0x216   :  { %v4401_v16 = vsel %vm465_vm13, 1.0, %v6285_v46  ;;  %v4400_v17 = vsel %vm464_vm14, 1.0, %v6285_v46  ;;  %4921 = vmatmul.mubr.msk.bf16.gmra.mrb[8].mxu0 %vm878_vm4, %v553_v12 }
 0x217   :  { %v554_v18 = vpack.c.bf16 %v4401_v16, %v4400_v17  ;;  %4993 = vmatpush3.bf16.msra.mxu0 %v5338_v9 }
 0x218   :  { %v403_v19 = vpop.permute.xlu1 %402  ;;  %v400_v20 = vpop.permute.xlu0 %399  ;;  %4994 = vmatprep.subr.bf16.mxu0 %v5339_v15 }
 0x219   :  { %vm467_vm15 = vcmp.eq.s32.totalorder %v403_v19, %v6758_v40  ;;  %vm466_vm0 = vcmp.eq.s32.totalorder %v400_v20, %v6758_v40  ;;  %4924 = vmatprep.mubr.msk.bf16.mxu0 %vm878_vm4, %v554_v18 }
 0x21a   :  { %v4403_v22 = vsel %vm467_vm15, 1.0, %v6285_v46  ;;  %v4402_v23 = vsel %vm466_vm0, 1.0, %v6285_v46 }
 0x21b   :  { %v555_v24 = vpack.c.bf16 %v4403_v22, %v4402_v23  ;;  %4995 = vmatpush3.bf16.msra.mxu0 %v5339_v15 }
 0x21c   :  { %v409_v25 = vpop.permute.xlu1 %408  ;;  %v406_v26 = vpop.permute.xlu0 %405  ;;  %4996 = vmatprep.subr.bf16.mxu0 %v5340_v21 }
 0x21d   :  { %vm469_vm1 = vcmp.eq.s32.totalorder %v409_v25, %v6758_v40  ;;  %vm468_vm2 = vcmp.eq.s32.totalorder %v406_v26, %v6758_v40 }
 0x21e   :  { %v4405_v27 = vsel %vm469_vm1, 1.0, %v6285_v46  ;;  %v4404_v28 = vsel %vm468_vm2, 1.0, %v6285_v46  ;;  %4925 = vmatmul.mubr.msk.bf16.gmra.mrb[12].mxu0 %vm878_vm4, %v555_v24 }
 0x21f   :  { %v556_v29 = vpack.c.bf16 %v4405_v27, %v4404_v28  ;;  %4997 = vmatpush3.bf16.msra.mxu0 %v5340_v21 }
 0x220   :  { %v415_v30 = vpop.permute.xlu1 %414  ;;  %v412_v31 = vpop.permute.xlu0 %411 }
 0x221   :  { %vm471_vm3 = vcmp.eq.s32.totalorder %v415_v30, %v6758_v40  ;;  %vm470_vm5 = vcmp.eq.s32.totalorder %v412_v31, %v6758_v40  ;;  %4928 = vmatprep.mubr.msk.bf16.mxu0 %vm878_vm4, %v556_v29 }
 0x222   :  { %v4407_v32 = vsel %vm471_vm3, 1.0, %v6285_v46  ;;  %v4406_v33 = vsel %vm470_vm5, 1.0, %v6285_v46 }
 0x223   :  { %v557_v34 = vpack.c.bf16 %v4407_v32, %v4406_v33 }
 0x224   :  { %v421_v35 = vpop.permute.xlu1 %420  ;;  %v418_v36 = vpop.permute.xlu0 %417 }
 0x225   :  { %vm473_vm6 = vcmp.eq.s32.totalorder %v421_v35, %v6758_v40  ;;  %vm472_vm7 = vcmp.eq.s32.totalorder %v418_v36, %v6758_v40 }
 0x226   :  { %v4409_v37 = vsel %vm473_vm6, 1.0, %v6285_v46  ;;  %v4408_v38 = vsel %vm472_vm7, 1.0, %v6285_v46  ;;  %4929 = vmatmul.mubr.msk.bf16.gmra.mrb[16].mxu0 %vm878_vm4, %v557_v34 }
 0x227   :  { %v558_v41 = vpack.c.bf16 %v4409_v37, %v4408_v38 }
 0x228   :  { %v427_v42 = vpop.permute.xlu1 %426  ;;  %v424_v43 = vpop.permute.xlu0 %423 }
 0x229   :  { %vm475_vm8 = vcmp.eq.s32.totalorder %v427_v42, %v6758_v40  ;;  %vm474_vm9 = vcmp.eq.s32.totalorder %v424_v43, %v6758_v40  ;;  %4932 = vmatprep.mubr.msk.bf16.mxu0 %vm878_vm4, %v558_v41  ;;  %v5341_v43 = vld [vmem:[#allocation15 + $0x38] sm:$0xff]  }
 0x22a   :  { %v4411_v44 = vsel %vm475_vm8, 1.0, %v6285_v46  ;;  %v4410_v45 = vsel %vm474_vm9, 1.0, %v6285_v46  ;;  %4998 = vmatprep.subr.bf16.mxu0 %v5341_v43 }
 0x22b   :  { %v559_v47 = vpack.c.bf16 %v4411_v44, %v4410_v45  ;;  %4999 = vmatpush3.bf16.msra.mxu0 %v5341_v43  ;;  %v5346_v43 = vld [vmem:[#allocation16 + $0x20] sm:$0xff]  }
 0x22c   :  { %v433_v48 = vpop.permute.xlu1 %432  ;;  %v430_v49 = vpop.permute.xlu0 %429 }
 0x22d   :  { %vm477_vm10 = vcmp.eq.s32.totalorder %v433_v48, %v6758_v40  ;;  %vm476_vm11 = vcmp.eq.s32.totalorder %v430_v49, %v6758_v40 }
 0x22e   :  { %v4413_v50 = vsel %vm477_vm10, 1.0, %v6285_v46  ;;  %v4412_v51 = vsel %vm476_vm11, 1.0, %v6285_v46  ;;  %4933 = vmatmul.mubr.msk.bf16.gmra.mrb[20].mxu0 %vm878_vm4, %v559_v47 }
 0x22f   :  { %v560_v52 = vpack.c.bf16 %v4413_v50, %v4412_v51 }
 0x230   :  { %v439_v53 = vpop.permute.xlu1 %438  ;;  %v436_v54 = vpop.permute.xlu0 %435 }
 0x231   :  { %vm479_vm12 = vcmp.eq.s32.totalorder %v439_v53, %v6758_v40  ;;  %vm478_vm13 = vcmp.eq.s32.totalorder %v436_v54, %v6758_v40  ;;  %4936 = vmatprep.mubr.msk.bf16.mxu0 %vm878_vm4, %v560_v52 }
 0x232   :  { %v4415_v55 = vsel %vm479_vm12, 1.0, %v6285_v46  ;;  %v4414_v56 = vsel %vm478_vm13, 1.0, %v6285_v46 }
 0x233   :  { %v561_v57 = vpack.c.bf16 %v4415_v55, %v4414_v56 }
 0x234   :  { %v445_v58 = vpop.permute.xlu1 %444  ;;  %v442_v59 = vpop.permute.xlu0 %441 }
 0x235   :  { %vm481_vm14 = vcmp.eq.s32.totalorder %v445_v58, %v6758_v40  ;;  %vm480_vm15 = vcmp.eq.s32.totalorder %v442_v59, %v6758_v40 }
 0x236   :  { %v4417_v60 = vsel %vm481_vm14, 1.0, %v6285_v46  ;;  %v4416_v61 = vsel %vm480_vm15, 1.0, %v6285_v46  ;;  %4937 = vmatmul.mubr.msk.bf16.gmra.mrb[24].mxu0 %vm878_vm4, %v561_v57 }
 0x237   :  { %v562_v62 = vpack.c.bf16 %v4417_v60, %v4416_v61 }
 0x238   :  { %v451_v63 = vpop.permute.xlu1 %450  ;;  %v448_v0 = vpop.permute.xlu0 %447 }
 0x239   :  { %vm483_vm0 = vcmp.eq.s32.totalorder %v451_v63, %v6758_v40  ;;  %vm482_vm1 = vcmp.eq.s32.totalorder %v448_v0, %v6758_v40  ;;  %4940 = vmatprep.mubr.msk.bf16.mxu0 %vm878_vm4, %v562_v62 }
 0x23a   :  { %v4419_v1 = vsel %vm483_vm0, 1.0, %v6285_v46  ;;  %v4418_v2 = vsel %vm482_vm1, 1.0, %v6285_v46 }
 0x23b   :  { %v563_v3 = vpack.c.bf16 %v4419_v1, %v4418_v2 }
 0x23d   :  { %v569_v4 = vpop.permute.xlu1 %568  ;;  %v566_v5 = vpop.permute.xlu0 %565 }
 0x23e   :  { %vm661_vm2 = vcmp.eq.s32.totalorder %v569_v4, %v6758_v40  ;;  %vm660_vm3 = vcmp.eq.s32.totalorder %v566_v5, %v6758_v40  ;;  %4941 = vmatmul.mubr.msk.bf16.gmra.mrb[28].mxu0 %vm878_vm4, %v563_v3 }
 0x23f   :  { %v4420_v6 = vsel %vm660_vm3, 1.0, %v6285_v46  ;;  %v4421_v7 = vsel %vm661_vm2, 1.0, %v6285_v46 }
 0x240   :  { %v756_v8 = vpack.c.bf16 %v4421_v7, %v4420_v6 }
 0x241   :  { %v572_v9 = vpop.permute.xlu1 %571  ;;  %v575_v10 = vpop.permute.xlu0 %574 }
 0x242   :  { %vm662_vm5 = vcmp.eq.s32.totalorder %v572_v9, %v6758_v40  ;;  %vm663_vm6 = vcmp.eq.s32.totalorder %v575_v10, %v6758_v40  ;;  %4952 = vmatprep.mubr.msk.bf16.mxu1 %vm878_vm4, %v756_v8 }
 0x243   :  { %v4422_v11 = vsel %vm662_vm5, 1.0, %v6285_v46  ;;  %v4423_v12 = vsel %vm663_vm6, 1.0, %v6285_v46 }
 0x244   :  { %v757_v13 = vpack.c.bf16 %v4423_v12, %v4422_v11 }
 0x245   :  { %v578_v14 = vpop.permute.xlu1 %577  ;;  %v581_v15 = vpop.permute.xlu0 %580 }
 0x246   :  { %vm664_vm7 = vcmp.eq.s32.totalorder %v578_v14, %v6758_v40  ;;  %vm665_vm8 = vcmp.eq.s32.totalorder %v581_v15, %v6758_v40  ;;  %4953 = vmatmul.mubr.msk.bf16.vlgmr.msra.gmra.mrb[0].mxu1 %vm878_vm4, %v757_v13 }
 0x247   :  { %v4424_v16 = vsel %vm664_vm7, 1.0, %v6285_v46  ;;  %v4425_v17 = vsel %vm665_vm8, 1.0, %v6285_v46 }
 0x248   :  { %v758_v18 = vpack.c.bf16 %v4425_v17, %v4424_v16 }
 0x249   :  { %v584_v19 = vpop.permute.xlu1 %583  ;;  %v587_v20 = vpop.permute.xlu0 %586 }
 0x24a   :  { %vm666_vm9 = vcmp.eq.s32.totalorder %v584_v19, %v6758_v40  ;;  %vm667_vm10 = vcmp.eq.s32.totalorder %v587_v20, %v6758_v40  ;;  %4956 = vmatprep.mubr.msk.bf16.mxu1 %vm878_vm4, %v758_v18 }
 0x24b   :  { %v4426_v21 = vsel %vm666_vm9, 1.0, %v6285_v46  ;;  %v4427_v22 = vsel %vm667_vm10, 1.0, %v6285_v46 }
 0x24c   :  { %v759_v23 = vpack.c.bf16 %v4427_v22, %v4426_v21 }
 0x24d   :  { %v590_v24 = vpop.permute.xlu1 %589  ;;  %v593_v25 = vpop.permute.xlu0 %592 }
 0x24e   :  { %vm668_vm11 = vcmp.eq.s32.totalorder %v590_v24, %v6758_v40  ;;  %vm669_vm12 = vcmp.eq.s32.totalorder %v593_v25, %v6758_v40  ;;  %4957 = vmatmul.mubr.msk.bf16.gmra.mrb[4].mxu1 %vm878_vm4, %v759_v23  ;;  %v5342_v24 = vld [vmem:[#allocation16] sm:$0xff]  }
 0x24f   :  { %v4428_v26 = vsel %vm668_vm11, 1.0, %v6285_v46  ;;  %v4429_v27 = vsel %vm669_vm12, 1.0, %v6285_v46  ;;  %5032 = vmatprep.subr.bf16.mxu0 %v5342_v24 }
 0x250   :  { %v760_v28 = vpack.c.bf16 %v4429_v27, %v4428_v26 }
 0x251   :  { %v596_v29 = vpop.permute.xlu1 %595  ;;  %v599_v30 = vpop.permute.xlu0 %598 }
 0x252   :  { %vm670_vm13 = vcmp.eq.s32.totalorder %v596_v29, %v6758_v40  ;;  %vm671_vm14 = vcmp.eq.s32.totalorder %v599_v30, %v6758_v40  ;;  %4960 = vmatprep.mubr.msk.bf16.mxu1 %vm878_vm4, %v760_v28 }
 0x253   :  { %v4430_v31 = vsel %vm670_vm13, 1.0, %v6285_v46  ;;  %v4431_v32 = vsel %vm671_vm14, 1.0, %v6285_v46 }
 0x254   :  { %v761_v33 = vpack.c.bf16 %v4431_v32, %v4430_v31 }
 0x255   :  { %v602_v34 = vpop.permute.xlu1 %601  ;;  %v605_v35 = vpop.permute.xlu0 %604 }
 0x256   :  { %vm672_vm15 = vcmp.eq.s32.totalorder %v602_v34, %v6758_v40  ;;  %vm673_vm0 = vcmp.eq.s32.totalorder %v605_v35, %v6758_v40  ;;  %4961 = vmatmul.mubr.msk.bf16.gmra.mrb[8].mxu1 %vm878_vm4, %v761_v33  ;;  %v5344_v33 = vld [vmem:[#allocation16 + $0x10] sm:$0xff]  }
 0x257   :  { %v4432_v36 = vsel %vm672_vm15, 1.0, %v6285_v46  ;;  %v4433_v37 = vsel %vm673_vm0, 1.0, %v6285_v46 }
 0x258   :  { %v762_v38 = vpack.c.bf16 %v4433_v37, %v4432_v36 }
 0x259   :  { %v608_v41 = vpop.permute.xlu1 %607  ;;  %v611_v42 = vpop.permute.xlu0 %610 }
 0x25a   :  { %vm674_vm1 = vcmp.eq.s32.totalorder %v608_v41, %v6758_v40  ;;  %vm675_vm2 = vcmp.eq.s32.totalorder %v611_v42, %v6758_v40  ;;  %4964 = vmatprep.mubr.msk.bf16.mxu1 %vm878_vm4, %v762_v38  ;;  %v5345_v38 = vld [vmem:[#allocation16 + $0x18] sm:$0xff]  }
 0x25b   :  { %v4434_v44 = vsel %vm674_vm1, 1.0, %v6285_v46  ;;  %v4435_v45 = vsel %vm675_vm2, 1.0, %v6285_v46 }
 0x25c   :  { %v763_v47 = vpack.c.bf16 %v4435_v45, %v4434_v44 }
 0x25d   :  { %v614_v48 = vpop.permute.xlu1 %613  ;;  %v617_v49 = vpop.permute.xlu0 %616 }
 0x25e   :  { %vm676_vm3 = vcmp.eq.s32.totalorder %v614_v48, %v6758_v40  ;;  %vm677_vm5 = vcmp.eq.s32.totalorder %v617_v49, %v6758_v40  ;;  %4965 = vmatmul.mubr.msk.bf16.gmra.mrb[12].mxu1 %vm878_vm4, %v763_v47  ;;  %v5347_v49 = vld [vmem:[#allocation16 + $0x28] sm:$0xff]  }
 0x25f   :  { %v4436_v50 = vsel %vm676_vm3, 1.0, %v6285_v46  ;;  %v4437_v51 = vsel %vm677_vm5, 1.0, %v6285_v46  ;;  %vm2409_vm5 = vcmask 261120  }
 0x260   :  { %v764_v52 = vpack.c.bf16 %v4437_v51, %v4436_v50 }
 0x261   :  { %v620_v53 = vpop.permute.xlu1 %619  ;;  %v623_v54 = vpop.permute.xlu0 %622 }
 0x262   :  { %vm678_vm6 = vcmp.eq.s32.totalorder %v620_v53, %v6758_v40  ;;  %vm679_vm7 = vcmp.eq.s32.totalorder %v623_v54, %v6758_v40  ;;  %4968 = vmatprep.mubr.msk.bf16.mxu1 %vm878_vm4, %v764_v52  ;;  %v5348_v52 = vld [vmem:[#allocation16 + $0x30] sm:$0xff]  }
 0x263   :  { %v4438_v55 = vsel %vm678_vm6, 1.0, %v6285_v46  ;;  %v4439_v56 = vsel %vm679_vm7, 1.0, %v6285_v46 }
 0x264   :  { %v765_v57 = vpack.c.bf16 %v4439_v56, %v4438_v55 }
 0x265   :  { %v626_v58 = vpop.permute.xlu1 %625  ;;  %v629_v59 = vpop.permute.xlu0 %628 }
 0x266   :  { %vm680_vm8 = vcmp.eq.s32.totalorder %v626_v58, %v6758_v40  ;;  %vm681_vm9 = vcmp.eq.s32.totalorder %v629_v59, %v6758_v40  ;;  %4969 = vmatmul.mubr.msk.bf16.gmra.mrb[16].mxu1 %vm878_vm4, %v765_v57  ;;  %v5349_v57 = vld [vmem:[#allocation16 + $0x38] sm:$0xff]  }
 0x267   :  { %v4440_v60 = vsel %vm680_vm8, 1.0, %v6285_v46  ;;  %v4441_v61 = vsel %vm681_vm9, 1.0, %v6285_v46 }
 0x268   :  { %v766_v62 = vpack.c.bf16 %v4441_v61, %v4440_v60 }
 0x269   :  { %v632_v63 = vpop.permute.xlu1 %631  ;;  %v635_v0 = vpop.permute.xlu0 %634 }
 0x26a   :  { %vm682_vm10 = vcmp.eq.s32.totalorder %v632_v63, %v6758_v40  ;;  %vm683_vm11 = vcmp.eq.s32.totalorder %v635_v0, %v6758_v40  ;;  %4972 = vmatprep.mubr.msk.bf16.mxu1 %vm878_vm4, %v766_v62 }
 0x26b   :  { %v4442_v1 = vsel %vm682_vm10, 1.0, %v6285_v46  ;;  %v4443_v2 = vsel %vm683_vm11, 1.0, %v6285_v46 }
 0x26c   :  { %v767_v3 = vpack.c.bf16 %v4443_v2, %v4442_v1 }
 0x26d   :  { %v638_v4 = vpop.permute.xlu1 %637  ;;  %v641_v5 = vpop.permute.xlu0 %640 }
 0x26e   :  { %vm684_vm12 = vcmp.eq.s32.totalorder %v638_v4, %v6758_v40  ;;  %vm685_vm13 = vcmp.eq.s32.totalorder %v641_v5, %v6758_v40  ;;  %4973 = vmatmul.mubr.msk.bf16.gmra.mrb[20].mxu1 %vm878_vm4, %v767_v3 }
 0x26f   :  { %v4444_v6 = vsel %vm684_vm12, 1.0, %v6285_v46  ;;  %v4445_v7 = vsel %vm685_vm13, 1.0, %v6285_v46 }
 0x270   :  { %v768_v8 = vpack.c.bf16 %v4445_v7, %v4444_v6 }
 0x271   :  { %v644_v9 = vpop.permute.xlu1 %643  ;;  %v647_v10 = vpop.permute.xlu0 %646 }
 0x272   :  { %vm686_vm14 = vcmp.eq.s32.totalorder %v644_v9, %v6758_v40  ;;  %vm687_vm15 = vcmp.eq.s32.totalorder %v647_v10, %v6758_v40  ;;  %4976 = vmatprep.mubr.msk.bf16.mxu1 %vm878_vm4, %v768_v8 }
 0x273   :  { %v4446_v11 = vsel %vm686_vm14, 1.0, %v6285_v46  ;;  %v4447_v12 = vsel %vm687_vm15, 1.0, %v6285_v46 }
 0x274   :  { %v769_v13 = vpack.c.bf16 %v4447_v12, %v4446_v11 }
 0x275   :  { %v650_v14 = vpop.permute.xlu1 %649  ;;  %v653_v15 = vpop.permute.xlu0 %652 }
 0x276   :  { %vm688_vm0 = vcmp.eq.s32.totalorder %v650_v14, %v6758_v40  ;;  %vm689_vm1 = vcmp.eq.s32.totalorder %v653_v15, %v6758_v40  ;;  %4977 = vmatmul.mubr.msk.bf16.gmra.mrb[24].mxu1 %vm878_vm4, %v769_v13 }
 0x277   :  { %v4448_v16 = vsel %vm688_vm0, 1.0, %v6285_v46  ;;  %v4449_v17 = vsel %vm689_vm1, 1.0, %v6285_v46 }
 0x278   :  { %v770_v18 = vpack.c.bf16 %v4449_v17, %v4448_v16 }
 0x279   :  { %v656_v19 = vpop.permute.xlu1 %655  ;;  %v659_v20 = vpop.permute.xlu0 %658 }
 0x27a   :  { %vm690_vm2 = vcmp.eq.s32.totalorder %v656_v19, %v6758_v40  ;;  %vm691_vm3 = vcmp.eq.s32.totalorder %v659_v20, %v6758_v40  ;;  %4980 = vmatprep.mubr.msk.bf16.mxu1 %vm878_vm4, %v770_v18 }
 0x27b   :  { %v4450_v21 = vsel %vm690_vm2, 1.0, %v6285_v46  ;;  %v4451_v22 = vsel %vm691_vm3, 1.0, %v6285_v46  ;;  %v5343_v46 = vld [vmem:[#allocation16 + $0x8] sm:$0xff]  }
 0x27c   :  { %v771_v23 = vpack.c.bf16 %v4451_v22, %v4450_v21 }
 0x27e   :  { %4981 = vmatmul.mubr.msk.bf16.gmra.mrb[28].mxu1 %vm878_vm4, %v771_v23  ;;  %vm8321_vm4 = vcmp.lt.s32.totalorder %v6758_v40, 3  ;;  %v2043_v40 = vld [vmem:[#allocation9] sm:$0xff] }
 0x2d9   :  { %v6922_v25 = vpop.f32.mrb[0].mxu0 }
 0x2da   :  { %v6924_v26 = vpop.f32.mrb[1].mxu0 }
 0x2db   :  { %v6926_v27 = vpop.f32.mrb[2].mxu0 }
 0x2dc   :  { %v1498_v28 = vpack.c.bf16 %v6926_v27, %v6922_v25  ;;  %v6930_v29 = vpop.f32.mrb[3].mxu0 }
 0x2dd   :  { %v1497_v30 = vpack.c.bf16 %v6930_v29, %v6924_v26 }
 0x2df   :  { %5000 = vmatprep.mubr.bf16.mxu0 %v1497_v30 }
 0x2e0   :  { %5001 = vmatmul.mubr.bf16.vlgmr.msra.gmra.mrb[32].mxu0 %v1498_v28 }
 0x2e1   :  { %v6934_v31 = vpop.f32.mrb[4].mxu0  ;;  %5033 = vmatpush3.bf16.msra.mxu0 %v5342_v24 }
 0x2e2   :  { %v6936_v32 = vpop.f32.mrb[5].mxu0  ;;  %5034 = vmatprep.subr.bf16.mxu0 %v5343_v46 }
 0x2e3   :  { %v6938_v34 = vpop.f32.mrb[6].mxu0 }
 0x2e4   :  { %v1500_v35 = vpack.c.bf16 %v6938_v34, %v6934_v31  ;;  %v6942_v36 = vpop.f32.mrb[7].mxu0 }
 0x2e5   :  { %v1499_v37 = vpack.c.bf16 %v6942_v36, %v6936_v32  ;;  %5035 = vmatpush3.bf16.msra.mxu0 %v5343_v46 }
 0x2e6   :  { %5036 = vmatprep.subr.bf16.mxu0 %v5344_v33 }
 0x2e7   :  { %5004 = vmatprep.mubr.bf16.mxu0 %v1499_v37 }
 0x2e8   :  { %5005 = vmatmul.mubr.bf16.gmra.mrb[36].mxu0 %v1500_v35 }
 0x2e9   :  { %v6946_v41 = vpop.f32.mrb[8].mxu0  ;;  %5037 = vmatpush3.bf16.msra.mxu0 %v5344_v33 }
 0x2ea   :  { %v6948_v42 = vpop.f32.mrb[9].mxu0  ;;  %5038 = vmatprep.subr.bf16.mxu0 %v5345_v38 }
 0x2eb   :  { %v6950_v44 = vpop.f32.mrb[10].mxu0 }
 0x2ec   :  { %v1502_v45 = vpack.c.bf16 %v6950_v44, %v6946_v41  ;;  %v6954_v47 = vpop.f32.mrb[11].mxu0 }
 0x2ed   :  { %v1501_v48 = vpack.c.bf16 %v6954_v47, %v6948_v42  ;;  %5039 = vmatpush3.bf16.msra.mxu0 %v5345_v38 }
 0x2ee   :  { %5040 = vmatprep.subr.bf16.mxu0 %v5346_v43 }
 0x2ef   :  { %5008 = vmatprep.mubr.bf16.mxu0 %v1501_v48 }
 0x2f0   :  { %5009 = vmatmul.mubr.bf16.gmra.mrb[40].mxu0 %v1502_v45 }
 0x2f1   :  { %v6958_v50 = vpop.f32.mrb[12].mxu0  ;;  %5041 = vmatpush3.bf16.msra.mxu0 %v5346_v43 }
 0x2f2   :  { %v6960_v51 = vpop.f32.mrb[13].mxu0  ;;  %5042 = vmatprep.subr.bf16.mxu0 %v5347_v49 }
 0x2f3   :  { %v6962_v53 = vpop.f32.mrb[14].mxu0 }
 0x2f4   :  { %v1504_v54 = vpack.c.bf16 %v6962_v53, %v6958_v50  ;;  %v6966_v55 = vpop.f32.mrb[15].mxu0 }
 0x2f5   :  { %v1503_v56 = vpack.c.bf16 %v6966_v55, %v6960_v51  ;;  %5043 = vmatpush3.bf16.msra.mxu0 %v5347_v49 }
 0x2f6   :  { %5044 = vmatprep.subr.bf16.mxu0 %v5348_v52 }
 0x2f7   :  { %5012 = vmatprep.mubr.bf16.mxu0 %v1503_v56 }
 0x2f8   :  { %5013 = vmatmul.mubr.bf16.gmra.mrb[44].mxu0 %v1504_v54 }
 0x2f9   :  { %v6970_v58 = vpop.f32.mrb[16].mxu0  ;;  %5045 = vmatpush3.bf16.msra.mxu0 %v5348_v52 }
 0x2fa   :  { %v6972_v59 = vpop.f32.mrb[17].mxu0  ;;  %5046 = vmatprep.subr.bf16.mxu0 %v5349_v57 }
 0x2fb   :  { %v6974_v60 = vpop.f32.mrb[18].mxu0 }
 0x2fc   :  { %v1506_v61 = vpack.c.bf16 %v6974_v60, %v6970_v58  ;;  %v6978_v62 = vpop.f32.mrb[19].mxu0 }
 0x2fd   :  { %v1505_v63 = vpack.c.bf16 %v6978_v62, %v6972_v59  ;;  %5047 = vmatpush3.bf16.msra.mxu0 %v5349_v57 }
 0x2ff   :  { %5016 = vmatprep.mubr.bf16.mxu0 %v1505_v63 }
 0x300   :  { %5017 = vmatmul.mubr.bf16.gmra.mrb[48].mxu0 %v1506_v61 }
 0x301   :  { %v6982_v0 = vpop.f32.mrb[20].mxu0 }
 0x302   :  { %v6984_v1 = vpop.f32.mrb[21].mxu0 }
 0x303   :  { %v6986_v2 = vpop.f32.mrb[22].mxu0 }
 0x304   :  { %v1508_v3 = vpack.c.bf16 %v6986_v2, %v6982_v0  ;;  %v6990_v4 = vpop.f32.mrb[23].mxu0 }
 0x305   :  { %v1507_v5 = vpack.c.bf16 %v6990_v4, %v6984_v1 }
 0x307   :  { %5020 = vmatprep.mubr.bf16.mxu0 %v1507_v5 }
 0x308   :  { %5021 = vmatmul.mubr.bf16.gmra.mrb[52].mxu0 %v1508_v3 }
 0x309   :  { %v6994_v6 = vpop.f32.mrb[24].mxu0 }
 0x30a   :  { %v6996_v7 = vpop.f32.mrb[25].mxu0 }
 0x30b   :  { %v6998_v8 = vpop.f32.mrb[26].mxu0 }
 0x30c   :  { %v1510_v9 = vpack.c.bf16 %v6998_v8, %v6994_v6  ;;  %v7002_v10 = vpop.f32.mrb[27].mxu0 }
 0x30d   :  { %v1509_v11 = vpack.c.bf16 %v7002_v10, %v6996_v7 }
 0x30f   :  { %5024 = vmatprep.mubr.bf16.mxu0 %v1509_v11 }
 0x310   :  { %5025 = vmatmul.mubr.bf16.gmra.mrb[56].mxu0 %v1510_v9 }
 0x311   :  { %v7006_v12 = vpop.f32.mrb[28].mxu0 }
 0x312   :  { %v7008_v13 = vpop.f32.mrb[29].mxu0 }
 0x313   :  { %v7010_v14 = vpop.f32.mrb[30].mxu0 }
 0x314   :  { %v1512_v15 = vpack.c.bf16 %v7010_v14, %v7006_v12  ;;  %v7014_v16 = vpop.f32.mrb[31].mxu0 }
 0x315   :  { %v1511_v17 = vpack.c.bf16 %v7014_v16, %v7008_v13 }
 0x317   :  { %5028 = vmatprep.mubr.bf16.mxu0 %v1511_v17 }
 0x318   :  { %5029 = vmatmul.mubr.bf16.gmra.mrb[60].mxu0 %v1512_v15 }
 0x319   :  { %v4954_v18 = vpop.f32.mrb[0].mxu1 }
 0x31a   :  { %v1300_v19 = vsub.f32 %v6922_v25, %v4954_v18  ;;  %v1170_v20 = vpop.f32.mrb[1].mxu1 }
 0x31b   :  { %v1298_v21 = vsub.f32 %v6924_v26, %v1170_v20  ;;  %v4955_v22 = vpop.f32.mrb[2].mxu1 }
 0x31c   :  { %v1301_v23 = vsub.f32 %v6926_v27, %v4955_v22  ;;  %v1771_v24 = vpack.c.bf16 %v4955_v22, %v4954_v18  ;;  %v1173_v28 = vpop.f32.mrb[3].mxu1  ;;  %v7041_v37 = vsel %vm8321_vm4, %v1300_v19, 0.0 }
 0x31d   :  { %v1299_v30 = vsub.f32 %v6930_v29, %v1173_v28  ;;  %v1770_v46 = vpack.c.bf16 %v1173_v28, %v1170_v20  ;;  %v7025_v33 = vsel %vm8321_vm4, %v1298_v21, 0.0  ;;  %v1364_v57 = vmul.f32 %v7041_v37, %v7041_v37 }
 0x31e   :  { %v1362_v25 = vmul.f32 %v7025_v33, %v7025_v33  ;;  %v7035_v26 = vsel %vm8321_vm4, %v1301_v23, 0.0 }
 0x31f   :  { %5048 = vmatprep.mubr.bf16.mxu0 %v1770_v46  ;;  %v7031_v35 = vsel %vm8321_vm4, %v1299_v30, 0.0  ;;  %v1365_v45 = vmul.f32 %v7035_v26, %v7035_v26 }
 0x320   :  { %1394 = vadd.xlane.f32.xlu1 %v1362_v25  ;;  %5049 = vmatmul.mubr.bf16.vlgmr.msra.gmra.mrb[32].mxu0 %v1771_v24  ;;  %v1363_v27 = vmul.f32 %v7031_v35, %v7031_v35 }
 0x321   :  { %v4958_v29 = vpop.f32.mrb[4].mxu1 }
 0x322   :  { %v1304_v38 = vsub.f32 %v6934_v31, %v4958_v29  ;;  %1396 = vadd.xlane.f32.xlu0 %v1363_v27  ;;  %v1186_v43 = vpop.f32.mrb[5].mxu1 }
 0x323   :  { %v1302_v48 = vsub.f32 %v6936_v32, %v1186_v43  ;;  %v4959_v49 = vpop.f32.mrb[6].mxu1 }
 0x324   :  { %v1305_v52 = vsub.f32 %v6938_v34, %v4959_v49  ;;  %v1773_v54 = vpack.c.bf16 %v4959_v49, %v4958_v29  ;;  %1400 = vadd.xlane.f32.xlu1 %v1365_v45  ;;  %v1189_v56 = vpop.f32.mrb[7].mxu1 }
 0x325   :  { %v1303_v61 = vsub.f32 %v6942_v36, %v1189_v56  ;;  %v1772_v63 = vpack.c.bf16 %v1189_v56, %v1186_v43  ;;  %v7053_v31 = vsel %vm8321_vm4, %v1302_v48, 0.0  ;;  %v7065_v36 = vsel %vm8321_vm4, %v1304_v38, 0.0 }
 0x326   :  { %1398 = vadd.xlane.f32.xlu0 %v1364_v57  ;;  %v1366_v34 = vmul.f32 %v7053_v31, %v7053_v31  ;;  %8335 = vst [vmem:[#allocation48_spill] sm:$0xff] %v7065_v36  ;;  %v7069_v9 = vsel %vm8321_vm4, %v1305_v52, 0.0  ;;  %v1368_v22 = vmul.f32 %v7065_v36, %v7065_v36 }
 0x327   :  { %5052 = vmatprep.mubr.bf16.mxu0 %v1772_v63  ;;  %v7057_v32 = vsel %vm8321_vm4, %v1303_v61, 0.0  ;;  %8336 = vst [vmem:[#allocation49_spill] sm:$0xff] %v7069_v9  ;;  %v1369_v23 = vmul.f32 %v7069_v9, %v7069_v9 }
 0x328   :  { %8334 = vst [vmem:[#allocation47_spill] sm:$0xff] %v7057_v32  ;;  %5053 = vmatmul.mubr.bf16.gmra.mrb[36].mxu0 %v1773_v54  ;;  %v1367_v3 = vmul.f32 %v7057_v32, %v7057_v32 }
 0x329   :  { %v4962_v5 = vpop.f32.mrb[8].mxu1 }
 0x32a   :  { %v1308_v11 = vsub.f32 %v6946_v41, %v4962_v5  ;;  %1402 = vadd.xlane.f32.xlu0 %v1366_v34  ;;  %1404 = vadd.xlane.f32.xlu1 %v1367_v3  ;;  %v1202_v15 = vpop.f32.mrb[9].mxu1 }
 0x32b   :  { %v1306_v17 = vsub.f32 %v6948_v42, %v1202_v15  ;;  %v4963_v18 = vpop.f32.mrb[10].mxu1 }
 0x32c   :  { %v1309_v19 = vsub.f32 %v6950_v44, %v4963_v18  ;;  %v1775_v20 = vpack.c.bf16 %v4963_v18, %v4962_v5  ;;  %v1205_v21 = vpop.f32.mrb[11].mxu1  ;;  %v7093_v46 = vsel %vm8321_vm4, %v1308_v11, 0.0 }
 0x32d   :  { %v1307_v24 = vsub.f32 %v6954_v47, %v1205_v21  ;;  %v1774_v28 = vpack.c.bf16 %v1205_v21, %v1202_v15  ;;  %v7081_v41 = vsel %vm8321_vm4, %v1306_v17, 0.0  ;;  %8339 = vst [vmem:[#allocation52_spill] sm:$0xff] %v7093_v46  ;;  %v1372_v52 = vmul.f32 %v7093_v46, %v7093_v46 }
 0x32e   :  { %8337 = vst [vmem:[#allocation50_spill] sm:$0xff] %v7081_v41  ;;  %1406 = vadd.xlane.f32.xlu0 %v1368_v22  ;;  %1408 = vadd.xlane.f32.xlu1 %v1369_v23  ;;  %v1370_v44 = vmul.f32 %v7081_v41, %v7081_v41  ;;  %v7097_v25 = vsel %vm8321_vm4, %v1309_v19, 0.0 }
 0x32f   :  { %5056 = vmatprep.mubr.bf16.mxu0 %v1774_v28  ;;  %v7085_v42 = vsel %vm8321_vm4, %v1307_v24, 0.0  ;;  %8340 = vst [vmem:[#allocation53_spill] sm:$0xff] %v7097_v25  ;;  %v1373_v54 = vmul.f32 %v7097_v25, %v7097_v25 }
 0x330   :  { %8338 = vst [vmem:[#allocation51_spill] sm:$0xff] %v7085_v42  ;;  %5057 = vmatmul.mubr.bf16.gmra.mrb[40].mxu0 %v1775_v20  ;;  %v1371_v30 = vmul.f32 %v7085_v42, %v7085_v42 }
 0x331   :  { %v4966_v47 = vpop.f32.mrb[12].mxu1 }
 0x332   :  { %v1312_v27 = vsub.f32 %v6958_v50, %v4966_v47  ;;  %1410 = vadd.xlane.f32.xlu0 %v1370_v44  ;;  %1412 = vadd.xlane.f32.xlu1 %v1371_v30  ;;  %v1218_v29 = vpop.f32.mrb[13].mxu1 }
 0x333   :  { %v1310_v38 = vsub.f32 %v6960_v51, %v1218_v29  ;;  %v4967_v43 = vpop.f32.mrb[14].mxu1 }
 0x334   :  { %v1313_v45 = vsub.f32 %v6962_v53, %v4967_v43  ;;  %v1777_v48 = vpack.c.bf16 %v4967_v43, %v4966_v47  ;;  %v1221_v49 = vpop.f32.mrb[15].mxu1  ;;  %v7121_v63 = vsel %vm8321_vm4, %v1312_v27, 0.0 }
 0x335   :  { %v1311_v56 = vsub.f32 %v6966_v55, %v1221_v49  ;;  %v1776_v57 = vpack.c.bf16 %v1221_v49, %v1218_v29  ;;  %v7109_v50 = vsel %vm8321_vm4, %v1310_v38, 0.0  ;;  %8343 = vst [vmem:[#allocation56_spill] sm:$0xff] %v7121_v63  ;;  %v1376_v20 = vmul.f32 %v7121_v63, %v7121_v63  ;;  %v7267_v63 = vld [vmem:[#allocation18] ss:$0 sm:$0xff] }
 0x336   :  { %8341 = vst [vmem:[#allocation54_spill] sm:$0xff] %v7109_v50  ;;  %1414 = vadd.xlane.f32.xlu0 %v1372_v52  ;;  %1416 = vadd.xlane.f32.xlu1 %v1373_v54  ;;  %v1374_v53 = vmul.f32 %v7109_v50, %v7109_v50  ;;  %v7125_v34 = vsel %vm8321_vm4, %v1313_v45, 0.0 }
 0x337   :  { %5060 = vmatprep.mubr.bf16.mxu0 %v1776_v57  ;;  %v7113_v51 = vsel %vm8321_vm4, %v1311_v56, 0.0  ;;  %8344 = vst [vmem:[#allocation57_spill] sm:$0xff] %v7125_v34  ;;  %v1377_v21 = vmul.f32 %v7125_v34, %v7125_v34 }
 0x338   :  { %8342 = vst [vmem:[#allocation55_spill] sm:$0xff] %v7113_v51  ;;  %5061 = vmatmul.mubr.bf16.gmra.mrb[44].mxu0 %v1777_v48  ;;  %v1375_v61 = vmul.f32 %v7113_v51, %v7113_v51 }
 0x339   :  { %v4970_v55 = vpop.f32.mrb[16].mxu1 }
 0x33a   :  { %v1316_v3 = vsub.f32 %v6970_v58, %v4970_v55  ;;  %1418 = vadd.xlane.f32.xlu0 %v1374_v53  ;;  %1420 = vadd.xlane.f32.xlu1 %v1375_v61  ;;  %v1234_v5 = vpop.f32.mrb[17].mxu1 }
 0x33b   :  { %v1314_v11 = vsub.f32 %v6972_v59, %v1234_v5  ;;  %v4971_v15 = vpop.f32.mrb[18].mxu1 }
 0x33c   :  { %v1317_v17 = vsub.f32 %v6974_v60, %v4971_v15  ;;  %v1779_v18 = vpack.c.bf16 %v4971_v15, %v4970_v55  ;;  %v1237_v19 = vpop.f32.mrb[19].mxu1  ;;  %v7149_v28 = vsel %vm8321_vm4, %v1316_v3, 0.0 }
 0x33d   :  { %v1315_v22 = vsub.f32 %v6978_v62, %v1237_v19  ;;  %v1778_v23 = vpack.c.bf16 %v1237_v19, %v1234_v5  ;;  %v7137_v58 = vsel %vm8321_vm4, %v1314_v11, 0.0  ;;  %v1380_v48 = vmul.f32 %v7149_v28, %v7149_v28 }
 0x33e   :  { %1422 = vadd.xlane.f32.xlu0 %v1376_v20  ;;  %1424 = vadd.xlane.f32.xlu1 %v1377_v21  ;;  %v1378_v60 = vmul.f32 %v7137_v58, %v7137_v58  ;;  %v7153_v44 = vsel %vm8321_vm4, %v1317_v17, 0.0 }
 0x33f   :  { %5064 = vmatprep.mubr.bf16.mxu0 %v1778_v23  ;;  %v7141_v59 = vsel %vm8321_vm4, %v1315_v22, 0.0  ;;  %v1381_v49 = vmul.f32 %v7153_v44, %v7153_v44 }
 0x340   :  { %5065 = vmatmul.mubr.bf16.gmra.mrb[48].mxu0 %v1779_v18  ;;  %v1379_v24 = vmul.f32 %v7141_v59, %v7141_v59 }
 0x341   :  { %v4974_v62 = vpop.f32.mrb[20].mxu1 }
 0x342   :  { %v1320_v30 = vsub.f32 %v6982_v0, %v4974_v62  ;;  %1426 = vadd.xlane.f32.xlu0 %v1378_v60  ;;  %1428 = vadd.xlane.f32.xlu1 %v1379_v24  ;;  %v1250_v47 = vpop.f32.mrb[21].mxu1 }
 0x343   :  { %v1318_v27 = vsub.f32 %v6984_v1, %v1250_v47  ;;  %v4975_v29 = vpop.f32.mrb[22].mxu1 }
 0x344   :  { %v1321_v38 = vsub.f32 %v6986_v2, %v4975_v29  ;;  %v1781_v43 = vpack.c.bf16 %v4975_v29, %v4974_v62  ;;  %v1253_v45 = vpop.f32.mrb[23].mxu1  ;;  %v7177_v57 = vsel %vm8321_vm4, %v1320_v30, 0.0 }
 0x345   :  { %v1319_v52 = vsub.f32 %v6990_v4, %v1253_v45  ;;  %v1780_v54 = vpack.c.bf16 %v1253_v45, %v1250_v47  ;;  %v7165_v0 = vsel %vm8321_vm4, %v1318_v27, 0.0  ;;  %v1384_v18 = vmul.f32 %v7177_v57, %v7177_v57 }
 0x346   :  { %8345 = vst [vmem:[#allocation58_spill] sm:$0xff] %v7165_v0  ;;  %1430 = vadd.xlane.f32.xlu0 %v1380_v48  ;;  %1432 = vadd.xlane.f32.xlu1 %v1381_v49  ;;  %v1382_v2 = vmul.f32 %v7165_v0, %v7165_v0  ;;  %v7181_v53 = vsel %vm8321_vm4, %v1321_v38, 0.0 }
 0x347   :  { %5068 = vmatprep.mubr.bf16.mxu0 %v1780_v54  ;;  %v7169_v1 = vsel %vm8321_vm4, %v1319_v52, 0.0  ;;  %8347 = vst [vmem:[#allocation60_spill] sm:$0xff] %v7181_v53  ;;  %v1385_v19 = vmul.f32 %v7181_v53, %v7181_v53 }
 0x348   :  { %8346 = vst [vmem:[#allocation59_spill] sm:$0xff] %v7169_v1  ;;  %5069 = vmatmul.mubr.bf16.gmra.mrb[52].mxu0 %v1781_v43  ;;  %v1383_v56 = vmul.f32 %v7169_v1, %v7169_v1 }
 0x349   :  { %v4978_v4 = vpop.f32.mrb[24].mxu1 }
 0x34a   :  { %v1324_v61 = vsub.f32 %v6994_v6, %v4978_v4  ;;  %1434 = vadd.xlane.f32.xlu0 %v1382_v2  ;;  %1436 = vadd.xlane.f32.xlu1 %v1383_v56  ;;  %v1266_v55 = vpop.f32.mrb[25].mxu1 }
 0x34b   :  { %v1322_v3 = vsub.f32 %v6996_v7, %v1266_v55  ;;  %v4979_v5 = vpop.f32.mrb[26].mxu1 }
 0x34c   :  { %v1325_v11 = vsub.f32 %v6998_v8, %v4979_v5  ;;  %v1783_v15 = vpack.c.bf16 %v4979_v5, %v4978_v4  ;;  %v1269_v17 = vpop.f32.mrb[27].mxu1  ;;  %v7205_v23 = vsel %vm8321_vm4, %v1324_v61, 0.0  ;;  %v5350_v4 = vld [vmem:[#allocation19] sm:$0xff]   ;;  %v5351_v61 = vld [vmem:[#allocation19 + $0x8] sm:$0xff]  }
 0x34d   :  { %v1323_v20 = vsub.f32 %v7002_v10, %v1269_v17  ;;  %v1782_v21 = vpack.c.bf16 %v1269_v17, %v1266_v55  ;;  %v7193_v6 = vsel %vm8321_vm4, %v1322_v3, 0.0  ;;  %8350 = vst [vmem:[#allocation63_spill] sm:$0xff] %v7205_v23  ;;  %v1388_v43 = vmul.f32 %v7205_v23, %v7205_v23  ;;  %5080 = vmatprep.subr.bf16.mxu1 %v5350_v4  ;;  %v2052_v23 = vld [vmem:[#allocation9 + $0x48] sm:$0xff] }
 0x34e   :  { %8348 = vst [vmem:[#allocation61_spill] sm:$0xff] %v7193_v6  ;;  %1438 = vadd.xlane.f32.xlu0 %v1384_v18  ;;  %1440 = vadd.xlane.f32.xlu1 %v1385_v19  ;;  %v1386_v8 = vmul.f32 %v7193_v6, %v7193_v6  ;;  %v7209_v60 = vsel %vm8321_vm4, %v1325_v11, 0.0 }
 0x34f   :  { %5072 = vmatprep.mubr.bf16.mxu0 %v1782_v21  ;;  %v7197_v7 = vsel %vm8321_vm4, %v1323_v20, 0.0  ;;  %8351 = vst [vmem:[#allocation64_spill] sm:$0xff] %v7209_v60  ;;  %v1389_v45 = vmul.f32 %v7209_v60, %v7209_v60  ;;  %5081 = vmatpush3.bf16.msra.mxu1 %v5350_v4 }
 0x350   :  { %8349 = vst [vmem:[#allocation62_spill] sm:$0xff] %v7197_v7  ;;  %5073 = vmatmul.mubr.bf16.gmra.mrb[56].mxu0 %v1783_v15  ;;  %v1387_v22 = vmul.f32 %v7197_v7, %v7197_v7  ;;  %5082 = vmatprep.subr.bf16.mxu1 %v5351_v61 }
 0x351   :  { %v4982_v10 = vpop.f32.mrb[28].mxu1 }
 0x352   :  { %v1328_v24 = vsub.f32 %v7006_v12, %v4982_v10  ;;  %1442 = vadd.xlane.f32.xlu0 %v1386_v8  ;;  %1444 = vadd.xlane.f32.xlu1 %v1387_v22  ;;  %v1282_v62 = vpop.f32.mrb[29].mxu1 }
 0x353   :  { %v1326_v30 = vsub.f32 %v7008_v13, %v1282_v62  ;;  %v4983_v47 = vpop.f32.mrb[30].mxu1  ;;  %5083 = vmatpush3.bf16.msra.mxu1 %v5351_v61 }
 0x354   :  { %v1329_v27 = vsub.f32 %v7010_v14, %v4983_v47  ;;  %v1785_v29 = vpack.c.bf16 %v4983_v47, %v4982_v10  ;;  %v1285_v38 = vpop.f32.mrb[31].mxu1 }
 0x355   :  { %v1327_v48 = vsub.f32 %v7014_v16, %v1285_v38  ;;  %v1784_v49 = vpack.c.bf16 %v1285_v38, %v1282_v62  ;;  %v7221_v12 = vsel %vm8321_vm4, %v1326_v30, 0.0  ;;  %v7233_v16 = vsel %vm8321_vm4, %v1328_v24, 0.0 }
 0x356   :  { %8352 = vst [vmem:[#allocation65_spill] sm:$0xff] %v7221_v12  ;;  %1446 = vadd.xlane.f32.xlu0 %v1388_v43  ;;  %1448 = vadd.xlane.f32.xlu1 %v1389_v45  ;;  %v1390_v14 = vmul.f32 %v7221_v12, %v7221_v12  ;;  %8354 = vst [vmem:[#allocation67_spill] sm:$0xff] %v7233_v16  ;;  %v7237_v54 = vsel %vm8321_vm4, %v1329_v27, 0.0  ;;  %v1392_v2 = vmul.f32 %v7233_v16, %v7233_v16  ;;  %v7257_v45 = vld [vmem:[#allocation13] ss:$0 sm:$0xff] }
 0x357   :  { %5076 = vmatprep.mubr.bf16.mxu0 %v1784_v49  ;;  %v7225_v13 = vsel %vm8321_vm4, %v1327_v48, 0.0  ;;  %8355 = vst [vmem:[#allocation68_spill] sm:$0xff] %v7237_v54  ;;  %v1393_v56 = vmul.f32 %v7237_v54, %v7237_v54 }
 0x358   :  { %8353 = vst [vmem:[#allocation66_spill] sm:$0xff] %v7225_v13  ;;  %5077 = vmatmul.mubr.bf16.gmra.mrb[60].mxu0 %v1785_v29  ;;  %v1391_v52 = vmul.f32 %v7225_v13, %v7225_v13 }
 0x35a   :  { %1450 = vadd.xlane.f32.xlu0 %v1390_v14  ;;  %1452 = vadd.xlane.f32.xlu1 %v1391_v52 }
 0x35e   :  { %1454 = vadd.xlane.f32.xlu0 %v1392_v2  ;;  %1456 = vadd.xlane.f32.xlu1 %v1393_v56  ;;  %v2045_v56 = vld [vmem:[#allocation9 + $0x10] sm:$0xff] }
 0x3ad   :  { %v1395_v55 = vpop.xlane.xlu1 %1394 }
 0x3ae   :  { %v1465_v14 = vmul.f32 %v7257_v45, %v1395_v55  ;;  %v2044_v55 = vld [vmem:[#allocation9 + $0x8] sm:$0xff] }
 0x3af   :  { %v1397_v3 = vpop.xlane.xlu0 %1396 }
 0x3b0   :  { %v1466_v34 = vmul.f32 %v7257_v45, %v1397_v3 }
 0x3b1   :  { %v1401_v5 = vpop.xlane.xlu1 %1400 }
 0x3b2   :  { %v1468_v4 = vmul.f32 %v7257_v45, %v1401_v5 }
 0x3b3   :  { %v1399_v11 = vpop.xlane.xlu0 %1398 }
 0x3b4   :  { %v1467_v48 = vmul.f32 %v7257_v45, %v1399_v11  ;;  %v2046_v11 = vld [vmem:[#allocation9 + $0x18] sm:$0xff] }
 0x3b7   :  { %v1405_v15 = vpop.xlane.xlu1 %1404  ;;  %v1403_v17 = vpop.xlane.xlu0 %1402 }
 0x3b8   :  { %v1470_v46 = vmul.f32 %v7257_v45, %v1405_v15  ;;  %v1469_v3 = vmul.f32 %v7257_v45, %v1403_v17  ;;  %v2049_v15 = vld [vmem:[#allocation9 + $0x30] sm:$0xff] }
 0x3bb   :  { %v1409_v18 = vpop.xlane.xlu1 %1408  ;;  %v1407_v19 = vpop.xlane.xlu0 %1406 }
 0x3bf   :  { %v1413_v20 = vpop.xlane.xlu1 %1412  ;;  %v1411_v21 = vpop.xlane.xlu0 %1410 }
 0x3c3   :  { %v1417_v8 = vpop.xlane.xlu1 %1416  ;;  %v1415_v22 = vpop.xlane.xlu0 %1414 }
 0x3c4   :  { %v1475_v17 = vmul.f32 %v7257_v45, %v1415_v22 }
 0x3c7   :  { %v1421_v10 = vpop.xlane.xlu1 %1420  ;;  %v1419_v24 = vpop.xlane.xlu0 %1418 }
 0x3cb   :  { %v7243_v62 = vpop.xlane.xlu1 %1424  ;;  %v7245_v30 = vpop.xlane.xlu0 %1422 }
 0x3cf   :  { %v7247_v47 = vpop.xlane.xlu1 %1428  ;;  %v7249_v27 = vpop.xlane.xlu0 %1426 }
 0x3d3   :  { %v7251_v29 = vpop.xlane.xlu1 %1432  ;;  %v7253_v38 = vpop.xlane.xlu0 %1430 }
 0x3d7   :  { %v7255_v43 = vpop.xlane.xlu1 %1436  ;;  %v7260_v49 = vpop.xlane.xlu0 %1434 }
 0x3db   :  { %v7263_v52 = vpop.xlane.xlu1 %1440  ;;  %v1439_v7 = vpop.xlane.xlu0 %1438 }
 0x3f3   :  { %v5050_v2 = vpop.f32.mrb[32].mxu0 }
 0x3f4   :  { %v5224_v61 = vadd.f32 %v5050_v2, %v1467_v48  ;;  %v1884_v39 = vpop.f32.mrb[33].mxu0  ;;  %v1472_v2 = vmul.f32 %v7257_v45, %v1409_v18 }
 0x3f5   :  { %v5225_v54 = vadd.f32 %v1884_v39, %v1465_v14  ;;  %v5051_v16 = vpop.f32.mrb[34].mxu0  ;;  %v1445_v39 = vpop.xlane.xlu1 %1444 }
 0x3f6   :  { %v2077_v13 = vadd.f32 %v5224_v61, %v2045_v56  ;;  %v5226_v12 = vadd.f32 %v5051_v16, %v1468_v4  ;;  %v1887_v51 = vpop.f32.mrb[35].mxu0  ;;  %v1471_v56 = vmul.f32 %v7257_v45, %v1407_v19  ;;  %v2047_v4 = vld [vmem:[#allocation9 + $0x20] sm:$0xff] }
 0x3f7   :  { %v2075_v50 = vadd.f32 %v5225_v54, %v2043_v40  ;;  %v5227_v25 = vadd.f32 %v1887_v51, %v1466_v34  ;;  %v7280_v40 = vmul.f32 %v7257_v45, %v1413_v20 }
 0x3f8   :  { %v7271_v5 = vadd.f32 %v7267_v63, %v2077_v13  ;;  %v2078_v48 = vadd.f32 %v5226_v12, %v2046_v11  ;;  %v1473_v12 = vmul.f32 %v7257_v45, %v1411_v21  ;;  %v7288_v13 = vmul.f32 %v7257_v45, %v1417_v8 }
 0x3f9   :  { %v7276_v14 = vadd.f32 %v7267_v63, %v2075_v50  ;;  %v2076_v16 = vadd.f32 %v5227_v25, %v2044_v55  ;;  %v7297_v21 = vmul.f32 %v7257_v45, %v1421_v10  ;;  %v2050_v55 = vld [vmem:[#allocation9 + $0x38] sm:$0xff]  ;;  %v1449_v10 = vpop.xlane.xlu1 %1448 }
 0x3fa   :  { %v4524_v51 = vmul.f32 -1.442695, %v7271_v5  ;;  %v7284_v34 = vadd.f32 %v7267_v63, %v2078_v48  ;;  %v7301_v48 = vmul.f32 %v7257_v45, %v1419_v24  ;;  %v7313_v24 = vmul.f32 %v7257_v45, %v7247_v47 }
 0x3fb   :  { %v4522_v54 = vmul.f32 -1.442695, %v7276_v14  ;;  %v7292_v50 = vadd.f32 %v7267_v63, %v2076_v16  ;;  %v5054_v25 = vpop.f32.mrb[36].mxu0  ;;  %v1443_v16 = vpop.xlane.xlu0 %1442  ;;  %v7335_v47 = vmul.f32 %v7257_v45, %v7255_v43 }
 0x3fc   :  { %5378 = vpow2.f32 %v4524_v51  ;;  %v4525_v18 = vmul.f32 -1.442695, %v7284_v34  ;;  %v5228_v19 = vadd.f32 %v5054_v25, %v1471_v56  ;;  %v1900_v20 = vpop.f32.mrb[37].mxu0  ;;  %v2048_v56 = vld [vmem:[#allocation9 + $0x28] sm:$0xff]  ;;  %v7305_v25 = vmul.f32 %v7257_v45, %v7243_v62 }
 0x3fd   :  { %5380 = vpow2.f32 %v4522_v54  ;;  %v4523_v8 = vmul.f32 -1.442695, %v7292_v50  ;;  %v5229_v61 = vadd.f32 %v1900_v20, %v1469_v3  ;;  %v5055_v11 = vpop.f32.mrb[38].mxu0  ;;  %v7309_v3 = vmul.f32 %v7257_v45, %v7245_v30 }
 0x3fe   :  { %5382 = vpow2.f32 %v4525_v18  ;;  %v2081_v22 = vadd.f32 %v5228_v19, %v2049_v15  ;;  %v5230_v51 = vadd.f32 %v5055_v11, %v1472_v2  ;;  %v1903_v60 = vpop.f32.mrb[39].mxu0  ;;  %v7320_v62 = vmul.f32 %v7257_v45, %v7249_v27 }
 0x3ff   :  { %5384 = vpow2.f32 %v4523_v8  ;;  %v2079_v54 = vadd.f32 %v5229_v61, %v2047_v4  ;;  %v5231_v6 = vadd.f32 %v1903_v60, %v1470_v46  ;;  %v7324_v18 = vmul.f32 %v7257_v45, %v7251_v29  ;;  %v2053_v4 = vld [vmem:[#allocation9 + $0x50] sm:$0xff]  ;;  %v1447_v61 = vpop.xlane.xlu0 %1446 }
 0x400   :  { %v7316_v2 = vadd.f32 %v7267_v63, %v2081_v22  ;;  %v2082_v15 = vadd.f32 %v5230_v51, %v2050_v55  ;;  %v7331_v30 = vmul.f32 %v7257_v45, %v7253_v38  ;;  %v7343_v29 = vmul.f32 %v7257_v45, %v7260_v49  ;;  %v2051_v22 = vld [vmem:[#allocation9 + $0x40] sm:$0xff]  ;;  %v1453_v51 = vpop.xlane.xlu1 %1452 }
 0x401   :  { %v7327_v46 = vadd.f32 %v7267_v63, %v2079_v54  ;;  %v2080_v60 = vadd.f32 %v5231_v6, %v2048_v56  ;;  %v7347_v6 = vmul.f32 %v7257_v45, %v7263_v52  ;;  %v7354_v8 = vmul.f32 %v7257_v45, %v1439_v7 }
 0x402   :  { %v4528_v19 = vmul.f32 -1.442695, %v7316_v2  ;;  %v7339_v27 = vadd.f32 %v7267_v63, %v2082_v15  ;;  %v7358_v52 = vmul.f32 %v7257_v45, %v1445_v39  ;;  %v7362_v7 = vmul.f32 %v7257_v45, %v1443_v16 }
 0x403   :  { %v4526_v38 = vmul.f32 -1.442695, %v7327_v46  ;;  %v7351_v20 = vadd.f32 %v7267_v63, %v2080_v60  ;;  %v5058_v43 = vpop.f32.mrb[40].mxu0  ;;  %v2054_v60 = vld [vmem:[#allocation9 + $0x58] sm:$0xff] }
 0x404   :  { %5386 = vpow2.f32 %v4528_v19  ;;  %v4529_v11 = vmul.f32 -1.442695, %v7339_v27  ;;  %v5232_v49 = vadd.f32 %v5058_v43, %v1475_v17  ;;  %v1916_v55 = vpop.f32.mrb[41].mxu0 }
 0x405   :  { %5388 = vpow2.f32 %v4526_v38  ;;  %v4527_v56 = vmul.f32 -1.442695, %v7351_v20  ;;  %v5233_v54 = vadd.f32 %v1916_v55, %v1473_v12  ;;  %v5059_v15 = vpop.f32.mrb[42].mxu0  ;;  %v7367_v12 = vmul.f32 %v7257_v45, %v1449_v10 }
 0x406   :  { %v5379_v42 = vpop.eup %5378  ;;  %5390 = vpow2.f32 %v4529_v11  ;;  %v2085_v19 = vadd.f32 %v5232_v49, %v2053_v4  ;;  %v5234_v17 = vadd.f32 %v5059_v15, %v7288_v13  ;;  %v1919_v43 = vpop.f32.mrb[43].mxu0 }
 0x407   :  { %v5381_v41 = vpop.eup %5380  ;;  %v2244_v39 = vadd.f32 1.0, %v5379_v42  ;;  %5392 = vpow2.f32 %v4527_v56  ;;  %v2083_v9 = vadd.f32 %v5233_v54, %v2051_v22  ;;  %v5235_v38 = vadd.f32 %v1919_v43, %v7280_v40  ;;  %v1451_v56 = vpop.xlane.xlu0 %1450 }
 0x408   :  { %v5383_v36 = vpop.eup %5382  ;;  %v2242_v55 = vadd.f32 1.0, %v5381_v41  ;;  %v7370_v16 = vadd.f32 %v7267_v63, %v2085_v19  ;;  %v2086_v11 = vadd.f32 %v5234_v17, %v2054_v60  ;;  %v7380_v41 = vmul.f32 %v7257_v45, %v1447_v61  ;;  %v1457_v54 = vpop.xlane.xlu1 %1456  ;;  %v2055_v61 = vld [vmem:[#allocation9 + $0x60] sm:$0xff] }
 0x409   :  { %v5385_v4 = vpop.eup %5384  ;;  %5394 = vrcp.f32 %v2244_v39  ;;  %v2245_v13 = vadd.f32 1.0, %v5383_v36  ;;  %v7373_v49 = vadd.f32 %v7267_v63, %v2083_v9  ;;  %v2084_v42 = vadd.f32 %v5235_v38, %v2052_v23  ;;  %v2057_v23 = vld [vmem:[#allocation9 + $0x70] sm:$0xff] }
 0x40a   :  { %5396 = vrcp.f32 %v2242_v55  ;;  %v2243_v22 = vadd.f32 1.0, %v5385_v4  ;;  %v4532_v40 = vmul.f32 -1.442695, %v7370_v16  ;;  %v7377_v10 = vadd.f32 %v7267_v63, %v2086_v11  ;;  %v2058_v4 = vld [vmem:[#allocation9 + $0x78] sm:$0xff] }
 0x40b   :  { %5398 = vrcp.f32 %v2245_v13  ;;  %v4530_v15 = vmul.f32 -1.442695, %v7373_v49  ;;  %v7384_v36 = vadd.f32 %v7267_v63, %v2084_v42  ;;  %v5062_v9 = vpop.f32.mrb[44].mxu0  ;;  %v7387_v60 = vmul.f32 %v7257_v45, %v1453_v51 }
 0x40c   :  { %5400 = vrcp.f32 %v2243_v22  ;;  %v4533_v19 = vmul.f32 -1.442695, %v7377_v10  ;;  %v5236_v17 = vadd.f32 %v5062_v9, %v7309_v3  ;;  %v1932_v43 = vpop.f32.mrb[45].mxu0  ;;  %v7392_v39 = vmul.f32 %v7257_v45, %v1451_v56  ;;  %v2056_v9 = vld [vmem:[#allocation9 + $0x68] sm:$0xff] }
 0x40d   :  { %5402 = vpow2.f32 %v4532_v40  ;;  %v4531_v38 = vmul.f32 -1.442695, %v7384_v36  ;;  %v5237_v55 = vadd.f32 %v1932_v43, %v7301_v48  ;;  %v5063_v11 = vpop.f32.mrb[46].mxu0  ;;  %v7397_v51 = vmul.f32 %v7257_v45, %v1457_v54  ;;  %v1455_v48 = vpop.xlane.xlu0 %1454 }
 0x40e   :  { %v5387_v13 = vpop.eup %5386  ;;  %5404 = vpow2.f32 %v4530_v15  ;;  %v2089_v42 = vadd.f32 %v5236_v17, %v2057_v23  ;;  %v5238_v3 = vadd.f32 %v5063_v11, %v7305_v25  ;;  %v1935_v22 = vpop.f32.mrb[47].mxu0 }
 0x40f   :  { %v5389_v1 = vpop.eup %5388  ;;  %v2248_v56 = vadd.f32 1.0, %v5387_v13  ;;  %5406 = vpow2.f32 %v4533_v19  ;;  %v2087_v40 = vadd.f32 %v5237_v55, %v2055_v61  ;;  %v5239_v53 = vadd.f32 %v1935_v22, %v7297_v21 }
 0x410   :  { %v5391_v0 = vpop.eup %5390  ;;  %v2246_v43 = vadd.f32 1.0, %v5389_v1  ;;  %5408 = vpow2.f32 %v4531_v38  ;;  %v7402_v32 = vadd.f32 %v7267_v63, %v2089_v42  ;;  %v2090_v54 = vadd.f32 %v5238_v3, %v2058_v4 }
 0x411   :  { %v5393_v15 = vpop.eup %5392  ;;  %5410 = vrcp.f32 %v2248_v56  ;;  %v2249_v23 = vadd.f32 1.0, %v5391_v0  ;;  %v7405_v25 = vadd.f32 %v7267_v63, %v2087_v40  ;;  %v2088_v17 = vadd.f32 %v5239_v53, %v2056_v9  ;;  %v2061_v53 = vld [vmem:[#allocation9 + $0x90] sm:$0xff]  ;;  %v2059_v9 = vld [vmem:[#allocation9 + $0x80] sm:$0xff] }
 0x412   :  { %5412 = vrcp.f32 %v2246_v43  ;;  %v2247_v19 = vadd.f32 1.0, %v5393_v15  ;;  %v4536_v21 = vmul.f32 -1.442695, %v7402_v32  ;;  %v7409_v61 = vadd.f32 %v7267_v63, %v2090_v54 }
 0x413   :  { %v5395_v1 = vpop.eup %5394  ;;  %v7412_v38 = vmul.f32 %v7257_v45, %v1455_v48  ;;  %5414 = vrcp.f32 %v2249_v23  ;;  %v4534_v55 = vmul.f32 -1.442695, %v7405_v25  ;;  %v7416_v0 = vadd.f32 %v7267_v63, %v2088_v17  ;;  %v5066_v11 = vpop.f32.mrb[48].mxu0  ;;  %v2062_v17 = vld [vmem:[#allocation9 + $0x98] sm:$0xff] }
 0x414   :  { %v5397_v4 = vpop.eup %5396  ;;  %v2340_v13 = vmul.f32 %v5395_v1, %v7271_v5  ;;  %5416 = vrcp.f32 %v2247_v19  ;;  %v4537_v42 = vmul.f32 -1.442695, %v7409_v61  ;;  %v5240_v3 = vadd.f32 %v5066_v11, %v7331_v30  ;;  %v1948_v22 = vpop.f32.mrb[49].mxu0  ;;  %v2060_v19 = vld [vmem:[#allocation9 + $0x88] sm:$0xff] }
 0x415   :  { %v5399_v45 = vpop.eup %5398  ;;  %v2338_v56 = vmul.f32 %v5397_v4, %v7276_v14  ;;  %5418 = vpow2.f32 %v4536_v21  ;;  %v4535_v40 = vmul.f32 -1.442695, %v7416_v0  ;;  %v5241_v48 = vadd.f32 %v1948_v22, %v7320_v62  ;;  %v5067_v43 = vpop.f32.mrb[50].mxu0 }
 0x416   :  { %v5401_v54 = vpop.eup %5400  ;;  %v2341_v15 = vmul.f32 %v5399_v45, %v7284_v34  ;;  %5420 = vpow2.f32 %v4534_v55  ;;  %v2093_v5 = vadd.f32 %v5240_v3, %v2061_v53  ;;  %v5242_v23 = vadd.f32 %v5067_v43, %v7324_v18  ;;  %v1951_v30 = vpop.f32.mrb[51].mxu0 }
 0x417   :  { %v5403_v1 = vpop.eup %5402  ;;  %v2339_v11 = vmul.f32 %v5401_v54, %v7292_v50  ;;  %5422 = vpow2.f32 %v4537_v42  ;;  %v2091_v14 = vadd.f32 %v5241_v48, %v2059_v9  ;;  %v5243_v21 = vadd.f32 %v1951_v30, %v7313_v24 }
 0x418   :  { %v5405_v4 = vpop.eup %5404  ;;  %v2371_v62 = vpack.c.bf16 %v2341_v15, %v2340_v13  ;;  %v2252_v22 = vadd.f32 1.0, %v5403_v1  ;;  %5424 = vpow2.f32 %v4535_v40  ;;  %v7429_v34 = vadd.f32 %v7267_v63, %v2093_v5  ;;  %v2065_v15 = vld [vmem:[#allocation9 + $0xb0] sm:$0xff] }
 0x419   :  { %v5407_v55 = vpop.eup %5406  ;;  %v2250_v53 = vadd.f32 1.0, %v5405_v4  ;;  %v7432_v18 = vadd.f32 %v7267_v63, %v2091_v14  ;;  %v2094_v3 = vadd.f32 %v5242_v23, %v2062_v17  ;;  %v2092_v45 = vadd.f32 %v5243_v21, %v2060_v19  ;;  %v2063_v19 = vld [vmem:[#allocation9 + $0xa0] sm:$0xff] }
 0x41a   :  { %v5409_v43 = vpop.eup %5408  ;;  %5426 = vrcp.f32 %v2252_v22  ;;  %v2253_v50 = vadd.f32 1.0, %v5407_v55  ;;  %v4540_v42 = vmul.f32 -1.442695, %v7429_v34  ;;  %v2370_v24 = vpack.c.bf16 %v2339_v11, %v2338_v56 }
 0x41b   :  { %v5411_v9 = vpop.eup %5410  ;;  %5428 = vrcp.f32 %v2250_v53  ;;  %v2251_v13 = vadd.f32 1.0, %v5409_v43  ;;  %v4538_v40 = vmul.f32 -1.442695, %v7432_v18  ;;  %v7437_v48 = vadd.f32 %v7267_v63, %v2094_v3  ;;  %v5070_v54 = vpop.f32.mrb[52].mxu0  ;;  %v2066_v53 = vld [vmem:[#allocation9 + $0xb8] sm:$0xff] }
 0x41c   :  { %v5413_v5 = vpop.eup %5412  ;;  %v7440_v23 = vmul.f32 %v5411_v9, %v7316_v2  ;;  %5430 = vrcp.f32 %v2253_v50  ;;  %v7443_v17 = vadd.f32 %v7267_v63, %v2092_v45  ;;  %v5244_v56 = vadd.f32 %v5070_v54, %v7354_v8  ;;  %5084 = vmatprep.mubr.msk.bf16.mxu1 %vm2409_vm5, %v2370_v24  ;;  %v1964_v30 = vpop.f32.mrb[53].mxu0  ;;  %v2064_v50 = vld [vmem:[#allocation9 + $0xa8] sm:$0xff] }
 0x41d   :  { %v5415_v1 = vpop.eup %5414  ;;  %v2342_v11 = vmul.f32 %v5413_v5, %v7327_v46  ;;  %5432 = vrcp.f32 %v2251_v13  ;;  %v4541_v14 = vmul.f32 -1.442695, %v7437_v48  ;;  %v5245_v21 = vadd.f32 %v1964_v30, %v7343_v29  ;;  %5085 = vmatmul.mubr.msk.bf16.vlgmr.msra.gmra.mrb[32].mxu1 %vm2409_vm5, %v2371_v62  ;;  %v5071_v2 = vpop.f32.mrb[54].mxu0 }
 0x41e   :  { %v5417_v4 = vpop.eup %5416  ;;  %v7452_v22 = vmul.f32 %v5415_v1, %v7339_v27  ;;  %5434 = vpow2.f32 %v4540_v42  ;;  %v4539_v8 = vmul.f32 -1.442695, %v7443_v17  ;;  %v2097_v55 = vadd.f32 %v5244_v56, %v2065_v15  ;;  %v1967_v3 = vpop.f32.mrb[55].mxu0  ;;  %v2069_v1 = vld [vmem:[#allocation9 + $0xd0] sm:$0xff] }
 0x41f   :  { %v5419_v45 = vpop.eup %5418  ;;  %v2343_v46 = vmul.f32 %v5417_v4, %v7351_v20  ;;  %5436 = vpow2.f32 %v4538_v40  ;;  %v2095_v43 = vadd.f32 %v5245_v21, %v2063_v19  ;;  %v5246_v29 = vadd.f32 %v5071_v2, %v7347_v6 }
 0x420   :  { %v5421_v62 = vpop.eup %5420  ;;  %v2256_v24 = vadd.f32 1.0, %v5419_v45  ;;  %5438 = vpow2.f32 %v4541_v14  ;;  %v7458_v27 = vadd.f32 %v7267_v63, %v2097_v55  ;;  %v5247_v42 = vadd.f32 %v1967_v3, %v7335_v47  ;;  %v2067_v55 = vld [vmem:[#allocation9 + $0xc0] sm:$0xff] }
 0x421   :  { %v5423_v9 = vpop.eup %5422  ;;  %v2254_v13 = vadd.f32 1.0, %v5421_v62  ;;  %5440 = vpow2.f32 %v4539_v8  ;;  %v7462_v54 = vadd.f32 %v7267_v63, %v2095_v43  ;;  %v2098_v20 = vadd.f32 %v5246_v29, %v2066_v53 }
 0x422   :  { %v5425_v40 = vpop.eup %5424  ;;  %5442 = vrcp.f32 %v2256_v24  ;;  %v2257_v15 = vadd.f32 1.0, %v5423_v9  ;;  %v4544_v6 = vmul.f32 -1.442695, %v7458_v27  ;;  %v2096_v5 = vadd.f32 %v5247_v42, %v2064_v50  ;;  %v2070_v9 = vld [vmem:[#allocation9 + $0xd8] sm:$0xff] }
 0x423   :  { %5444 = vrcp.f32 %v2254_v13  ;;  %v2255_v56 = vadd.f32 1.0, %v5425_v40  ;;  %v4542_v30 = vmul.f32 -1.442695, %v7462_v54  ;;  %v7467_v19 = vadd.f32 %v7267_v63, %v2098_v20  ;;  %v5074_v47 = vpop.f32.mrb[56].mxu0 }
 0x424   :  { %v5427_v14 = vpop.eup %5426  ;;  %5446 = vrcp.f32 %v2257_v15  ;;  %v7470_v21 = vadd.f32 %v7267_v63, %v2096_v5  ;;  %v5248_v2 = vadd.f32 %v5074_v47, %v7380_v41  ;;  %v2372_v4 = vpack.c.bf16 %v2343_v46, %v2342_v11  ;;  %v1980_v8 = vpop.f32.mrb[57].mxu0  ;;  %v2068_v15 = vld [vmem:[#allocation9 + $0xc8] sm:$0xff] }
 0x425   :  { %v5429_v53 = vpop.eup %5428  ;;  %v7474_v3 = vmul.f32 %v5427_v14, %v7370_v16  ;;  %5448 = vrcp.f32 %v2255_v56  ;;  %v4545_v45 = vmul.f32 -1.442695, %v7467_v19  ;;  %v5249_v43 = vadd.f32 %v1980_v8, %v7362_v7  ;;  %v5075_v29 = vpop.f32.mrb[58].mxu0  ;;  %v2073_v8 = vld [vmem:[#allocation9 + $0xf0] sm:$0xff] }
 0x426   :  { %v5431_v50 = vpop.eup %5430  ;;  %v2346_v62 = vmul.f32 %v5429_v53, %v7373_v49  ;;  %5450 = vpow2.f32 %v4544_v6  ;;  %v4543_v24 = vmul.f32 -1.442695, %v7470_v21  ;;  %v2101_v41 = vadd.f32 %v5248_v2, %v2069_v1  ;;  %5088 = vmatprep.mubr.msk.bf16.mxu1 %vm2409_vm5, %v2372_v4  ;;  %v1983_v11 = vpop.f32.mrb[59].mxu0 }
 0x427   :  { %v5433_v46 = vpop.eup %5432  ;;  %v7482_v16 = vmul.f32 %v5431_v50, %v7377_v10  ;;  %5452 = vpow2.f32 %v4542_v30  ;;  %v2099_v42 = vadd.f32 %v5249_v43, %v2067_v55  ;;  %v2373_v7 = vpack.c.bf16 %v7452_v22, %v7440_v23 }
 0x428   :  { %v5435_v13 = vpop.eup %5434  ;;  %v2347_v49 = vmul.f32 %v5433_v46, %v7384_v36  ;;  %5454 = vpow2.f32 %v4545_v45  ;;  %v7488_v20 = vadd.f32 %v7267_v63, %v2101_v41  ;;  %v5250_v40 = vadd.f32 %v5075_v29, %v7367_v12  ;;  %v2071_v29 = vld [vmem:[#allocation9 + $0xe0] sm:$0xff] }
 0x429   :  { %v5437_v6 = vpop.eup %5436  ;;  %v2260_v5 = vadd.f32 1.0, %v5435_v13  ;;  %5456 = vpow2.f32 %v4543_v24  ;;  %v7492_v10 = vadd.f32 %v7267_v63, %v2099_v42  ;;  %5089 = vmatmul.mubr.msk.bf16.gmra.mrb[36].mxu1 %vm2409_vm5, %v2373_v7  ;;  %v5251_v23 = vadd.f32 %v1983_v11, %v7358_v52 }
 0x42a   :  { %v5439_v22 = vpop.eup %5438  ;;  %v2258_v56 = vadd.f32 1.0, %v5437_v6  ;;  %v4548_v36 = vmul.f32 -1.442695, %v7488_v20  ;;  %v2102_v30 = vadd.f32 %v5250_v40, %v2070_v9  ;;  %v2374_v47 = vpack.c.bf16 %v2347_v49, %v2346_v62 }
 0x42b   :  { %v5441_v1 = vpop.eup %5440  ;;  %5458 = vrcp.f32 %v2260_v5  ;;  %v2261_v12 = vadd.f32 1.0, %v5439_v22  ;;  %v4546_v14 = vmul.f32 -1.442695, %v7492_v10  ;;  %v2100_v2 = vadd.f32 %v5251_v23, %v2068_v15  ;;  %v5078_v4 = vpop.f32.mrb[60].mxu0  ;;  %v2074_v5 = vld [vmem:[#allocation9 + $0xf8] sm:$0xff] }
 0x42c   :  { %v5443_v55 = vpop.eup %5442  ;;  %5460 = vrcp.f32 %v2258_v56  ;;  %v2259_v53 = vadd.f32 1.0, %v5441_v1  ;;  %v7499_v45 = vadd.f32 %v7267_v63, %v2102_v30  ;;  %v5252_v52 = vadd.f32 %v5078_v4, %v7412_v38  ;;  %5092 = vmatprep.mubr.msk.bf16.mxu1 %vm2409_vm5, %v2374_v47  ;;  %v1996_v43 = vpop.f32.mrb[61].mxu0 }
 0x42d   :  { %v5445_v50 = vpop.eup %5444  ;;  %v7504_v62 = vmul.f32 %v5443_v55, %v7402_v32  ;;  %5462 = vrcp.f32 %v2261_v12  ;;  %v7507_v24 = vadd.f32 %v7267_v63, %v2100_v2  ;;  %v5253_v41 = vadd.f32 %v1996_v43, %v7392_v39  ;;  %v5079_v11 = vpop.f32.mrb[62].mxu0 }
 0x42e   :  { %v5447_v46 = vpop.eup %5446  ;;  %v2350_v42 = vmul.f32 %v5445_v50, %v7405_v25  ;;  %5464 = vrcp.f32 %v2259_v53  ;;  %v4549_v38 = vmul.f32 -1.442695, %v7499_v45  ;;  %v2105_v7 = vadd.f32 %v5252_v52, %v2073_v8  ;;  %v1999_v9 = vpop.f32.mrb[63].mxu0 }
 0x42f   :  { %v5449_v13 = vpop.eup %5448  ;;  %v2353_v49 = vmul.f32 %v5447_v46, %v7409_v61  ;;  %5466 = vpow2.f32 %v4548_v36  ;;  %v4547_v32 = vmul.f32 -1.442695, %v7507_v24  ;;  %v2103_v40 = vadd.f32 %v5253_v41, %v2071_v29  ;;  %v2072_v36 = vld [vmem:[#allocation9 + $0xe8] sm:$0xff] }
 0x430   :  { %v5451_v15 = vpop.eup %5450  ;;  %v2351_v6 = vmul.f32 %v5449_v13, %v7416_v0  ;;  %5468 = vpow2.f32 %v4546_v14  ;;  %v7516_v39 = vadd.f32 %v7267_v63, %v2105_v7  ;;  %v2375_v25 = vpack.c.bf16 %v7482_v16, %v7474_v3 }
 0x431   :  { %v5453_v23 = vpop.eup %5452  ;;  %v2264_v22 = vadd.f32 1.0, %v5451_v15  ;;  %5470 = vpow2.f32 %v4549_v38  ;;  %v7521_v61 = vadd.f32 %v7267_v63, %v2103_v40  ;;  %v5254_v56 = vadd.f32 %v5079_v11, %v7397_v51 }
 0x432   :  { %v5455_v30 = vpop.eup %5454  ;;  %v2262_v47 = vadd.f32 1.0, %v5453_v23  ;;  %5472 = vpow2.f32 %v4547_v32  ;;  %v4552_v0 = vmul.f32 -1.442695, %v7516_v39  ;;  %5093 = vmatmul.mubr.msk.bf16.gmra.mrb[40].mxu1 %vm2409_vm5, %v2375_v25  ;;  %v5255_v1 = vadd.f32 %v1999_v9, %v7387_v60 }
 0x433   :  { %v5457_v3 = vpop.eup %5456  ;;  %5474 = vrcp.f32 %v2264_v22  ;;  %v2265_v16 = vadd.f32 1.0, %v5455_v30  ;;  %v4550_v12 = vmul.f32 -1.442695, %v7521_v61  ;;  %v2106_v14 = vadd.f32 %v5254_v56, %v2074_v5 }
 0x434   :  { %5476 = vrcp.f32 %v2262_v47  ;;  %v2263_v2 = vadd.f32 1.0, %v5457_v3  ;;  %v2104_v4 = vadd.f32 %v5255_v1, %v2072_v36  ;;  %v2376_v51 = vpack.c.bf16 %v2351_v6, %v2350_v42 }
 0x435   :  { %v5459_v8 = vpop.eup %5458  ;;  %5478 = vrcp.f32 %v2265_v16  ;;  %v7529_v55 = vadd.f32 %v7267_v63, %v2106_v14  ;;  %v2377_v53 = vpack.c.bf16 %v2353_v49, %v7504_v62 }
 0x436   :  { %v5461_v52 = vpop.eup %5460  ;;  %5480 = vrcp.f32 %v2263_v2  ;;  %v7533_v60 = vadd.f32 %v7267_v63, %v2104_v4  ;;  %5096 = vmatprep.mubr.msk.bf16.mxu1 %vm2409_vm5, %v2376_v51  ;;  %v2356_v41 = vmul.f32 %v5459_v8, %v7429_v34 }
 0x437   :  { %v5463_v43 = vpop.eup %5462  ;;  %5482 = vpow2.f32 %v4552_v0  ;;  %v4553_v29 = vmul.f32 -1.442695, %v7529_v55  ;;  %v2354_v42 = vmul.f32 %v5461_v52, %v7432_v18 }
 0x438   :  { %v5465_v50 = vpop.eup %5464  ;;  %v2357_v11 = vmul.f32 %v5463_v43, %v7437_v48  ;;  %5484 = vpow2.f32 %v4550_v12  ;;  %v4551_v46 = vmul.f32 -1.442695, %v7533_v60 }
 0x439   :  { %v5467_v62 = vpop.eup %5466  ;;  %v2355_v63 = vmul.f32 %v5465_v50, %v7443_v17  ;;  %5486 = vpow2.f32 %v4553_v29 }
 0x43a   :  { %v5469_v38 = vpop.eup %5468  ;;  %v2268_v7 = vadd.f32 1.0, %v5467_v62  ;;  %5488 = vpow2.f32 %v4551_v46  ;;  %5097 = vmatmul.mubr.msk.bf16.gmra.mrb[44].mxu1 %vm2409_vm5, %v2377_v53  ;;  %v2379_v9 = vpack.c.bf16 %v2357_v11, %v2356_v41  ;;  %v5352_v62 = vld [vmem:[#allocation22] sm:$0xff]  }
 0x43b   :  { %v5471_v13 = vpop.eup %5470  ;;  %v2266_v49 = vadd.f32 1.0, %v5469_v38  ;;  %v2378_v34 = vpack.c.bf16 %v2355_v63, %v2354_v42  ;;  %5116 = vmatprep.subr.bf16.mxu1 %v5352_v62  ;;  %v5353_v42 = vld [vmem:[#allocation22 + $0x8] sm:$0xff]   ;;  %v5358_v63 = vld [vmem:[#allocation22 + $0x30] sm:$0xff]   ;;  %v5359_v38 = vld [vmem:[#allocation22 + $0x38] sm:$0xff]  }
 0x43c   :  { %v5473_v32 = vpop.eup %5472  ;;  %5490 = vrcp.f32 %v2268_v7  ;;  %v2269_v48 = vadd.f32 1.0, %v5471_v13  ;;  %5117 = vmatpush3.bf16.msra.mxu1 %v5352_v62  ;;  %v7563_v7 = vld [vmem:[#allocation21] ss:$0 sm:$0xff] }
 0x43d   :  { %v5475_v40 = vpop.eup %5474  ;;  %5492 = vrcp.f32 %v2266_v49  ;;  %v2267_v15 = vadd.f32 1.0, %v5473_v32  ;;  %5100 = vmatprep.mubr.msk.bf16.mxu1 %vm2409_vm5, %v2378_v34  ;;  %5118 = vmatprep.subr.bf16.mxu1 %v5353_v42 }
 0x43e   :  { %v5477_v18 = vpop.eup %5476  ;;  %5494 = vrcp.f32 %v2269_v48  ;;  %v2360_v25 = vmul.f32 %v5475_v40, %v7458_v27 }
 0x43f   :  { %v5479_v17 = vpop.eup %5478  ;;  %5496 = vrcp.f32 %v2267_v15  ;;  %v2358_v22 = vmul.f32 %v5477_v18, %v7462_v54 }
 0x440   :  { %v5481_v6 = vpop.eup %5480  ;;  %v2361_v5 = vmul.f32 %v5479_v17, %v7467_v19  ;;  %5119 = vmatpush3.bf16.msra.mxu1 %v5353_v42 }
 0x441   :  { %v5483_v23 = vpop.eup %5482  ;;  %v2359_v56 = vmul.f32 %v5481_v6, %v7470_v21 }
 0x442   :  { %v5485_v36 = vpop.eup %5484  ;;  %v2272_v30 = vadd.f32 1.0, %v5483_v23  ;;  %5101 = vmatmul.mubr.msk.bf16.gmra.mrb[48].mxu1 %vm2409_vm5, %v2379_v9  ;;  %v2381_v47 = vpack.c.bf16 %v2361_v5, %v2360_v25 }
 0x443   :  { %v5487_v0 = vpop.eup %5486  ;;  %v2270_v1 = vadd.f32 1.0, %v5485_v36  ;;  %v2380_v3 = vpack.c.bf16 %v2359_v56, %v2358_v22 }
 0x444   :  { %v5489_v16 = vpop.eup %5488  ;;  %5498 = vrcp.f32 %v2272_v30  ;;  %v2273_v12 = vadd.f32 1.0, %v5487_v0 }
 0x445   :  { %5500 = vrcp.f32 %v2270_v1  ;;  %v2271_v27 = vadd.f32 1.0, %v5489_v16  ;;  %5104 = vmatprep.mubr.msk.bf16.mxu1 %vm2409_vm5, %v2380_v3 }
 0x446   :  { %v5491_v19 = vpop.eup %5490  ;;  %5502 = vrcp.f32 %v2273_v12 }
 0x447   :  { %v5493_v54 = vpop.eup %5492  ;;  %5504 = vrcp.f32 %v2271_v27  ;;  %v2364_v2 = vmul.f32 %v5491_v19, %v7488_v20 }
 0x448   :  { %v5495_v21 = vpop.eup %5494  ;;  %v2362_v51 = vmul.f32 %v5493_v54, %v7492_v10 }
 0x449   :  { %v5497_v14 = vpop.eup %5496  ;;  %v2365_v4 = vmul.f32 %v5495_v21, %v7499_v45 }
 0x44a   :  { %v2363_v8 = vmul.f32 %v5497_v14, %v7507_v24  ;;  %5105 = vmatmul.mubr.msk.bf16.gmra.mrb[52].mxu1 %vm2409_vm5, %v2381_v47 }
 0x44b   :  { %v2383_v53 = vpack.c.bf16 %v2365_v4, %v2364_v2 }
 0x44c   :  { %v2382_v52 = vpack.c.bf16 %v2363_v8, %v2362_v51 }
 0x44e   :  { %v5499_v43 = vpop.eup %5498  ;;  %5108 = vmatprep.mubr.msk.bf16.mxu1 %vm2409_vm5, %v2382_v52 }
 0x44f   :  { %v5501_v29 = vpop.eup %5500  ;;  %v2368_v11 = vmul.f32 %v5499_v43, %v7516_v39  ;;  %v5354_v39 = vld [vmem:[#allocation22 + $0x10] sm:$0xff]  }
 0x450   :  { %v5503_v50 = vpop.eup %5502  ;;  %v2366_v45 = vmul.f32 %v5501_v29, %v7521_v61  ;;  %5120 = vmatprep.subr.bf16.mxu1 %v5354_v39  ;;  %v5355_v61 = vld [vmem:[#allocation22 + $0x18] sm:$0xff]  }
 0x451   :  { %v5505_v41 = vpop.eup %5504  ;;  %v2369_v20 = vmul.f32 %v5503_v50, %v7529_v55  ;;  %5121 = vmatpush3.bf16.msra.mxu1 %v5354_v39  ;;  %v5356_v55 = vld [vmem:[#allocation22 + $0x20] sm:$0xff]  }
 0x452   :  { %v2367_v10 = vmul.f32 %v5505_v41, %v7533_v60  ;;  %5109 = vmatmul.mubr.msk.bf16.gmra.mrb[56].mxu1 %vm2409_vm5, %v2383_v53  ;;  %5122 = vmatprep.subr.bf16.mxu1 %v5355_v61  ;;  %v5357_v60 = vld [vmem:[#allocation22 + $0x28] sm:$0xff]  }
 0x453   :  { %v2385_v24 = vpack.c.bf16 %v2369_v20, %v2368_v11 }
 0x454   :  { %v2384_v46 = vpack.c.bf16 %v2367_v10, %v2366_v45 }
 0x455   :  { %5123 = vmatpush3.bf16.msra.mxu1 %v5355_v61 }
 0x456   :  { %5112 = vmatprep.mubr.msk.bf16.mxu1 %vm2409_vm5, %v2384_v46  ;;  %5124 = vmatprep.subr.bf16.mxu1 %v5356_v55 }
 0x459   :  { %5125 = vmatpush3.bf16.msra.mxu1 %v5356_v55 }
 0x45a   :  { %5113 = vmatmul.mubr.msk.bf16.gmra.mrb[60].mxu1 %vm2409_vm5, %v2385_v24  ;;  %5126 = vmatprep.subr.bf16.mxu1 %v5357_v60 }
 0x45d   :  { %5127 = vmatpush3.bf16.msra.mxu1 %v5357_v60 }
 0x45e   :  { %5128 = vmatprep.subr.bf16.mxu1 %v5358_v63 }
 0x461   :  { %5129 = vmatpush3.bf16.msra.mxu1 %v5358_v63 }
 0x462   :  { %5130 = vmatprep.subr.bf16.mxu1 %v5359_v38 }
 0x465   :  { %5131 = vmatpush3.bf16.msra.mxu1 %v5359_v38 }
 0x4f0   :  { %v5086_v9 = vpop.f32.mrb[32].mxu1 }
 0x4f1   :  { %v7566_v13 = vadd.f32 %v5086_v9, %v7563_v7  ;;  %v2492_v49 = vpop.f32.mrb[33].mxu1 }
 0x4f2   :  { %v7569_v34 = vadd.f32 %v7563_v7, %v2492_v49  ;;  %v5087_v32 = vpop.f32.mrb[34].mxu1 }
 0x4f3   :  { %v4575_v48 = vmul.f32 -1.442695, %v7566_v13  ;;  %v7573_v40 = vadd.f32 %v5087_v32, %v7563_v7  ;;  %v2495_v15 = vpop.f32.mrb[35].mxu1 }
 0x4f4   :  { %v4573_v18 = vmul.f32 -1.442695, %v7569_v34  ;;  %v7577_v17 = vadd.f32 %v7563_v7, %v2495_v15 }
 0x4f5   :  { %5506 = vpow2.f32 %v4575_v48  ;;  %v4576_v6 = vmul.f32 -1.442695, %v7573_v40 }
 0x4f6   :  { %5508 = vpow2.f32 %v4573_v18  ;;  %v4574_v25 = vmul.f32 -1.442695, %v7577_v17 }
 0x4f7   :  { %5510 = vpow2.f32 %v4576_v6 }
 0x4f8   :  { %5512 = vpow2.f32 %v4574_v25 }
 0x4fc   :  { %v5090_v5 = vpop.f32.mrb[36].mxu1 }
 0x4fd   :  { %v7582_v23 = vadd.f32 %v5090_v5, %v7563_v7  ;;  %v2508_v22 = vpop.f32.mrb[37].mxu1 }
 0x4fe   :  { %v7585_v56 = vadd.f32 %v7563_v7, %v2508_v22  ;;  %v5091_v36 = vpop.f32.mrb[38].mxu1 }
 0x4ff   :  { %v5507_v30 = vpop.eup %5506  ;;  %v4579_v47 = vmul.f32 -1.442695, %v7582_v23  ;;  %v7589_v0 = vadd.f32 %v5091_v36, %v7563_v7  ;;  %v2511_v1 = vpop.f32.mrb[39].mxu1 }
 0x500   :  { %v5509_v3 = vpop.eup %5508  ;;  %v2717_v16 = vadd.f32 1.0, %v5507_v30  ;;  %v7592_v12 = vadd.f32 %v7563_v7, %v2511_v1  ;;  %v4577_v14 = vmul.f32 -1.442695, %v7585_v56 }
 0x501   :  { %v5511_v27 = vpop.eup %5510  ;;  %v2715_v19 = vadd.f32 1.0, %v5509_v3  ;;  %5514 = vpow2.f32 %v4579_v47  ;;  %v4580_v4 = vmul.f32 -1.442695, %v7589_v0 }
 0x502   :  { %v5513_v54 = vpop.eup %5512  ;;  %5516 = vrcp.f32 %v2717_v16  ;;  %v2718_v21 = vadd.f32 1.0, %v5511_v27  ;;  %v4578_v51 = vmul.f32 -1.442695, %v7592_v12 }
 0x503   :  { %5518 = vrcp.f32 %v2715_v19  ;;  %v2716_v2 = vadd.f32 1.0, %v5513_v54 }
 0x504   :  { %5520 = vrcp.f32 %v2718_v21 }
 0x505   :  { %5522 = vrcp.f32 %v2716_v2  ;;  %v5094_v8 = vpop.f32.mrb[40].mxu1 }
 0x506   :  { %5524 = vpow2.f32 %v4577_v14  ;;  %v7598_v53 = vadd.f32 %v5094_v8, %v7563_v7  ;;  %v2524_v52 = vpop.f32.mrb[41].mxu1 }
 0x507   :  { %5526 = vpow2.f32 %v4580_v4  ;;  %v7601_v43 = vadd.f32 %v7563_v7, %v2524_v52  ;;  %v5095_v29 = vpop.f32.mrb[42].mxu1 }
 0x508   :  { %5528 = vpow2.f32 %v4578_v51  ;;  %v4583_v50 = vmul.f32 -1.442695, %v7598_v53  ;;  %v7605_v41 = vadd.f32 %v5095_v29, %v7563_v7  ;;  %v2527_v11 = vpop.f32.mrb[43].mxu1 }
 0x509   :  { %v4581_v20 = vmul.f32 -1.442695, %v7601_v43  ;;  %v7609_v45 = vadd.f32 %v7563_v7, %v2527_v11 }
 0x50a   :  { %5530 = vpow2.f32 %v4583_v50  ;;  %v4584_v10 = vmul.f32 -1.442695, %v7605_v41 }
 0x50b   :  { %v5515_v24 = vpop.eup %5514  ;;  %5532 = vpow2.f32 %v4581_v20  ;;  %v4582_v46 = vmul.f32 -1.442695, %v7609_v45 }
 0x50c   :  { %v5517_v62 = vpop.eup %5516  ;;  %5534 = vpow2.f32 %v4584_v10  ;;  %v2721_v39 = vadd.f32 1.0, %v5515_v24 }
 0x50d   :  { %v5519_v42 = vpop.eup %5518  ;;  %5536 = vpow2.f32 %v4582_v46  ;;  %v5098_v61 = vpop.f32.mrb[44].mxu1  ;;  %v7630_v22 = vmul.f32 %v5517_v62, %v7566_v13 }
 0x50e   :  { %v5521_v55 = vpop.eup %5520  ;;  %v7614_v60 = vadd.f32 %v5098_v61, %v7563_v7  ;;  %v2540_v63 = vpop.f32.mrb[45].mxu1  ;;  %v7623_v15 = vmul.f32 %v5519_v42, %v7569_v34  ;;  %5538 = vrcp.f32 %v2721_v39 }
 0x50f   :  { %v5523_v38 = vpop.eup %5522  ;;  %v7617_v9 = vmul.f32 %v5521_v55, %v7573_v40  ;;  %v7620_v49 = vadd.f32 %v7563_v7, %v2540_v63  ;;  %v5099_v32 = vpop.f32.mrb[46].mxu1 }
 0x510   :  { %v5525_v48 = vpop.eup %5524  ;;  %v7626_v18 = vmul.f32 %v5523_v38, %v7577_v17  ;;  %v4587_v6 = vmul.f32 -1.442695, %v7614_v60  ;;  %v2543_v25 = vpop.f32.mrb[47].mxu1  ;;  %v7638_v3 = vadd.f32 %v5099_v32, %v7563_v7 }
 0x511   :  { %v5527_v5 = vpop.eup %5526  ;;  %v2719_v40 = vadd.f32 1.0, %v5525_v48  ;;  %v4585_v47 = vmul.f32 -1.442695, %v7620_v49  ;;  %v2844_v17 = vpack.c.bf16 %v7617_v9, %v7630_v22  ;;  %v7641_v16 = vadd.f32 %v7563_v7, %v2543_v25 }
 0x512   :  { %v5529_v36 = vpop.eup %5528  ;;  %v2722_v30 = vadd.f32 1.0, %v5527_v5  ;;  %5540 = vpow2.f32 %v4587_v6  ;;  %v2843_v34 = vpack.c.bf16 %v7626_v18, %v7623_v15  ;;  %v4588_v52 = vmul.f32 -1.442695, %v7638_v3 }
 0x513   :  { %5542 = vrcp.f32 %v2719_v40  ;;  %v2720_v1 = vadd.f32 1.0, %v5529_v36  ;;  %v4586_v20 = vmul.f32 -1.442695, %v7641_v16 }
 0x514   :  { %v5531_v13 = vpop.eup %5530  ;;  %5544 = vrcp.f32 %v2722_v30  ;;  %5132 = vmatprep.mubr.bf16.mxu1 %v2843_v34 }
 0x515   :  { %v5533_v27 = vpop.eup %5532  ;;  %5546 = vrcp.f32 %v2720_v1  ;;  %v2725_v19 = vadd.f32 1.0, %v5531_v13  ;;  %v5102_v54 = vpop.f32.mrb[48].mxu1  ;;  %5133 = vmatmul.mubr.bf16.vlgmr.msra.gmra.mrb[64].mxu1 %v2844_v17 }
 0x516   :  { %v5535_v21 = vpop.eup %5534  ;;  %v2723_v14 = vadd.f32 1.0, %v5533_v27  ;;  %5548 = vpow2.f32 %v4585_v47  ;;  %v7644_v2 = vadd.f32 %v5102_v54, %v7563_v7  ;;  %v2556_v4 = vpop.f32.mrb[49].mxu1 }
 0x517   :  { %v5537_v51 = vpop.eup %5536  ;;  %5550 = vrcp.f32 %v2725_v19  ;;  %v2726_v8 = vadd.f32 1.0, %v5535_v21  ;;  %v7648_v29 = vadd.f32 %v7563_v7, %v2556_v4  ;;  %v5103_v50 = vpop.f32.mrb[50].mxu1 }
 0x518   :  { %5552 = vrcp.f32 %v2723_v14  ;;  %v2724_v11 = vadd.f32 1.0, %v5537_v51  ;;  %v7652_v10 = vadd.f32 %v5103_v50, %v7563_v7  ;;  %v2559_v24 = vpop.f32.mrb[51].mxu1  ;;  %v4591_v46 = vmul.f32 -1.442695, %v7644_v2  ;;  %v5539_v39 = vpop.eup %5538 }
 0x519   :  { %5554 = vrcp.f32 %v2726_v8  ;;  %v7656_v62 = vadd.f32 %v7563_v7, %v2559_v24  ;;  %v4589_v42 = vmul.f32 -1.442695, %v7648_v29 }
 0x51a   :  { %5556 = vrcp.f32 %v2724_v11  ;;  %v4592_v55 = vmul.f32 -1.442695, %v7652_v10 }
 0x51b   :  { %5558 = vpow2.f32 %v4588_v52  ;;  %v4590_v38 = vmul.f32 -1.442695, %v7656_v62 }
 0x51c   :  { %v5541_v61 = vpop.eup %5540  ;;  %5560 = vpow2.f32 %v4586_v20 }
 0x51d   :  { %v5543_v63 = vpop.eup %5542  ;;  %5562 = vpow2.f32 %v4591_v46  ;;  %v5106_v32 = vpop.f32.mrb[52].mxu1  ;;  %v2729_v30 = vadd.f32 1.0, %v5541_v61 }
 0x51e   :  { %v5545_v48 = vpop.eup %5544  ;;  %5564 = vpow2.f32 %v4589_v42  ;;  %v7662_v6 = vadd.f32 %v5106_v32, %v7563_v7  ;;  %v2572_v25 = vpop.f32.mrb[53].mxu1  ;;  %v7665_v40 = vmul.f32 %v5543_v63, %v7585_v56 }
 0x51f   :  { %v5547_v5 = vpop.eup %5546  ;;  %v7668_v36 = vmul.f32 %v5545_v48, %v7589_v0  ;;  %v7671_v47 = vadd.f32 %v7563_v7, %v2572_v25  ;;  %v5107_v34 = vpop.f32.mrb[54].mxu1  ;;  %5566 = vpow2.f32 %v4592_v55  ;;  %v7681_v0 = vmul.f32 %v5539_v39, %v7582_v23 }
 0x520   :  { %v5549_v17 = vpop.eup %5548  ;;  %v7674_v1 = vmul.f32 %v5547_v5, %v7592_v12  ;;  %v4595_v13 = vmul.f32 -1.442695, %v7662_v6  ;;  %v7678_v27 = vadd.f32 %v5107_v34, %v7563_v7  ;;  %v2575_v56 = vpop.f32.mrb[55].mxu1  ;;  %5568 = vpow2.f32 %v4590_v38 }
 0x521   :  { %v5551_v19 = vpop.eup %5550  ;;  %v4593_v54 = vmul.f32 -1.442695, %v7671_v47  ;;  %v7685_v21 = vadd.f32 %v7563_v7, %v2575_v56  ;;  %v2727_v8 = vadd.f32 1.0, %v5549_v17  ;;  %v2846_v23 = vpack.c.bf16 %v7668_v36, %v7681_v0 }
 0x522   :  { %v5553_v14 = vpop.eup %5552  ;;  %5570 = vpow2.f32 %v4595_v13  ;;  %v4596_v12 = vmul.f32 -1.442695, %v7678_v27  ;;  %v2845_v4 = vpack.c.bf16 %v7674_v1, %v7665_v40  ;;  %v7712_v17 = vmul.f32 %v5551_v19, %v7598_v53 }
 0x523   :  { %v5555_v51 = vpop.eup %5554  ;;  %5572 = vrcp.f32 %v2729_v30  ;;  %v4594_v52 = vmul.f32 -1.442695, %v7685_v21  ;;  %v7694_v20 = vmul.f32 %v5553_v14, %v7601_v43 }
 0x524   :  { %v5557_v50 = vpop.eup %5556  ;;  %5574 = vpow2.f32 %v4593_v54  ;;  %5136 = vmatprep.mubr.bf16.mxu1 %v2845_v4  ;;  %v7703_v38 = vmul.f32 %v5555_v51, %v7605_v41  ;;  %8358 = vst [vmem:[#allocation71_spill] sm:$0xff] %v7712_v17 }
 0x525   :  { %v5559_v11 = vpop.eup %5558  ;;  %v7697_v24 = vmul.f32 %v5557_v50, %v7609_v45  ;;  %5576 = vpow2.f32 %v4596_v12  ;;  %5137 = vmatmul.mubr.bf16.gmra.mrb[68].mxu1 %v2846_v23  ;;  %v5110_v46 = vpop.f32.mrb[56].mxu1 }
 0x526   :  { %v5561_v42 = vpop.eup %5560  ;;  %v2730_v39 = vadd.f32 1.0, %v5559_v11  ;;  %5578 = vpow2.f32 %v4594_v52  ;;  %v7700_v61 = vadd.f32 %v5110_v46, %v7563_v7  ;;  %v2588_v55 = vpop.f32.mrb[57].mxu1  ;;  %8357 = vst [vmem:[#allocation70_spill] sm:$0xff] %v7703_v38  ;;  %v2848_v14 = vpack.c.bf16 %v7703_v38, %v7712_v17 }
 0x527   :  { %8356 = vst [vmem:[#allocation69_spill] sm:$0xff] %v7697_v24  ;;  %v5563_v63 = vpop.eup %5562  ;;  %5580 = vrcp.f32 %v2727_v8  ;;  %v2728_v43 = vadd.f32 1.0, %v5561_v42  ;;  %v5111_v32 = vpop.f32.mrb[58].mxu1  ;;  %v2847_v45 = vpack.c.bf16 %v7697_v24, %v7694_v20  ;;  %v7709_v30 = vadd.f32 %v7563_v7, %v2588_v55 }
 0x528   :  { %v5565_v48 = vpop.eup %5564  ;;  %5582 = vrcp.f32 %v2730_v39  ;;  %v2733_v25 = vadd.f32 1.0, %v5563_v63  ;;  %v4599_v5 = vmul.f32 -1.442695, %v7700_v61  ;;  %v2591_v34 = vpop.f32.mrb[59].mxu1  ;;  %v7718_v8 = vadd.f32 %v5111_v32, %v7563_v7 }
 0x529   :  { %5584 = vrcp.f32 %v2728_v43  ;;  %v2731_v41 = vadd.f32 1.0, %v5565_v48  ;;  %5140 = vmatprep.mubr.bf16.mxu1 %v2847_v45  ;;  %v5567_v13 = vpop.eup %5566  ;;  %v4597_v51 = vmul.f32 -1.442695, %v7709_v30  ;;  %v7721_v52 = vadd.f32 %v7563_v7, %v2591_v34 }
 0x52a   :  { %5586 = vrcp.f32 %v2733_v25  ;;  %v5569_v56 = vpop.eup %5568  ;;  %v2734_v54 = vadd.f32 1.0, %v5567_v13  ;;  %v4600_v45 = vmul.f32 -1.442695, %v7718_v8 }
 0x52b   :  { %5588 = vrcp.f32 %v2731_v41  ;;  %v2732_v4 = vadd.f32 1.0, %v5569_v56  ;;  %v4598_v41 = vmul.f32 -1.442695, %v7721_v52 }
 0x52c   :  { %v5571_v12 = vpop.eup %5570  ;;  %5590 = vpow2.f32 %v4599_v5 }
 0x52d   :  { %v5573_v53 = vpop.eup %5572  ;;  %5592 = vrcp.f32 %v2734_v54  ;;  %v2737_v19 = vadd.f32 1.0, %v5571_v12  ;;  %5141 = vmatmul.mubr.bf16.gmra.mrb[72].mxu1 %v2848_v14  ;;  %v5114_v23 = vpop.f32.mrb[60].mxu1 }
 0x52e   :  { %v5575_v50 = vpop.eup %5574  ;;  %5594 = vrcp.f32 %v2732_v4  ;;  %v7724_v11 = vadd.f32 %v5114_v23, %v7563_v7  ;;  %v2604_v46 = vpop.f32.mrb[61].mxu1 }
 0x52f   :  { %v5577_v42 = vpop.eup %5576  ;;  %5596 = vrcp.f32 %v2737_v19  ;;  %v2735_v39 = vadd.f32 1.0, %v5575_v50  ;;  %v7727_v55 = vadd.f32 %v7563_v7, %v2604_v46  ;;  %v5115_v63 = vpop.f32.mrb[62].mxu1  ;;  %v7750_v46 = vmul.f32 %v5573_v53, %v7614_v60 }
 0x530   :  { %v5579_v43 = vpop.eup %5578  ;;  %v2738_v32 = vadd.f32 1.0, %v5577_v42  ;;  %5598 = vpow2.f32 %v4597_v51  ;;  %v7731_v48 = vadd.f32 %v5115_v63, %v7563_v7  ;;  %v2607_v25 = vpop.f32.mrb[63].mxu1  ;;  %v4603_v54 = vmul.f32 -1.442695, %v7724_v11 }
 0x531   :  { %v5581_v5 = vpop.eup %5580  ;;  %5600 = vrcp.f32 %v2735_v39  ;;  %v2736_v34 = vadd.f32 1.0, %v5579_v43  ;;  %v7735_v13 = vadd.f32 %v7563_v7, %v2607_v25  ;;  %v4601_v4 = vmul.f32 -1.442695, %v7727_v55  ;;  %8362 = vst [vmem:[#allocation75_spill] sm:$0xff] %v7750_v46 }
 0x532   :  { %v5583_v56 = vpop.eup %5582  ;;  %5602 = vrcp.f32 %v2738_v32  ;;  %v7743_v19 = vmul.f32 %v5581_v5, %v7620_v49  ;;  %v4604_v7 = vmul.f32 -1.442695, %v7731_v48 }
 0x533   :  { %v5585_v14 = vpop.eup %5584  ;;  %v7739_v12 = vmul.f32 %v5583_v56, %v7638_v3  ;;  %5604 = vrcp.f32 %v2736_v34  ;;  %v4602_v42 = vmul.f32 -1.442695, %v7735_v13 }
 0x534   :  { %v5587_v51 = vpop.eup %5586  ;;  %8360 = vst [vmem:[#allocation73_spill] sm:$0xff] %v7743_v19  ;;  %v7746_v23 = vmul.f32 %v5585_v14, %v7641_v16  ;;  %5606 = vpow2.f32 %v4600_v45 }
 0x535   :  { %8359 = vst [vmem:[#allocation72_spill] sm:$0xff] %v7739_v12  ;;  %v5589_v50 = vpop.eup %5588  ;;  %5608 = vpow2.f32 %v4598_v41  ;;  %v2850_v16 = vpack.c.bf16 %v7739_v12, %v7750_v46 }
 0x536   :  { %8361 = vst [vmem:[#allocation74_spill] sm:$0xff] %v7746_v23  ;;  %v5591_v3 = vpop.eup %5590  ;;  %5610 = vpow2.f32 %v4603_v54  ;;  %v2849_v39 = vpack.c.bf16 %v7746_v23, %v7743_v19  ;;  %v7758_v60 = vmul.f32 %v5589_v50, %v7648_v29  ;;  %v7769_v29 = vmul.f32 %v5587_v51, %v7644_v2 }
 0x537   :  { %v5593_v49 = vpop.eup %5592  ;;  %5612 = vpow2.f32 %v4601_v4  ;;  %v2741_v5 = vadd.f32 1.0, %v5591_v3 }
 0x538   :  { %v5595_v63 = vpop.eup %5594  ;;  %5614 = vpow2.f32 %v4604_v7  ;;  %5144 = vmatprep.mubr.bf16.mxu1 %v2849_v39  ;;  %v7764_v25 = vmul.f32 %v5593_v49, %v7652_v10 }
 0x539   :  { %v5597_v43 = vpop.eup %5596  ;;  %v7761_v53 = vmul.f32 %v5595_v63, %v7656_v62  ;;  %5145 = vmatmul.mubr.bf16.gmra.mrb[76].mxu1 %v2850_v16  ;;  %5616 = vpow2.f32 %v4602_v42 }
 0x53a   :  { %v5599_v32 = vpop.eup %5598  ;;  %5618 = vrcp.f32 %v2741_v5  ;;  %v2852_v50 = vpack.c.bf16 %v7764_v25, %v7769_v29  ;;  %v7785_v63 = vmul.f32 %v5597_v43, %v7662_v6 }
 0x53b   :  { %v5601_v45 = vpop.eup %5600  ;;  %v2851_v34 = vpack.c.bf16 %v7761_v53, %v7758_v60  ;;  %v2739_v56 = vadd.f32 1.0, %v5599_v32 }
 0x53c   :  { %v5603_v41 = vpop.eup %5602  ;;  %v7772_v14 = vmul.f32 %v5601_v45, %v7671_v47 }
 0x53d   :  { %v5605_v54 = vpop.eup %5604  ;;  %5148 = vmatprep.mubr.bf16.mxu1 %v2851_v34  ;;  %5620 = vrcp.f32 %v2739_v56 }
 0x53e   :  { %v5607_v62 = vpop.eup %5606  ;;  %v7775_v4 = vmul.f32 %v5605_v54, %v7685_v21  ;;  %v7782_v21 = vmul.f32 %v5603_v41, %v7678_v27 }
 0x53f   :  { %v5609_v10 = vpop.eup %5608  ;;  %v2742_v7 = vadd.f32 1.0, %v5607_v62 }
 0x540   :  { %v5611_v3 = vpop.eup %5610  ;;  %v2740_v42 = vadd.f32 1.0, %v5609_v10  ;;  %v2853_v2 = vpack.c.bf16 %v7775_v4, %v7772_v14  ;;  %v2854_v5 = vpack.c.bf16 %v7782_v21, %v7785_v63 }
 0x541   :  { %v5613_v51 = vpop.eup %5612  ;;  %5622 = vrcp.f32 %v2742_v7  ;;  %5149 = vmatmul.mubr.bf16.gmra.mrb[80].mxu1 %v2852_v50  ;;  %v2745_v32 = vadd.f32 1.0, %v5611_v3 }
 0x542   :  { %v5615_v47 = vpop.eup %5614  ;;  %5624 = vrcp.f32 %v2740_v42  ;;  %v2743_v39 = vadd.f32 1.0, %v5613_v51  ;;  %5152 = vmatprep.mubr.bf16.mxu1 %v2853_v2 }
 0x543   :  { %v2746_v49 = vadd.f32 1.0, %v5615_v47  ;;  %v5617_v16 = vpop.eup %5616 }
 0x544   :  { %5626 = vrcp.f32 %v2743_v39  ;;  %v2744_v45 = vadd.f32 1.0, %v5617_v16  ;;  %v5619_v34 = vpop.eup %5618 }
 0x545   :  { %5628 = vrcp.f32 %v2746_v49  ;;  %v7799_v62 = vmul.f32 %v5619_v34, %v7700_v61 }
 0x546   :  { %5630 = vrcp.f32 %v2744_v45 }
 0x547   :  { %5632 = vrcp.f32 %v2745_v32  ;;  %v5621_v56 = vpop.eup %5620  ;;  %8365 = vst [vmem:[#allocation78_spill] sm:$0xff] %v7799_v62 }
 0x548   :  { %v7793_v6 = vmul.f32 %v5621_v56, %v7709_v30 }
 0x549   :  { %5153 = vmatmul.mubr.bf16.gmra.mrb[84].mxu1 %v2854_v5 }
 0x54b   :  { %v5623_v54 = vpop.eup %5622 }
 0x54c   :  { %v5625_v27 = vpop.eup %5624  ;;  %v7790_v41 = vmul.f32 %v5623_v54, %v7718_v8 }
 0x54d   :  { %v7796_v43 = vmul.f32 %v5625_v27, %v7721_v52 }
 0x54e   :  { %8363 = vst [vmem:[#allocation76_spill] sm:$0xff] %v7790_v41  ;;  %v5627_v10 = vpop.eup %5626  ;;  %v2856_v3 = vpack.c.bf16 %v7790_v41, %v7799_v62 }
 0x54f   :  { %8364 = vst [vmem:[#allocation77_spill] sm:$0xff] %v7796_v43  ;;  %v2855_v7 = vpack.c.bf16 %v7796_v43, %v7793_v6  ;;  %v5629_v50 = vpop.eup %5628  ;;  %v7806_v8 = vmul.f32 %v5627_v10, %v7727_v55  ;;  %v7821_v55 = vld [vmem:[#allocation24] ss:$0 sm:$0xff] }
 0x550   :  { %v5631_v42 = vpop.eup %5630  ;;  %v7812_v61 = vmul.f32 %v5629_v50, %v7731_v48 }
 0x551   :  { %5156 = vmatprep.mubr.bf16.mxu1 %v2855_v7  ;;  %8366 = vst [vmem:[#allocation79_spill] sm:$0xff] %v7806_v8  ;;  %v7809_v30 = vmul.f32 %v5631_v42, %v7735_v13  ;;  %v5633_v52 = vpop.eup %5632 }
 0x552   :  { %5157 = vmatmul.mubr.bf16.gmra.mrb[88].mxu1 %v2856_v3  ;;  %8368 = vst [vmem:[#allocation81_spill] sm:$0xff] %v7812_v61  ;;  %v7817_v51 = vmul.f32 %v5633_v52, %v7724_v11 }
 0x553   :  { %8367 = vst [vmem:[#allocation80_spill] sm:$0xff] %v7809_v30  ;;  %v2857_v2 = vpack.c.bf16 %v7809_v30, %v7806_v8 }
 0x554   :  { %8369 = vst [vmem:[#allocation82_spill] sm:$0xff] %v7817_v51  ;;  %v2858_v47 = vpack.c.bf16 %v7812_v61, %v7817_v51 }
 0x555   :  { %5160 = vmatprep.mubr.bf16.mxu1 %v2857_v2 }
 0x55a   :  { %5161 = vmatmul.mubr.bf16.gmra.mrb[92].mxu1 %v2858_v47 }
 0x5e8   :  { %v5134_v13 = vpop.f32.mrb[64].mxu1 }
 0x5e9   :  { %v2973_v39 = vadd.f32 %v5134_v13, %v7821_v55  ;;  %v2964_v49 = vpop.f32.mrb[65].mxu1 }
 0x5ea   :  { %v2965_v48 = vadd.f32 %v7821_v55, %v2964_v49  ;;  %v5135_v16 = vpop.f32.mrb[66].mxu1 }
 0x5eb   :  { %v4616_v32 = vmul.f32 -1.442695, %v2973_v39  ;;  %v2976_v45 = vadd.f32 %v5135_v16, %v7821_v55  ;;  %v2967_v5 = vpop.f32.mrb[67].mxu1 }
 0x5ec   :  { %v4614_v11 = vmul.f32 -1.442695, %v2965_v48  ;;  %v2968_v34 = vadd.f32 %v7821_v55, %v2967_v5 }
 0x5ed   :  { %5634 = vpow2.f32 %v4616_v32  ;;  %v4617_v56 = vmul.f32 -1.442695, %v2976_v45 }
 0x5ee   :  { %5636 = vpow2.f32 %v4614_v11  ;;  %v4615_v54 = vmul.f32 -1.442695, %v2968_v34 }
 0x5ef   :  { %5638 = vpow2.f32 %v4617_v56 }
 0x5f0   :  { %5640 = vpow2.f32 %v4615_v54 }
 0x5f7   :  { %v5635_v27 = vpop.eup %5634 }
 0x5f8   :  { %v5637_v10 = vpop.eup %5636  ;;  %v3189_v7 = vadd.f32 1.0, %v5635_v27  ;;  %v5138_v50 = vpop.f32.mrb[68].mxu1 }
 0x5f9   :  { %v5639_v3 = vpop.eup %5638  ;;  %v3187_v42 = vadd.f32 1.0, %v5637_v10  ;;  %v7828_v52 = vadd.f32 %v5138_v50, %v7821_v55  ;;  %v2980_v2 = vpop.f32.mrb[69].mxu1 }
 0x5fa   :  { %v5641_v47 = vpop.eup %5640  ;;  %5642 = vrcp.f32 %v3189_v7  ;;  %v3190_v13 = vadd.f32 1.0, %v5639_v3  ;;  %v7831_v49 = vadd.f32 %v7821_v55, %v2980_v2  ;;  %v5139_v16 = vpop.f32.mrb[70].mxu1 }
 0x5fb   :  { %5644 = vrcp.f32 %v3187_v42  ;;  %v3188_v32 = vadd.f32 1.0, %v5641_v47  ;;  %v4620_v5 = vmul.f32 -1.442695, %v7828_v52  ;;  %v7835_v11 = vadd.f32 %v5139_v16, %v7821_v55  ;;  %v2983_v56 = vpop.f32.mrb[71].mxu1 }
 0x5fc   :  { %5646 = vrcp.f32 %v3190_v13  ;;  %v4618_v54 = vmul.f32 -1.442695, %v7831_v49  ;;  %v7839_v27 = vadd.f32 %v7821_v55, %v2983_v56 }
 0x5fd   :  { %5648 = vrcp.f32 %v3188_v32  ;;  %v4621_v10 = vmul.f32 -1.442695, %v7835_v11 }
 0x5fe   :  { %5650 = vpow2.f32 %v4620_v5  ;;  %v4619_v7 = vmul.f32 -1.442695, %v7839_v27 }
 0x5ff   :  { %5652 = vpow2.f32 %v4618_v54 }
 0x600   :  { %5654 = vpow2.f32 %v4621_v10  ;;  %v5142_v50 = vpop.f32.mrb[72].mxu1  ;;  %v7857_v10 = vld [vmem:[#allocation25] ss:$0 sm:$0xff] }
 0x601   :  { %5656 = vpow2.f32 %v4619_v7  ;;  %v7844_v3 = vadd.f32 %v5142_v50, %v7821_v55  ;;  %v2996_v42 = vpop.f32.mrb[73].mxu1 }
 0x602   :  { %v7847_v2 = vadd.f32 %v7821_v55, %v2996_v42  ;;  %v5143_v47 = vpop.f32.mrb[74].mxu1 }
 0x603   :  { %v4624_v13 = vmul.f32 -1.442695, %v7844_v3  ;;  %v7851_v16 = vadd.f32 %v5143_v47, %v7821_v55  ;;  %v2999_v32 = vpop.f32.mrb[75].mxu1 }
 0x604   :  { %v5643_v5 = vpop.eup %5642  ;;  %v4622_v56 = vmul.f32 -1.442695, %v7847_v2  ;;  %v7855_v54 = vadd.f32 %v7821_v55, %v2999_v32 }
 0x605   :  { %v5645_v7 = vpop.eup %5644  ;;  %v3285_v50 = vmul.f32 %v5643_v5, %v2973_v39  ;;  %5658 = vpow2.f32 %v4624_v13  ;;  %v4625_v42 = vmul.f32 -1.442695, %v7851_v16 }
 0x606   :  { %v5647_v12 = vpop.eup %5646  ;;  %v3283_v46 = vmul.f32 %v5645_v7, %v2965_v48  ;;  %5660 = vpow2.f32 %v4622_v56  ;;  %v4623_v47 = vmul.f32 -1.442695, %v7855_v54 }
 0x607   :  { %v5649_v61 = vpop.eup %5648  ;;  %v3286_v51 = vmul.f32 %v5647_v12, %v2976_v45  ;;  %5662 = vpow2.f32 %v4625_v42  ;;  %v3324_v23 = vmul.f32 %v7857_v10, %v3285_v50 }
 0x608   :  { %v5651_v30 = vpop.eup %5650  ;;  %v3284_v32 = vmul.f32 %v5649_v61, %v2968_v34  ;;  %5664 = vpow2.f32 %v4623_v47  ;;  %v3322_v5 = vmul.f32 %v7857_v10, %v3283_v46 }
 0x609   :  { %v5653_v8 = vpop.eup %5652  ;;  %v3193_v19 = vadd.f32 1.0, %v5651_v30  ;;  %v3360_v39 = vsel %vm2409_vm5, %v3324_v23, 0.0  ;;  %v3325_v13 = vmul.f32 %v7857_v10, %v3286_v51 }
 0x60a   :  { %v5655_v48 = vpop.eup %5654  ;;  %v3191_v56 = vadd.f32 1.0, %v5653_v8  ;;  %3361 = vadd.xlane.f32.xlu0 %v3360_v39  ;;  %v3323_v50 = vmul.f32 %v7857_v10, %v3284_v32  ;;  %v3354_v46 = vsel %vm2409_vm5, %v3322_v5, 0.0 }
 0x60b   :  { %v5657_v7 = vpop.eup %5656  ;;  %5666 = vrcp.f32 %v3193_v19  ;;  %v3194_v12 = vadd.f32 1.0, %v5655_v48  ;;  %v3363_v45 = vsel %vm2409_vm5, %v3325_v13, 0.0 }
 0x60c   :  { %5668 = vrcp.f32 %v3191_v56  ;;  %v3192_v61 = vadd.f32 1.0, %v5657_v7  ;;  %v5146_v34 = vpop.f32.mrb[76].mxu1  ;;  %3364 = vadd.xlane.f32.xlu1 %v3363_v45  ;;  %v3357_v39 = vsel %vm2409_vm5, %v3323_v50, 0.0 }
 0x60d   :  { %5670 = vrcp.f32 %v3194_v12  ;;  %v7868_v23 = vadd.f32 %v5146_v34, %v7821_v55  ;;  %v3012_v30 = vpop.f32.mrb[77].mxu1 }
 0x60e   :  { %5672 = vrcp.f32 %v3192_v61  ;;  %v7872_v8 = vadd.f32 %v7821_v55, %v3012_v30  ;;  %v5147_v19 = vpop.f32.mrb[78].mxu1  ;;  %3355 = vadd.xlane.f32.xlu0 %v3354_v46 }
 0x60f   :  { %v5659_v51 = vpop.eup %5658  ;;  %v4628_v42 = vmul.f32 -1.442695, %v7868_v23  ;;  %v7876_v47 = vadd.f32 %v5147_v19, %v7821_v55  ;;  %v3015_v32 = vpop.f32.mrb[79].mxu1 }
 0x610   :  { %v5661_v13 = vpop.eup %5660  ;;  %v3197_v48 = vadd.f32 1.0, %v5659_v51  ;;  %v7880_v56 = vadd.f32 %v7821_v55, %v3015_v32  ;;  %3358 = vadd.xlane.f32.xlu1 %v3357_v39  ;;  %v4626_v61 = vmul.f32 -1.442695, %v7872_v8 }
 0x611   :  { %v5663_v5 = vpop.eup %5662  ;;  %v3195_v7 = vadd.f32 1.0, %v5661_v13  ;;  %5674 = vpow2.f32 %v4628_v42  ;;  %v4629_v30 = vmul.f32 -1.442695, %v7876_v47 }
 0x612   :  { %v5665_v12 = vpop.eup %5664  ;;  %5676 = vrcp.f32 %v3197_v48  ;;  %v3198_v45 = vadd.f32 1.0, %v5663_v5  ;;  %v4627_v50 = vmul.f32 -1.442695, %v7880_v56 }
 0x613   :  { %5678 = vrcp.f32 %v3195_v7  ;;  %v3196_v34 = vadd.f32 1.0, %v5665_v12 }
 0x614   :  { %5680 = vrcp.f32 %v3198_v45  ;;  %v5150_v46 = vpop.f32.mrb[80].mxu1 }
 0x615   :  { %v5667_v19 = vpop.eup %5666  ;;  %5682 = vrcp.f32 %v3196_v34  ;;  %v7886_v51 = vadd.f32 %v5150_v46, %v7821_v55  ;;  %v3028_v32 = vpop.f32.mrb[81].mxu1 }
 0x616   :  { %v5669_v42 = vpop.eup %5668  ;;  %v3289_v39 = vmul.f32 %v5667_v19, %v7828_v52  ;;  %5684 = vpow2.f32 %v4626_v61  ;;  %v7890_v13 = vadd.f32 %v7821_v55, %v3028_v32  ;;  %v5151_v48 = vpop.f32.mrb[82].mxu1 }
 0x617   :  { %v5671_v5 = vpop.eup %5670  ;;  %v3287_v7 = vmul.f32 %v5669_v42, %v7831_v49  ;;  %5686 = vpow2.f32 %v4629_v30  ;;  %v4632_v12 = vmul.f32 -1.442695, %v7886_v51  ;;  %v7895_v45 = vadd.f32 %v5151_v48, %v7821_v55  ;;  %v3031_v34 = vpop.f32.mrb[83].mxu1 }
 0x618   :  { %v5673_v46 = vpop.eup %5672  ;;  %v3290_v38 = vmul.f32 %v5671_v5, %v7835_v11  ;;  %5688 = vpow2.f32 %v4627_v50  ;;  %v4630_v52 = vmul.f32 -1.442695, %v7890_v13  ;;  %v7900_v61 = vadd.f32 %v7821_v55, %v3031_v34 }
 0x619   :  { %v3288_v19 = vmul.f32 %v5673_v46, %v7839_v27  ;;  %5690 = vpow2.f32 %v4632_v12  ;;  %v4633_v49 = vmul.f32 -1.442695, %v7895_v45  ;;  %v3328_v30 = vmul.f32 %v7857_v10, %v3289_v39 }
 0x61a   :  { %5692 = vpow2.f32 %v4630_v52  ;;  %v4631_v32 = vmul.f32 -1.442695, %v7900_v61  ;;  %v3329_v42 = vmul.f32 %v7857_v10, %v3290_v38  ;;  %v3326_v11 = vmul.f32 %v7857_v10, %v3287_v7 }
 0x61b   :  { %v5675_v50 = vpop.eup %5674  ;;  %5694 = vpow2.f32 %v4633_v49  ;;  %v3372_v48 = vsel %vm2409_vm5, %v3328_v30, 0.0  ;;  %v3327_v39 = vmul.f32 %v7857_v10, %v3288_v19 }
 0x61c   :  { %v5677_v5 = vpop.eup %5676  ;;  %v3201_v34 = vadd.f32 1.0, %v5675_v50  ;;  %5696 = vpow2.f32 %v4631_v32  ;;  %v5154_v27 = vpop.f32.mrb[84].mxu1  ;;  %3373 = vadd.xlane.f32.xlu0 %v3372_v48  ;;  %v3375_v12 = vsel %vm2409_vm5, %v3329_v42, 0.0  ;;  %v3366_v50 = vsel %vm2409_vm5, %v3326_v11, 0.0 }
 0x61d   :  { %v5679_v46 = vpop.eup %5678  ;;  %v3293_v52 = vmul.f32 %v5677_v5, %v7844_v3  ;;  %v7913_v38 = vadd.f32 %v5154_v27, %v7821_v55  ;;  %v3044_v7 = vpop.f32.mrb[85].mxu1  ;;  %3376 = vadd.xlane.f32.xlu1 %v3375_v12 }
 0x61e   :  { %v5681_v49 = vpop.eup %5680  ;;  %5698 = vrcp.f32 %v3201_v34  ;;  %v7916_v30 = vadd.f32 %v7821_v55, %v3044_v7  ;;  %v5155_v32 = vpop.f32.mrb[86].mxu1  ;;  %v3291_v42 = vmul.f32 %v5679_v46, %v7847_v2  ;;  %v3369_v7 = vsel %vm2409_vm5, %v3327_v39, 0.0 }
 0x61f   :  { %v5683_v48 = vpop.eup %5682  ;;  %v3294_v19 = vmul.f32 %v5681_v49, %v7851_v16  ;;  %v4636_v3 = vmul.f32 -1.442695, %v7913_v38  ;;  %v3047_v5 = vpop.f32.mrb[87].mxu1  ;;  %v3332_v27 = vmul.f32 %v7857_v10, %v3293_v52  ;;  %v7927_v2 = vadd.f32 %v5155_v32, %v7821_v55 }
 0x620   :  { %v5685_v17 = vpop.eup %5684  ;;  %v3292_v12 = vmul.f32 %v5683_v48, %v7855_v54  ;;  %v4634_v34 = vmul.f32 -1.442695, %v7916_v30  ;;  %3367 = vadd.xlane.f32.xlu0 %v3366_v50  ;;  %v7931_v52 = vadd.f32 %v7821_v55, %v3047_v5 }
 0x621   :  { %v5687_v41 = vpop.eup %5686  ;;  %v3199_v11 = vadd.f32 1.0, %v5685_v17  ;;  %5700 = vpow2.f32 %v4636_v3  ;;  %3370 = vadd.xlane.f32.xlu1 %v3369_v7  ;;  %v3384_v16 = vsel %vm2409_vm5, %v3332_v27, 0.0  ;;  %v3333_v54 = vmul.f32 %v7857_v10, %v3294_v19 }
 0x622   :  { %v5689_v46 = vpop.eup %5688  ;;  %v3202_v49 = vadd.f32 1.0, %v5687_v41  ;;  %5702 = vpow2.f32 %v4634_v34  ;;  %v3330_v17 = vmul.f32 %v7857_v10, %v3291_v42  ;;  %v3331_v27 = vmul.f32 %v7857_v10, %v3292_v12 }
 0x623   :  { %v5691_v50 = vpop.eup %5690  ;;  %5704 = vrcp.f32 %v3199_v11  ;;  %v3200_v39 = vadd.f32 1.0, %v5689_v46  ;;  %v3387_v3 = vsel %vm2409_vm5, %v3333_v54, 0.0  ;;  %v4637_v5 = vmul.f32 -1.442695, %v7927_v2 }
 0x624   :  { %v5693_v48 = vpop.eup %5692  ;;  %5706 = vrcp.f32 %v3202_v49  ;;  %v3205_v32 = vadd.f32 1.0, %v5691_v50  ;;  %3385 = vadd.xlane.f32.xlu0 %v3384_v16  ;;  %v4635_v42 = vmul.f32 -1.442695, %v7931_v52  ;;  %v3378_v50 = vsel %vm2409_vm5, %v3330_v17, 0.0 }
 0x625   :  { %v5695_v41 = vpop.eup %5694  ;;  %5708 = vrcp.f32 %v3200_v39  ;;  %v3203_v34 = vadd.f32 1.0, %v5693_v48  ;;  %v5158_v7 = vpop.f32.mrb[88].mxu1  ;;  %3388 = vadd.xlane.f32.xlu1 %v3387_v3 }
 0x626   :  { %v5697_v19 = vpop.eup %5696  ;;  %5710 = vrcp.f32 %v3205_v32  ;;  %v3206_v11 = vadd.f32 1.0, %v5695_v41  ;;  %v7940_v46 = vadd.f32 %v5158_v7, %v7821_v55  ;;  %v3060_v16 = vpop.f32.mrb[89].mxu1  ;;  %v3381_v41 = vsel %vm2409_vm5, %v3331_v27, 0.0 }
 0x627   :  { %5712 = vrcp.f32 %v3203_v34  ;;  %v3204_v49 = vadd.f32 1.0, %v5697_v19  ;;  %v7943_v12 = vadd.f32 %v7821_v55, %v3060_v16  ;;  %v5159_v54 = vpop.f32.mrb[90].mxu1 }
 0x628   :  { %v5699_v39 = vpop.eup %5698  ;;  %5714 = vrcp.f32 %v3206_v11  ;;  %v4640_v48 = vmul.f32 -1.442695, %v7940_v46  ;;  %v7948_v32 = vadd.f32 %v5159_v54, %v7821_v55  ;;  %v3063_v3 = vpop.f32.mrb[91].mxu1  ;;  %3379 = vadd.xlane.f32.xlu0 %v3378_v50 }
 0x629   :  { %v3297_v34 = vmul.f32 %v5699_v39, %v7868_v23  ;;  %5716 = vrcp.f32 %v3204_v49  ;;  %v4638_v7 = vmul.f32 -1.442695, %v7943_v12  ;;  %v7954_v19 = vadd.f32 %v7821_v55, %v3063_v3  ;;  %3382 = vadd.xlane.f32.xlu1 %v3381_v41 }
 0x62a   :  { %5718 = vpow2.f32 %v4637_v5  ;;  %v4641_v50 = vmul.f32 -1.442695, %v7948_v32 }
 0x62b   :  { %v5701_v17 = vpop.eup %5700  ;;  %5720 = vpow2.f32 %v4635_v42  ;;  %v3336_v11 = vmul.f32 %v7857_v10, %v3297_v34  ;;  %v4639_v23 = vmul.f32 -1.442695, %v7954_v19 }
 0x62c   :  { %v5703_v16 = vpop.eup %5702  ;;  %v3209_v54 = vadd.f32 1.0, %v5701_v17  ;;  %5722 = vpow2.f32 %v4640_v48 }
 0x62d   :  { %v5705_v27 = vpop.eup %5704  ;;  %v3207_v24 = vadd.f32 1.0, %v5703_v16  ;;  %5724 = vpow2.f32 %v4638_v7  ;;  %v5162_v49 = vpop.f32.mrb[92].mxu1  ;;  %v3396_v39 = vsel %vm2409_vm5, %v3336_v11, 0.0 }
 0x62e   :  { %v5707_v3 = vpop.eup %5706  ;;  %5726 = vrcp.f32 %v3209_v54  ;;  %v7961_v5 = vadd.f32 %v5162_v49, %v7821_v55  ;;  %v3076_v42 = vpop.f32.mrb[93].mxu1  ;;  %3397 = vadd.xlane.f32.xlu0 %v3396_v39  ;;  %v3295_v48 = vmul.f32 %v5705_v27, %v7872_v8 }
 0x62f   :  { %v5709_v41 = vpop.eup %5708  ;;  %v3298_v34 = vmul.f32 %v5707_v3, %v7876_v47  ;;  %5728 = vrcp.f32 %v3207_v24  ;;  %v7966_v7 = vadd.f32 %v7821_v55, %v3076_v42  ;;  %v5163_v17 = vpop.f32.mrb[94].mxu1 }
 0x630   :  { %v5711_v16 = vpop.eup %5710  ;;  %v3296_v11 = vmul.f32 %v5709_v41, %v7880_v56  ;;  %5730 = vpow2.f32 %v4641_v50  ;;  %v4644_v54 = vmul.f32 -1.442695, %v7961_v5  ;;  %v7971_v49 = vadd.f32 %v5163_v17, %v7821_v55  ;;  %v3079_v39 = vpop.f32.mrb[95].mxu1 }
 0x631   :  { %v5713_v43 = vpop.eup %5712  ;;  %v3301_v8 = vmul.f32 %v5711_v16, %v7886_v51  ;;  %5732 = vpow2.f32 %v4639_v23  ;;  %v4642_v24 = vmul.f32 -1.442695, %v7966_v7  ;;  %v7976_v47 = vadd.f32 %v7821_v55, %v3079_v39 }
 0x632   :  { %v5715_v27 = vpop.eup %5714  ;;  %5734 = vpow2.f32 %v4644_v54  ;;  %v4645_v56 = vmul.f32 -1.442695, %v7971_v49  ;;  %v3337_v50 = vmul.f32 %v7857_v10, %v3298_v34  ;;  %v3334_v51 = vmul.f32 %v7857_v10, %v3295_v48 }
 0x633   :  { %v5717_v3 = vpop.eup %5716  ;;  %v3302_v42 = vmul.f32 %v5715_v27, %v7895_v45  ;;  %5736 = vpow2.f32 %v4642_v24  ;;  %v4643_v41 = vmul.f32 -1.442695, %v7976_v47  ;;  %v3299_v17 = vmul.f32 %v5713_v43, %v7890_v13 }
 0x634   :  { %v5719_v23 = vpop.eup %5718  ;;  %5738 = vpow2.f32 %v4645_v56  ;;  %v3399_v55 = vsel %vm2409_vm5, %v3337_v50, 0.0  ;;  %v3335_v16 = vmul.f32 %v7857_v10, %v3296_v11  ;;  %v3390_v34 = vsel %vm2409_vm5, %v3334_v51, 0.0 }
 0x635   :  { %v5721_v54 = vpop.eup %5720  ;;  %v3210_v39 = vadd.f32 1.0, %v5719_v23  ;;  %5740 = vpow2.f32 %v4643_v41  ;;  %3400 = vadd.xlane.f32.xlu1 %v3399_v55  ;;  %v3340_v45 = vmul.f32 %v7857_v10, %v3301_v8  ;;  %3391 = vadd.xlane.f32.xlu0 %v3390_v34  ;;  %v3341_v48 = vmul.f32 %v7857_v10, %v3302_v42 }
 0x636   :  { %v5723_v24 = vpop.eup %5722  ;;  %v3208_v27 = vadd.f32 1.0, %v5721_v54  ;;  %v3300_v11 = vmul.f32 %v5717_v3, %v7900_v61  ;;  %v3393_v41 = vsel %vm2409_vm5, %v3335_v16, 0.0  ;;  %v3338_v23 = vmul.f32 %v7857_v10, %v3299_v17 }
 0x637   :  { %v5725_v62 = vpop.eup %5724  ;;  %5742 = vrcp.f32 %v3210_v39  ;;  %v3213_v43 = vadd.f32 1.0, %v5723_v24  ;;  %v3408_v13 = vsel %vm2409_vm5, %v3340_v45, 0.0  ;;  %v3411_v55 = vsel %vm2409_vm5, %v3341_v48, 0.0 }
 0x638   :  { %v5727_v56 = vpop.eup %5726  ;;  %5744 = vrcp.f32 %v3208_v27  ;;  %v3211_v50 = vadd.f32 1.0, %v5725_v62  ;;  %v3339_v16 = vmul.f32 %v7857_v10, %v3300_v11  ;;  %v3402_v17 = vsel %vm2409_vm5, %v3338_v23, 0.0 }
 0x639   :  { %v5729_v51 = vpop.eup %5728  ;;  %v3305_v8 = vmul.f32 %v5727_v56, %v7913_v38  ;;  %5746 = vrcp.f32 %v3213_v43  ;;  %3394 = vadd.xlane.f32.xlu1 %v3393_v41  ;;  %3409 = vadd.xlane.f32.xlu0 %v3408_v13 }
 0x63a   :  { %v5731_v42 = vpop.eup %5730  ;;  %5748 = vrcp.f32 %v3211_v50  ;;  %v3303_v38 = vmul.f32 %v5729_v51, %v7916_v30  ;;  %v3405_v56 = vsel %vm2409_vm5, %v3339_v16, 0.0 }
 0x63b   :  { %v5733_v54 = vpop.eup %5732  ;;  %v3214_v39 = vadd.f32 1.0, %v5731_v42  ;;  %v3344_v61 = vmul.f32 %v7857_v10, %v3305_v8 }
 0x63c   :  { %v5735_v3 = vpop.eup %5734  ;;  %v3212_v62 = vadd.f32 1.0, %v5733_v54  ;;  %v3342_v50 = vmul.f32 %v7857_v10, %v3303_v38 }
 0x63d   :  { %v5737_v34 = vpop.eup %5736  ;;  %5750 = vrcp.f32 %v3214_v39  ;;  %v3217_v45 = vadd.f32 1.0, %v5735_v3  ;;  %3412 = vadd.xlane.f32.xlu1 %v3411_v55  ;;  %3403 = vadd.xlane.f32.xlu0 %v3402_v17  ;;  %v3420_v13 = vsel %vm2409_vm5, %v3344_v61, 0.0 }
 0x63e   :  { %v5739_v24 = vpop.eup %5738  ;;  %5752 = vrcp.f32 %v3212_v62  ;;  %v3215_v27 = vadd.f32 1.0, %v5737_v34  ;;  %v3414_v61 = vsel %vm2409_vm5, %v3342_v50, 0.0 }
 0x63f   :  { %v5741_v48 = vpop.eup %5740  ;;  %5754 = vrcp.f32 %v3217_v45  ;;  %v3218_v43 = vadd.f32 1.0, %v5739_v24 }
 0x640   :  { %5756 = vrcp.f32 %v3215_v27  ;;  %v3216_v30 = vadd.f32 1.0, %v5741_v48 }
 0x641   :  { %v5743_v11 = vpop.eup %5742  ;;  %5758 = vrcp.f32 %v3218_v43  ;;  %3406 = vadd.xlane.f32.xlu1 %v3405_v56  ;;  %3421 = vadd.xlane.f32.xlu0 %v3420_v13 }
 0x642   :  { %v5745_v41 = vpop.eup %5744  ;;  %v3306_v51 = vmul.f32 %v5743_v11, %v7927_v2  ;;  %5760 = vrcp.f32 %v3216_v30 }
 0x643   :  { %v5747_v8 = vpop.eup %5746  ;;  %v3304_v23 = vmul.f32 %v5745_v41, %v7931_v52 }
 0x644   :  { %v5749_v42 = vpop.eup %5748  ;;  %v3309_v55 = vmul.f32 %v5747_v8, %v7940_v46  ;;  %v3345_v54 = vmul.f32 %v7857_v10, %v3306_v51 }
 0x645   :  { %v3307_v39 = vmul.f32 %v5749_v42, %v7943_v12  ;;  %3415 = vadd.xlane.f32.xlu0 %v3414_v61  ;;  %v3343_v62 = vmul.f32 %v7857_v10, %v3304_v23 }
 0x646   :  { %v3423_v3 = vsel %vm2409_vm5, %v3345_v54, 0.0  ;;  %v3348_v2 = vmul.f32 %v7857_v10, %v3309_v55  ;;  %v8033_v54 = vld [vmem:[#allocation3] ss:$0 sm:$0xff] }
 0x647   :  { %v5751_v16 = vpop.eup %5750  ;;  %3424 = vadd.xlane.f32.xlu1 %v3423_v3  ;;  %v3346_v12 = vmul.f32 %v7857_v10, %v3307_v39  ;;  %v3417_v27 = vsel %vm2409_vm5, %v3343_v62, 0.0 }
 0x648   :  { %v5753_v52 = vpop.eup %5752  ;;  %v3310_v34 = vmul.f32 %v5751_v16, %v7948_v32  ;;  %v3432_v46 = vsel %vm2409_vm5, %v3348_v2, 0.0 }
 0x649   :  { %v5755_v38 = vpop.eup %5754  ;;  %v3308_v17 = vmul.f32 %v5753_v52, %v7954_v19  ;;  %3433 = vadd.xlane.f32.xlu0 %v3432_v46  ;;  %v3426_v30 = vsel %vm2409_vm5, %v3346_v12, 0.0 }
 0x64a   :  { %v5757_v45 = vpop.eup %5756  ;;  %v3313_v24 = vmul.f32 %v5755_v38, %v7961_v5  ;;  %v3349_v48 = vmul.f32 %v7857_v10, %v3310_v34 }
 0x64b   :  { %v5759_v43 = vpop.eup %5758  ;;  %3418 = vadd.xlane.f32.xlu1 %v3417_v27  ;;  %v3311_v11 = vmul.f32 %v5757_v45, %v7966_v7  ;;  %v3347_v19 = vmul.f32 %v7857_v10, %v3308_v17 }
 0x64c   :  { %v3314_v13 = vmul.f32 %v5759_v43, %v7971_v49  ;;  %v3435_v32 = vsel %vm2409_vm5, %v3349_v48, 0.0  ;;  %v3352_v56 = vmul.f32 %v7857_v10, %v3313_v24  ;;  %v5761_v5 = vpop.eup %5760 }
 0x64d   :  { %3427 = vadd.xlane.f32.xlu0 %v3426_v30  ;;  %v3350_v51 = vmul.f32 %v7857_v10, %v3311_v11  ;;  %v3312_v49 = vmul.f32 %v5761_v5, %v7976_v47  ;;  %v3429_v8 = vsel %vm2409_vm5, %v3347_v19, 0.0 }
 0x64e   :  { %v3444_v50 = vsel %vm2409_vm5, %v3352_v56, 0.0  ;;  %v3353_v41 = vmul.f32 %v7857_v10, %v3314_v13 }
 0x64f   :  { %3436 = vadd.xlane.f32.xlu1 %v3435_v32  ;;  %v3438_v23 = vsel %vm2409_vm5, %v3350_v51, 0.0  ;;  %v3351_v42 = vmul.f32 %v7857_v10, %v3312_v49 }
 0x650   :  { %v3447_v7 = vsel %vm2409_vm5, %v3353_v41, 0.0 }
 0x651   :  { %3445 = vadd.xlane.f32.xlu0 %v3444_v50  ;;  %v3441_v55 = vsel %vm2409_vm5, %v3351_v42, 0.0 }
 0x653   :  { %3430 = vadd.xlane.f32.xlu1 %v3429_v8 }
 0x655   :  { %3439 = vadd.xlane.f32.xlu0 %v3438_v23 }
 0x657   :  { %3448 = vadd.xlane.f32.xlu1 %v3447_v7 }
 0x65b   :  { %3442 = vadd.xlane.f32.xlu1 %v3441_v55 }
 0x697   :  { %v3362_v39 = vpop.xlane.xlu0 %3361 }
 0x698   :  { %v3459_v47 = vadd.f32 %v8033_v54, %v3362_v39 }
 0x699   :  { %v3365_v61 = vpop.xlane.xlu1 %3364 }
 0x69a   :  { %3501 = vperm.xlu1 %5328, %v3459_v47   ;;  %v3460_v2 = vadd.f32 %v8033_v54, %v3365_v61 }
 0x69b   :  { %v3356_v3 = vpop.xlane.xlu0 %3355 }
 0x69c   :  { %v3457_v62 = vadd.f32 %v8033_v54, %v3356_v3 }
 0x69d   :  { %v3359_v16 = vpop.xlane.xlu1 %3358 }
 0x69e   :  { %3491 = vperm.xlu1 %5328, %v3457_v62   ;;  %v3458_v10 = vadd.f32 %v8033_v54, %v3359_v16 }
 0x6a2   :  { %3506 = vperm.xlu1 %5328, %v3460_v2  }
 0x6a6   :  { %3496 = vperm.xlu1 %5328, %v3458_v10  }
 0x6a9   :  { %v3374_v52 = vpop.xlane.xlu0 %3373 }
 0x6aa   :  { %v3463_v34 = vadd.f32 %v8033_v54, %v3374_v52  ;;  %v3377_v46 = vpop.xlane.xlu1 %3376 }
 0x6ab   :  { %v3464_v38 = vadd.f32 %v8033_v54, %v3377_v46 }
 0x6ac   :  { %3521 = vperm.xlu1 %5328, %v3463_v34  }
 0x6ad   :  { %v3368_v12 = vpop.xlane.xlu0 %3367  ;;  %3526 = vperm.xlu0 %5329, %v3464_v38  }
 0x6ae   :  { %v3461_v45 = vadd.f32 %v8033_v54, %v3368_v12  ;;  %v3371_v17 = vpop.xlane.xlu1 %3370 }
 0x6af   :  { %v3462_v24 = vadd.f32 %v8033_v54, %v3371_v17 }
 0x6b0   :  { %3511 = vperm.xlu1 %5328, %v3461_v45  }
 0x6b1   :  { %v3386_v27 = vpop.xlane.xlu0 %3385  ;;  %3516 = vperm.xlu0 %5329, %v3462_v24  }
 0x6b2   :  { %v3467_v48 = vadd.f32 %v8033_v54, %v3386_v27  ;;  %v3389_v43 = vpop.xlane.xlu1 %3388 }
 0x6b3   :  { %v3468_v13 = vadd.f32 %v8033_v54, %v3389_v43 }
 0x6b4   :  { %3541 = vperm.xlu1 %5328, %v3467_v48  }
 0x6b5   :  { %v3380_v32 = vpop.xlane.xlu0 %3379  ;;  %3546 = vperm.xlu0 %5329, %v3468_v13  }
 0x6b6   :  { %v3465_v56 = vadd.f32 %v8033_v54, %v3380_v32  ;;  %v3383_v11 = vpop.xlane.xlu1 %3382 }
 0x6b7   :  { %v3466_v30 = vadd.f32 %v8033_v54, %v3383_v11 }
 0x6b8   :  { %3531 = vperm.xlu1 %5328, %v3465_v56  }
 0x6b9   :  { %3536 = vperm.xlu0 %5329, %v3466_v30  }
 0x6bb   :  { %v3398_v19 = vpop.xlane.xlu0 %3397 }
 0x6c2   :  { %v3401_v5 = vpop.xlane.xlu1 %3400  ;;  %v3392_v50 = vpop.xlane.xlu0 %3391 }
 0x6c3   :  { %v3469_v43 = vadd.f32 %v8033_v54, %v3392_v50  ;;  %v3471_v50 = vadd.f32 %v8033_v54, %v3398_v19  ;;  %v3833_v19 = vld [vmem:[#allocation12 + $0x20] sm:$0xff] }
 0x6c6   :  { %v3395_v41 = vpop.xlane.xlu1 %3394  ;;  %v3410_v51 = vpop.xlane.xlu0 %3409 }
 0x6c7   :  { %v3475_v49 = vadd.f32 %v8033_v54, %v3410_v51  ;;  %v3470_v32 = vadd.f32 %v8033_v54, %v3395_v41  ;;  %v3472_v41 = vadd.f32 %v8033_v54, %v3401_v5  ;;  %v6286_v5 = vmov 1.0|1.0  }
 0x6c9   :  { %3581 = vperm.xlu1 %5328, %v3475_v49  }
 0x6ca   :  { %v3413_v8 = vpop.xlane.xlu1 %3412  ;;  %v3404_v7 = vpop.xlane.xlu0 %3403 }
 0x6cb   :  { %v3476_v23 = vadd.f32 %v8033_v54, %v3413_v8  ;;  %v3473_v42 = vadd.f32 %v8033_v54, %v3404_v7  ;;  %v3829_v7 = vld [vmem:[#allocation12] sm:$0xff] }
 0x6cd   :  { %3586 = vperm.xlu1 %5328, %v3476_v23   ;;  %3571 = vperm.xlu0 %5329, %v3473_v42   ;;  %v3830_v23 = vld [vmem:[#allocation12 + $0x8] sm:$0xff]  ;;  %v8370_v42 = vlaneseq }
 0x6ce   :  { %v3407_v55 = vpop.xlane.xlu1 %3406  ;;  %v3422_v39 = vpop.xlane.xlu0 %3421 }
 0x6cf   :  { %v3474_v47 = vadd.f32 %v8033_v54, %v3407_v55  ;;  %v3479_v3 = vadd.f32 %v8033_v54, %v3422_v39  ;;  %v773_v55 = vshrl.u32 %v8370_v42, 7  ;;  %v3831_v39 = vld [vmem:[#allocation12 + $0x10] sm:$0xff] }
 0x6d1   :  { %3576 = vperm.xlu1 %5328, %v3474_v47   ;;  %v788_v47 = vsub.s32 1, %v773_v55 }
 0x6d2   :  { %v3416_v61 = vpop.xlane.xlu0 %3415 }
 0x6d3   :  { %v3477_v10 = vadd.f32 %v8033_v54, %v3416_v61  ;;  %v3832_v61 = vld [vmem:[#allocation12 + $0x18] sm:$0xff] }
 0x6d4   :  { %v3425_v62 = vpop.xlane.xlu1 %3424 }
 0x6d5   :  { %v3480_v2 = vadd.f32 %v8033_v54, %v3425_v62  ;;  %3601 = vperm.xlu1 %5328, %v3479_v3   ;;  %v781_v3 = vld [vmem:[#allocation7] sm:$0x3]  ;;  %v784_v62 = vsub.s32 0, %v773_v55 }
 0x6d6   :  { %v3434_v16 = vpop.xlane.xlu0 %3433 }
 0x6d7   :  { %3606 = vperm.xlu0 %5329, %v3480_v2   ;;  %v3483_v38 = vadd.f32 %v8033_v54, %v3434_v16  ;;  %v774_v2 = vadd.s32 8, %v773_v55  ;;  %v789_v16 = vrot.slane %v781_v3, %v788_v47 }
 0x6d8   :  { %v3419_v52 = vpop.xlane.xlu1 %3418 }
 0x6d9   :  { %v3478_v34 = vadd.f32 %v8033_v54, %v3419_v52  ;;  %3591 = vperm.xlu1 %5328, %v3477_v10   ;;  %v785_v10 = vrot.slane %v781_v3, %v784_v62  ;;  %vm791_vm6 = vcmp.eq.s32.totalorder %v789_v16, %v773_v55  ;;  %vm793_vm7 = vcmp.eq.s32.totalorder %v789_v16, %v774_v2  ;;  %v5365_v52 = vld [vmem:[#allocation28 + $0x28] sm:$0xff]  }
 0x6da   :  { %v3428_v46 = vpop.xlane.xlu0 %3427  ;;  %vm4648_vm9 = vmpackc.low %vm793_vm7, %vm791_vm6 }
 0x6db   :  { %3596 = vperm.xlu0 %5329, %v3478_v34   ;;  %v3481_v24 = vadd.f32 %v8033_v54, %v3428_v46  ;;  %vm792_vm8 = vcmp.eq.s32.totalorder %v785_v10, %v774_v2  ;;  %vm790_vm10 = vcmp.eq.s32.totalorder %v785_v10, %v773_v55  ;;  %4649 = vmatprep.mubr.msk.bf16.mxu0 %vm4648_vm9, %v6286_v5  ;;  %v3835_v34 = vld [vmem:[#allocation12 + $0x30] sm:$0xff]  ;;  %v3836_v46 = vld [vmem:[#allocation12 + $0x38] sm:$0xff] }
 0x6dc   :  { %v3437_v12 = vpop.xlane.xlu1 %3436  ;;  %vm8069_vm11 = vmpackc.low %vm792_vm8, %vm790_vm10 }
 0x6dd   :  { %v3484_v45 = vadd.f32 %v8033_v54, %v3437_v12  ;;  %3621 = vperm.xlu1 %5328, %v3483_v38   ;;  %v775_v38 = vadd.s32 16, %v773_v55  ;;  %v776_v12 = vadd.s32 24, %v773_v55 }
 0x6de   :  { %v3446_v17 = vpop.xlane.xlu0 %3445 }
 0x6df   :  { %3626 = vperm.xlu0 %5329, %v3484_v45   ;;  %v3487_v49 = vadd.f32 %v8033_v54, %v3446_v17  ;;  %vm795_vm12 = vcmp.eq.s32.totalorder %v789_v16, %v775_v38  ;;  %vm797_vm13 = vcmp.eq.s32.totalorder %v789_v16, %v776_v12  ;;  %vm794_vm14 = vcmp.eq.s32.totalorder %v785_v10, %v775_v38  ;;  %v5366_v45 = vld [vmem:[#allocation28 + $0x30] sm:$0xff]  }
 0x6e0   :  { %v3431_v27 = vpop.xlane.xlu1 %3430  ;;  %vm796_vm15 = vcmp.eq.s32.totalorder %v785_v10, %v776_v12  ;;  %vm8073_vm0 = vmpackc.low %vm797_vm13, %vm795_vm12  ;;  %v777_v17 = vadd.s32 32, %v773_v55 }
 0x6e1   :  { %v3482_v48 = vadd.f32 %v8033_v54, %v3431_v27  ;;  %3611 = vperm.xlu1 %5328, %v3481_v24   ;;  %v778_v24 = vadd.s32 40, %v773_v55  ;;  %vm8077_vm1 = vmpackc.low %vm796_vm15, %vm794_vm14  ;;  %v5367_v27 = vld [vmem:[#allocation28 + $0x38] sm:$0xff]  }
 0x6e2   :  { %v3440_v56 = vpop.xlane.xlu0 %3439  ;;  %vm799_vm2 = vcmp.eq.s32.totalorder %v789_v16, %v777_v17  ;;  %vm798_vm6 = vcmp.eq.s32.totalorder %v785_v10, %v777_v17 }
 0x6e3   :  { %3616 = vperm.xlu0 %5329, %v3482_v48   ;;  %v3485_v11 = vadd.f32 %v8033_v54, %v3440_v56  ;;  %vm801_vm3 = vcmp.eq.s32.totalorder %v789_v16, %v778_v24  ;;  %vm800_vm7 = vcmp.eq.s32.totalorder %v785_v10, %v778_v24  ;;  %v5368_v48 = vld [vmem:[#allocation27] sm:$0xff]  }
 0x6e4   :  { %v3449_v13 = vpop.xlane.xlu1 %3448  ;;  %vm8081_vm8 = vmpackc.low %vm801_vm3, %vm799_vm2 }
 0x6e5   :  { %3551 = vperm.xlu1 %5328, %v3469_v43   ;;  %v3488_v8 = vadd.f32 %v8033_v54, %v3449_v13  ;;  %vm8085_vm9 = vmpackc.low %vm800_vm7, %vm798_vm6  ;;  %v779_v13 = vadd.s32 48, %v773_v55 }
 0x6e7   :  { %3556 = vperm.xlu0 %5329, %v3470_v32   ;;  %v780_v32 = vadd.s32 56, %v773_v55  ;;  %vm803_vm10 = vcmp.eq.s32.totalorder %v789_v16, %v779_v13  ;;  %vm802_vm13 = vcmp.eq.s32.totalorder %v785_v10, %v779_v13 }
 0x6e8   :  { %v3443_v30 = vpop.xlane.xlu1 %3442 }
 0x6e9   :  { %v3486_v51 = vadd.f32 %v8033_v54, %v3443_v30  ;;  %3631 = vperm.xlu1 %5328, %v3485_v11   ;;  %v3834_v54 = vld [vmem:[#allocation12 + $0x28] sm:$0xff]  ;;  %vm805_vm12 = vcmp.eq.s32.totalorder %v789_v16, %v780_v32  ;;  %vm804_vm14 = vcmp.eq.s32.totalorder %v785_v10, %v780_v32  ;;  %v5360_v30 = vld [vmem:[#allocation28] sm:$0xff]  }
 0x6ea   :  { %vm8089_vm15 = vmpackc.low %vm805_vm12, %vm803_vm10  ;;  %5164 = vmatprep.subr.bf16.mxu1 %v5360_v30 }
 0x6eb   :  { %3636 = vperm.xlu0 %5329, %v3486_v51   ;;  %vm8093_vm4 = vmpackc.low %vm804_vm14, %vm802_vm13  ;;  %v5361_v51 = vld [vmem:[#allocation28 + $0x8] sm:$0xff]   ;;  %5165 = vmatpush3.bf16.msra.mxu1 %v5360_v30 }
 0x6ec   :  { %5166 = vmatprep.subr.bf16.mxu1 %v5361_v51 }
 0x6ed   :  { %3641 = vperm.xlu1 %5328, %v3487_v49   ;;  %v5362_v49 = vld [vmem:[#allocation28 + $0x10] sm:$0xff]  }
 0x6ef   :  { %3646 = vperm.xlu0 %5329, %v3488_v8   ;;  %5167 = vmatpush3.bf16.msra.mxu1 %v5361_v51 }
 0x6f0   :  { %5168 = vmatprep.subr.bf16.mxu1 %v5362_v49 }
 0x6f1   :  { %3561 = vperm.xlu1 %5328, %v3471_v50   ;;  %v5363_v50 = vld [vmem:[#allocation28 + $0x18] sm:$0xff]  }
 0x6f3   :  { %3566 = vperm.xlu0 %5329, %v3472_v41   ;;  %5169 = vmatpush3.bf16.msra.mxu1 %v5362_v49 }
 0x6f4   :  { %5170 = vmatprep.subr.bf16.mxu1 %v5363_v50 }
 0x6f5   :  { %3839 = vperm.xlu1 %5328, %v3829_v7   ;;  %v5364_v7 = vld [vmem:[#allocation28 + $0x20] sm:$0xff]  }
 0x6f7   :  { %3844 = vperm.xlu0 %5329, %v3830_v23   ;;  %5171 = vmatpush3.bf16.msra.mxu1 %v5363_v50 }
 0x6f8   :  { %5172 = vmatprep.subr.bf16.mxu1 %v5364_v7 }
 0x6f9   :  { %3849 = vperm.xlu1 %5328, %v3831_v39  }
 0x6fb   :  { %3854 = vperm.xlu0 %5329, %v3832_v61   ;;  %5173 = vmatpush3.bf16.msra.mxu1 %v5364_v7 }
 0x6fc   :  { %5174 = vmatprep.subr.bf16.mxu1 %v5365_v52 }
 0x6fd   :  { %3859 = vperm.xlu1 %5328, %v3833_v19  }
 0x6ff   :  { %3864 = vperm.xlu0 %5329, %v3834_v54   ;;  %5175 = vmatpush3.bf16.msra.mxu1 %v5365_v52 }
 0x700   :  { %5176 = vmatprep.subr.bf16.mxu1 %v5366_v45 }
 0x701   :  { %3869 = vperm.xlu1 %5328, %v3835_v34  }
 0x703   :  { %3874 = vperm.xlu0 %5329, %v3836_v46   ;;  %5177 = vmatpush3.bf16.msra.mxu1 %v5366_v45 }
 0x704   :  { %5178 = vmatprep.subr.bf16.mxu1 %v5367_v27 }
 0x707   :  { %5179 = vmatpush3.bf16.msra.mxu1 %v5367_v27 }
 0x708   :  { %5188 = vmatprep.subr.bf16.mxu1 %v5368_v48 }
 0x719   :  { %v3502_v8 = vpop.permute.xlu1 %3501 }
 0x71d   :  { %v3492_v41 = vpop.permute.xlu1 %3491 }
 0x71e   :  { %v3649_v12 = vmul.f32 %v3492_v41, %v7025_v33 }
 0x721   :  { %v3507_v23 = vpop.permute.xlu1 %3506 }
 0x722   :  { %v3652_v32 = vmul.f32 %v3507_v23, %v7035_v26  ;;  %v8386_v23 = vld [vmem:[#allocation58_spill] sm:$0xff] }
 0x725   :  { %v3497_v42 = vpop.permute.xlu1 %3496 }
 0x726   :  { %v3650_v34 = vmul.f32 %v3497_v42, %v7031_v35 }
 0x728   :  { %v3682_v30 = vadd.f32 %v3650_v34, %v7626_v18 }
 0x72b   :  { %v3522_v55 = vpop.permute.xlu1 %3521 }
 0x72c   :  { %v3527_v39 = vpop.permute.xlu0 %3526 }
 0x72f   :  { %v3512_v47 = vpop.permute.xlu1 %3511 }
 0x730   :  { %v3517_v61 = vpop.permute.xlu0 %3516  ;;  %v3653_v18 = vmul.f32 %v3512_v47, %v7053_v31  ;;  %v8389_v31 = vld [vmem:[#allocation48_spill] sm:$0xff] }
 0x731   :  { %v3655_v47 = vmul.f32 %v3522_v55, %v8389_v31 }
 0x732   :  { %v3685_v34 = vadd.f32 %v3653_v18, %v7665_v40  ;;  %v8391_v40 = vld [vmem:[#allocation50_spill] sm:$0xff] }
 0x733   :  { %v8097_v3 = vpop.permute.xlu1 %3541  ;;  %v3687_v55 = vadd.f32 %v3655_v47, %v7681_v0  ;;  %v8405_v47 = vld [vmem:[#allocation70_spill] sm:$0xff] }
 0x734   :  { %v8099_v62 = vpop.permute.xlu0 %3546 }
 0x737   :  { %v3532_v2 = vpop.permute.xlu1 %3531 }
 0x738   :  { %v3537_v16 = vpop.permute.xlu0 %3536 }
 0x748   :  { %v3582_v10 = vpop.permute.xlu1 %3581 }
 0x749   :  { %v3667_v24 = vmul.f32 %v3582_v10, %v7149_v28  ;;  %v8387_v10 = vld [vmem:[#allocation60_spill] sm:$0xff] }
 0x74b   :  { %v3699_v50 = vadd.f32 %v3667_v24, %v7769_v29 }
 0x74c   :  { %v3587_v19 = vpop.permute.xlu1 %3586  ;;  %v3572_v54 = vpop.permute.xlu0 %3571 }
 0x74d   :  { %v3668_v46 = vmul.f32 %v3587_v19, %v7153_v44  ;;  %v3665_v38 = vmul.f32 %v3572_v54, %v7137_v58  ;;  %v3651_v44 = vmul.f32 %v3502_v8, %v7041_v37  ;;  %v3681_v58 = vadd.f32 %v3649_v12, %v7623_v15  ;;  %v8385_v37 = vld [vmem:[#allocation47_spill] sm:$0xff] }
 0x74e   :  { %v3654_v15 = vmul.f32 %v3517_v61, %v8385_v37  ;;  %v8388_v19 = vld [vmem:[#allocation59_spill] sm:$0xff] }
 0x74f   :  { %v3700_v51 = vadd.f32 %v3668_v46, %v7764_v25  ;;  %v3697_v49 = vadd.f32 %v3665_v38, %v7758_v60  ;;  %v3713_v26 = vpack.c.bf16 %v3682_v30, %v3681_v58  ;;  %v3683_v60 = vadd.f32 %v3651_v44, %v7630_v22  ;;  %v8390_v38 = vld [vmem:[#allocation49_spill] sm:$0xff]  ;;  %v8393_v44 = vld [vmem:[#allocation51_spill] sm:$0xff] }
 0x750   :  { %v3577_v17 = vpop.permute.xlu1 %3576  ;;  %v3656_v12 = vmul.f32 %v3527_v39, %v8390_v38  ;;  %v3658_v39 = vmul.f32 %v3537_v16, %v8393_v44  ;;  %v8399_v16 = vld [vmem:[#allocation77_spill] sm:$0xff]  ;;  %v8408_v38 = vld [vmem:[#allocation66_spill] sm:$0xff]  ;;  %v8414_v44 = vld [vmem:[#allocation68_spill] sm:$0xff] }
 0x751   :  { %v3666_v13 = vmul.f32 %v3577_v17, %v7141_v59  ;;  %v3684_v59 = vadd.f32 %v3652_v32, %v7617_v9  ;;  %v3722_v25 = vpack.c.bf16 %v3700_v51, %v3699_v50  ;;  %v3686_v17 = vadd.f32 %v3654_v15, %v7674_v1  ;;  %v8394_v1 = vld [vmem:[#allocation61_spill] sm:$0xff] }
 0x752   :  { %v3657_v51 = vmul.f32 %v3532_v2, %v8391_v40  ;;  %v8397_v2 = vld [vmem:[#allocation52_spill] sm:$0xff]  ;;  %v8401_v15 = vld [vmem:[#allocation69_spill] sm:$0xff] }
 0x753   :  { %v3698_v35 = vadd.f32 %v3666_v13, %v7761_v53  ;;  %v3714_v42 = vpack.c.bf16 %v3684_v59, %v3683_v60  ;;  %v3715_v30 = vpack.c.bf16 %v3686_v17, %v3685_v34  ;;  %v3659_v59 = vmul.f32 %v8097_v3, %v8397_v2  ;;  %v8403_v3 = vld [vmem:[#allocation71_spill] sm:$0xff]  ;;  %v8417_v2 = vld [vmem:[#allocation56_spill] sm:$0xff] }
 0x754   :  { %v3602_v33 = vpop.permute.xlu1 %3601 }
 0x755   :  { %v3721_v41 = vpack.c.bf16 %v3698_v35, %v3697_v49  ;;  %v3671_v53 = vmul.f32 %v3602_v33, %v7177_v57  ;;  %v3688_v35 = vadd.f32 %v3656_v12, %v7668_v36  ;;  %v8398_v36 = vld [vmem:[#allocation78_spill] sm:$0xff] }
 0x756   :  { %v3607_v28 = vpop.permute.xlu0 %3606 }
 0x757   :  { %4834 = vmatprep.subr.bf16.mxu0 %v3721_v41  ;;  %v3672_v9 = vmul.f32 %v3607_v28, %v8387_v10  ;;  %v3703_v57 = vadd.f32 %v3671_v53, %v7785_v63  ;;  %v8396_v28 = vld [vmem:[#allocation62_spill] sm:$0xff]  ;;  %v3716_v41 = vpack.c.bf16 %v3688_v35, %v3687_v55 }
 0x758   :  { %v3592_v7 = vpop.permute.xlu1 %3591  ;;  %4835 = vmatpush3.bf16.msra.mxu0 %v3713_v26  ;;  %v3689_v26 = vadd.f32 %v3657_v51, %v7694_v20 }
 0x759   :  { %v3669_v29 = vmul.f32 %v3592_v7, %v8386_v23  ;;  %4836 = vmatprep.subr.bf16.mxu0 %v3722_v25  ;;  %v3704_v13 = vadd.f32 %v3672_v9, %v7782_v21  ;;  %v8395_v21 = vld [vmem:[#allocation64_spill] sm:$0xff]  ;;  %v8400_v7 = vld [vmem:[#allocation53_spill] sm:$0xff]  ;;  %v3691_v9 = vadd.f32 %v3659_v59, %v8403_v3 }
 0x75a   :  { %v3597_v8 = vpop.permute.xlu0 %3596  ;;  %v3660_v37 = vmul.f32 %v8099_v62, %v8400_v7 }
 0x75b   :  { %v3670_v54 = vmul.f32 %v3597_v8, %v8388_v19  ;;  %v3701_v22 = vadd.f32 %v3669_v29, %v7772_v14  ;;  %v8392_v14 = vld [vmem:[#allocation63_spill] sm:$0xff]  ;;  %v3690_v8 = vadd.f32 %v3658_v39, %v8401_v15  ;;  %v8402_v29 = vld [vmem:[#allocation76_spill] sm:$0xff]  ;;  %v8404_v19 = vld [vmem:[#allocation54_spill] sm:$0xff] }
 0x75c   :  { %v3622_v61 = vpop.permute.xlu1 %3621  ;;  %4837 = vmatpush3.bf16.msra.mxu0 %v3714_v42  ;;  %v3692_v34 = vadd.f32 %v3660_v37, %v8405_v47 }
 0x75d   :  { %v3702_v46 = vadd.f32 %v3670_v54, %v7775_v4  ;;  %v3675_v49 = vmul.f32 %v3622_v61, %v8392_v14  ;;  %v3724_v4 = vpack.c.bf16 %v3704_v13, %v3703_v57  ;;  %v3717_v20 = vpack.c.bf16 %v3690_v8, %v3689_v26  ;;  %v8412_v14 = vld [vmem:[#allocation74_spill] sm:$0xff]  ;;  %v8418_v26 = vld [vmem:[#allocation57_spill] sm:$0xff] }
 0x75e   :  { %v3627_v24 = vpop.permute.xlu0 %3626  ;;  %v3718_v17 = vpack.c.bf16 %v3692_v34, %v3691_v9  ;;  %v5370_v34 = vld [vmem:[#allocation27 + $0x10] sm:$0xff]  }
 0x75f   :  { %v3723_v32 = vpack.c.bf16 %v3702_v46, %v3701_v22  ;;  %v3676_v50 = vmul.f32 %v3627_v24, %v8395_v21  ;;  %v3707_v25 = vadd.f32 %v3675_v49, %v8398_v36  ;;  %v8406_v22 = vld [vmem:[#allocation55_spill] sm:$0xff]  ;;  %v8407_v46 = vld [vmem:[#allocation65_spill] sm:$0xff] }
 0x760   :  { %v3612_v63 = vpop.permute.xlu1 %3611  ;;  %v8409_v24 = vld [vmem:[#allocation73_spill] sm:$0xff] }
 0x761   :  { %4838 = vmatprep.subr.bf16.mxu0 %v3723_v32  ;;  %v3673_v33 = vmul.f32 %v3612_v63, %v8394_v1  ;;  %v3708_v42 = vadd.f32 %v3676_v50, %v8402_v29  ;;  %v8410_v32 = vld [vmem:[#allocation79_spill] sm:$0xff]  ;;  %v8416_v50 = vld [vmem:[#allocation81_spill] sm:$0xff] }
 0x762   :  { %v3617_v58 = vpop.permute.xlu0 %3616  ;;  %4839 = vmatpush3.bf16.msra.mxu0 %v3715_v30  ;;  %v8411_v30 = vld [vmem:[#allocation80_spill] sm:$0xff] }
 0x763   :  { %v3674_v0 = vmul.f32 %v3617_v58, %v8396_v28  ;;  %4840 = vmatprep.subr.bf16.mxu0 %v3724_v4  ;;  %v3705_v18 = vadd.f32 %v3673_v33, %v7793_v6  ;;  %v3726_v31 = vpack.c.bf16 %v3708_v42, %v3707_v25  ;;  %v8413_v4 = vld [vmem:[#allocation67_spill] sm:$0xff]  ;;  %v8415_v33 = vld [vmem:[#allocation82_spill] sm:$0xff] }
 0x764   :  { %v3552_v53 = vpop.permute.xlu1 %3551  ;;  %v8419_v25 = vld [vmem:[#allocation75_spill] sm:$0xff] }
 0x765   :  { %v3706_v60 = vadd.f32 %v3674_v0, %v8399_v16  ;;  %v3661_v6 = vmul.f32 %v3552_v53, %v8404_v19  ;;  %v5369_v19 = vld [vmem:[#allocation27 + $0x8] sm:$0xff]  }
 0x766   :  { %v3557_v23 = vpop.permute.xlu0 %3556  ;;  %4841 = vmatpush3.bf16.msra.mxu0 %v3716_v41 }
 0x767   :  { %v3725_v10 = vpack.c.bf16 %v3706_v60, %v3705_v18  ;;  %v3662_v57 = vmul.f32 %v3557_v23, %v8406_v22  ;;  %v3693_v13 = vadd.f32 %v3661_v6, %v8409_v24  ;;  %v8420_v60 = vld [vmem:[#allocation72_spill] sm:$0xff] }
 0x768   :  { %v3632_v54 = vpop.permute.xlu1 %3631  ;;  %v5372_v24 = vld [vmem:[#allocation27 + $0x20] sm:$0xff]  }
 0x769   :  { %4842 = vmatprep.subr.bf16.mxu0 %v3725_v10  ;;  %v3677_v61 = vmul.f32 %v3632_v54, %v8407_v46  ;;  %v3694_v49 = vadd.f32 %v3662_v57, %v8412_v14  ;;  %v5371_v46 = vld [vmem:[#allocation27 + $0x18] sm:$0xff]  }
 0x76a   :  { %v3637_v62 = vpop.permute.xlu0 %3636  ;;  %4843 = vmatpush3.bf16.msra.mxu0 %v3717_v20  ;;  %v5375_v14 = vld [vmem:[#allocation27 + $0x38] sm:$0xff]  }
 0x76b   :  { %v3678_v12 = vmul.f32 %v3637_v62, %v8408_v38  ;;  %4844 = vmatprep.subr.bf16.mxu0 %v3726_v31  ;;  %v3709_v55 = vadd.f32 %v3677_v61, %v8410_v32  ;;  %v3719_v1 = vpack.c.bf16 %v3694_v49, %v3693_v13  ;;  %v5795_v49 = vld [vmem:[#allocation10 + $0x8] sm:$0xff]  }
 0x76c   :  { %v3642_v51 = vpop.permute.xlu1 %3641 }
 0x76d   :  { %v3710_v40 = vadd.f32 %v3678_v12, %v8411_v30  ;;  %v3679_v35 = vmul.f32 %v3642_v51, %v8413_v4  ;;  %v5373_v30 = vld [vmem:[#allocation27 + $0x28] sm:$0xff]   ;;  %v5374_v51 = vld [vmem:[#allocation27 + $0x30] sm:$0xff]   ;;  %v5797_v4 = vld [vmem:[#allocation10 + $0x18] sm:$0xff]  }
 0x76e   :  { %v3647_v63 = vpop.permute.xlu0 %3646  ;;  %4845 = vmatpush3.bf16.msra.mxu0 %v3718_v17 }
 0x76f   :  { %v3680_v39 = vmul.f32 %v3647_v63, %v8414_v44  ;;  %v3727_v58 = vpack.c.bf16 %v3710_v40, %v3709_v55  ;;  %v3711_v21 = vadd.f32 %v3679_v35, %v8415_v33  ;;  %v5794_v40 = vld [vmem:[#allocation10] sm:$0xff]   ;;  %v5796_v63 = vld [vmem:[#allocation10 + $0x10] sm:$0xff]  }
 0x770   :  { %v3562_v0 = vpop.permute.xlu1 %3561  ;;  %v5376_v35 = vld [vmem:[#allocation31] sm:$0xff]   ;;  %v5377_v44 = vld [vmem:[#allocation31 + $0x8] sm:$0xff]  }
 0x771   :  { %v3712_v28 = vadd.f32 %v3680_v39, %v8416_v50  ;;  %4846 = vmatprep.subr.bf16.mxu0 %v3727_v58  ;;  %v3663_v59 = vmul.f32 %v3562_v0, %v8417_v2  ;;  %v4688_v39 = vld [vmem:[#allocation30] ss:$0 sm:$0xff] }
 0x772   :  { %v3567_v41 = vpop.permute.xlu0 %3566  ;;  %4847 = vmatpush3.bf16.msra.mxu0 %v3719_v1 }
 0x773   :  { %v3664_v18 = vmul.f32 %v3567_v41, %v8418_v26  ;;  %v3728_v36 = vpack.c.bf16 %v3712_v28, %v3711_v21  ;;  %v3695_v16 = vadd.f32 %v3663_v59, %v8419_v25 }
 0x775   :  { %v3696_v53 = vadd.f32 %v3664_v18, %v8420_v60  ;;  %4848 = vmatprep.subr.bf16.mxu0 %v3728_v36 }
 0x777   :  { %v3720_v7 = vpack.c.bf16 %v3696_v53, %v3695_v16 }
 0x779   :  { %4849 = vmatpush3.bf16.msra.mxu0 %v3720_v7 }
 0x77a   :  { %5212 = vmatprep.subr.bf16.mxu0 %v5376_v35 }
 0x77c   :  { %4651 = vmatmul.mubr.msk.bf16.vlgmr.msra.gmra.mrb[64].mxu0 %vm8069_vm11, %v6286_v5 }
 0x77d   :  { %4653 = vmatprep.mubr.msk.bf16.mxu0 %vm8073_vm0, %v6286_v5  ;;  %5213 = vmatpush3.bf16.msra.mxu0 %v5376_v35 }
 0x77e   :  { %5214 = vmatprep.subr.bf16.mxu0 %v5377_v44 }
 0x781   :  { %5215 = vmatpush3.bf16.msra.mxu0 %v5377_v44 }
 0x784   :  { %4655 = vmatmul.mubr.msk.bf16.gmra.mrb[68].mxu0 %vm8077_vm1, %v6286_v5 }
 0x785   :  { %4657 = vmatprep.mubr.msk.bf16.mxu0 %vm8081_vm8, %v6286_v5 }
 0x78c   :  { %4659 = vmatmul.mubr.msk.bf16.gmra.mrb[72].mxu0 %vm8085_vm9, %v6286_v5 }
 0x78d   :  { %4661 = vmatprep.mubr.msk.bf16.mxu0 %vm8089_vm15, %v6286_v5 }
 0x794   :  { %4663 = vmatmul.mubr.msk.bf16.gmra.mrb[76].mxu0 %vm8093_vm4, %v6286_v5 }
 0x84f   :  { %v4850_v43 = vpop.f32.mrb[64].mxu0 }
 0x850   :  { %v4851_v37 = vpop.f32.mrb[65].mxu0 }
 0x851   :  { %v8188_v15 = vadd.f32 %v4851_v37, %v4850_v43  ;;  %v4853_v56 = vpop.f32.mrb[66].mxu0 }
 0x852   :  { %v4854_v8 = vpop.f32.mrb[67].mxu0 }
 0x853   :  { %v8190_v23 = vadd.f32 %v4854_v8, %v4853_v56 }
 0x855   :  { %v3925_v5 = vpack.c.bf16 %v8190_v23, %v8188_v15 }
 0x857   :  { %v4856_v11 = vpop.f32.mrb[68].mxu0  ;;  %5180 = vmatprep.mubr.bf16.mxu1 %v3925_v5 }
 0x858   :  { %v4857_v29 = vpop.f32.mrb[69].mxu0 }
 0x859   :  { %v8194_v42 = vadd.f32 %v4857_v29, %v4856_v11  ;;  %v4859_v10 = vpop.f32.mrb[70].mxu0 }
 0x85a   :  { %v4860_v3 = vpop.f32.mrb[71].mxu0 }
 0x85b   :  { %v8196_v9 = vadd.f32 %v4860_v3, %v4859_v10 }
 0x85d   :  { %v3926_v20 = vpack.c.bf16 %v8196_v9, %v8194_v42 }
 0x85f   :  { %v4862_v6 = vpop.f32.mrb[72].mxu0  ;;  %5181 = vmatmul.mubr.bf16.vlgmr.msra.gmra.mrb[96].mxu1 %v3926_v20 }
 0x860   :  { %5189 = vmatpush3.bf16.msra.mxu1 %v5368_v48  ;;  %v4863_v54 = vpop.f32.mrb[73].mxu0 }
 0x861   :  { %v8200_v31 = vadd.f32 %v4863_v54, %v4862_v6  ;;  %v4865_v47 = vpop.f32.mrb[74].mxu0  ;;  %5190 = vmatprep.subr.bf16.mxu1 %v5369_v19 }
 0x862   :  { %v4866_v22 = vpop.f32.mrb[75].mxu0 }
 0x863   :  { %v8202_v57 = vadd.f32 %v4866_v22, %v4865_v47 }
 0x864   :  { %5191 = vmatpush3.bf16.msra.mxu1 %v5369_v19 }
 0x865   :  { %v3927_v62 = vpack.c.bf16 %v8202_v57, %v8200_v31  ;;  %5192 = vmatprep.subr.bf16.mxu1 %v5370_v34 }
 0x867   :  { %v4868_v61 = vpop.f32.mrb[76].mxu0  ;;  %5184 = vmatprep.mubr.bf16.mxu1 %v3927_v62 }
 0x868   :  { %5193 = vmatpush3.bf16.msra.mxu1 %v5370_v34  ;;  %v4869_v38 = vpop.f32.mrb[77].mxu0 }
 0x869   :  { %v8206_v12 = vadd.f32 %v4869_v38, %v4868_v61  ;;  %v4871_v17 = vpop.f32.mrb[78].mxu0  ;;  %5194 = vmatprep.subr.bf16.mxu1 %v5371_v46 }
 0x86a   :  { %v4872_v13 = vpop.f32.mrb[79].mxu0 }
 0x86b   :  { %v8208_v32 = vadd.f32 %v4872_v13, %v4871_v17 }
 0x86c   :  { %5195 = vmatpush3.bf16.msra.mxu1 %v5371_v46 }
 0x86d   :  { %v3928_v55 = vpack.c.bf16 %v8208_v32, %v8206_v12  ;;  %5196 = vmatprep.subr.bf16.mxu1 %v5372_v24 }
 0x86f   :  { %5185 = vmatmul.mubr.bf16.gmra.mrb[100].mxu1 %v3928_v55 }
 0x870   :  { %5197 = vmatpush3.bf16.msra.mxu1 %v5372_v24  ;;  %5204 = vmatprep.mubr.bf16.mxu1 %v5794_v40 }
 0x871   :  { %5198 = vmatprep.subr.bf16.mxu1 %v5373_v30 }
 0x874   :  { %5199 = vmatpush3.bf16.msra.mxu1 %v5373_v30 }
 0x875   :  { %5200 = vmatprep.subr.bf16.mxu1 %v5374_v51 }
 0x878   :  { %5201 = vmatpush3.bf16.msra.mxu1 %v5374_v51 }
 0x879   :  { %5202 = vmatprep.subr.bf16.mxu1 %v5375_v14 }
 0x87c   :  { %5203 = vmatpush3.bf16.msra.mxu1 %v5375_v14 }
 0x87f   :  { %5205 = vmatmul.mubr.bf16.vlgmr.msra.gmra.mrb[96].mxu1 %v5795_v49 }
 0x880   :  { %5208 = vmatprep.mubr.bf16.mxu1 %v5796_v63 }
 0x887   :  { %5209 = vmatmul.mubr.bf16.gmra.mrb[100].mxu1 %v5797_v4 }
 0x952   :  { %v5206_v58 = vpop.f32.mrb[96].mxu1 }
 0x953   :  { %v4180_v1 = vadd.f32 %v5206_v58, %v4688_v39  ;;  %v4140_v33 = vpop.f32.mrb[97].mxu1 }
 0x954   :  { %v4178_v21 = vadd.f32 %v4688_v39, %v4140_v33  ;;  %v5207_v50 = vpop.f32.mrb[98].mxu1 }
 0x955   :  { %v4691_v28 = vmul.f32 -1.442695, %v4180_v1  ;;  %v4181_v0 = vadd.f32 %v5207_v50, %v4688_v39  ;;  %v4143_v41 = vpop.f32.mrb[99].mxu1 }
 0x956   :  { %v4689_v2 = vmul.f32 -1.442695, %v4178_v21  ;;  %v4179_v59 = vadd.f32 %v4688_v39, %v4143_v41 }
 0x957   :  { %5762 = vpow2.f32 %v4691_v28  ;;  %v4692_v26 = vmul.f32 -1.442695, %v4181_v0 }
 0x958   :  { %5764 = vpow2.f32 %v4689_v2  ;;  %v4690_v18 = vmul.f32 -1.442695, %v4179_v59 }
 0x959   :  { %5766 = vpow2.f32 %v4692_v26 }
 0x95a   :  { %5768 = vpow2.f32 %v4690_v18  ;;  %v5210_v36 = vpop.f32.mrb[100].mxu1 }
 0x95b   :  { %v4184_v25 = vadd.f32 %v5210_v36, %v4688_v39  ;;  %v4156_v16 = vpop.f32.mrb[101].mxu1 }
 0x95c   :  { %v4182_v60 = vadd.f32 %v4688_v39, %v4156_v16  ;;  %v5211_v53 = vpop.f32.mrb[102].mxu1 }
 0x95d   :  { %v4695_v7 = vmul.f32 -1.442695, %v4184_v25  ;;  %v4185_v52 = vadd.f32 %v5211_v53, %v4688_v39  ;;  %v4159_v45 = vpop.f32.mrb[103].mxu1 }
 0x95e   :  { %v4693_v27 = vmul.f32 -1.442695, %v4182_v60  ;;  %v4183_v48 = vadd.f32 %v4688_v39, %v4159_v45 }
 0x95f   :  { %5770 = vpow2.f32 %v4695_v7  ;;  %v4696_v43 = vmul.f32 -1.442695, %v4185_v52 }
 0x960   :  { %5772 = vpow2.f32 %v4693_v27  ;;  %v4694_v37 = vmul.f32 -1.442695, %v4183_v48 }
 0x961   :  { %v5763_v56 = vpop.eup %5762  ;;  %5774 = vpow2.f32 %v4696_v43 }
 0x962   :  { %v5765_v8 = vpop.eup %5764  ;;  %v4212_v5 = vadd.f32 1.0, %v5763_v56  ;;  %5776 = vpow2.f32 %v4694_v37 }
 0x963   :  { %v5767_v11 = vpop.eup %5766  ;;  %v4210_v29 = vadd.f32 1.0, %v5765_v8 }
 0x964   :  { %v5769_v10 = vpop.eup %5768  ;;  %5778 = vrcp.f32 %v4212_v5  ;;  %v4213_v3 = vadd.f32 1.0, %v5767_v11 }
 0x965   :  { %5780 = vrcp.f32 %v4210_v29  ;;  %v4211_v20 = vadd.f32 1.0, %v5769_v10 }
 0x966   :  { %5782 = vrcp.f32 %v4213_v3 }
 0x967   :  { %5784 = vrcp.f32 %v4211_v20 }
 0x969   :  { %v5771_v19 = vpop.eup %5770 }
 0x96a   :  { %v5773_v6 = vpop.eup %5772  ;;  %v4216_v54 = vadd.f32 1.0, %v5771_v19 }
 0x96b   :  { %v5775_v47 = vpop.eup %5774  ;;  %v4214_v34 = vadd.f32 1.0, %v5773_v6 }
 0x96c   :  { %v5777_v22 = vpop.eup %5776  ;;  %5786 = vrcp.f32 %v4216_v54  ;;  %v4217_v62 = vadd.f32 1.0, %v5775_v47 }
 0x96d   :  { %5788 = vrcp.f32 %v4214_v34  ;;  %v4215_v46 = vadd.f32 1.0, %v5777_v22 }
 0x96e   :  { %v5779_v61 = vpop.eup %5778  ;;  %5790 = vrcp.f32 %v4217_v62 }
 0x96f   :  { %v5781_v38 = vpop.eup %5780  ;;  %5792 = vrcp.f32 %v4215_v46  ;;  %v4236_v13 = vmul.f32 %v5779_v61, %v4180_v1  ;;  %v3840_v1 = vpop.permute.xlu1 %3839 }
 0x970   :  { %v5783_v17 = vpop.eup %5782  ;;  %v4234_v30 = vmul.f32 %v5781_v38, %v4178_v21  ;;  %v3845_v21 = vpop.permute.xlu0 %3844  ;;  %v3877_v26 = vmul.f32 %v8188_v15, %v3840_v1 }
 0x971   :  { %v5785_v24 = vpop.eup %5784  ;;  %v4237_v55 = vmul.f32 %v5783_v17, %v4181_v0 }
 0x972   :  { %v4235_v40 = vmul.f32 %v5785_v24, %v4179_v59  ;;  %v4664_v53 = vclamps-f32 %v3877_v26, 100.0 }
 0x973   :  { %v4243_v51 = vpack.c.bf16 %v4237_v55, %v4236_v13  ;;  %v3850_v0 = vpop.permute.xlu1 %3849 }
 0x974   :  { %v4242_v14 = vpack.c.bf16 %v4235_v40, %v4234_v30  ;;  %v3855_v41 = vpop.permute.xlu0 %3854  ;;  %v3879_v2 = vmul.f32 %v8194_v42, %v3850_v0  ;;  %v8421_v42 = vld [vmem:[#allocation46_spill] sm:$0xff] }
 0x975   :  { %v3880_v18 = vmul.f32 %v8196_v9, %v3855_v41  ;;  %vm8422_vm4 = vcmp.lt.s32.totalorder %v8421_v42, 3 }
 0x976   :  { %v5787_v49 = vpop.eup %5786  ;;  %5216 = vmatprep.mubr.msk.bf16.mxu0 %vm2409_vm5, %v4242_v14  ;;  %v4666_v16 = vclamps-f32 %v3879_v2, 100.0  ;;  %vm8424_vm11 = vmmov %vm8422_vm4 }
 0x977   :  { %v5789_v63 = vpop.eup %5788  ;;  %5217 = vmatmul.mubr.msk.bf16.vlgmr.msra.gmra.mrb[80].mxu0 %vm2409_vm5, %v4243_v51  ;;  %v4240_v44 = vmul.f32 %v5787_v49, %v4184_v25  ;;  %v3860_v59 = vpop.permute.xlu1 %3859  ;;  %v3878_v25 = vmul.f32 %v8190_v23, %v3845_v21  ;;  %v4667_v7 = vclamps-f32 %v3880_v18, 100.0  ;;  %vm8425_vm0 = vmmov %vm8422_vm4 }
 0x978   :  { %v5791_v4 = vpop.eup %5790  ;;  %v4238_v58 = vmul.f32 %v5789_v63, %v4182_v60  ;;  %v3865_v36 = vpop.permute.xlu0 %3864  ;;  %v4697_v60 = vld [vmem:[#allocation33] ss:$0 sm:$0xff]  ;;  %v3903_v56 = vsel %vm8422_vm4, %v4666_v16, 0.0  ;;  %v3881_v5 = vmul.f32 %v8200_v31, %v3860_v59  ;;  %vm8426_vm1 = vmmov %vm8425_vm0 }
 0x979   :  { %v5793_v35 = vpop.eup %5792  ;;  %v4241_v39 = vmul.f32 %v5791_v4, %v4185_v52  ;;  %v4665_v27 = vclamps-f32 %v3878_v25, 100.0  ;;  %v3882_v6 = vmul.f32 %v8202_v57, %v3865_v36  ;;  %vm8427_vm2 = vmmov %vm8425_vm0 }
 0x97a   :  { %v4239_v33 = vmul.f32 %v5793_v35, %v4183_v48  ;;  %v4668_v22 = vclamps-f32 %v3881_v5, 100.0  ;;  %vm8428_vm3 = vmmov %vm8425_vm0 }
 0x97b   :  { %v4245_v50 = vpack.c.bf16 %v4241_v39, %v4240_v44  ;;  %v3870_v45 = vpop.permute.xlu1 %3869  ;;  %v3902_v31 = vsel %vm8425_vm0, %v4665_v27, 0.0  ;;  %v4669_v46 = vclamps-f32 %v3882_v6, 100.0  ;;  %vm8429_vm6 = vmmov %vm8425_vm0 }
 0x97c   :  { %v4244_v28 = vpack.c.bf16 %v4239_v33, %v4238_v58  ;;  %v3883_v37 = vmul.f32 %v8206_v12, %v3870_v45  ;;  %v3875_v9 = vpop.permute.xlu0 %3874  ;;  %v3904_v12 = vsel %vm8424_vm11, %v4667_v7, 0.0  ;;  %v3905_v55 = vsel %vm8427_vm2, %v4668_v22, 0.0 }
 0x97d   :  { %v3884_v3 = vmul.f32 %v8208_v32, %v3875_v9  ;;  %v3906_v4 = vsel %vm8429_vm6, %v4669_v46, 0.0 }
 0x97e   :  { %5220 = vmatprep.mubr.msk.bf16.mxu0 %vm2409_vm5, %v4244_v28  ;;  %v4670_v47 = vclamps-f32 %v3883_v37, 100.0 }
 0x97f   :  { %5221 = vmatmul.mubr.msk.bf16.gmra.mrb[84].mxu0 %vm2409_vm5, %v4245_v50  ;;  %vm8423_vm5 = vmmov %vm8422_vm4  ;;  %v4671_v62 = vclamps-f32 %v3884_v3, 100.0 }
 0x980   :  { %v3901_v11 = vsel %vm8423_vm5, %v4664_v53, 0.0  ;;  %v3907_v17 = vsel %vm8426_vm1, %v4670_v47, 0.0 }
 0x981   :  { %v3908_v14 = vsel %vm8428_vm3, %v4671_v62, 0.0 }
 0xa4a   :  { %v5218_v52 = vpop.f32.mrb[80].mxu0 }
 0xa4b   :  { %v4324_v48 = vadd.f32 %v5218_v52, %v4697_v60  ;;  %v4315_v43 = vpop.f32.mrb[81].mxu0 }
 0xa4c   :  { %v4316_v15 = vadd.f32 %v4697_v60, %v4315_v43  ;;  %v5219_v8 = vpop.f32.mrb[82].mxu0 }
 0xa4d   :  { %v4348_v23 = vadd.f32 %v4324_v48, %v3903_v56  ;;  %v4327_v29 = vadd.f32 %v5219_v8, %v4697_v60  ;;  %v4318_v10 = vpop.f32.mrb[83].mxu0 }
 0xa4e   :  { %v4346_v20 = vadd.f32 %v4316_v15, %v3901_v11  ;;  %v4319_v19 = vadd.f32 %v4697_v60, %v4318_v10 }
 0xa4f   :  { %4356 = vst [vmem:[#allocation34 + $0x10] sm:$0xff] %v4348_v23  ;;  %v4349_v54 = vadd.f32 %v4327_v29, %v3904_v12 }
 0xa50   :  { %4354 = vst [vmem:[#allocation34] sm:$0xff] %v4346_v20  ;;  %v4347_v34 = vadd.f32 %v4319_v19, %v3902_v31 }
 0xa51   :  { %4357 = vst [vmem:[#allocation34 + $0x18] sm:$0xff] %v4349_v54 }
 0xa52   :  { %4355 = vst [vmem:[#allocation34 + $0x8] sm:$0xff] %v4347_v34  ;;  %v5222_v32 = vpop.f32.mrb[84].mxu0 }
 0xa53   :  { %v4340_v61 = vadd.f32 %v5222_v32, %v4697_v60  ;;  %v4331_v38 = vpop.f32.mrb[85].mxu0 }
 0xa54   :  { %v4332_v57 = vadd.f32 %v4697_v60, %v4331_v38  ;;  %v5223_v24 = vpop.f32.mrb[86].mxu0 }
 0xa55   :  { %v4352_v13 = vadd.f32 %v4340_v61, %v3907_v17  ;;  %v4343_v30 = vadd.f32 %v5223_v24, %v4697_v60  ;;  %v4334_v40 = vpop.f32.mrb[87].mxu0 }
 0xa56   :  { %v4350_v51 = vadd.f32 %v4332_v57, %v3905_v55  ;;  %v4335_v49 = vadd.f32 %v4697_v60, %v4334_v40 }
 0xa57   :  { %4360 = vst [vmem:[#allocation34 + $0x30] sm:$0xff] %v4352_v13  ;;  %v4353_v63 = vadd.f32 %v4343_v30, %v3908_v14 }
 0xa58   :  { %4358 = vst [vmem:[#allocation34 + $0x20] sm:$0xff] %v4350_v51  ;;  %v4351_v35 = vadd.f32 %v4335_v49, %v3906_v4 }
 0xa59   :  { %4361 = vst [vmem:[#allocation34 + $0x38] sm:$0xff] %v4353_v63 }
 0xa5a   :  { %4359 = vst [vmem:[#allocation34 + $0x28] sm:$0xff] %v4351_v35 }
 0xa5b   :  { %6227 = shalt.err (!%p6224_p2)
}
 0xa5c   :  { %s8430_s28 = sld [smem:[#allocation88_spill]] }
 0xa62   :  { %s6228_s9 = scalar_lea.hbm %s8430_s28, 1024 }
 0xa63   :  { %p6229_p3 = scmp.ne.s32.totalorder %s8430_s28, %s6228_s9  ;;  %p6232_p4 = scmp.lt.u32.totalorder %s6228_s9, %s8430_s28 }
 0xa65   :  { %p6234_p5 = pnand %p6232_p4, %p6229_p3 }
 0xa67   :  { %6237 = shalt.err (!%p6234_p5)
}
 0xa68   :  { %4373 = dma.vmem_to_hbm [thread:$0]  %s4368_s16, 1024, %s8430_s28, [#allocation6], %s6272_s18, %s6272_s18, %s6273_s4  }
 0xa69   :  { %6258 = dma.done.wait [#allocation6], 1024  }
 0xa6a   :  { %6259 = vsyncadd [#allocation6], 4294966272 }
 0xa6b   :  { %4377 = vsyncpa [#allocation5], 1 }
 0xa6c   :  { %4378 = vsyncpa [#allocation8], 1 }
 0xa6d   :  { %4379 = vsyncpa [#allocation11], 1 }
 0xa6e   :  { %4380 = vsyncpa [#allocation14], 1 }
 0xa6f   :  { %4381 = vsyncpa [#allocation17], 1 }
 0xa70   :  { %4382 = vsyncpa [#allocation20], 1 }
 0xa71   :  { %4383 = vsyncpa [#allocation23], 1 }
 0xa72   :  { %4384 = vsyncpa [#allocation26], 1 }
 0xa73   :  { %4385 = vsyncpa [#allocation29], 1 }
 0xa74   :  { %4386 = vsyncpa [#allocation32], 1 }
 0xa75   :  { %4387 = vsyncpa [#allocation6], 1 }

// kernel: tpu_custom_call.1
= control target key start
LH: loop header
LB: loop body
LE: loop exit
PB: predicated region body
PF: predicated region fallthrough
CT: control target
= control target key end

     0   :  { %s8255_s0 = inlined_call_operand.hbm [shape: s32[256,2], index: 0, kind: input, shape index: {}]   ;;  %s8256_s1 = inlined_call_operand.hbm [shape: s32[1,256], index: 1, kind: input, shape index: {}]   ;;  %s8257_s2 = inlined_call_operand.hbm [shape: f32[256,32], index: 2, kind: input, shape index: {}]   ;;  %s8258_s3 = inlined_call_operand.hbm [shape: bf16[64,128], index: 3, kind: input, shape index: {}]   ;;  %s8259_s4 = inlined_call_operand.hbm [shape: f32[64,1], index: 4, kind: input, shape index: {}]   ;;  %s8260_s5 = inlined_call_operand.hbm [shape: f32[1,32], index: 5, kind: input, shape index: {}]   ;;  %s8261_s6 = inlined_call_operand.hbm [shape: bf16[128,32], index: 6, kind: input, shape index: {}]   ;;  %s8262_s7 = inlined_call_operand.hbm [shape: bf16[128,32], index: 7, kind: input, shape index: {}]   ;;  %s8263_s8 = inlined_call_operand.hbm [shape: f32[1,32], index: 8, kind: input, shape index: {}]   ;;  %s8264_s9 = inlined_call_operand.hbm [shape: bf16[32,128], index: 9, kind: input, shape index: {}]   ;;  %s8265_s10 = inlined_call_operand.hbm [shape: f32[1,128], index: 10, kind: input, shape index: {}]   ;;  %s8266_s11 = inlined_call_operand.hbm [shape: bf16[128,32], index: 11, kind: input, shape index: {}]   ;;  %s8267_s12 = inlined_call_operand.hbm [shape: f32[1,32], index: 12, kind: input, shape index: {}]   ;;  %s8268_s13 = inlined_call_operand.hbm [shape: f32[1,32], index: 13, kind: input, shape index: {}]   ;;  %s8269_s14 = inlined_call_operand.<no memory space> [shape: f32[1,1], index: 14, kind: input, shape index: {}]   ;;  %s8270_s15 = inlined_call_operand.hbm [shape: bf16[128,32], index: 15, kind: input, shape index: {}]   ;;  %s8271_s16 = inlined_call_operand.hbm [shape: bf16[128,32], index: 16, kind: input, shape index: {}]   ;;  %s8272_s17 = inlined_call_operand.hbm [shape: f32[1,32], index: 17, kind: input, shape index: {}]   ;;  %s8273_s18 = inlined_call_operand.hbm [shape: bf16[32,128], index: 18, kind: input, shape index: {}]   ;;  %s8274_s19 = inlined_call_operand.hbm [shape: f32[1,128], index: 19, kind: input, shape index: {}]   ;;  %s8275_s20 = inlined_call_operand.hbm [shape: f32[64,128], index: 20, kind: output, shape index: {}]  }
   0x1   :  { %8322 = sst [smem:[#allocation83_spill]] %s8255_s0  ;;  %v25_v0 = vstv %s8269_s14 }
   0x2   :  { %8323 = sst [smem:[#allocation84_spill]] %s8256_s1  ;;  %26 = vst [vmem:[#allocation3] sm:$0x1] %v25_v0 }
   0x3   :  { %8324 = sst [smem:[#allocation85_spill]] %s8257_s2 }
   0x4   :  { %8325 = sst [smem:[#allocation86_spill]] %s8258_s3 }
   0x5   :  { %8326 = sst [smem:[#allocation87_spill]] %s8259_s4 }
   0x6   :  { %8327 = sst [smem:[#allocation88_spill]] %s8275_s20 }
   0x7   :  { %27 = vsyncpa [#allocation5], 0 }
   0x8   :  { %28 = vsyncpa [#allocation8], 0 }
   0x9   :  { %29 = vsyncpa [#allocation11], 0 }
   0xa   :  { %30 = vsyncpa [#allocation14], 0 }
   0xb   :  { %31 = vsyncpa [#allocation17], 0 }
   0xc   :  { %32 = vsyncpa [#allocation20], 0 }
   0xd   :  { %33 = vsyncpa [#allocation23], 0 }
   0xe   :  { %34 = vsyncpa [#allocation26], 0 }
   0xf   :  { %35 = vsyncpa [#allocation29], 0 }
  0x10   :  { %36 = vsyncpa [#allocation32], 0 }
  0x11   :  { %37 = vsyncpa [#allocation6], 0  ;;  %s6260_s23 = smov [#allocation7]   ;;  %s6261_s2 = smov [#allocation10]  }
  0x12   :  { %s56_s24 = sshll.u32 %s6260_s23, 4  ;;  %s77_s25 = sshll.u32 %s6261_s2, 4  ;;  %s57_s24 = int_to_ptr.vmem [resolvable:$true] %s56_s24  ;;  %s6396_s25 = int_to_ptr.vmem [resolvable:$true] %s77_s25 }
  0x13   :  { %s8328_s26 = sld [smem:[#allocation84_spill]] }
  0x19   :  { %s5798_s27 = scalar_lea.hbm %s8328_s26, 32 }
  0x1a   :  { %p5799_p0 = scmp.ne.s32.totalorder %s8328_s26, %s5798_s27  ;;  %p5802_p1 = scmp.lt.u32.totalorder %s5798_s27, %s8328_s26 }
  0x1c   :  { %p5804_p2 = pnand %p5802_p1, %p5799_p0 }
  0x1e   :  { %5807 = shalt.err (!%p5804_p2)
}
  0x1f   :  { %s5808_s0 = scalar_lea.vmem %s57_s24, 32  ;;  %p5813_p4 = scmp.lt.s32.totalorder %s57_s24, %s57_s24 }
  0x20   :  { %p5809_p3 = scmp.ne.s32.totalorder %s57_s24, %s5808_s0  ;;  %p5814_p5 = scmp.lt.s32.totalorder %s5808_s0, %s5808_s0 }
  0x22   :  { %p5815_p6 = por %p5814_p5, %p5813_p4 }
  0x24   :  { %p5816_p7 = pnand %p5815_p6, %p5809_p3 }
  0x26   :  { %5819 = shalt.err (!%p5816_p7)
}
  0x27   :  { %59 = dma.hbm_to_vmem [thread:$0]  %s8328_s26, 32, %s57_s24, [#allocation8]  }
  0x28   :  { %s8329_s2 = sld [smem:[#allocation86_spill]] }
  0x2e   :  { %s5820_s14 = scalar_lea.hbm %s8329_s2, 512 }
  0x2f   :  { %p5821_p8 = scmp.ne.s32.totalorder %s8329_s2, %s5820_s14  ;;  %p5824_p9 = scmp.lt.u32.totalorder %s5820_s14, %s8329_s2 }
  0x31   :  { %p5826_p10 = pnand %p5824_p9, %p5821_p8 }
  0x33   :  { %5829 = shalt.err (!%p5826_p10)
}
  0x34   :  { %s5830_s29 = scalar_lea.vmem %s6396_s25, 512  ;;  %p5835_p12 = scmp.lt.s32.totalorder %s6396_s25, %s6396_s25 }
  0x35   :  { %p5831_p11 = scmp.ne.s32.totalorder %s6396_s25, %s5830_s29  ;;  %p5836_p13 = scmp.lt.s32.totalorder %s5830_s29, %s5830_s29 }
  0x37   :  { %p5837_p0 = por %p5836_p13, %p5835_p12 }
  0x39   :  { %p5838_p1 = pnand %p5837_p0, %p5831_p11 }
  0x3b   :  { %5841 = shalt.err (!%p5838_p1)
}
  0x3c   :  { %s6262_s24 = smov 64   ;;  %s6263_s26 = smov 4  }
  0x3d   :  { %83 = dma.hbm_to_vmem [thread:$0]  %s8329_s2, 512, %s6396_s25, [#allocation11], %s6262_s24, %s6262_s24, %s6263_s26  }
  0x3e   :  { %s6264_s21 = smov [#allocation13]   ;;  %s6265_s22 = smov [#allocation16]  }
  0x3f   :  { %s102_s1 = sshll.u32 %s6264_s21, 4  ;;  %s123_s23 = sshll.u32 %s6265_s22, 4  ;;  %s103_s1 = int_to_ptr.vmem [resolvable:$true] %s102_s1  ;;  %s6430_s23 = int_to_ptr.vmem [resolvable:$true] %s123_s23 }
  0x40   :  { %s5842_s28 = scalar_lea.hbm %s8260_s5, 16 }
  0x41   :  { %p5843_p2 = scmp.ne.s32.totalorder %s8260_s5, %s5842_s28  ;;  %p5846_p3 = scmp.lt.u32.totalorder %s5842_s28, %s8260_s5 }
  0x43   :  { %p5848_p4 = pnand %p5846_p3, %p5843_p2 }
  0x45   :  { %5851 = shalt.err (!%p5848_p4)
}
  0x46   :  { %s5852_s25 = scalar_lea.vmem %s103_s1, 16  ;;  %s5856_s2 = scalar_lea.vmem %s103_s1, 32 }
  0x47   :  { %p5853_p5 = scmp.ne.s32.totalorder %s103_s1, %s5852_s25  ;;  %p5857_p6 = scmp.lt.s32.totalorder %s103_s1, %s103_s1 }
  0x48   :  { %p5858_p7 = scmp.lt.s32.totalorder %s5856_s2, %s5852_s25 }
  0x4a   :  { %p5859_p8 = por %p5858_p7, %p5857_p6 }
  0x4c   :  { %p5860_p9 = pnand %p5859_p8, %p5853_p5 }
  0x4e   :  { %5863 = shalt.err (!%p5860_p9)
}
  0x4f   :  { %105 = dma.hbm_to_vmem [thread:$0]  %s8260_s5, 16, %s103_s1, [#allocation14]  }
  0x50   :  { %s5864_s14 = scalar_lea.hbm %s8262_s7, 1024 }
  0x51   :  { %p5865_p10 = scmp.ne.s32.totalorder %s8262_s7, %s5864_s14  ;;  %p5868_p11 = scmp.lt.u32.totalorder %s5864_s14, %s8262_s7 }
  0x53   :  { %p5870_p12 = pnand %p5868_p11, %p5865_p10 }
  0x55   :  { %5873 = shalt.err (!%p5870_p12)
}
  0x56   :  { %s5874_s4 = scalar_lea.vmem %s6430_s23, 1024  ;;  %p5879_p0 = scmp.lt.s32.totalorder %s6430_s23, %s6430_s23 }
  0x57   :  { %p5875_p13 = scmp.ne.s32.totalorder %s6430_s23, %s5874_s4  ;;  %p5880_p1 = scmp.lt.s32.totalorder %s5874_s4, %s5874_s4 }
  0x59   :  { %p5881_p2 = por %p5880_p1, %p5879_p0 }
  0x5b   :  { %p5882_p3 = pnand %p5881_p2, %p5875_p13 }
  0x5d   :  { %5885 = shalt.err (!%p5882_p3)
}
  0x5e   :  { %129 = dma.hbm_to_vmem [thread:$0]  %s8262_s7, 1024, %s6430_s23, [#allocation17], %s6262_s24, %s6262_s24, %s6263_s26  }
  0x5f   :  { %s6266_s29 = smov [#allocation19]   ;;  %s6267_s2 = smov [#allocation22]  }
  0x60   :  { %s145_s25 = sshll.u32 %s6266_s29, 4  ;;  %s167_s30 = sshll.u32 %s6267_s2, 4  ;;  %s146_s25 = int_to_ptr.vmem [resolvable:$true] %s145_s25  ;;  %s6464_s30 = int_to_ptr.vmem [resolvable:$true] %s167_s30 }
  0x61   :  { %s5886_s22 = scalar_lea.hbm %s8264_s9, 256 }
  0x62   :  { %p5887_p4 = scmp.ne.s32.totalorder %s8264_s9, %s5886_s22  ;;  %p5890_p5 = scmp.lt.u32.totalorder %s5886_s22, %s8264_s9 }
  0x64   :  { %p5892_p6 = pnand %p5890_p5, %p5887_p4 }
  0x66   :  { %5895 = shalt.err (!%p5892_p6)
}
  0x67   :  { %s5896_s7 = scalar_lea.vmem %s146_s25, 256  ;;  %p5901_p8 = scmp.lt.s32.totalorder %s146_s25, %s146_s25 }
  0x68   :  { %p5897_p7 = scmp.ne.s32.totalorder %s146_s25, %s5896_s7  ;;  %p5902_p9 = scmp.lt.s32.totalorder %s5896_s7, %s5896_s7 }
  0x6a   :  { %p5903_p10 = por %p5902_p9, %p5901_p8 }
  0x6c   :  { %p5904_p11 = pnand %p5903_p10, %p5897_p7 }
  0x6e   :  { %5907 = shalt.err (!%p5904_p11)
}
  0x6f   :  { %151 = dma.hbm_to_vmem [thread:$0]  %s8264_s9, 256, %s146_s25, [#allocation20], %s6262_s24, %s6262_s24, %s6263_s26  }
  0x70   :  { %s5908_s1 = scalar_lea.hbm %s8266_s11, 1024 }
  0x71   :  { %p5909_p12 = scmp.ne.s32.totalorder %s8266_s11, %s5908_s1  ;;  %p5912_p13 = scmp.lt.u32.totalorder %s5908_s1, %s8266_s11 }
  0x73   :  { %p5914_p0 = pnand %p5912_p13, %p5909_p12 }
  0x75   :  { %5917 = shalt.err (!%p5914_p0)
}
  0x76   :  { %s5918_s22 = scalar_lea.vmem %s6464_s30, 1024  ;;  %p5923_p2 = scmp.lt.s32.totalorder %s6464_s30, %s6464_s30 }
  0x77   :  { %p5919_p1 = scmp.ne.s32.totalorder %s6464_s30, %s5918_s22  ;;  %p5924_p3 = scmp.lt.s32.totalorder %s5918_s22, %s5918_s22 }
  0x79   :  { %p5925_p4 = por %p5924_p3, %p5923_p2 }
  0x7b   :  { %p5926_p5 = pnand %p5925_p4, %p5919_p1 }
  0x7d   :  { %5929 = shalt.err (!%p5926_p5)
}
  0x7e   :  { %173 = dma.hbm_to_vmem [thread:$0]  %s8266_s11, 1024, %s6464_s30, [#allocation23], %s6262_s24, %s6262_s24, %s6263_s26  }
  0x7f   :  { %s6268_s14 = smov [#allocation25]   ;;  %s6269_s3 = smov [#allocation28]  }
  0x80   :  { %s190_s20 = sshll.u32 %s6268_s14, 4  ;;  %s213_s28 = sshll.u32 %s6269_s3, 4  ;;  %s191_s20 = int_to_ptr.vmem [resolvable:$true] %s190_s20  ;;  %s6501_s28 = int_to_ptr.vmem [resolvable:$true] %s213_s28 }
  0x81   :  { %s5930_s27 = scalar_lea.hbm %s8268_s13, 16 }
  0x82   :  { %p5931_p6 = scmp.ne.s32.totalorder %s8268_s13, %s5930_s27  ;;  %p5934_p7 = scmp.lt.u32.totalorder %s5930_s27, %s8268_s13 }
  0x84   :  { %p5936_p8 = pnand %p5934_p7, %p5931_p6 }
  0x86   :  { %5939 = shalt.err (!%p5936_p8)
}
  0x87   :  { %s5940_s11 = scalar_lea.vmem %s191_s20, 16  ;;  %s5944_s30 = scalar_lea.vmem %s191_s20, 32 }
  0x88   :  { %p5941_p9 = scmp.ne.s32.totalorder %s191_s20, %s5940_s11  ;;  %p5945_p10 = scmp.lt.s32.totalorder %s191_s20, %s191_s20 }
  0x89   :  { %p5946_p11 = scmp.lt.s32.totalorder %s5944_s30, %s5940_s11 }
  0x8b   :  { %p5947_p12 = por %p5946_p11, %p5945_p10 }
  0x8d   :  { %p5948_p13 = pnand %p5947_p12, %p5941_p9 }
  0x8f   :  { %5951 = shalt.err (!%p5948_p13)
}
  0x90   :  { %193 = dma.hbm_to_vmem [thread:$0]  %s8268_s13, 16, %s191_s20, [#allocation26]  }
  0x91   :  { %s5952_s9 = scalar_lea.hbm %s8271_s16, 1024 }
  0x92   :  { %p5953_p0 = scmp.ne.s32.totalorder %s8271_s16, %s5952_s9  ;;  %p5956_p1 = scmp.lt.u32.totalorder %s5952_s9, %s8271_s16 }
  0x94   :  { %p5958_p2 = pnand %p5956_p1, %p5953_p0 }
  0x96   :  { %5961 = shalt.err (!%p5958_p2)
}
  0x97   :  { %s5962_s23 = scalar_lea.vmem %s6501_s28, 1024  ;;  %p5967_p4 = scmp.lt.s32.totalorder %s6501_s28, %s6501_s28 }
  0x98   :  { %p5963_p3 = scmp.ne.s32.totalorder %s6501_s28, %s5962_s23  ;;  %p5968_p5 = scmp.lt.s32.totalorder %s5962_s23, %s5962_s23 }
  0x9a   :  { %p5969_p6 = por %p5968_p5, %p5967_p4 }
  0x9c   :  { %p5970_p7 = pnand %p5969_p6, %p5963_p3 }
  0x9e   :  { %5973 = shalt.err (!%p5970_p7)
}
  0x9f   :  { %219 = dma.hbm_to_vmem [thread:$0]  %s8271_s16, 1024, %s6501_s28, [#allocation29], %s6262_s24, %s6262_s24, %s6263_s26  }
  0xa0   :  { %s6270_s27 = smov [#allocation31]   ;;  %s6271_s5 = smov [#allocation4]  }
  0xa1   :  { %s235_s4 = sshll.u32 %s6270_s27, 4  ;;  %s43_s1 = sshll.u32 %s6271_s5, 4  ;;  %s236_s4 = int_to_ptr.vmem [resolvable:$true] %s235_s4  ;;  %s6535_s1 = int_to_ptr.vmem [resolvable:$true] %s43_s1 }
  0xa2   :  { %s5974_s30 = scalar_lea.hbm %s8273_s18, 256 }
  0xa3   :  { %p5975_p8 = scmp.ne.s32.totalorder %s8273_s18, %s5974_s30  ;;  %p5978_p9 = scmp.lt.u32.totalorder %s5974_s30, %s8273_s18 }
  0xa5   :  { %p5980_p10 = pnand %p5978_p9, %p5975_p8 }
  0xa7   :  { %5983 = shalt.err (!%p5980_p10)
}
  0xa8   :  { %s5984_s16 = scalar_lea.vmem %s236_s4, 256  ;;  %p5989_p12 = scmp.lt.s32.totalorder %s236_s4, %s236_s4 }
  0xa9   :  { %p5985_p11 = scmp.ne.s32.totalorder %s236_s4, %s5984_s16  ;;  %p5990_p13 = scmp.lt.s32.totalorder %s5984_s16, %s5984_s16 }
  0xab   :  { %p5991_p0 = por %p5990_p13, %p5989_p12 }
  0xad   :  { %p5992_p1 = pnand %p5991_p0, %p5985_p11 }
  0xaf   :  { %5995 = shalt.err (!%p5992_p1)
}
  0xb0   :  { %241 = dma.hbm_to_vmem [thread:$0]  %s8273_s18, 256, %s236_s4, [#allocation32], %s6262_s24, %s6262_s24, %s6263_s26  }
  0xb1   :  { %s8330_s3 = sld [smem:[#allocation83_spill]] }
  0xb7   :  { %s5996_s7 = scalar_lea.hbm %s8330_s3, 4096 }
  0xb8   :  { %p5997_p2 = scmp.ne.s32.totalorder %s8330_s3, %s5996_s7  ;;  %p6000_p3 = scmp.lt.u32.totalorder %s5996_s7, %s8330_s3 }
  0xba   :  { %p6002_p4 = pnand %p6000_p3, %p5997_p2 }
  0xbc   :  { %6005 = shalt.err (!%p6002_p4)
}
  0xbd   :  { %s6006_s5 = scalar_lea.vmem %s6535_s1, 4096  ;;  %p6011_p6 = scmp.lt.s32.totalorder %s6535_s1, %s6535_s1 }
  0xbe   :  { %p6007_p5 = scmp.ne.s32.totalorder %s6535_s1, %s6006_s5  ;;  %p6012_p7 = scmp.lt.s32.totalorder %s6006_s5, %s6006_s5 }
  0xc0   :  { %p6013_p8 = por %p6012_p7, %p6011_p6 }
  0xc2   :  { %p6014_p9 = pnand %p6013_p8, %p6007_p5 }
  0xc4   :  { %6017 = shalt.err (!%p6014_p9)
}
  0xc5   :  { %s6272_s18 = smov 128   ;;  %s6273_s4 = smov 8  }
  0xc6   :  { %49 = dma.hbm_to_vmem [thread:$0]  %s8330_s3, 4096, %s6535_s1, [#allocation5], %s6272_s18, %s6272_s18, %s6273_s4  }
  0xc7   :  { %s6274_s30 = smov [#allocation9]   ;;  %s6275_s0 = smov [#allocation12]  }
  0xc8   :  { %s65_s2 = sshll.u32 %s6274_s30, 4  ;;  %s89_s21 = sshll.u32 %s6275_s0, 4  ;;  %s66_s2 = int_to_ptr.vmem [resolvable:$true] %s65_s2  ;;  %s6572_s21 = int_to_ptr.vmem [resolvable:$true] %s89_s21 }
  0xc9   :  { %s8331_s28 = sld [smem:[#allocation85_spill]] }
  0xcf   :  { %s6018_s9 = scalar_lea.hbm %s8331_s28, 4096 }
  0xd0   :  { %p6019_p10 = scmp.ne.s32.totalorder %s8331_s28, %s6018_s9  ;;  %p6022_p11 = scmp.lt.u32.totalorder %s6018_s9, %s8331_s28 }
  0xd2   :  { %p6024_p12 = pnand %p6022_p11, %p6019_p10 }
  0xd4   :  { %6027 = shalt.err (!%p6024_p12)
}
  0xd5   :  { %s6028_s1 = scalar_lea.vmem %s66_s2, 4096  ;;  %p6033_p0 = scmp.lt.s32.totalorder %s66_s2, %s66_s2 }
  0xd6   :  { %p6029_p13 = scmp.ne.s32.totalorder %s66_s2, %s6028_s1  ;;  %p6034_p1 = scmp.lt.s32.totalorder %s6028_s1, %s6028_s1 }
  0xd8   :  { %p6035_p2 = por %p6034_p1, %p6033_p0 }
  0xda   :  { %p6036_p3 = pnand %p6035_p2, %p6029_p13 }
  0xdc   :  { %6039 = shalt.err (!%p6036_p3)
}
  0xdd   :  { %71 = dma.hbm_to_vmem [thread:$0]  %s8331_s28, 4096, %s66_s2, [#allocation8], %s6272_s18, %s6272_s18, %s6273_s4  }
  0xde   :  { %s8332_s5 = sld [smem:[#allocation87_spill]] }
  0xe4   :  { %s6040_s29 = scalar_lea.hbm %s8332_s5, 1024 }
  0xe5   :  { %p6041_p4 = scmp.ne.s32.totalorder %s8332_s5, %s6040_s29  ;;  %p6044_p5 = scmp.lt.u32.totalorder %s6040_s29, %s8332_s5 }
  0xe7   :  { %p6046_p6 = pnand %p6044_p5, %p6041_p4 }
  0xe9   :  { %6049 = shalt.err (!%p6046_p6)
}
  0xea   :  { %s6050_s16 = scalar_lea.vmem %s6572_s21, 1024  ;;  %p6055_p8 = scmp.lt.s32.totalorder %s6572_s21, %s6572_s21 }
  0xeb   :  { %p6051_p7 = scmp.ne.s32.totalorder %s6572_s21, %s6050_s16  ;;  %p6056_p9 = scmp.lt.s32.totalorder %s6050_s16, %s6050_s16 }
  0xed   :  { %p6057_p10 = por %p6056_p9, %p6055_p8 }
  0xef   :  { %p6058_p11 = pnand %p6057_p10, %p6051_p7 }
  0xf1   :  { %6061 = shalt.err (!%p6058_p11)
}
  0xf2   :  { %95 = dma.hbm_to_vmem [thread:$0]  %s8332_s5, 1024, %s6572_s21, [#allocation11], %s6272_s18, %s6272_s18, %s6273_s4  }
  0xf3   :  { %s6276_s9 = smov [#allocation15]   ;;  %s6277_s14 = smov [#allocation18]  }
  0xf4   :  { %s111_s25 = sshll.u32 %s6276_s9, 4  ;;  %s136_s7 = sshll.u32 %s6277_s14, 4  ;;  %s112_s25 = int_to_ptr.vmem [resolvable:$true] %s111_s25  ;;  %s137_s7 = int_to_ptr.vmem [resolvable:$true] %s136_s7 }
  0xf5   :  { %s6062_s3 = scalar_lea.hbm %s8261_s6, 1024 }
  0xf6   :  { %p6063_p12 = scmp.ne.s32.totalorder %s8261_s6, %s6062_s3  ;;  %p6066_p13 = scmp.lt.u32.totalorder %s6062_s3, %s8261_s6 }
  0xf8   :  { %p6068_p0 = pnand %p6066_p13, %p6063_p12 }
  0xfa   :  { %6071 = shalt.err (!%p6068_p0)
}
  0xfb   :  { %s6072_s21 = scalar_lea.vmem %s112_s25, 1024  ;;  %p6077_p2 = scmp.lt.s32.totalorder %s112_s25, %s112_s25 }
  0xfc   :  { %p6073_p1 = scmp.ne.s32.totalorder %s112_s25, %s6072_s21  ;;  %p6078_p3 = scmp.lt.s32.totalorder %s6072_s21, %s6072_s21 }
  0xfe   :  { %p6079_p4 = por %p6078_p3, %p6077_p2 }
 0x100   :  { %p6080_p5 = pnand %p6079_p4, %p6073_p1 }
 0x102   :  { %6083 = shalt.err (!%p6080_p5)
}
 0x103   :  { %117 = dma.hbm_to_vmem [thread:$0]  %s8261_s6, 1024, %s112_s25, [#allocation14], %s6262_s24, %s6262_s24, %s6263_s26  }
 0x104   :  { %s6084_s22 = scalar_lea.hbm %s8263_s8, 16 }
 0x105   :  { %p6085_p6 = scmp.ne.s32.totalorder %s8263_s8, %s6084_s22  ;;  %p6088_p7 = scmp.lt.u32.totalorder %s6084_s22, %s8263_s8 }
 0x107   :  { %p6090_p8 = pnand %p6088_p7, %p6085_p6 }
 0x109   :  { %6093 = shalt.err (!%p6090_p8)
}
 0x10a   :  { %s6094_s14 = scalar_lea.vmem %s137_s7, 16  ;;  %s6098_s23 = scalar_lea.vmem %s137_s7, 32 }
 0x10b   :  { %p6095_p9 = scmp.ne.s32.totalorder %s137_s7, %s6094_s14  ;;  %p6099_p10 = scmp.lt.s32.totalorder %s137_s7, %s137_s7 }
 0x10c   :  { %p6100_p11 = scmp.lt.s32.totalorder %s6098_s23, %s6094_s14 }
 0x10e   :  { %p6101_p12 = por %p6100_p11, %p6099_p10 }
 0x110   :  { %p6102_p13 = pnand %p6101_p12, %p6095_p9 }
 0x112   :  { %6105 = shalt.err (!%p6102_p13)
}
 0x113   :  { %139 = dma.hbm_to_vmem [thread:$0]  %s8263_s8, 16, %s137_s7, [#allocation17]  }
 0x114   :  { %s6278_s1 = smov [#allocation21]   ;;  %s6279_s13 = smov [#allocation24]  }
 0x115   :  { %s158_s3 = sshll.u32 %s6278_s1, 4  ;;  %s180_s20 = sshll.u32 %s6279_s13, 4  ;;  %s159_s3 = int_to_ptr.vmem [resolvable:$true] %s158_s3  ;;  %s181_s20 = int_to_ptr.vmem [resolvable:$true] %s180_s20 }
 0x116   :  { %s6106_s21 = scalar_lea.hbm %s8265_s10, 16 }
 0x117   :  { %p6107_p0 = scmp.ne.s32.totalorder %s8265_s10, %s6106_s21  ;;  %p6110_p1 = scmp.lt.u32.totalorder %s6106_s21, %s8265_s10 }
 0x119   :  { %p6112_p2 = pnand %p6110_p1, %p6107_p0 }
 0x11b   :  { %6115 = shalt.err (!%p6112_p2)
}
 0x11c   :  { %s6116_s8 = scalar_lea.vmem %s159_s3, 16  ;;  %s6120_s7 = scalar_lea.vmem %s159_s3, 32 }
 0x11d   :  { %p6117_p3 = scmp.ne.s32.totalorder %s159_s3, %s6116_s8  ;;  %p6121_p4 = scmp.lt.s32.totalorder %s159_s3, %s159_s3 }
 0x11e   :  { %p6122_p5 = scmp.lt.s32.totalorder %s6120_s7, %s6116_s8 }
 0x120   :  { %p6123_p6 = por %p6122_p5, %p6121_p4 }
 0x122   :  { %p6124_p7 = pnand %p6123_p6, %p6117_p3 }
 0x124   :  { %6127 = shalt.err (!%p6124_p7)
}
 0x125   :  { %161 = dma.hbm_to_vmem [thread:$0]  %s8265_s10, 16, %s159_s3, [#allocation20]  }
 0x126   :  { %s6128_s9 = scalar_lea.hbm %s8267_s12, 16 }
 0x127   :  { %p6129_p8 = scmp.ne.s32.totalorder %s8267_s12, %s6128_s9  ;;  %p6132_p9 = scmp.lt.u32.totalorder %s6128_s9, %s8267_s12 }
 0x129   :  { %p6134_p10 = pnand %p6132_p9, %p6129_p8 }
 0x12b   :  { %6137 = shalt.err (!%p6134_p10)
}
 0x12c   :  { %s6138_s1 = scalar_lea.vmem %s181_s20, 16  ;;  %s6142_s13 = scalar_lea.vmem %s181_s20, 32 }
 0x12d   :  { %p6139_p11 = scmp.ne.s32.totalorder %s181_s20, %s6138_s1  ;;  %p6143_p12 = scmp.lt.s32.totalorder %s181_s20, %s181_s20 }
 0x12e   :  { %p6144_p13 = scmp.lt.s32.totalorder %s6142_s13, %s6138_s1 }
 0x130   :  { %p6145_p0 = por %p6144_p13, %p6143_p12 }
 0x132   :  { %p6146_p1 = pnand %p6145_p0, %p6139_p11 }
 0x134   :  { %6149 = shalt.err (!%p6146_p1)
}
 0x135   :  { %183 = dma.hbm_to_vmem [thread:$0]  %s8267_s12, 16, %s181_s20, [#allocation23]  }
 0x136   :  { %s6280_s27 = smov [#allocation27]   ;;  %s6281_s21 = smov [#allocation30]  }
 0x137   :  { %s201_s29 = sshll.u32 %s6280_s27, 4  ;;  %s226_s5 = sshll.u32 %s6281_s21, 4  ;;  %s202_s29 = int_to_ptr.vmem [resolvable:$true] %s201_s29  ;;  %s227_s5 = int_to_ptr.vmem [resolvable:$true] %s226_s5 }
 0x138   :  { %s6150_s0 = scalar_lea.hbm %s8270_s15, 1024 }
 0x139   :  { %p6151_p2 = scmp.ne.s32.totalorder %s8270_s15, %s6150_s0  ;;  %p6154_p3 = scmp.lt.u32.totalorder %s6150_s0, %s8270_s15 }
 0x13b   :  { %p6156_p4 = pnand %p6154_p3, %p6151_p2 }
 0x13d   :  { %6159 = shalt.err (!%p6156_p4)
}
 0x13e   :  { %s6160_s12 = scalar_lea.vmem %s202_s29, 1024  ;;  %p6165_p6 = scmp.lt.s32.totalorder %s202_s29, %s202_s29 }
 0x13f   :  { %p6161_p5 = scmp.ne.s32.totalorder %s202_s29, %s6160_s12  ;;  %p6166_p7 = scmp.lt.s32.totalorder %s6160_s12, %s6160_s12 }
 0x141   :  { %p6167_p8 = por %p6166_p7, %p6165_p6 }
 0x143   :  { %p6168_p9 = pnand %p6167_p8, %p6161_p5 }
 0x145   :  { %6171 = shalt.err (!%p6168_p9)
}
 0x146   :  { %207 = dma.hbm_to_vmem [thread:$0]  %s8270_s15, 1024, %s202_s29, [#allocation26], %s6262_s24, %s6262_s24, %s6263_s26  }
 0x147   :  { %s6172_s14 = scalar_lea.hbm %s8272_s17, 16 }
 0x148   :  { %p6173_p10 = scmp.ne.s32.totalorder %s8272_s17, %s6172_s14  ;;  %p6176_p11 = scmp.lt.u32.totalorder %s6172_s14, %s8272_s17 }
 0x14a   :  { %p6178_p12 = pnand %p6176_p11, %p6173_p10 }
 0x14c   :  { %6181 = shalt.err (!%p6178_p12)
}
 0x14d   :  { %s6182_s13 = scalar_lea.vmem %s227_s5, 16  ;;  %s6186_s10 = scalar_lea.vmem %s227_s5, 32 }
 0x14e   :  { %p6183_p13 = scmp.ne.s32.totalorder %s227_s5, %s6182_s13  ;;  %p6187_p0 = scmp.lt.s32.totalorder %s227_s5, %s227_s5 }
 0x14f   :  { %p6188_p1 = scmp.lt.s32.totalorder %s6186_s10, %s6182_s13 }
 0x151   :  { %p6189_p2 = por %p6188_p1, %p6187_p0 }
 0x153   :  { %p6190_p3 = pnand %p6189_p2, %p6183_p13 }
 0x155   :  { %6193 = shalt.err (!%p6190_p3)
}
 0x156   :  { %229 = dma.hbm_to_vmem [thread:$0]  %s8272_s17, 16, %s227_s5, [#allocation29]  }
 0x157   :  { %s6282_s26 = smov [#allocation33]   ;;  %s6194_s21 = scalar_lea.hbm %s8274_s19, 16 }
 0x158   :  { %s248_s3 = sshll.u32 %s6282_s26, 4  ;;  %p6195_p4 = scmp.ne.s32.totalorder %s8274_s19, %s6194_s21  ;;  %s249_s3 = int_to_ptr.vmem [resolvable:$true] %s248_s3 }
 0x159   :  { %p6198_p5 = scmp.lt.u32.totalorder %s6194_s21, %s8274_s19 }
 0x15b   :  { %p6200_p6 = pnand %p6198_p5, %p6195_p4 }
 0x15d   :  { %6203 = shalt.err (!%p6200_p6)
}
 0x15e   :  { %s6204_s7 = scalar_lea.vmem %s249_s3, 16  ;;  %s6208_s17 = scalar_lea.vmem %s249_s3, 32 }
 0x15f   :  { %p6205_p7 = scmp.ne.s32.totalorder %s249_s3, %s6204_s7  ;;  %p6209_p8 = scmp.lt.s32.totalorder %s249_s3, %s249_s3 }
 0x160   :  { %p6210_p9 = scmp.lt.s32.totalorder %s6208_s17, %s6204_s7 }
 0x162   :  { %p6211_p10 = por %p6210_p9, %p6209_p8 }
 0x164   :  { %p6212_p11 = pnand %p6211_p10, %p6205_p7 }
 0x166   :  { %6215 = shalt.err (!%p6212_p11)
}
 0x167   :  { %251 = dma.hbm_to_vmem [thread:$0]  %s8274_s19, 16, %s249_s3, [#allocation32]  }
 0x168   :  { %6238 = dma.done.wait [#allocation5], 4096  }
 0x169   :  { %6239 = vsyncadd [#allocation5], 4294963200 }
 0x16a   :  { %6240 = dma.done.wait [#allocation8], 4128  }
 0x16b   :  { %6241 = vsyncadd [#allocation8], 4294963168 }
 0x16c   :  { %6242 = dma.done.wait [#allocation11], 1536  }
 0x16d   :  { %6243 = vsyncadd [#allocation11], 4294965760 }
 0x16e   :  { %6244 = dma.done.wait [#allocation14], 1040  }
 0x16f   :  { %6245 = vsyncadd [#allocation14], 4294966256 }
 0x170   :  { %6246 = dma.done.wait [#allocation17], 1040  }
 0x171   :  { %6247 = vsyncadd [#allocation17], 4294966256 }
 0x172   :  { %6248 = dma.done.wait [#allocation20], 272  }
 0x173   :  { %6249 = vsyncadd [#allocation20], 4294967024 }
 0x174   :  { %6250 = dma.done.wait [#allocation23], 1040  }
 0x175   :  { %6251 = vsyncadd [#allocation23], 4294966256 }
 0x176   :  { %6252 = dma.done.wait [#allocation26], 1040  }
 0x177   :  { %6253 = vsyncadd [#allocation26], 4294966256 }
 0x178   :  { %6254 = dma.done.wait [#allocation29], 1040  }
 0x179   :  { %6255 = vsyncadd [#allocation29], 4294966256 }
 0x17a   :  { %6256 = dma.done.wait [#allocation32], 272  }
 0x17b   :  { %6257 = vsyncadd [#allocation32], 4294967024  ;;  %v6283_v1 = vmov 0   ;;  %v6701_v2 = vld [vmem:[#allocation4 + $0x10] sm:$0xff]  ;;  %v6703_v3 = vld [vmem:[#allocation4] sm:$0xff]  ;;  %v6284_v38 = vmov 1   ;;  %v8282_v39 = vlaneseq }
 0x17c   :  { %5325 = vset.pattern.permute.xlu1 %v6283_v1  ;;  %5324 = vset.pattern.permute.xlu0 %v6283_v1  ;;  %v6707_v4 = vld [vmem:[#allocation4 + $0x18] sm:$0xff]  ;;  %v6709_v5 = vld [vmem:[#allocation4 + $0x8] sm:$0xff]  ;;  %v6715_v7 = vld [vmem:[#allocation4 + $0x20] sm:$0xff]  ;;  %vm878_vm4 = vcmask 523264   ;;  %v6285_v46 = vmov 0.0   ;;  %s6287_s19 = smov [#allocation34]  }
 0x17d   :  { %363 = vperm.xlu1 %5325, %v6701_v2   ;;  %357 = vperm.xlu0 %5324, %v6703_v3   ;;  %v6713_v6 = vld [vmem:[#allocation4 + $0x28] sm:$0xff]  ;;  %v6719_v8 = vld [vmem:[#allocation4 + $0x38] sm:$0xff]  ;;  %v6721_v9 = vld [vmem:[#allocation4 + $0x30] sm:$0xff]  ;;  %v6758_v40 = vand.u32 127, %v8282_v39  ;;  %s4367_s16 = sshll.u32 %s6287_s19, 4  ;;  %s4368_s16 = int_to_ptr.vmem [resolvable:$true] %s4367_s16 }
 0x17e   :  { %v5330_v10 = vld [vmem:[#allocation10] sm:$0xff]   ;;  %v5331_v12 = vld [vmem:[#allocation10 + $0x8] sm:$0xff]   ;;  %v5332_v14 = vld [vmem:[#allocation10 + $0x10] sm:$0xff]   ;;  %s6216_s12 = scalar_lea.vmem %s4368_s16, 1024  ;;  %p6221_p13 = scmp.lt.s32.totalorder %s4368_s16, %s4368_s16 }
 0x17f   :  { %v6723_v11 = vld [vmem:[#allocation4 + $0x48] sm:$0xff]  ;;  %v6727_v13 = vld [vmem:[#allocation4 + $0x40] sm:$0xff]  ;;  %4904 = vmatprep.subr.bf16.mxu0 %v5330_v10  ;;  %4944 = vmatprep.subr.bf16.mxu1 %v5330_v10  ;;  %v6729_v15 = vld [vmem:[#allocation4 + $0x58] sm:$0xff]  ;;  %8333 = vst [vmem:[#allocation46_spill] sm:$0xff] %v6758_v40  ;;  %p6217_p12 = scmp.ne.s32.totalorder %s4368_s16, %s6216_s12  ;;  %p6222_p0 = scmp.lt.s32.totalorder %s6216_s12, %s6216_s12 }
 0x180   :  { %4905 = vmatpush3.bf16.msra.mxu0 %v5330_v10  ;;  %4945 = vmatpush3.bf16.msra.mxu1 %v5330_v10  ;;  %v6731_v16 = vld [vmem:[#allocation4 + $0x50] sm:$0xff]  ;;  %v5333_v17 = vld [vmem:[#allocation10 + $0x18] sm:$0xff]   ;;  %v6735_v18 = vld [vmem:[#allocation4 + $0x68] sm:$0xff] }
 0x181   :  { %366 = vperm.xlu1 %5325, %v6707_v4   ;;  %360 = vperm.xlu0 %5324, %v6709_v5   ;;  %v6737_v19 = vld [vmem:[#allocation4 + $0x60] sm:$0xff]  ;;  %v337_v20 = vld [vmem:[#allocation4 + $0x78] sm:$0xff]  ;;  %v336_v21 = vld [vmem:[#allocation4 + $0x70] sm:$0xff]  ;;  %p6223_p1 = por %p6222_p0, %p6221_p13 }
 0x182   :  { %4906 = vmatprep.subr.bf16.mxu0 %v5331_v12  ;;  %4946 = vmatprep.subr.bf16.mxu1 %v5331_v12  ;;  %v339_v22 = vld [vmem:[#allocation4 + $0x88] sm:$0xff]  ;;  %v338_v23 = vld [vmem:[#allocation4 + $0x80] sm:$0xff]  ;;  %v341_v24 = vld [vmem:[#allocation4 + $0x98] sm:$0xff] }
 0x183   :  { %v340_v25 = vld [vmem:[#allocation4 + $0x90] sm:$0xff]  ;;  %v343_v26 = vld [vmem:[#allocation4 + $0xa8] sm:$0xff]  ;;  %v342_v27 = vld [vmem:[#allocation4 + $0xa0] sm:$0xff]  ;;  %p6224_p2 = pnand %p6223_p1, %p6217_p12 }
 0x184   :  { %4907 = vmatpush3.bf16.msra.mxu0 %v5331_v12  ;;  %4947 = vmatpush3.bf16.msra.mxu1 %v5331_v12  ;;  %v345_v28 = vld [vmem:[#allocation4 + $0xb8] sm:$0xff]  ;;  %v344_v29 = vld [vmem:[#allocation4 + $0xb0] sm:$0xff]  ;;  %v347_v30 = vld [vmem:[#allocation4 + $0xc8] sm:$0xff] }
 0x185   :  { %372 = vperm.xlu1 %5325, %v6713_v6   ;;  %369 = vperm.xlu0 %5324, %v6715_v7   ;;  %v346_v31 = vld [vmem:[#allocation4 + $0xc0] sm:$0xff]  ;;  %v349_v32 = vld [vmem:[#allocation4 + $0xd8] sm:$0xff]  ;;  %v348_v33 = vld [vmem:[#allocation4 + $0xd0] sm:$0xff] }
 0x186   :  { %4908 = vmatprep.subr.bf16.mxu0 %v5332_v14  ;;  %4948 = vmatprep.subr.bf16.mxu1 %v5332_v14  ;;  %v351_v34 = vld [vmem:[#allocation4 + $0xe8] sm:$0xff]  ;;  %v350_v35 = vld [vmem:[#allocation4 + $0xe0] sm:$0xff]  ;;  %v353_v36 = vld [vmem:[#allocation4 + $0xf8] sm:$0xff] }
 0x187   :  { %v352_v37 = vld [vmem:[#allocation4 + $0xf0] sm:$0xff]  ;;  %v5334_v43 = vld [vmem:[#allocation15] sm:$0xff]  }
 0x188   :  { %4909 = vmatpush3.bf16.msra.mxu0 %v5332_v14  ;;  %4949 = vmatpush3.bf16.msra.mxu1 %v5332_v14  ;;  %v5335_v55 = vld [vmem:[#allocation15 + $0x8] sm:$0xff]   ;;  %v5336_v61 = vld [vmem:[#allocation15 + $0x10] sm:$0xff]  }
 0x189   :  { %378 = vperm.xlu1 %5325, %v6719_v8   ;;  %375 = vperm.xlu0 %5324, %v6721_v9  }
 0x18a   :  { %4910 = vmatprep.subr.bf16.mxu0 %v5333_v17  ;;  %4950 = vmatprep.subr.bf16.mxu1 %v5333_v17 }
 0x18c   :  { %4911 = vmatpush3.bf16.msra.mxu0 %v5333_v17  ;;  %4951 = vmatpush3.bf16.msra.mxu1 %v5333_v17 }
 0x18d   :  { %384 = vperm.xlu1 %5325, %v6723_v11   ;;  %381 = vperm.xlu0 %5324, %v6727_v13  }
 0x18e   :  { %4984 = vmatprep.subr.bf16.mxu0 %v5334_v43 }
 0x191   :  { %390 = vperm.xlu1 %5325, %v6729_v15   ;;  %387 = vperm.xlu0 %5324, %v6731_v16  }
 0x195   :  { %396 = vperm.xlu1 %5325, %v6735_v18   ;;  %393 = vperm.xlu0 %5324, %v6737_v19  }
 0x199   :  { %402 = vperm.xlu1 %5325, %v337_v20   ;;  %399 = vperm.xlu0 %5324, %v336_v21  }
 0x19d   :  { %408 = vperm.xlu1 %5325, %v339_v22   ;;  %405 = vperm.xlu0 %5324, %v338_v23  }
 0x1a1   :  { %414 = vperm.xlu1 %5325, %v341_v24   ;;  %411 = vperm.xlu0 %5324, %v340_v25  }
 0x1a5   :  { %420 = vperm.xlu1 %5325, %v343_v26   ;;  %417 = vperm.xlu0 %5324, %v342_v27  }
 0x1a9   :  { %426 = vperm.xlu1 %5325, %v345_v28   ;;  %423 = vperm.xlu0 %5324, %v344_v29  }
 0x1ad   :  { %432 = vperm.xlu1 %5325, %v347_v30   ;;  %429 = vperm.xlu0 %5324, %v346_v31  }
 0x1b1   :  { %438 = vperm.xlu1 %5325, %v349_v32   ;;  %435 = vperm.xlu0 %5324, %v348_v33  }
 0x1b5   :  { %444 = vperm.xlu1 %5325, %v351_v34   ;;  %441 = vperm.xlu0 %5324, %v350_v35  }
 0x1b9   :  { %450 = vperm.xlu1 %5325, %v353_v36   ;;  %447 = vperm.xlu0 %5324, %v352_v37  }
 0x1bd   :  { %5327 = vset.pattern.permute.xlu1 %v6284_v38  ;;  %5326 = vset.pattern.permute.xlu0 %v6284_v38 }
 0x1be   :  { %568 = vperm.xlu1 %5327, %v6709_v5   ;;  %565 = vperm.xlu0 %5326, %v6703_v3   ;;  %v5337_v3 = vld [vmem:[#allocation15 + $0x18] sm:$0xff]  }
 0x1c2   :  { %571 = vperm.xlu1 %5327, %v6701_v2   ;;  %574 = vperm.xlu0 %5326, %v6707_v4  }
 0x1c6   :  { %577 = vperm.xlu1 %5327, %v6715_v7   ;;  %580 = vperm.xlu0 %5326, %v6713_v6  }
 0x1ca   :  { %583 = vperm.xlu1 %5327, %v6721_v9   ;;  %586 = vperm.xlu0 %5326, %v6719_v8   ;;  %v5338_v9 = vld [vmem:[#allocation15 + $0x20] sm:$0xff]  }
 0x1ce   :  { %589 = vperm.xlu1 %5327, %v6727_v13   ;;  %592 = vperm.xlu0 %5326, %v6723_v11  }
 0x1d2   :  { %595 = vperm.xlu1 %5327, %v6731_v16   ;;  %598 = vperm.xlu0 %5326, %v6729_v15   ;;  %v5339_v15 = vld [vmem:[#allocation15 + $0x28] sm:$0xff]  }
 0x1d6   :  { %601 = vperm.xlu1 %5327, %v6737_v19   ;;  %604 = vperm.xlu0 %5326, %v6735_v18  }
 0x1da   :  { %607 = vperm.xlu1 %5327, %v336_v21   ;;  %610 = vperm.xlu0 %5326, %v337_v20   ;;  %v5340_v21 = vld [vmem:[#allocation15 + $0x30] sm:$0xff]  }
 0x1de   :  { %613 = vperm.xlu1 %5327, %v338_v23   ;;  %616 = vperm.xlu0 %5326, %v339_v22  }
 0x1e2   :  { %619 = vperm.xlu1 %5327, %v340_v25   ;;  %622 = vperm.xlu0 %5326, %v341_v24  }
 0x1e6   :  { %625 = vperm.xlu1 %5327, %v342_v27   ;;  %628 = vperm.xlu0 %5326, %v343_v26  }
 0x1ea   :  { %631 = vperm.xlu1 %5327, %v344_v29   ;;  %634 = vperm.xlu0 %5326, %v345_v28  }
 0x1ee   :  { %637 = vperm.xlu1 %5327, %v346_v31   ;;  %640 = vperm.xlu0 %5326, %v347_v30  }
 0x1f2   :  { %643 = vperm.xlu1 %5327, %v348_v33   ;;  %646 = vperm.xlu0 %5326, %v349_v32  }
 0x1f6   :  { %649 = vperm.xlu1 %5327, %v350_v35   ;;  %652 = vperm.xlu0 %5326, %v351_v34  }
 0x1fa   :  { %655 = vperm.xlu1 %5327, %v352_v37   ;;  %658 = vperm.xlu0 %5326, %v353_v36  }
 0x1fc   :  { %v364_v41 = vpop.permute.xlu1 %363  ;;  %v358_v42 = vpop.permute.xlu0 %357 }
 0x1fd   :  { %vm454_vm0 = vcmp.eq.s32.totalorder %v364_v41, %v6758_v40  ;;  %vm452_vm1 = vcmp.eq.s32.totalorder %v358_v42, %v6758_v40 }
 0x1fe   :  { %5328 = vset.pattern.permute.xlu1 %v6283_v1  ;;  %5329 = vset.pattern.permute.xlu0 %v6283_v1  ;;  %v4390_v47 = vsel %vm454_vm0, 1.0, %v6285_v46  ;;  %v4388_v49 = vsel %vm452_vm1, 1.0, %v6285_v46 }
 0x200   :  { %v367_v44 = vpop.permute.xlu1 %366  ;;  %v361_v45 = vpop.permute.xlu0 %360 }
 0x201   :  { %vm455_vm2 = vcmp.eq.s32.totalorder %v367_v44, %v6758_v40  ;;  %vm453_vm3 = vcmp.eq.s32.totalorder %v361_v45, %v6758_v40 }
 0x202   :  { %v4391_v48 = vsel %vm455_vm2, 1.0, %v6285_v46  ;;  %v4389_v50 = vsel %vm453_vm3, 1.0, %v6285_v46 }
 0x203   :  { %v549_v51 = vpack.c.bf16 %v4391_v48, %v4390_v47  ;;  %v548_v52 = vpack.c.bf16 %v4389_v50, %v4388_v49 }
 0x204   :  { %v373_v53 = vpop.permute.xlu1 %372  ;;  %v370_v54 = vpop.permute.xlu0 %369 }
 0x205   :  { %vm457_vm5 = vcmp.eq.s32.totalorder %v373_v53, %v6758_v40  ;;  %vm456_vm6 = vcmp.eq.s32.totalorder %v370_v54, %v6758_v40  ;;  %4912 = vmatprep.mubr.msk.bf16.mxu0 %vm878_vm4, %v548_v52 }
 0x206   :  { %v4393_v56 = vsel %vm457_vm5, 1.0, %v6285_v46  ;;  %v4392_v57 = vsel %vm456_vm6, 1.0, %v6285_v46  ;;  %4913 = vmatmul.mubr.msk.bf16.vlgmr.msra.gmra.mrb[0].mxu0 %vm878_vm4, %v549_v51 }
 0x207   :  { %v550_v58 = vpack.c.bf16 %v4393_v56, %v4392_v57  ;;  %4985 = vmatpush3.bf16.msra.mxu0 %v5334_v43 }
 0x208   :  { %v379_v59 = vpop.permute.xlu1 %378  ;;  %v376_v60 = vpop.permute.xlu0 %375  ;;  %4986 = vmatprep.subr.bf16.mxu0 %v5335_v55 }
 0x209   :  { %vm459_vm7 = vcmp.eq.s32.totalorder %v379_v59, %v6758_v40  ;;  %vm458_vm8 = vcmp.eq.s32.totalorder %v376_v60, %v6758_v40  ;;  %4916 = vmatprep.mubr.msk.bf16.mxu0 %vm878_vm4, %v550_v58 }
 0x20a   :  { %v4395_v62 = vsel %vm459_vm7, 1.0, %v6285_v46  ;;  %v4394_v63 = vsel %vm458_vm8, 1.0, %v6285_v46 }
 0x20b   :  { %v551_v0 = vpack.c.bf16 %v4395_v62, %v4394_v63  ;;  %4987 = vmatpush3.bf16.msra.mxu0 %v5335_v55 }
 0x20c   :  { %v385_v1 = vpop.permute.xlu1 %384  ;;  %v382_v2 = vpop.permute.xlu0 %381  ;;  %4988 = vmatprep.subr.bf16.mxu0 %v5336_v61 }
 0x20d   :  { %vm461_vm9 = vcmp.eq.s32.totalorder %v385_v1, %v6758_v40  ;;  %vm460_vm10 = vcmp.eq.s32.totalorder %v382_v2, %v6758_v40 }
 0x20e   :  { %v4397_v4 = vsel %vm461_vm9, 1.0, %v6285_v46  ;;  %v4396_v5 = vsel %vm460_vm10, 1.0, %v6285_v46  ;;  %4917 = vmatmul.mubr.msk.bf16.gmra.mrb[4].mxu0 %vm878_vm4, %v551_v0 }
 0x20f   :  { %v552_v6 = vpack.c.bf16 %v4397_v4, %v4396_v5  ;;  %4989 = vmatpush3.bf16.msra.mxu0 %v5336_v61 }
 0x210   :  { %v391_v7 = vpop.permute.xlu1 %390  ;;  %v388_v8 = vpop.permute.xlu0 %387  ;;  %4990 = vmatprep.subr.bf16.mxu0 %v5337_v3 }
 0x211   :  { %vm463_vm11 = vcmp.eq.s32.totalorder %v391_v7, %v6758_v40  ;;  %vm462_vm12 = vcmp.eq.s32.totalorder %v388_v8, %v6758_v40  ;;  %4920 = vmatprep.mubr.msk.bf16.mxu0 %vm878_vm4, %v552_v6 }
 0x212   :  { %v4399_v10 = vsel %vm463_vm11, 1.0, %v6285_v46  ;;  %v4398_v11 = vsel %vm462_vm12, 1.0, %v6285_v46 }
 0x213   :  { %v553_v12 = vpack.c.bf16 %v4399_v10, %v4398_v11  ;;  %4991 = vmatpush3.bf16.msra.mxu0 %v5337_v3 }
 0x214   :  { %v397_v13 = vpop.permute.xlu1 %396  ;;  %v394_v14 = vpop.permute.xlu0 %393  ;;  %4992 = vmatprep.subr.bf16.mxu0 %v5338_v9 }
 0x215   :  { %vm465_vm13 = vcmp.eq.s32.totalorder %v397_v13, %v6758_v40  ;;  %vm464_vm14 = vcmp.eq.s32.totalorder %v394_v14, %v6758_v40 }
 0x216   :  { %v4401_v16 = vsel %vm465_vm13, 1.0, %v6285_v46  ;;  %v4400_v17 = vsel %vm464_vm14, 1.0, %v6285_v46  ;;  %4921 = vmatmul.mubr.msk.bf16.gmra.mrb[8].mxu0 %vm878_vm4, %v553_v12 }
 0x217   :  { %v554_v18 = vpack.c.bf16 %v4401_v16, %v4400_v17  ;;  %4993 = vmatpush3.bf16.msra.mxu0 %v5338_v9 }
 0x218   :  { %v403_v19 = vpop.permute.xlu1 %402  ;;  %v400_v20 = vpop.permute.xlu0 %399  ;;  %4994 = vmatprep.subr.bf16.mxu0 %v5339_v15 }
 0x219   :  { %vm467_vm15 = vcmp.eq.s32.totalorder %v403_v19, %v6758_v40  ;;  %vm466_vm0 = vcmp.eq.s32.totalorder %v400_v20, %v6758_v40  ;;  %4924 = vmatprep.mubr.msk.bf16.mxu0 %vm878_vm4, %v554_v18 }
 0x21a   :  { %v4403_v22 = vsel %vm467_vm15, 1.0, %v6285_v46  ;;  %v4402_v23 = vsel %vm466_vm0, 1.0, %v6285_v46 }
 0x21b   :  { %v555_v24 = vpack.c.bf16 %v4403_v22, %v4402_v23  ;;  %4995 = vmatpush3.bf16.msra.mxu0 %v5339_v15 }
 0x21c   :  { %v409_v25 = vpop.permute.xlu1 %408  ;;  %v406_v26 = vpop.permute.xlu0 %405  ;;  %4996 = vmatprep.subr.bf16.mxu0 %v5340_v21 }
 0x21d   :  { %vm469_vm1 = vcmp.eq.s32.totalorder %v409_v25, %v6758_v40  ;;  %vm468_vm2 = vcmp.eq.s32.totalorder %v406_v26, %v6758_v40 }
 0x21e   :  { %v4405_v27 = vsel %vm469_vm1, 1.0, %v6285_v46  ;;  %v4404_v28 = vsel %vm468_vm2, 1.0, %v6285_v46  ;;  %4925 = vmatmul.mubr.msk.bf16.gmra.mrb[12].mxu0 %vm878_vm4, %v555_v24 }
 0x21f   :  { %v556_v29 = vpack.c.bf16 %v4405_v27, %v4404_v28  ;;  %4997 = vmatpush3.bf16.msra.mxu0 %v5340_v21 }
 0x220   :  { %v415_v30 = vpop.permute.xlu1 %414  ;;  %v412_v31 = vpop.permute.xlu0 %411 }
 0x221   :  { %vm471_vm3 = vcmp.eq.s32.totalorder %v415_v30, %v6758_v40  ;;  %vm470_vm5 = vcmp.eq.s32.totalorder %v412_v31, %v6758_v40  ;;  %4928 = vmatprep.mubr.msk.bf16.mxu0 %vm878_vm4, %v556_v29 }
 0x222   :  { %v4407_v32 = vsel %vm471_vm3, 1.0, %v6285_v46  ;;  %v4406_v33 = vsel %vm470_vm5, 1.0, %v6285_v46 }
 0x223   :  { %v557_v34 = vpack.c.bf16 %v4407_v32, %v4406_v33 }
 0x224   :  { %v421_v35 = vpop.permute.xlu1 %420  ;;  %v418_v36 = vpop.permute.xlu0 %417 }
 0x225   :  { %vm473_vm6 = vcmp.eq.s32.totalorder %v421_v35, %v6758_v40  ;;  %vm472_vm7 = vcmp.eq.s32.totalorder %v418_v36, %v6758_v40 }
 0x226   :  { %v4409_v37 = vsel %vm473_vm6, 1.0, %v6285_v46  ;;  %v4408_v38 = vsel %vm472_vm7, 1.0, %v6285_v46  ;;  %4929 = vmatmul.mubr.msk.bf16.gmra.mrb[16].mxu0 %vm878_vm4, %v557_v34 }
 0x227   :  { %v558_v41 = vpack.c.bf16 %v4409_v37, %v4408_v38 }
 0x228   :  { %v427_v42 = vpop.permute.xlu1 %426  ;;  %v424_v43 = vpop.permute.xlu0 %423 }
 0x229   :  { %vm475_vm8 = vcmp.eq.s32.totalorder %v427_v42, %v6758_v40  ;;  %vm474_vm9 = vcmp.eq.s32.totalorder %v424_v43, %v6758_v40  ;;  %4932 = vmatprep.mubr.msk.bf16.mxu0 %vm878_vm4, %v558_v41  ;;  %v5341_v43 = vld [vmem:[#allocation15 + $0x38] sm:$0xff]  }
 0x22a   :  { %v4411_v44 = vsel %vm475_vm8, 1.0, %v6285_v46  ;;  %v4410_v45 = vsel %vm474_vm9, 1.0, %v6285_v46  ;;  %4998 = vmatprep.subr.bf16.mxu0 %v5341_v43 }
 0x22b   :  { %v559_v47 = vpack.c.bf16 %v4411_v44, %v4410_v45  ;;  %4999 = vmatpush3.bf16.msra.mxu0 %v5341_v43  ;;  %v5346_v43 = vld [vmem:[#allocation16 + $0x20] sm:$0xff]  }
 0x22c   :  { %v433_v48 = vpop.permute.xlu1 %432  ;;  %v430_v49 = vpop.permute.xlu0 %429 }
 0x22d   :  { %vm477_vm10 = vcmp.eq.s32.totalorder %v433_v48, %v6758_v40  ;;  %vm476_vm11 = vcmp.eq.s32.totalorder %v430_v49, %v6758_v40 }
 0x22e   :  { %v4413_v50 = vsel %vm477_vm10, 1.0, %v6285_v46  ;;  %v4412_v51 = vsel %vm476_vm11, 1.0, %v6285_v46  ;;  %4933 = vmatmul.mubr.msk.bf16.gmra.mrb[20].mxu0 %vm878_vm4, %v559_v47 }
 0x22f   :  { %v560_v52 = vpack.c.bf16 %v4413_v50, %v4412_v51 }
 0x230   :  { %v439_v53 = vpop.permute.xlu1 %438  ;;  %v436_v54 = vpop.permute.xlu0 %435 }
 0x231   :  { %vm479_vm12 = vcmp.eq.s32.totalorder %v439_v53, %v6758_v40  ;;  %vm478_vm13 = vcmp.eq.s32.totalorder %v436_v54, %v6758_v40  ;;  %4936 = vmatprep.mubr.msk.bf16.mxu0 %vm878_vm4, %v560_v52 }
 0x232   :  { %v4415_v55 = vsel %vm479_vm12, 1.0, %v6285_v46  ;;  %v4414_v56 = vsel %vm478_vm13, 1.0, %v6285_v46 }
 0x233   :  { %v561_v57 = vpack.c.bf16 %v4415_v55, %v4414_v56 }
 0x234   :  { %v445_v58 = vpop.permute.xlu1 %444  ;;  %v442_v59 = vpop.permute.xlu0 %441 }
 0x235   :  { %vm481_vm14 = vcmp.eq.s32.totalorder %v445_v58, %v6758_v40  ;;  %vm480_vm15 = vcmp.eq.s32.totalorder %v442_v59, %v6758_v40 }
 0x236   :  { %v4417_v60 = vsel %vm481_vm14, 1.0, %v6285_v46  ;;  %v4416_v61 = vsel %vm480_vm15, 1.0, %v6285_v46  ;;  %4937 = vmatmul.mubr.msk.bf16.gmra.mrb[24].mxu0 %vm878_vm4, %v561_v57 }
 0x237   :  { %v562_v62 = vpack.c.bf16 %v4417_v60, %v4416_v61 }
 0x238   :  { %v451_v63 = vpop.permute.xlu1 %450  ;;  %v448_v0 = vpop.permute.xlu0 %447 }
 0x239   :  { %vm483_vm0 = vcmp.eq.s32.totalorder %v451_v63, %v6758_v40  ;;  %vm482_vm1 = vcmp.eq.s32.totalorder %v448_v0, %v6758_v40  ;;  %4940 = vmatprep.mubr.msk.bf16.mxu0 %vm878_vm4, %v562_v62 }
 0x23a   :  { %v4419_v1 = vsel %vm483_vm0, 1.0, %v6285_v46  ;;  %v4418_v2 = vsel %vm482_vm1, 1.0, %v6285_v46 }
 0x23b   :  { %v563_v3 = vpack.c.bf16 %v4419_v1, %v4418_v2 }
 0x23d   :  { %v569_v4 = vpop.permute.xlu1 %568  ;;  %v566_v5 = vpop.permute.xlu0 %565 }
 0x23e   :  { %vm661_vm2 = vcmp.eq.s32.totalorder %v569_v4, %v6758_v40  ;;  %vm660_vm3 = vcmp.eq.s32.totalorder %v566_v5, %v6758_v40  ;;  %4941 = vmatmul.mubr.msk.bf16.gmra.mrb[28].mxu0 %vm878_vm4, %v563_v3 }
 0x23f   :  { %v4420_v6 = vsel %vm660_vm3, 1.0, %v6285_v46  ;;  %v4421_v7 = vsel %vm661_vm2, 1.0, %v6285_v46 }
 0x240   :  { %v756_v8 = vpack.c.bf16 %v4421_v7, %v4420_v6 }
 0x241   :  { %v572_v9 = vpop.permute.xlu1 %571  ;;  %v575_v10 = vpop.permute.xlu0 %574 }
 0x242   :  { %vm662_vm5 = vcmp.eq.s32.totalorder %v572_v9, %v6758_v40  ;;  %vm663_vm6 = vcmp.eq.s32.totalorder %v575_v10, %v6758_v40  ;;  %4952 = vmatprep.mubr.msk.bf16.mxu1 %vm878_vm4, %v756_v8 }
 0x243   :  { %v4422_v11 = vsel %vm662_vm5, 1.0, %v6285_v46  ;;  %v4423_v12 = vsel %vm663_vm6, 1.0, %v6285_v46 }
 0x244   :  { %v757_v13 = vpack.c.bf16 %v4423_v12, %v4422_v11 }
 0x245   :  { %v578_v14 = vpop.permute.xlu1 %577  ;;  %v581_v15 = vpop.permute.xlu0 %580 }
 0x246   :  { %vm664_vm7 = vcmp.eq.s32.totalorder %v578_v14, %v6758_v40  ;;  %vm665_vm8 = vcmp.eq.s32.totalorder %v581_v15, %v6758_v40  ;;  %4953 = vmatmul.mubr.msk.bf16.vlgmr.msra.gmra.mrb[0].mxu1 %vm878_vm4, %v757_v13 }
 0x247   :  { %v4424_v16 = vsel %vm664_vm7, 1.0, %v6285_v46  ;;  %v4425_v17 = vsel %vm665_vm8, 1.0, %v6285_v46 }
 0x248   :  { %v758_v18 = vpack.c.bf16 %v4425_v17, %v4424_v16 }
 0x249   :  { %v584_v19 = vpop.permute.xlu1 %583  ;;  %v587_v20 = vpop.permute.xlu0 %586 }
 0x24a   :  { %vm666_vm9 = vcmp.eq.s32.totalorder %v584_v19, %v6758_v40  ;;  %vm667_vm10 = vcmp.eq.s32.totalorder %v587_v20, %v6758_v40  ;;  %4956 = vmatprep.mubr.msk.bf16.mxu1 %vm878_vm4, %v758_v18 }
 0x24b   :  { %v4426_v21 = vsel %vm666_vm9, 1.0, %v6285_v46  ;;  %v4427_v22 = vsel %vm667_vm10, 1.0, %v6285_v46 }
 0x24c   :  { %v759_v23 = vpack.c.bf16 %v4427_v22, %v4426_v21 }
 0x24d   :  { %v590_v24 = vpop.permute.xlu1 %589  ;;  %v593_v25 = vpop.permute.xlu0 %592 }
 0x24e   :  { %vm668_vm11 = vcmp.eq.s32.totalorder %v590_v24, %v6758_v40  ;;  %vm669_vm12 = vcmp.eq.s32.totalorder %v593_v25, %v6758_v40  ;;  %4957 = vmatmul.mubr.msk.bf16.gmra.mrb[4].mxu1 %vm878_vm4, %v759_v23  ;;  %v5342_v24 = vld [vmem:[#allocation16] sm:$0xff]  }
 0x24f   :  { %v4428_v26 = vsel %vm668_vm11, 1.0, %v6285_v46  ;;  %v4429_v27 = vsel %vm669_vm12, 1.0, %v6285_v46  ;;  %5032 = vmatprep.subr.bf16.mxu0 %v5342_v24 }
 0x250   :  { %v760_v28 = vpack.c.bf16 %v4429_v27, %v4428_v26 }
 0x251   :  { %v596_v29 = vpop.permute.xlu1 %595  ;;  %v599_v30 = vpop.permute.xlu0 %598 }
 0x252   :  { %vm670_vm13 = vcmp.eq.s32.totalorder %v596_v29, %v6758_v40  ;;  %vm671_vm14 = vcmp.eq.s32.totalorder %v599_v30, %v6758_v40  ;;  %4960 = vmatprep.mubr.msk.bf16.mxu1 %vm878_vm4, %v760_v28 }
 0x253   :  { %v4430_v31 = vsel %vm670_vm13, 1.0, %v6285_v46  ;;  %v4431_v32 = vsel %vm671_vm14, 1.0, %v6285_v46 }
 0x254   :  { %v761_v33 = vpack.c.bf16 %v4431_v32, %v4430_v31 }
 0x255   :  { %v602_v34 = vpop.permute.xlu1 %601  ;;  %v605_v35 = vpop.permute.xlu0 %604 }
 0x256   :  { %vm672_vm15 = vcmp.eq.s32.totalorder %v602_v34, %v6758_v40  ;;  %vm673_vm0 = vcmp.eq.s32.totalorder %v605_v35, %v6758_v40  ;;  %4961 = vmatmul.mubr.msk.bf16.gmra.mrb[8].mxu1 %vm878_vm4, %v761_v33  ;;  %v5344_v33 = vld [vmem:[#allocation16 + $0x10] sm:$0xff]  }
 0x257   :  { %v4432_v36 = vsel %vm672_vm15, 1.0, %v6285_v46  ;;  %v4433_v37 = vsel %vm673_vm0, 1.0, %v6285_v46 }
 0x258   :  { %v762_v38 = vpack.c.bf16 %v4433_v37, %v4432_v36 }
 0x259   :  { %v608_v41 = vpop.permute.xlu1 %607  ;;  %v611_v42 = vpop.permute.xlu0 %610 }
 0x25a   :  { %vm674_vm1 = vcmp.eq.s32.totalorder %v608_v41, %v6758_v40  ;;  %vm675_vm2 = vcmp.eq.s32.totalorder %v611_v42, %v6758_v40  ;;  %4964 = vmatprep.mubr.msk.bf16.mxu1 %vm878_vm4, %v762_v38  ;;  %v5345_v38 = vld [vmem:[#allocation16 + $0x18] sm:$0xff]  }
 0x25b   :  { %v4434_v44 = vsel %vm674_vm1, 1.0, %v6285_v46  ;;  %v4435_v45 = vsel %vm675_vm2, 1.0, %v6285_v46 }
 0x25c   :  { %v763_v47 = vpack.c.bf16 %v4435_v45, %v4434_v44 }
 0x25d   :  { %v614_v48 = vpop.permute.xlu1 %613  ;;  %v617_v49 = vpop.permute.xlu0 %616 }
 0x25e   :  { %vm676_vm3 = vcmp.eq.s32.totalorder %v614_v48, %v6758_v40  ;;  %vm677_vm5 = vcmp.eq.s32.totalorder %v617_v49, %v6758_v40  ;;  %4965 = vmatmul.mubr.msk.bf16.gmra.mrb[12].mxu1 %vm878_vm4, %v763_v47  ;;  %v5347_v49 = vld [vmem:[#allocation16 + $0x28] sm:$0xff]  }
 0x25f   :  { %v4436_v50 = vsel %vm676_vm3, 1.0, %v6285_v46  ;;  %v4437_v51 = vsel %vm677_vm5, 1.0, %v6285_v46  ;;  %vm2409_vm5 = vcmask 261120  }
 0x260   :  { %v764_v52 = vpack.c.bf16 %v4437_v51, %v4436_v50 }
 0x261   :  { %v620_v53 = vpop.permute.xlu1 %619  ;;  %v623_v54 = vpop.permute.xlu0 %622 }
 0x262   :  { %vm678_vm6 = vcmp.eq.s32.totalorder %v620_v53, %v6758_v40  ;;  %vm679_vm7 = vcmp.eq.s32.totalorder %v623_v54, %v6758_v40  ;;  %4968 = vmatprep.mubr.msk.bf16.mxu1 %vm878_vm4, %v764_v52  ;;  %v5348_v52 = vld [vmem:[#allocation16 + $0x30] sm:$0xff]  }
 0x263   :  { %v4438_v55 = vsel %vm678_vm6, 1.0, %v6285_v46  ;;  %v4439_v56 = vsel %vm679_vm7, 1.0, %v6285_v46 }
 0x264   :  { %v765_v57 = vpack.c.bf16 %v4439_v56, %v4438_v55 }
 0x265   :  { %v626_v58 = vpop.permute.xlu1 %625  ;;  %v629_v59 = vpop.permute.xlu0 %628 }
 0x266   :  { %vm680_vm8 = vcmp.eq.s32.totalorder %v626_v58, %v6758_v40  ;;  %vm681_vm9 = vcmp.eq.s32.totalorder %v629_v59, %v6758_v40  ;;  %4969 = vmatmul.mubr.msk.bf16.gmra.mrb[16].mxu1 %vm878_vm4, %v765_v57  ;;  %v5349_v57 = vld [vmem:[#allocation16 + $0x38] sm:$0xff]  }
 0x267   :  { %v4440_v60 = vsel %vm680_vm8, 1.0, %v6285_v46  ;;  %v4441_v61 = vsel %vm681_vm9, 1.0, %v6285_v46 }
 0x268   :  { %v766_v62 = vpack.c.bf16 %v4441_v61, %v4440_v60 }
 0x269   :  { %v632_v63 = vpop.permute.xlu1 %631  ;;  %v635_v0 = vpop.permute.xlu0 %634 }
 0x26a   :  { %vm682_vm10 = vcmp.eq.s32.totalorder %v632_v63, %v6758_v40  ;;  %vm683_vm11 = vcmp.eq.s32.totalorder %v635_v0, %v6758_v40  ;;  %4972 = vmatprep.mubr.msk.bf16.mxu1 %vm878_vm4, %v766_v62 }
 0x26b   :  { %v4442_v1 = vsel %vm682_vm10, 1.0, %v6285_v46  ;;  %v4443_v2 = vsel %vm683_vm11, 1.0, %v6285_v46 }
 0x26c   :  { %v767_v3 = vpack.c.bf16 %v4443_v2, %v4442_v1 }
 0x26d   :  { %v638_v4 = vpop.permute.xlu1 %637  ;;  %v641_v5 = vpop.permute.xlu0 %640 }
 0x26e   :  { %vm684_vm12 = vcmp.eq.s32.totalorder %v638_v4, %v6758_v40  ;;  %vm685_vm13 = vcmp.eq.s32.totalorder %v641_v5, %v6758_v40  ;;  %4973 = vmatmul.mubr.msk.bf16.gmra.mrb[20].mxu1 %vm878_vm4, %v767_v3 }
 0x26f   :  { %v4444_v6 = vsel %vm684_vm12, 1.0, %v6285_v46  ;;  %v4445_v7 = vsel %vm685_vm13, 1.0, %v6285_v46 }
 0x270   :  { %v768_v8 = vpack.c.bf16 %v4445_v7, %v4444_v6 }
 0x271   :  { %v644_v9 = vpop.permute.xlu1 %643  ;;  %v647_v10 = vpop.permute.xlu0 %646 }
 0x272   :  { %vm686_vm14 = vcmp.eq.s32.totalorder %v644_v9, %v6758_v40  ;;  %vm687_vm15 = vcmp.eq.s32.totalorder %v647_v10, %v6758_v40  ;;  %4976 = vmatprep.mubr.msk.bf16.mxu1 %vm878_vm4, %v768_v8 }
 0x273   :  { %v4446_v11 = vsel %vm686_vm14, 1.0, %v6285_v46  ;;  %v4447_v12 = vsel %vm687_vm15, 1.0, %v6285_v46 }
 0x274   :  { %v769_v13 = vpack.c.bf16 %v4447_v12, %v4446_v11 }
 0x275   :  { %v650_v14 = vpop.permute.xlu1 %649  ;;  %v653_v15 = vpop.permute.xlu0 %652 }
 0x276   :  { %vm688_vm0 = vcmp.eq.s32.totalorder %v650_v14, %v6758_v40  ;;  %vm689_vm1 = vcmp.eq.s32.totalorder %v653_v15, %v6758_v40  ;;  %4977 = vmatmul.mubr.msk.bf16.gmra.mrb[24].mxu1 %vm878_vm4, %v769_v13 }
 0x277   :  { %v4448_v16 = vsel %vm688_vm0, 1.0, %v6285_v46  ;;  %v4449_v17 = vsel %vm689_vm1, 1.0, %v6285_v46 }
 0x278   :  { %v770_v18 = vpack.c.bf16 %v4449_v17, %v4448_v16 }
 0x279   :  { %v656_v19 = vpop.permute.xlu1 %655  ;;  %v659_v20 = vpop.permute.xlu0 %658 }
 0x27a   :  { %vm690_vm2 = vcmp.eq.s32.totalorder %v656_v19, %v6758_v40  ;;  %vm691_vm3 = vcmp.eq.s32.totalorder %v659_v20, %v6758_v40  ;;  %4980 = vmatprep.mubr.msk.bf16.mxu1 %vm878_vm4, %v770_v18 }
 0x27b   :  { %v4450_v21 = vsel %vm690_vm2, 1.0, %v6285_v46  ;;  %v4451_v22 = vsel %vm691_vm3, 1.0, %v6285_v46  ;;  %v5343_v46 = vld [vmem:[#allocation16 + $0x8] sm:$0xff]  }
 0x27c   :  { %v771_v23 = vpack.c.bf16 %v4451_v22, %v4450_v21 }
 0x27e   :  { %4981 = vmatmul.mubr.msk.bf16.gmra.mrb[28].mxu1 %vm878_vm4, %v771_v23  ;;  %vm8321_vm4 = vcmp.lt.s32.totalorder %v6758_v40, 3  ;;  %v2043_v40 = vld [vmem:[#allocation9] sm:$0xff] }
 0x2d9   :  { %v6922_v25 = vpop.f32.mrb[0].mxu0 }
 0x2da   :  { %v6924_v26 = vpop.f32.mrb[1].mxu0 }
 0x2db   :  { %v6926_v27 = vpop.f32.mrb[2].mxu0 }
 0x2dc   :  { %v1498_v28 = vpack.c.bf16 %v6926_v27, %v6922_v25  ;;  %v6930_v29 = vpop.f32.mrb[3].mxu0 }
 0x2dd   :  { %v1497_v30 = vpack.c.bf16 %v6930_v29, %v6924_v26 }
 0x2df   :  { %5000 = vmatprep.mubr.bf16.mxu0 %v1497_v30 }
 0x2e0   :  { %5001 = vmatmul.mubr.bf16.vlgmr.msra.gmra.mrb[32].mxu0 %v1498_v28 }
 0x2e1   :  { %v6934_v31 = vpop.f32.mrb[4].mxu0  ;;  %5033 = vmatpush3.bf16.msra.mxu0 %v5342_v24 }
 0x2e2   :  { %v6936_v32 = vpop.f32.mrb[5].mxu0  ;;  %5034 = vmatprep.subr.bf16.mxu0 %v5343_v46 }
 0x2e3   :  { %v6938_v34 = vpop.f32.mrb[6].mxu0 }
 0x2e4   :  { %v1500_v35 = vpack.c.bf16 %v6938_v34, %v6934_v31  ;;  %v6942_v36 = vpop.f32.mrb[7].mxu0 }
 0x2e5   :  { %v1499_v37 = vpack.c.bf16 %v6942_v36, %v6936_v32  ;;  %5035 = vmatpush3.bf16.msra.mxu0 %v5343_v46 }
 0x2e6   :  { %5036 = vmatprep.subr.bf16.mxu0 %v5344_v33 }
 0x2e7   :  { %5004 = vmatprep.mubr.bf16.mxu0 %v1499_v37 }
 0x2e8   :  { %5005 = vmatmul.mubr.bf16.gmra.mrb[36].mxu0 %v1500_v35 }
 0x2e9   :  { %v6946_v41 = vpop.f32.mrb[8].mxu0  ;;  %5037 = vmatpush3.bf16.msra.mxu0 %v5344_v33 }
 0x2ea   :  { %v6948_v42 = vpop.f32.mrb[9].mxu0  ;;  %5038 = vmatprep.subr.bf16.mxu0 %v5345_v38 }
 0x2eb   :  { %v6950_v44 = vpop.f32.mrb[10].mxu0 }
 0x2ec   :  { %v1502_v45 = vpack.c.bf16 %v6950_v44, %v6946_v41  ;;  %v6954_v47 = vpop.f32.mrb[11].mxu0 }
 0x2ed   :  { %v1501_v48 = vpack.c.bf16 %v6954_v47, %v6948_v42  ;;  %5039 = vmatpush3.bf16.msra.mxu0 %v5345_v38 }
 0x2ee   :  { %5040 = vmatprep.subr.bf16.mxu0 %v5346_v43 }
 0x2ef   :  { %5008 = vmatprep.mubr.bf16.mxu0 %v1501_v48 }
 0x2f0   :  { %5009 = vmatmul.mubr.bf16.gmra.mrb[40].mxu0 %v1502_v45 }
 0x2f1   :  { %v6958_v50 = vpop.f32.mrb[12].mxu0  ;;  %5041 = vmatpush3.bf16.msra.mxu0 %v5346_v43 }
 0x2f2   :  { %v6960_v51 = vpop.f32.mrb[13].mxu0  ;;  %5042 = vmatprep.subr.bf16.mxu0 %v5347_v49 }
 0x2f3   :  { %v6962_v53 = vpop.f32.mrb[14].mxu0 }
 0x2f4   :  { %v1504_v54 = vpack.c.bf16 %v6962_v53, %v6958_v50  ;;  %v6966_v55 = vpop.f32.mrb[15].mxu0 }
 0x2f5   :  { %v1503_v56 = vpack.c.bf16 %v6966_v55, %v6960_v51  ;;  %5043 = vmatpush3.bf16.msra.mxu0 %v5347_v49 }
 0x2f6   :  { %5044 = vmatprep.subr.bf16.mxu0 %v5348_v52 }
 0x2f7   :  { %5012 = vmatprep.mubr.bf16.mxu0 %v1503_v56 }
 0x2f8   :  { %5013 = vmatmul.mubr.bf16.gmra.mrb[44].mxu0 %v1504_v54 }
 0x2f9   :  { %v6970_v58 = vpop.f32.mrb[16].mxu0  ;;  %5045 = vmatpush3.bf16.msra.mxu0 %v5348_v52 }
 0x2fa   :  { %v6972_v59 = vpop.f32.mrb[17].mxu0  ;;  %5046 = vmatprep.subr.bf16.mxu0 %v5349_v57 }
 0x2fb   :  { %v6974_v60 = vpop.f32.mrb[18].mxu0 }
 0x2fc   :  { %v1506_v61 = vpack.c.bf16 %v6974_v60, %v6970_v58  ;;  %v6978_v62 = vpop.f32.mrb[19].mxu0 }
 0x2fd   :  { %v1505_v63 = vpack.c.bf16 %v6978_v62, %v6972_v59  ;;  %5047 = vmatpush3.bf16.msra.mxu0 %v5349_v57 }
 0x2ff   :  { %5016 = vmatprep.mubr.bf16.mxu0 %v1505_v63 }
 0x300   :  { %5017 = vmatmul.mubr.bf16.gmra.mrb[48].mxu0 %v1506_v61 }
 0x301   :  { %v6982_v0 = vpop.f32.mrb[20].mxu0 }
 0x302   :  { %v6984_v1 = vpop.f32.mrb[21].mxu0 }
 0x303   :  { %v6986_v2 = vpop.f32.mrb[22].mxu0 }
 0x304   :  { %v1508_v3 = vpack.c.bf16 %v6986_v2, %v6982_v0  ;;  %v6990_v4 = vpop.f32.mrb[23].mxu0 }
 0x305   :  { %v1507_v5 = vpack.c.bf16 %v6990_v4, %v6984_v1 }
 0x307   :  { %5020 = vmatprep.mubr.bf16.mxu0 %v1507_v5 }
 0x308   :  { %5021 = vmatmul.mubr.bf16.gmra.mrb[52].mxu0 %v1508_v3 }
 0x309   :  { %v6994_v6 = vpop.f32.mrb[24].mxu0 }
 0x30a   :  { %v6996_v7 = vpop.f32.mrb[25].mxu0 }
 0x30b   :  { %v6998_v8 = vpop.f32.mrb[26].mxu0 }
 0x30c   :  { %v1510_v9 = vpack.c.bf16 %v6998_v8, %v6994_v6  ;;  %v7002_v10 = vpop.f32.mrb[27].mxu0 }
 0x30d   :  { %v1509_v11 = vpack.c.bf16 %v7002_v10, %v6996_v7 }
 0x30f   :  { %5024 = vmatprep.mubr.bf16.mxu0 %v1509_v11 }
 0x310   :  { %5025 = vmatmul.mubr.bf16.gmra.mrb[56].mxu0 %v1510_v9 }
 0x311   :  { %v7006_v12 = vpop.f32.mrb[28].mxu0 }
 0x312   :  { %v7008_v13 = vpop.f32.mrb[29].mxu0 }
 0x313   :  { %v7010_v14 = vpop.f32.mrb[30].mxu0 }
 0x314   :  { %v1512_v15 = vpack.c.bf16 %v7010_v14, %v7006_v12  ;;  %v7014_v16 = vpop.f32.mrb[31].mxu0 }
 0x315   :  { %v1511_v17 = vpack.c.bf16 %v7014_v16, %v7008_v13 }
 0x317   :  { %5028 = vmatprep.mubr.bf16.mxu0 %v1511_v17 }
 0x318   :  { %5029 = vmatmul.mubr.bf16.gmra.mrb[60].mxu0 %v1512_v15 }
 0x319   :  { %v4954_v18 = vpop.f32.mrb[0].mxu1 }
 0x31a   :  { %v1300_v19 = vsub.f32 %v6922_v25, %v4954_v18  ;;  %v1170_v20 = vpop.f32.mrb[1].mxu1 }
 0x31b   :  { %v1298_v21 = vsub.f32 %v6924_v26, %v1170_v20  ;;  %v4955_v22 = vpop.f32.mrb[2].mxu1 }
 0x31c   :  { %v1301_v23 = vsub.f32 %v6926_v27, %v4955_v22  ;;  %v1771_v24 = vpack.c.bf16 %v4955_v22, %v4954_v18  ;;  %v1173_v28 = vpop.f32.mrb[3].mxu1  ;;  %v7041_v37 = vsel %vm8321_vm4, %v1300_v19, 0.0 }
 0x31d   :  { %v1299_v30 = vsub.f32 %v6930_v29, %v1173_v28  ;;  %v1770_v46 = vpack.c.bf16 %v1173_v28, %v1170_v20  ;;  %v7025_v33 = vsel %vm8321_vm4, %v1298_v21, 0.0  ;;  %v1364_v57 = vmul.f32 %v7041_v37, %v7041_v37 }
 0x31e   :  { %v1362_v25 = vmul.f32 %v7025_v33, %v7025_v33  ;;  %v7035_v26 = vsel %vm8321_vm4, %v1301_v23, 0.0 }
 0x31f   :  { %5048 = vmatprep.mubr.bf16.mxu0 %v1770_v46  ;;  %v7031_v35 = vsel %vm8321_vm4, %v1299_v30, 0.0  ;;  %v1365_v45 = vmul.f32 %v7035_v26, %v7035_v26 }
 0x320   :  { %1394 = vadd.xlane.f32.xlu1 %v1362_v25  ;;  %5049 = vmatmul.mubr.bf16.vlgmr.msra.gmra.mrb[32].mxu0 %v1771_v24  ;;  %v1363_v27 = vmul.f32 %v7031_v35, %v7031_v35 }
 0x321   :  { %v4958_v29 = vpop.f32.mrb[4].mxu1 }
 0x322   :  { %v1304_v38 = vsub.f32 %v6934_v31, %v4958_v29  ;;  %1396 = vadd.xlane.f32.xlu0 %v1363_v27  ;;  %v1186_v43 = vpop.f32.mrb[5].mxu1 }
 0x323   :  { %v1302_v48 = vsub.f32 %v6936_v32, %v1186_v43  ;;  %v4959_v49 = vpop.f32.mrb[6].mxu1 }
 0x324   :  { %v1305_v52 = vsub.f32 %v6938_v34, %v4959_v49  ;;  %v1773_v54 = vpack.c.bf16 %v4959_v49, %v4958_v29  ;;  %1400 = vadd.xlane.f32.xlu1 %v1365_v45  ;;  %v1189_v56 = vpop.f32.mrb[7].mxu1 }
 0x325   :  { %v1303_v61 = vsub.f32 %v6942_v36, %v1189_v56  ;;  %v1772_v63 = vpack.c.bf16 %v1189_v56, %v1186_v43  ;;  %v7053_v31 = vsel %vm8321_vm4, %v1302_v48, 0.0  ;;  %v7065_v36 = vsel %vm8321_vm4, %v1304_v38, 0.0 }
 0x326   :  { %1398 = vadd.xlane.f32.xlu0 %v1364_v57  ;;  %v1366_v34 = vmul.f32 %v7053_v31, %v7053_v31  ;;  %8335 = vst [vmem:[#allocation48_spill] sm:$0xff] %v7065_v36  ;;  %v7069_v9 = vsel %vm8321_vm4, %v1305_v52, 0.0  ;;  %v1368_v22 = vmul.f32 %v7065_v36, %v7065_v36 }
 0x327   :  { %5052 = vmatprep.mubr.bf16.mxu0 %v1772_v63  ;;  %v7057_v32 = vsel %vm8321_vm4, %v1303_v61, 0.0  ;;  %8336 = vst [vmem:[#allocation49_spill] sm:$0xff] %v7069_v9  ;;  %v1369_v23 = vmul.f32 %v7069_v9, %v7069_v9 }
 0x328   :  { %8334 = vst [vmem:[#allocation47_spill] sm:$0xff] %v7057_v32  ;;  %5053 = vmatmul.mubr.bf16.gmra.mrb[36].mxu0 %v1773_v54  ;;  %v1367_v3 = vmul.f32 %v7057_v32, %v7057_v32 }
 0x329   :  { %v4962_v5 = vpop.f32.mrb[8].mxu1 }
 0x32a   :  { %v1308_v11 = vsub.f32 %v6946_v41, %v4962_v5  ;;  %1402 = vadd.xlane.f32.xlu0 %v1366_v34  ;;  %1404 = vadd.xlane.f32.xlu1 %v1367_v3  ;;  %v1202_v15 = vpop.f32.mrb[9].mxu1 }
 0x32b   :  { %v1306_v17 = vsub.f32 %v6948_v42, %v1202_v15  ;;  %v4963_v18 = vpop.f32.mrb[10].mxu1 }
 0x32c   :  { %v1309_v19 = vsub.f32 %v6950_v44, %v4963_v18  ;;  %v1775_v20 = vpack.c.bf16 %v4963_v18, %v4962_v5  ;;  %v1205_v21 = vpop.f32.mrb[11].mxu1  ;;  %v7093_v46 = vsel %vm8321_vm4, %v1308_v11, 0.0 }
 0x32d   :  { %v1307_v24 = vsub.f32 %v6954_v47, %v1205_v21  ;;  %v1774_v28 = vpack.c.bf16 %v1205_v21, %v1202_v15  ;;  %v7081_v41 = vsel %vm8321_vm4, %v1306_v17, 0.0  ;;  %8339 = vst [vmem:[#allocation52_spill] sm:$0xff] %v7093_v46  ;;  %v1372_v52 = vmul.f32 %v7093_v46, %v7093_v46 }
 0x32e   :  { %8337 = vst [vmem:[#allocation50_spill] sm:$0xff] %v7081_v41  ;;  %1406 = vadd.xlane.f32.xlu0 %v1368_v22  ;;  %1408 = vadd.xlane.f32.xlu1 %v1369_v23  ;;  %v1370_v44 = vmul.f32 %v7081_v41, %v7081_v41  ;;  %v7097_v25 = vsel %vm8321_vm4, %v1309_v19, 0.0 }
 0x32f   :  { %5056 = vmatprep.mubr.bf16.mxu0 %v1774_v28  ;;  %v7085_v42 = vsel %vm8321_vm4, %v1307_v24, 0.0  ;;  %8340 = vst [vmem:[#allocation53_spill] sm:$0xff] %v7097_v25  ;;  %v1373_v54 = vmul.f32 %v7097_v25, %v7097_v25 }
 0x330   :  { %8338 = vst [vmem:[#allocation51_spill] sm:$0xff] %v7085_v42  ;;  %5057 = vmatmul.mubr.bf16.gmra.mrb[40].mxu0 %v1775_v20  ;;  %v1371_v30 = vmul.f32 %v7085_v42, %v7085_v42 }
 0x331   :  { %v4966_v47 = vpop.f32.mrb[12].mxu1 }
 0x332   :  { %v1312_v27 = vsub.f32 %v6958_v50, %v4966_v47  ;;  %1410 = vadd.xlane.f32.xlu0 %v1370_v44  ;;  %1412 = vadd.xlane.f32.xlu1 %v1371_v30  ;;  %v1218_v29 = vpop.f32.mrb[13].mxu1 }
 0x333   :  { %v1310_v38 = vsub.f32 %v6960_v51, %v1218_v29  ;;  %v4967_v43 = vpop.f32.mrb[14].mxu1 }
 0x334   :  { %v1313_v45 = vsub.f32 %v6962_v53, %v4967_v43  ;;  %v1777_v48 = vpack.c.bf16 %v4967_v43, %v4966_v47  ;;  %v1221_v49 = vpop.f32.mrb[15].mxu1  ;;  %v7121_v63 = vsel %vm8321_vm4, %v1312_v27, 0.0 }
 0x335   :  { %v1311_v56 = vsub.f32 %v6966_v55, %v1221_v49  ;;  %v1776_v57 = vpack.c.bf16 %v1221_v49, %v1218_v29  ;;  %v7109_v50 = vsel %vm8321_vm4, %v1310_v38, 0.0  ;;  %8343 = vst [vmem:[#allocation56_spill] sm:$0xff] %v7121_v63  ;;  %v1376_v20 = vmul.f32 %v7121_v63, %v7121_v63  ;;  %v7267_v63 = vld [vmem:[#allocation18] ss:$0 sm:$0xff] }
 0x336   :  { %8341 = vst [vmem:[#allocation54_spill] sm:$0xff] %v7109_v50  ;;  %1414 = vadd.xlane.f32.xlu0 %v1372_v52  ;;  %1416 = vadd.xlane.f32.xlu1 %v1373_v54  ;;  %v1374_v53 = vmul.f32 %v7109_v50, %v7109_v50  ;;  %v7125_v34 = vsel %vm8321_vm4, %v1313_v45, 0.0 }
 0x337   :  { %5060 = vmatprep.mubr.bf16.mxu0 %v1776_v57  ;;  %v7113_v51 = vsel %vm8321_vm4, %v1311_v56, 0.0  ;;  %8344 = vst [vmem:[#allocation57_spill] sm:$0xff] %v7125_v34  ;;  %v1377_v21 = vmul.f32 %v7125_v34, %v7125_v34 }
 0x338   :  { %8342 = vst [vmem:[#allocation55_spill] sm:$0xff] %v7113_v51  ;;  %5061 = vmatmul.mubr.bf16.gmra.mrb[44].mxu0 %v1777_v48  ;;  %v1375_v61 = vmul.f32 %v7113_v51, %v7113_v51 }
 0x339   :  { %v4970_v55 = vpop.f32.mrb[16].mxu1 }
 0x33a   :  { %v1316_v3 = vsub.f32 %v6970_v58, %v4970_v55  ;;  %1418 = vadd.xlane.f32.xlu0 %v1374_v53  ;;  %1420 = vadd.xlane.f32.xlu1 %v1375_v61  ;;  %v1234_v5 = vpop.f32.mrb[17].mxu1 }
 0x33b   :  { %v1314_v11 = vsub.f32 %v6972_v59, %v1234_v5  ;;  %v4971_v15 = vpop.f32.mrb[18].mxu1 }
 0x33c   :  { %v1317_v17 = vsub.f32 %v6974_v60, %v4971_v15  ;;  %v1779_v18 = vpack.c.bf16 %v4971_v15, %v4970_v55  ;;  %v1237_v19 = vpop.f32.mrb[19].mxu1  ;;  %v7149_v28 = vsel %vm8321_vm4, %v1316_v3, 0.0 }
 0x33d   :  { %v1315_v22 = vsub.f32 %v6978_v62, %v1237_v19  ;;  %v1778_v23 = vpack.c.bf16 %v1237_v19, %v1234_v5  ;;  %v7137_v58 = vsel %vm8321_vm4, %v1314_v11, 0.0  ;;  %v1380_v48 = vmul.f32 %v7149_v28, %v7149_v28 }
 0x33e   :  { %1422 = vadd.xlane.f32.xlu0 %v1376_v20  ;;  %1424 = vadd.xlane.f32.xlu1 %v1377_v21  ;;  %v1378_v60 = vmul.f32 %v7137_v58, %v7137_v58  ;;  %v7153_v44 = vsel %vm8321_vm4, %v1317_v17, 0.0 }
 0x33f   :  { %5064 = vmatprep.mubr.bf16.mxu0 %v1778_v23  ;;  %v7141_v59 = vsel %vm8321_vm4, %v1315_v22, 0.0  ;;  %v1381_v49 = vmul.f32 %v7153_v44, %v7153_v44 }
 0x340   :  { %5065 = vmatmul.mubr.bf16.gmra.mrb[48].mxu0 %v1779_v18  ;;  %v1379_v24 = vmul.f32 %v7141_v59, %v7141_v59 }
 0x341   :  { %v4974_v62 = vpop.f32.mrb[20].mxu1 }
 0x342   :  { %v1320_v30 = vsub.f32 %v6982_v0, %v4974_v62  ;;  %1426 = vadd.xlane.f32.xlu0 %v1378_v60  ;;  %1428 = vadd.xlane.f32.xlu1 %v1379_v24  ;;  %v1250_v47 = vpop.f32.mrb[21].mxu1 }
 0x343   :  { %v1318_v27 = vsub.f32 %v6984_v1, %v1250_v47  ;;  %v4975_v29 = vpop.f32.mrb[22].mxu1 }
 0x344   :  { %v1321_v38 = vsub.f32 %v6986_v2, %v4975_v29  ;;  %v1781_v43 = vpack.c.bf16 %v4975_v29, %v4974_v62  ;;  %v1253_v45 = vpop.f32.mrb[23].mxu1  ;;  %v7177_v57 = vsel %vm8321_vm4, %v1320_v30, 0.0 }
 0x345   :  { %v1319_v52 = vsub.f32 %v6990_v4, %v1253_v45  ;;  %v1780_v54 = vpack.c.bf16 %v1253_v45, %v1250_v47  ;;  %v7165_v0 = vsel %vm8321_vm4, %v1318_v27, 0.0  ;;  %v1384_v18 = vmul.f32 %v7177_v57, %v7177_v57 }
 0x346   :  { %8345 = vst [vmem:[#allocation58_spill] sm:$0xff] %v7165_v0  ;;  %1430 = vadd.xlane.f32.xlu0 %v1380_v48  ;;  %1432 = vadd.xlane.f32.xlu1 %v1381_v49  ;;  %v1382_v2 = vmul.f32 %v7165_v0, %v7165_v0  ;;  %v7181_v53 = vsel %vm8321_vm4, %v1321_v38, 0.0 }
 0x347   :  { %5068 = vmatprep.mubr.bf16.mxu0 %v1780_v54  ;;  %v7169_v1 = vsel %vm8321_vm4, %v1319_v52, 0.0  ;;  %8347 = vst [vmem:[#allocation60_spill] sm:$0xff] %v7181_v53  ;;  %v1385_v19 = vmul.f32 %v7181_v53, %v7181_v53 }
 0x348   :  { %8346 = vst [vmem:[#allocation59_spill] sm:$0xff] %v7169_v1  ;;  %5069 = vmatmul.mubr.bf16.gmra.mrb[52].mxu0 %v1781_v43  ;;  %v1383_v56 = vmul.f32 %v7169_v1, %v7169_v1 }
 0x349   :  { %v4978_v4 = vpop.f32.mrb[24].mxu1 }
 0x34a   :  { %v1324_v61 = vsub.f32 %v6994_v6, %v4978_v4  ;;  %1434 = vadd.xlane.f32.xlu0 %v1382_v2  ;;  %1436 = vadd.xlane.f32.xlu1 %v1383_v56  ;;  %v1266_v55 = vpop.f32.mrb[25].mxu1 }
 0x34b   :  { %v1322_v3 = vsub.f32 %v6996_v7, %v1266_v55  ;;  %v4979_v5 = vpop.f32.mrb[26].mxu1 }
 0x34c   :  { %v1325_v11 = vsub.f32 %v6998_v8, %v4979_v5  ;;  %v1783_v15 = vpack.c.bf16 %v4979_v5, %v4978_v4  ;;  %v1269_v17 = vpop.f32.mrb[27].mxu1  ;;  %v7205_v23 = vsel %vm8321_vm4, %v1324_v61, 0.0  ;;  %v5350_v4 = vld [vmem:[#allocation19] sm:$0xff]   ;;  %v5351_v61 = vld [vmem:[#allocation19 + $0x8] sm:$0xff]  }
 0x34d   :  { %v1323_v20 = vsub.f32 %v7002_v10, %v1269_v17  ;;  %v1782_v21 = vpack.c.bf16 %v1269_v17, %v1266_v55  ;;  %v7193_v6 = vsel %vm8321_vm4, %v1322_v3, 0.0  ;;  %8350 = vst [vmem:[#allocation63_spill] sm:$0xff] %v7205_v23  ;;  %v1388_v43 = vmul.f32 %v7205_v23, %v7205_v23  ;;  %5080 = vmatprep.subr.bf16.mxu1 %v5350_v4  ;;  %v2052_v23 = vld [vmem:[#allocation9 + $0x48] sm:$0xff] }
 0x34e   :  { %8348 = vst [vmem:[#allocation61_spill] sm:$0xff] %v7193_v6  ;;  %1438 = vadd.xlane.f32.xlu0 %v1384_v18  ;;  %1440 = vadd.xlane.f32.xlu1 %v1385_v19  ;;  %v1386_v8 = vmul.f32 %v7193_v6, %v7193_v6  ;;  %v7209_v60 = vsel %vm8321_vm4, %v1325_v11, 0.0 }
 0x34f   :  { %5072 = vmatprep.mubr.bf16.mxu0 %v1782_v21  ;;  %v7197_v7 = vsel %vm8321_vm4, %v1323_v20, 0.0  ;;  %8351 = vst [vmem:[#allocation64_spill] sm:$0xff] %v7209_v60  ;;  %v1389_v45 = vmul.f32 %v7209_v60, %v7209_v60  ;;  %5081 = vmatpush3.bf16.msra.mxu1 %v5350_v4 }
 0x350   :  { %8349 = vst [vmem:[#allocation62_spill] sm:$0xff] %v7197_v7  ;;  %5073 = vmatmul.mubr.bf16.gmra.mrb[56].mxu0 %v1783_v15  ;;  %v1387_v22 = vmul.f32 %v7197_v7, %v7197_v7  ;;  %5082 = vmatprep.subr.bf16.mxu1 %v5351_v61 }
 0x351   :  { %v4982_v10 = vpop.f32.mrb[28].mxu1 }
 0x352   :  { %v1328_v24 = vsub.f32 %v7006_v12, %v4982_v10  ;;  %1442 = vadd.xlane.f32.xlu0 %v1386_v8  ;;  %1444 = vadd.xlane.f32.xlu1 %v1387_v22  ;;  %v1282_v62 = vpop.f32.mrb[29].mxu1 }
 0x353   :  { %v1326_v30 = vsub.f32 %v7008_v13, %v1282_v62  ;;  %v4983_v47 = vpop.f32.mrb[30].mxu1  ;;  %5083 = vmatpush3.bf16.msra.mxu1 %v5351_v61 }
 0x354   :  { %v1329_v27 = vsub.f32 %v7010_v14, %v4983_v47  ;;  %v1785_v29 = vpack.c.bf16 %v4983_v47, %v4982_v10  ;;  %v1285_v38 = vpop.f32.mrb[31].mxu1 }
 0x355   :  { %v1327_v48 = vsub.f32 %v7014_v16, %v1285_v38  ;;  %v1784_v49 = vpack.c.bf16 %v1285_v38, %v1282_v62  ;;  %v7221_v12 = vsel %vm8321_vm4, %v1326_v30, 0.0  ;;  %v7233_v16 = vsel %vm8321_vm4, %v1328_v24, 0.0 }
 0x356   :  { %8352 = vst [vmem:[#allocation65_spill] sm:$0xff] %v7221_v12  ;;  %1446 = vadd.xlane.f32.xlu0 %v1388_v43  ;;  %1448 = vadd.xlane.f32.xlu1 %v1389_v45  ;;  %v1390_v14 = vmul.f32 %v7221_v12, %v7221_v12  ;;  %8354 = vst [vmem:[#allocation67_spill] sm:$0xff] %v7233_v16  ;;  %v7237_v54 = vsel %vm8321_vm4, %v1329_v27, 0.0  ;;  %v1392_v2 = vmul.f32 %v7233_v16, %v7233_v16  ;;  %v7257_v45 = vld [vmem:[#allocation13] ss:$0 sm:$0xff] }
 0x357   :  { %5076 = vmatprep.mubr.bf16.mxu0 %v1784_v49  ;;  %v7225_v13 = vsel %vm8321_vm4, %v1327_v48, 0.0  ;;  %8355 = vst [vmem:[#allocation68_spill] sm:$0xff] %v7237_v54  ;;  %v1393_v56 = vmul.f32 %v7237_v54, %v7237_v54 }
 0x358   :  { %8353 = vst [vmem:[#allocation66_spill] sm:$0xff] %v7225_v13  ;;  %5077 = vmatmul.mubr.bf16.gmra.mrb[60].mxu0 %v1785_v29  ;;  %v1391_v52 = vmul.f32 %v7225_v13, %v7225_v13 }
 0x35a   :  { %1450 = vadd.xlane.f32.xlu0 %v1390_v14  ;;  %1452 = vadd.xlane.f32.xlu1 %v1391_v52 }
 0x35e   :  { %1454 = vadd.xlane.f32.xlu0 %v1392_v2  ;;  %1456 = vadd.xlane.f32.xlu1 %v1393_v56  ;;  %v2045_v56 = vld [vmem:[#allocation9 + $0x10] sm:$0xff] }
 0x3ad   :  { %v1395_v55 = vpop.xlane.xlu1 %1394 }
 0x3ae   :  { %v1465_v14 = vmul.f32 %v7257_v45, %v1395_v55  ;;  %v2044_v55 = vld [vmem:[#allocation9 + $0x8] sm:$0xff] }
 0x3af   :  { %v1397_v3 = vpop.xlane.xlu0 %1396 }
 0x3b0   :  { %v1466_v34 = vmul.f32 %v7257_v45, %v1397_v3 }
 0x3b1   :  { %v1401_v5 = vpop.xlane.xlu1 %1400 }
 0x3b2   :  { %v1468_v4 = vmul.f32 %v7257_v45, %v1401_v5 }
 0x3b3   :  { %v1399_v11 = vpop.xlane.xlu0 %1398 }
 0x3b4   :  { %v1467_v48 = vmul.f32 %v7257_v45, %v1399_v11  ;;  %v2046_v11 = vld [vmem:[#allocation9 + $0x18] sm:$0xff] }
 0x3b7   :  { %v1405_v15 = vpop.xlane.xlu1 %1404  ;;  %v1403_v17 = vpop.xlane.xlu0 %1402 }
 0x3b8   :  { %v1470_v46 = vmul.f32 %v7257_v45, %v1405_v15  ;;  %v1469_v3 = vmul.f32 %v7257_v45, %v1403_v17  ;;  %v2049_v15 = vld [vmem:[#allocation9 + $0x30] sm:$0xff] }
 0x3bb   :  { %v1409_v18 = vpop.xlane.xlu1 %1408  ;;  %v1407_v19 = vpop.xlane.xlu0 %1406 }
 0x3bf   :  { %v1413_v20 = vpop.xlane.xlu1 %1412  ;;  %v1411_v21 = vpop.xlane.xlu0 %1410 }
 0x3c3   :  { %v1417_v8 = vpop.xlane.xlu1 %1416  ;;  %v1415_v22 = vpop.xlane.xlu0 %1414 }
 0x3c4   :  { %v1475_v17 = vmul.f32 %v7257_v45, %v1415_v22 }
 0x3c7   :  { %v1421_v10 = vpop.xlane.xlu1 %1420  ;;  %v1419_v24 = vpop.xlane.xlu0 %1418 }
 0x3cb   :  { %v7243_v62 = vpop.xlane.xlu1 %1424  ;;  %v7245_v30 = vpop.xlane.xlu0 %1422 }
 0x3cf   :  { %v7247_v47 = vpop.xlane.xlu1 %1428  ;;  %v7249_v27 = vpop.xlane.xlu0 %1426 }
 0x3d3   :  { %v7251_v29 = vpop.xlane.xlu1 %1432  ;;  %v7253_v38 = vpop.xlane.xlu0 %1430 }
 0x3d7   :  { %v7255_v43 = vpop.xlane.xlu1 %1436  ;;  %v7260_v49 = vpop.xlane.xlu0 %1434 }
 0x3db   :  { %v7263_v52 = vpop.xlane.xlu1 %1440  ;;  %v1439_v7 = vpop.xlane.xlu0 %1438 }
 0x3f3   :  { %v5050_v2 = vpop.f32.mrb[32].mxu0 }
 0x3f4   :  { %v5224_v61 = vadd.f32 %v5050_v2, %v1467_v48  ;;  %v1884_v39 = vpop.f32.mrb[33].mxu0  ;;  %v1472_v2 = vmul.f32 %v7257_v45, %v1409_v18 }
 0x3f5   :  { %v5225_v54 = vadd.f32 %v1884_v39, %v1465_v14  ;;  %v5051_v16 = vpop.f32.mrb[34].mxu0  ;;  %v1445_v39 = vpop.xlane.xlu1 %1444 }
 0x3f6   :  { %v2077_v13 = vadd.f32 %v5224_v61, %v2045_v56  ;;  %v5226_v12 = vadd.f32 %v5051_v16, %v1468_v4  ;;  %v1887_v51 = vpop.f32.mrb[35].mxu0  ;;  %v1471_v56 = vmul.f32 %v7257_v45, %v1407_v19  ;;  %v2047_v4 = vld [vmem:[#allocation9 + $0x20] sm:$0xff] }
 0x3f7   :  { %v2075_v50 = vadd.f32 %v5225_v54, %v2043_v40  ;;  %v5227_v25 = vadd.f32 %v1887_v51, %v1466_v34  ;;  %v7280_v40 = vmul.f32 %v7257_v45, %v1413_v20 }
 0x3f8   :  { %v7271_v5 = vadd.f32 %v7267_v63, %v2077_v13  ;;  %v2078_v48 = vadd.f32 %v5226_v12, %v2046_v11  ;;  %v1473_v12 = vmul.f32 %v7257_v45, %v1411_v21  ;;  %v7288_v13 = vmul.f32 %v7257_v45, %v1417_v8 }
 0x3f9   :  { %v7276_v14 = vadd.f32 %v7267_v63, %v2075_v50  ;;  %v2076_v16 = vadd.f32 %v5227_v25, %v2044_v55  ;;  %v7297_v21 = vmul.f32 %v7257_v45, %v1421_v10  ;;  %v2050_v55 = vld [vmem:[#allocation9 + $0x38] sm:$0xff]  ;;  %v1449_v10 = vpop.xlane.xlu1 %1448 }
 0x3fa   :  { %v4524_v51 = vmul.f32 -1.442695, %v7271_v5  ;;  %v7284_v34 = vadd.f32 %v7267_v63, %v2078_v48  ;;  %v7301_v48 = vmul.f32 %v7257_v45, %v1419_v24  ;;  %v7313_v24 = vmul.f32 %v7257_v45, %v7247_v47 }
 0x3fb   :  { %v4522_v54 = vmul.f32 -1.442695, %v7276_v14  ;;  %v7292_v50 = vadd.f32 %v7267_v63, %v2076_v16  ;;  %v5054_v25 = vpop.f32.mrb[36].mxu0  ;;  %v1443_v16 = vpop.xlane.xlu0 %1442  ;;  %v7335_v47 = vmul.f32 %v7257_v45, %v7255_v43 }
 0x3fc   :  { %5378 = vpow2.f32 %v4524_v51  ;;  %v4525_v18 = vmul.f32 -1.442695, %v7284_v34  ;;  %v5228_v19 = vadd.f32 %v5054_v25, %v1471_v56  ;;  %v1900_v20 = vpop.f32.mrb[37].mxu0  ;;  %v2048_v56 = vld [vmem:[#allocation9 + $0x28] sm:$0xff]  ;;  %v7305_v25 = vmul.f32 %v7257_v45, %v7243_v62 }
 0x3fd   :  { %5380 = vpow2.f32 %v4522_v54  ;;  %v4523_v8 = vmul.f32 -1.442695, %v7292_v50  ;;  %v5229_v61 = vadd.f32 %v1900_v20, %v1469_v3  ;;  %v5055_v11 = vpop.f32.mrb[38].mxu0  ;;  %v7309_v3 = vmul.f32 %v7257_v45, %v7245_v30 }
 0x3fe   :  { %5382 = vpow2.f32 %v4525_v18  ;;  %v2081_v22 = vadd.f32 %v5228_v19, %v2049_v15  ;;  %v5230_v51 = vadd.f32 %v5055_v11, %v1472_v2  ;;  %v1903_v60 = vpop.f32.mrb[39].mxu0  ;;  %v7320_v62 = vmul.f32 %v7257_v45, %v7249_v27 }
 0x3ff   :  { %5384 = vpow2.f32 %v4523_v8  ;;  %v2079_v54 = vadd.f32 %v5229_v61, %v2047_v4  ;;  %v5231_v6 = vadd.f32 %v1903_v60, %v1470_v46  ;;  %v7324_v18 = vmul.f32 %v7257_v45, %v7251_v29  ;;  %v2053_v4 = vld [vmem:[#allocation9 + $0x50] sm:$0xff]  ;;  %v1447_v61 = vpop.xlane.xlu0 %1446 }
 0x400   :  { %v7316_v2 = vadd.f32 %v7267_v63, %v2081_v22  ;;  %v2082_v15 = vadd.f32 %v5230_v51, %v2050_v55  ;;  %v7331_v30 = vmul.f32 %v7257_v45, %v7253_v38  ;;  %v7343_v29 = vmul.f32 %v7257_v45, %v7260_v49  ;;  %v2051_v22 = vld [vmem:[#allocation9 + $0x40] sm:$0xff]  ;;  %v1453_v51 = vpop.xlane.xlu1 %1452 }
 0x401   :  { %v7327_v46 = vadd.f32 %v7267_v63, %v2079_v54  ;;  %v2080_v60 = vadd.f32 %v5231_v6, %v2048_v56  ;;  %v7347_v6 = vmul.f32 %v7257_v45, %v7263_v52  ;;  %v7354_v8 = vmul.f32 %v7257_v45, %v1439_v7 }
 0x402   :  { %v4528_v19 = vmul.f32 -1.442695, %v7316_v2  ;;  %v7339_v27 = vadd.f32 %v7267_v63, %v2082_v15  ;;  %v7358_v52 = vmul.f32 %v7257_v45, %v1445_v39  ;;  %v7362_v7 = vmul.f32 %v7257_v45, %v1443_v16 }
 0x403   :  { %v4526_v38 = vmul.f32 -1.442695, %v7327_v46  ;;  %v7351_v20 = vadd.f32 %v7267_v63, %v2080_v60  ;;  %v5058_v43 = vpop.f32.mrb[40].mxu0  ;;  %v2054_v60 = vld [vmem:[#allocation9 + $0x58] sm:$0xff] }
 0x404   :  { %5386 = vpow2.f32 %v4528_v19  ;;  %v4529_v11 = vmul.f32 -1.442695, %v7339_v27  ;;  %v5232_v49 = vadd.f32 %v5058_v43, %v1475_v17  ;;  %v1916_v55 = vpop.f32.mrb[41].mxu0 }
 0x405   :  { %5388 = vpow2.f32 %v4526_v38  ;;  %v4527_v56 = vmul.f32 -1.442695, %v7351_v20  ;;  %v5233_v54 = vadd.f32 %v1916_v55, %v1473_v12  ;;  %v5059_v15 = vpop.f32.mrb[42].mxu0  ;;  %v7367_v12 = vmul.f32 %v7257_v45, %v1449_v10 }
 0x406   :  { %v5379_v42 = vpop.eup %5378  ;;  %5390 = vpow2.f32 %v4529_v11  ;;  %v2085_v19 = vadd.f32 %v5232_v49, %v2053_v4  ;;  %v5234_v17 = vadd.f32 %v5059_v15, %v7288_v13  ;;  %v1919_v43 = vpop.f32.mrb[43].mxu0 }
 0x407   :  { %v5381_v41 = vpop.eup %5380  ;;  %v2244_v39 = vadd.f32 1.0, %v5379_v42  ;;  %5392 = vpow2.f32 %v4527_v56  ;;  %v2083_v9 = vadd.f32 %v5233_v54, %v2051_v22  ;;  %v5235_v38 = vadd.f32 %v1919_v43, %v7280_v40  ;;  %v1451_v56 = vpop.xlane.xlu0 %1450 }
 0x408   :  { %v5383_v36 = vpop.eup %5382  ;;  %v2242_v55 = vadd.f32 1.0, %v5381_v41  ;;  %v7370_v16 = vadd.f32 %v7267_v63, %v2085_v19  ;;  %v2086_v11 = vadd.f32 %v5234_v17, %v2054_v60  ;;  %v7380_v41 = vmul.f32 %v7257_v45, %v1447_v61  ;;  %v1457_v54 = vpop.xlane.xlu1 %1456  ;;  %v2055_v61 = vld [vmem:[#allocation9 + $0x60] sm:$0xff] }
 0x409   :  { %v5385_v4 = vpop.eup %5384  ;;  %5394 = vrcp.f32 %v2244_v39  ;;  %v2245_v13 = vadd.f32 1.0, %v5383_v36  ;;  %v7373_v49 = vadd.f32 %v7267_v63, %v2083_v9  ;;  %v2084_v42 = vadd.f32 %v5235_v38, %v2052_v23  ;;  %v2057_v23 = vld [vmem:[#allocation9 + $0x70] sm:$0xff] }
 0x40a   :  { %5396 = vrcp.f32 %v2242_v55  ;;  %v2243_v22 = vadd.f32 1.0, %v5385_v4  ;;  %v4532_v40 = vmul.f32 -1.442695, %v7370_v16  ;;  %v7377_v10 = vadd.f32 %v7267_v63, %v2086_v11  ;;  %v2058_v4 = vld [vmem:[#allocation9 + $0x78] sm:$0xff] }
 0x40b   :  { %5398 = vrcp.f32 %v2245_v13  ;;  %v4530_v15 = vmul.f32 -1.442695, %v7373_v49  ;;  %v7384_v36 = vadd.f32 %v7267_v63, %v2084_v42  ;;  %v5062_v9 = vpop.f32.mrb[44].mxu0  ;;  %v7387_v60 = vmul.f32 %v7257_v45, %v1453_v51 }
 0x40c   :  { %5400 = vrcp.f32 %v2243_v22  ;;  %v4533_v19 = vmul.f32 -1.442695, %v7377_v10  ;;  %v5236_v17 = vadd.f32 %v5062_v9, %v7309_v3  ;;  %v1932_v43 = vpop.f32.mrb[45].mxu0  ;;  %v7392_v39 = vmul.f32 %v7257_v45, %v1451_v56  ;;  %v2056_v9 = vld [vmem:[#allocation9 + $0x68] sm:$0xff] }
 0x40d   :  { %5402 = vpow2.f32 %v4532_v40  ;;  %v4531_v38 = vmul.f32 -1.442695, %v7384_v36  ;;  %v5237_v55 = vadd.f32 %v1932_v43, %v7301_v48  ;;  %v5063_v11 = vpop.f32.mrb[46].mxu0  ;;  %v7397_v51 = vmul.f32 %v7257_v45, %v1457_v54  ;;  %v1455_v48 = vpop.xlane.xlu0 %1454 }
 0x40e   :  { %v5387_v13 = vpop.eup %5386  ;;  %5404 = vpow2.f32 %v4530_v15  ;;  %v2089_v42 = vadd.f32 %v5236_v17, %v2057_v23  ;;  %v5238_v3 = vadd.f32 %v5063_v11, %v7305_v25  ;;  %v1935_v22 = vpop.f32.mrb[47].mxu0 }
 0x40f   :  { %v5389_v1 = vpop.eup %5388  ;;  %v2248_v56 = vadd.f32 1.0, %v5387_v13  ;;  %5406 = vpow2.f32 %v4533_v19  ;;  %v2087_v40 = vadd.f32 %v5237_v55, %v2055_v61  ;;  %v5239_v53 = vadd.f32 %v1935_v22, %v7297_v21 }
 0x410   :  { %v5391_v0 = vpop.eup %5390  ;;  %v2246_v43 = vadd.f32 1.0, %v5389_v1  ;;  %5408 = vpow2.f32 %v4531_v38  ;;  %v7402_v32 = vadd.f32 %v7267_v63, %v2089_v42  ;;  %v2090_v54 = vadd.f32 %v5238_v3, %v2058_v4 }
 0x411   :  { %v5393_v15 = vpop.eup %5392  ;;  %5410 = vrcp.f32 %v2248_v56  ;;  %v2249_v23 = vadd.f32 1.0, %v5391_v0  ;;  %v7405_v25 = vadd.f32 %v7267_v63, %v2087_v40  ;;  %v2088_v17 = vadd.f32 %v5239_v53, %v2056_v9  ;;  %v2061_v53 = vld [vmem:[#allocation9 + $0x90] sm:$0xff]  ;;  %v2059_v9 = vld [vmem:[#allocation9 + $0x80] sm:$0xff] }
 0x412   :  { %5412 = vrcp.f32 %v2246_v43  ;;  %v2247_v19 = vadd.f32 1.0, %v5393_v15  ;;  %v4536_v21 = vmul.f32 -1.442695, %v7402_v32  ;;  %v7409_v61 = vadd.f32 %v7267_v63, %v2090_v54 }
 0x413   :  { %v5395_v1 = vpop.eup %5394  ;;  %v7412_v38 = vmul.f32 %v7257_v45, %v1455_v48  ;;  %5414 = vrcp.f32 %v2249_v23  ;;  %v4534_v55 = vmul.f32 -1.442695, %v7405_v25  ;;  %v7416_v0 = vadd.f32 %v7267_v63, %v2088_v17  ;;  %v5066_v11 = vpop.f32.mrb[48].mxu0  ;;  %v2062_v17 = vld [vmem:[#allocation9 + $0x98] sm:$0xff] }
 0x414   :  { %v5397_v4 = vpop.eup %5396  ;;  %v2340_v13 = vmul.f32 %v5395_v1, %v7271_v5  ;;  %5416 = vrcp.f32 %v2247_v19  ;;  %v4537_v42 = vmul.f32 -1.442695, %v7409_v61  ;;  %v5240_v3 = vadd.f32 %v5066_v11, %v7331_v30  ;;  %v1948_v22 = vpop.f32.mrb[49].mxu0  ;;  %v2060_v19 = vld [vmem:[#allocation9 + $0x88] sm:$0xff] }
 0x415   :  { %v5399_v45 = vpop.eup %5398  ;;  %v2338_v56 = vmul.f32 %v5397_v4, %v7276_v14  ;;  %5418 = vpow2.f32 %v4536_v21  ;;  %v4535_v40 = vmul.f32 -1.442695, %v7416_v0  ;;  %v5241_v48 = vadd.f32 %v1948_v22, %v7320_v62  ;;  %v5067_v43 = vpop.f32.mrb[50].mxu0 }
 0x416   :  { %v5401_v54 = vpop.eup %5400  ;;  %v2341_v15 = vmul.f32 %v5399_v45, %v7284_v34  ;;  %5420 = vpow2.f32 %v4534_v55  ;;  %v2093_v5 = vadd.f32 %v5240_v3, %v2061_v53  ;;  %v5242_v23 = vadd.f32 %v5067_v43, %v7324_v18  ;;  %v1951_v30 = vpop.f32.mrb[51].mxu0 }
 0x417   :  { %v5403_v1 = vpop.eup %5402  ;;  %v2339_v11 = vmul.f32 %v5401_v54, %v7292_v50  ;;  %5422 = vpow2.f32 %v4537_v42  ;;  %v2091_v14 = vadd.f32 %v5241_v48, %v2059_v9  ;;  %v5243_v21 = vadd.f32 %v1951_v30, %v7313_v24 }
 0x418   :  { %v5405_v4 = vpop.eup %5404  ;;  %v2371_v62 = vpack.c.bf16 %v2341_v15, %v2340_v13  ;;  %v2252_v22 = vadd.f32 1.0, %v5403_v1  ;;  %5424 = vpow2.f32 %v4535_v40  ;;  %v7429_v34 = vadd.f32 %v7267_v63, %v2093_v5  ;;  %v2065_v15 = vld [vmem:[#allocation9 + $0xb0] sm:$0xff] }
 0x419   :  { %v5407_v55 = vpop.eup %5406  ;;  %v2250_v53 = vadd.f32 1.0, %v5405_v4  ;;  %v7432_v18 = vadd.f32 %v7267_v63, %v2091_v14  ;;  %v2094_v3 = vadd.f32 %v5242_v23, %v2062_v17  ;;  %v2092_v45 = vadd.f32 %v5243_v21, %v2060_v19  ;;  %v2063_v19 = vld [vmem:[#allocation9 + $0xa0] sm:$0xff] }
 0x41a   :  { %v5409_v43 = vpop.eup %5408  ;;  %5426 = vrcp.f32 %v2252_v22  ;;  %v2253_v50 = vadd.f32 1.0, %v5407_v55  ;;  %v4540_v42 = vmul.f32 -1.442695, %v7429_v34  ;;  %v2370_v24 = vpack.c.bf16 %v2339_v11, %v2338_v56 }
 0x41b   :  { %v5411_v9 = vpop.eup %5410  ;;  %5428 = vrcp.f32 %v2250_v53  ;;  %v2251_v13 = vadd.f32 1.0, %v5409_v43  ;;  %v4538_v40 = vmul.f32 -1.442695, %v7432_v18  ;;  %v7437_v48 = vadd.f32 %v7267_v63, %v2094_v3  ;;  %v5070_v54 = vpop.f32.mrb[52].mxu0  ;;  %v2066_v53 = vld [vmem:[#allocation9 + $0xb8] sm:$0xff] }
 0x41c   :  { %v5413_v5 = vpop.eup %5412  ;;  %v7440_v23 = vmul.f32 %v5411_v9, %v7316_v2  ;;  %5430 = vrcp.f32 %v2253_v50  ;;  %v7443_v17 = vadd.f32 %v7267_v63, %v2092_v45  ;;  %v5244_v56 = vadd.f32 %v5070_v54, %v7354_v8  ;;  %5084 = vmatprep.mubr.msk.bf16.mxu1 %vm2409_vm5, %v2370_v24  ;;  %v1964_v30 = vpop.f32.mrb[53].mxu0  ;;  %v2064_v50 = vld [vmem:[#allocation9 + $0xa8] sm:$0xff] }
 0x41d   :  { %v5415_v1 = vpop.eup %5414  ;;  %v2342_v11 = vmul.f32 %v5413_v5, %v7327_v46  ;;  %5432 = vrcp.f32 %v2251_v13  ;;  %v4541_v14 = vmul.f32 -1.442695, %v7437_v48  ;;  %v5245_v21 = vadd.f32 %v1964_v30, %v7343_v29  ;;  %5085 = vmatmul.mubr.msk.bf16.vlgmr.msra.gmra.mrb[32].mxu1 %vm2409_vm5, %v2371_v62  ;;  %v5071_v2 = vpop.f32.mrb[54].mxu0 }
 0x41e   :  { %v5417_v4 = vpop.eup %5416  ;;  %v7452_v22 = vmul.f32 %v5415_v1, %v7339_v27  ;;  %5434 = vpow2.f32 %v4540_v42  ;;  %v4539_v8 = vmul.f32 -1.442695, %v7443_v17  ;;  %v2097_v55 = vadd.f32 %v5244_v56, %v2065_v15  ;;  %v1967_v3 = vpop.f32.mrb[55].mxu0  ;;  %v2069_v1 = vld [vmem:[#allocation9 + $0xd0] sm:$0xff] }
 0x41f   :  { %v5419_v45 = vpop.eup %5418  ;;  %v2343_v46 = vmul.f32 %v5417_v4, %v7351_v20  ;;  %5436 = vpow2.f32 %v4538_v40  ;;  %v2095_v43 = vadd.f32 %v5245_v21, %v2063_v19  ;;  %v5246_v29 = vadd.f32 %v5071_v2, %v7347_v6 }
 0x420   :  { %v5421_v62 = vpop.eup %5420  ;;  %v2256_v24 = vadd.f32 1.0, %v5419_v45  ;;  %5438 = vpow2.f32 %v4541_v14  ;;  %v7458_v27 = vadd.f32 %v7267_v63, %v2097_v55  ;;  %v5247_v42 = vadd.f32 %v1967_v3, %v7335_v47  ;;  %v2067_v55 = vld [vmem:[#allocation9 + $0xc0] sm:$0xff] }
 0x421   :  { %v5423_v9 = vpop.eup %5422  ;;  %v2254_v13 = vadd.f32 1.0, %v5421_v62  ;;  %5440 = vpow2.f32 %v4539_v8  ;;  %v7462_v54 = vadd.f32 %v7267_v63, %v2095_v43  ;;  %v2098_v20 = vadd.f32 %v5246_v29, %v2066_v53 }
 0x422   :  { %v5425_v40 = vpop.eup %5424  ;;  %5442 = vrcp.f32 %v2256_v24  ;;  %v2257_v15 = vadd.f32 1.0, %v5423_v9  ;;  %v4544_v6 = vmul.f32 -1.442695, %v7458_v27  ;;  %v2096_v5 = vadd.f32 %v5247_v42, %v2064_v50  ;;  %v2070_v9 = vld [vmem:[#allocation9 + $0xd8] sm:$0xff] }
 0x423   :  { %5444 = vrcp.f32 %v2254_v13  ;;  %v2255_v56 = vadd.f32 1.0, %v5425_v40  ;;  %v4542_v30 = vmul.f32 -1.442695, %v7462_v54  ;;  %v7467_v19 = vadd.f32 %v7267_v63, %v2098_v20  ;;  %v5074_v47 = vpop.f32.mrb[56].mxu0 }
 0x424   :  { %v5427_v14 = vpop.eup %5426  ;;  %5446 = vrcp.f32 %v2257_v15  ;;  %v7470_v21 = vadd.f32 %v7267_v63, %v2096_v5  ;;  %v5248_v2 = vadd.f32 %v5074_v47, %v7380_v41  ;;  %v2372_v4 = vpack.c.bf16 %v2343_v46, %v2342_v11  ;;  %v1980_v8 = vpop.f32.mrb[57].mxu0  ;;  %v2068_v15 = vld [vmem:[#allocation9 + $0xc8] sm:$0xff] }
 0x425   :  { %v5429_v53 = vpop.eup %5428  ;;  %v7474_v3 = vmul.f32 %v5427_v14, %v7370_v16  ;;  %5448 = vrcp.f32 %v2255_v56  ;;  %v4545_v45 = vmul.f32 -1.442695, %v7467_v19  ;;  %v5249_v43 = vadd.f32 %v1980_v8, %v7362_v7  ;;  %v5075_v29 = vpop.f32.mrb[58].mxu0  ;;  %v2073_v8 = vld [vmem:[#allocation9 + $0xf0] sm:$0xff] }
 0x426   :  { %v5431_v50 = vpop.eup %5430  ;;  %v2346_v62 = vmul.f32 %v5429_v53, %v7373_v49  ;;  %5450 = vpow2.f32 %v4544_v6  ;;  %v4543_v24 = vmul.f32 -1.442695, %v7470_v21  ;;  %v2101_v41 = vadd.f32 %v5248_v2, %v2069_v1  ;;  %5088 = vmatprep.mubr.msk.bf16.mxu1 %vm2409_vm5, %v2372_v4  ;;  %v1983_v11 = vpop.f32.mrb[59].mxu0 }
 0x427   :  { %v5433_v46 = vpop.eup %5432  ;;  %v7482_v16 = vmul.f32 %v5431_v50, %v7377_v10  ;;  %5452 = vpow2.f32 %v4542_v30  ;;  %v2099_v42 = vadd.f32 %v5249_v43, %v2067_v55  ;;  %v2373_v7 = vpack.c.bf16 %v7452_v22, %v7440_v23 }
 0x428   :  { %v5435_v13 = vpop.eup %5434  ;;  %v2347_v49 = vmul.f32 %v5433_v46, %v7384_v36  ;;  %5454 = vpow2.f32 %v4545_v45  ;;  %v7488_v20 = vadd.f32 %v7267_v63, %v2101_v41  ;;  %v5250_v40 = vadd.f32 %v5075_v29, %v7367_v12  ;;  %v2071_v29 = vld [vmem:[#allocation9 + $0xe0] sm:$0xff] }
 0x429   :  { %v5437_v6 = vpop.eup %5436  ;;  %v2260_v5 = vadd.f32 1.0, %v5435_v13  ;;  %5456 = vpow2.f32 %v4543_v24  ;;  %v7492_v10 = vadd.f32 %v7267_v63, %v2099_v42  ;;  %5089 = vmatmul.mubr.msk.bf16.gmra.mrb[36].mxu1 %vm2409_vm5, %v2373_v7  ;;  %v5251_v23 = vadd.f32 %v1983_v11, %v7358_v52 }
 0x42a   :  { %v5439_v22 = vpop.eup %5438  ;;  %v2258_v56 = vadd.f32 1.0, %v5437_v6  ;;  %v4548_v36 = vmul.f32 -1.442695, %v7488_v20  ;;  %v2102_v30 = vadd.f32 %v5250_v40, %v2070_v9  ;;  %v2374_v47 = vpack.c.bf16 %v2347_v49, %v2346_v62 }
 0x42b   :  { %v5441_v1 = vpop.eup %5440  ;;  %5458 = vrcp.f32 %v2260_v5  ;;  %v2261_v12 = vadd.f32 1.0, %v5439_v22  ;;  %v4546_v14 = vmul.f32 -1.442695, %v7492_v10  ;;  %v2100_v2 = vadd.f32 %v5251_v23, %v2068_v15  ;;  %v5078_v4 = vpop.f32.mrb[60].mxu0  ;;  %v2074_v5 = vld [vmem:[#allocation9 + $0xf8] sm:$0xff] }
 0x42c   :  { %v5443_v55 = vpop.eup %5442  ;;  %5460 = vrcp.f32 %v2258_v56  ;;  %v2259_v53 = vadd.f32 1.0, %v5441_v1  ;;  %v7499_v45 = vadd.f32 %v7267_v63, %v2102_v30  ;;  %v5252_v52 = vadd.f32 %v5078_v4, %v7412_v38  ;;  %5092 = vmatprep.mubr.msk.bf16.mxu1 %vm2409_vm5, %v2374_v47  ;;  %v1996_v43 = vpop.f32.mrb[61].mxu0 }
 0x42d   :  { %v5445_v50 = vpop.eup %5444  ;;  %v7504_v62 = vmul.f32 %v5443_v55, %v7402_v32  ;;  %5462 = vrcp.f32 %v2261_v12  ;;  %v7507_v24 = vadd.f32 %v7267_v63, %v2100_v2  ;;  %v5253_v41 = vadd.f32 %v1996_v43, %v7392_v39  ;;  %v5079_v11 = vpop.f32.mrb[62].mxu0 }
 0x42e   :  { %v5447_v46 = vpop.eup %5446  ;;  %v2350_v42 = vmul.f32 %v5445_v50, %v7405_v25  ;;  %5464 = vrcp.f32 %v2259_v53  ;;  %v4549_v38 = vmul.f32 -1.442695, %v7499_v45  ;;  %v2105_v7 = vadd.f32 %v5252_v52, %v2073_v8  ;;  %v1999_v9 = vpop.f32.mrb[63].mxu0 }
 0x42f   :  { %v5449_v13 = vpop.eup %5448  ;;  %v2353_v49 = vmul.f32 %v5447_v46, %v7409_v61  ;;  %5466 = vpow2.f32 %v4548_v36  ;;  %v4547_v32 = vmul.f32 -1.442695, %v7507_v24  ;;  %v2103_v40 = vadd.f32 %v5253_v41, %v2071_v29  ;;  %v2072_v36 = vld [vmem:[#allocation9 + $0xe8] sm:$0xff] }
 0x430   :  { %v5451_v15 = vpop.eup %5450  ;;  %v2351_v6 = vmul.f32 %v5449_v13, %v7416_v0  ;;  %5468 = vpow2.f32 %v4546_v14  ;;  %v7516_v39 = vadd.f32 %v7267_v63, %v2105_v7  ;;  %v2375_v25 = vpack.c.bf16 %v7482_v16, %v7474_v3 }
 0x431   :  { %v5453_v23 = vpop.eup %5452  ;;  %v2264_v22 = vadd.f32 1.0, %v5451_v15  ;;  %5470 = vpow2.f32 %v4549_v38  ;;  %v7521_v61 = vadd.f32 %v7267_v63, %v2103_v40  ;;  %v5254_v56 = vadd.f32 %v5079_v11, %v7397_v51 }
 0x432   :  { %v5455_v30 = vpop.eup %5454  ;;  %v2262_v47 = vadd.f32 1.0, %v5453_v23  ;;  %5472 = vpow2.f32 %v4547_v32  ;;  %v4552_v0 = vmul.f32 -1.442695, %v7516_v39  ;;  %5093 = vmatmul.mubr.msk.bf16.gmra.mrb[40].mxu1 %vm2409_vm5, %v2375_v25  ;;  %v5255_v1 = vadd.f32 %v1999_v9, %v7387_v60 }
 0x433   :  { %v5457_v3 = vpop.eup %5456  ;;  %5474 = vrcp.f32 %v2264_v22  ;;  %v2265_v16 = vadd.f32 1.0, %v5455_v30  ;;  %v4550_v12 = vmul.f32 -1.442695, %v7521_v61  ;;  %v2106_v14 = vadd.f32 %v5254_v56, %v2074_v5 }
 0x434   :  { %5476 = vrcp.f32 %v2262_v47  ;;  %v2263_v2 = vadd.f32 1.0, %v5457_v3  ;;  %v2104_v4 = vadd.f32 %v5255_v1, %v2072_v36  ;;  %v2376_v51 = vpack.c.bf16 %v2351_v6, %v2350_v42 }
 0x435   :  { %v5459_v8 = vpop.eup %5458  ;;  %5478 = vrcp.f32 %v2265_v16  ;;  %v7529_v55 = vadd.f32 %v7267_v63, %v2106_v14  ;;  %v2377_v53 = vpack.c.bf16 %v2353_v49, %v7504_v62 }
 0x436   :  { %v5461_v52 = vpop.eup %5460  ;;  %5480 = vrcp.f32 %v2263_v2  ;;  %v7533_v60 = vadd.f32 %v7267_v63, %v2104_v4  ;;  %5096 = vmatprep.mubr.msk.bf16.mxu1 %vm2409_vm5, %v2376_v51  ;;  %v2356_v41 = vmul.f32 %v5459_v8, %v7429_v34 }
 0x437   :  { %v5463_v43 = vpop.eup %5462  ;;  %5482 = vpow2.f32 %v4552_v0  ;;  %v4553_v29 = vmul.f32 -1.442695, %v7529_v55  ;;  %v2354_v42 = vmul.f32 %v5461_v52, %v7432_v18 }
 0x438   :  { %v5465_v50 = vpop.eup %5464  ;;  %v2357_v11 = vmul.f32 %v5463_v43, %v7437_v48  ;;  %5484 = vpow2.f32 %v4550_v12  ;;  %v4551_v46 = vmul.f32 -1.442695, %v7533_v60 }
 0x439   :  { %v5467_v62 = vpop.eup %5466  ;;  %v2355_v63 = vmul.f32 %v5465_v50, %v7443_v17  ;;  %5486 = vpow2.f32 %v4553_v29 }
 0x43a   :  { %v5469_v38 = vpop.eup %5468  ;;  %v2268_v7 = vadd.f32 1.0, %v5467_v62  ;;  %5488 = vpow2.f32 %v4551_v46  ;;  %5097 = vmatmul.mubr.msk.bf16.gmra.mrb[44].mxu1 %vm2409_vm5, %v2377_v53  ;;  %v2379_v9 = vpack.c.bf16 %v2357_v11, %v2356_v41  ;;  %v5352_v62 = vld [vmem:[#allocation22] sm:$0xff]  }
 0x43b   :  { %v5471_v13 = vpop.eup %5470  ;;  %v2266_v49 = vadd.f32 1.0, %v5469_v38  ;;  %v2378_v34 = vpack.c.bf16 %v2355_v63, %v2354_v42  ;;  %5116 = vmatprep.subr.bf16.mxu1 %v5352_v62  ;;  %v5353_v42 = vld [vmem:[#allocation22 + $0x8] sm:$0xff]   ;;  %v5358_v63 = vld [vmem:[#allocation22 + $0x30] sm:$0xff]   ;;  %v5359_v38 = vld [vmem:[#allocation22 + $0x38] sm:$0xff]  }
 0x43c   :  { %v5473_v32 = vpop.eup %5472  ;;  %5490 = vrcp.f32 %v2268_v7  ;;  %v2269_v48 = vadd.f32 1.0, %v5471_v13  ;;  %5117 = vmatpush3.bf16.msra.mxu1 %v5352_v62  ;;  %v7563_v7 = vld [vmem:[#allocation21] ss:$0 sm:$0xff] }
 0x43d   :  { %v5475_v40 = vpop.eup %5474  ;;  %5492 = vrcp.f32 %v2266_v49  ;;  %v2267_v15 = vadd.f32 1.0, %v5473_v32  ;;  %5100 = vmatprep.mubr.msk.bf16.mxu1 %vm2409_vm5, %v2378_v34  ;;  %5118 = vmatprep.subr.bf16.mxu1 %v5353_v42 }
 0x43e   :  { %v5477_v18 = vpop.eup %5476  ;;  %5494 = vrcp.f32 %v2269_v48  ;;  %v2360_v25 = vmul.f32 %v5475_v40, %v7458_v27 }
 0x43f   :  { %v5479_v17 = vpop.eup %5478  ;;  %5496 = vrcp.f32 %v2267_v15  ;;  %v2358_v22 = vmul.f32 %v5477_v18, %v7462_v54 }
 0x440   :  { %v5481_v6 = vpop.eup %5480  ;;  %v2361_v5 = vmul.f32 %v5479_v17, %v7467_v19  ;;  %5119 = vmatpush3.bf16.msra.mxu1 %v5353_v42 }
 0x441   :  { %v5483_v23 = vpop.eup %5482  ;;  %v2359_v56 = vmul.f32 %v5481_v6, %v7470_v21 }
 0x442   :  { %v5485_v36 = vpop.eup %5484  ;;  %v2272_v30 = vadd.f32 1.0, %v5483_v23  ;;  %5101 = vmatmul.mubr.msk.bf16.gmra.mrb[48].mxu1 %vm2409_vm5, %v2379_v9  ;;  %v2381_v47 = vpack.c.bf16 %v2361_v5, %v2360_v25 }
 0x443   :  { %v5487_v0 = vpop.eup %5486  ;;  %v2270_v1 = vadd.f32 1.0, %v5485_v36  ;;  %v2380_v3 = vpack.c.bf16 %v2359_v56, %v2358_v22 }
 0x444   :  { %v5489_v16 = vpop.eup %5488  ;;  %5498 = vrcp.f32 %v2272_v30  ;;  %v2273_v12 = vadd.f32 1.0, %v5487_v0 }
 0x445   :  { %5500 = vrcp.f32 %v2270_v1  ;;  %v2271_v27 = vadd.f32 1.0, %v5489_v16  ;;  %5104 = vmatprep.mubr.msk.bf16.mxu1 %vm2409_vm5, %v2380_v3 }
 0x446   :  { %v5491_v19 = vpop.eup %5490  ;;  %5502 = vrcp.f32 %v2273_v12 }
 0x447   :  { %v5493_v54 = vpop.eup %5492  ;;  %5504 = vrcp.f32 %v2271_v27  ;;  %v2364_v2 = vmul.f32 %v5491_v19, %v7488_v20 }
 0x448   :  { %v5495_v21 = vpop.eup %5494  ;;  %v2362_v51 = vmul.f32 %v5493_v54, %v7492_v10 }
 0x449   :  { %v5497_v14 = vpop.eup %5496  ;;  %v2365_v4 = vmul.f32 %v5495_v21, %v7499_v45 }
 0x44a   :  { %v2363_v8 = vmul.f32 %v5497_v14, %v7507_v24  ;;  %5105 = vmatmul.mubr.msk.bf16.gmra.mrb[52].mxu1 %vm2409_vm5, %v2381_v47 }
 0x44b   :  { %v2383_v53 = vpack.c.bf16 %v2365_v4, %v2364_v2 }
 0x44c   :  { %v2382_v52 = vpack.c.bf16 %v2363_v8, %v2362_v51 }
 0x44e   :  { %v5499_v43 = vpop.eup %5498  ;;  %5108 = vmatprep.mubr.msk.bf16.mxu1 %vm2409_vm5, %v2382_v52 }
 0x44f   :  { %v5501_v29 = vpop.eup %5500  ;;  %v2368_v11 = vmul.f32 %v5499_v43, %v7516_v39  ;;  %v5354_v39 = vld [vmem:[#allocation22 + $0x10] sm:$0xff]  }
 0x450   :  { %v5503_v50 = vpop.eup %5502  ;;  %v2366_v45 = vmul.f32 %v5501_v29, %v7521_v61  ;;  %5120 = vmatprep.subr.bf16.mxu1 %v5354_v39  ;;  %v5355_v61 = vld [vmem:[#allocation22 + $0x18] sm:$0xff]  }
 0x451   :  { %v5505_v41 = vpop.eup %5504  ;;  %v2369_v20 = vmul.f32 %v5503_v50, %v7529_v55  ;;  %5121 = vmatpush3.bf16.msra.mxu1 %v5354_v39  ;;  %v5356_v55 = vld [vmem:[#allocation22 + $0x20] sm:$0xff]  }
 0x452   :  { %v2367_v10 = vmul.f32 %v5505_v41, %v7533_v60  ;;  %5109 = vmatmul.mubr.msk.bf16.gmra.mrb[56].mxu1 %vm2409_vm5, %v2383_v53  ;;  %5122 = vmatprep.subr.bf16.mxu1 %v5355_v61  ;;  %v5357_v60 = vld [vmem:[#allocation22 + $0x28] sm:$0xff]  }
 0x453   :  { %v2385_v24 = vpack.c.bf16 %v2369_v20, %v2368_v11 }
 0x454   :  { %v2384_v46 = vpack.c.bf16 %v2367_v10, %v2366_v45 }
 0x455   :  { %5123 = vmatpush3.bf16.msra.mxu1 %v5355_v61 }
 0x456   :  { %5112 = vmatprep.mubr.msk.bf16.mxu1 %vm2409_vm5, %v2384_v46  ;;  %5124 = vmatprep.subr.bf16.mxu1 %v5356_v55 }
 0x459   :  { %5125 = vmatpush3.bf16.msra.mxu1 %v5356_v55 }
 0x45a   :  { %5113 = vmatmul.mubr.msk.bf16.gmra.mrb[60].mxu1 %vm2409_vm5, %v2385_v24  ;;  %5126 = vmatprep.subr.bf16.mxu1 %v5357_v60 }
 0x45d   :  { %5127 = vmatpush3.bf16.msra.mxu1 %v5357_v60 }
 0x45e   :  { %5128 = vmatprep.subr.bf16.mxu1 %v5358_v63 }
 0x461   :  { %5129 = vmatpush3.bf16.msra.mxu1 %v5358_v63 }
 0x462   :  { %5130 = vmatprep.subr.bf16.mxu1 %v5359_v38 }
 0x465   :  { %5131 = vmatpush3.bf16.msra.mxu1 %v5359_v38 }
 0x4f0   :  { %v5086_v9 = vpop.f32.mrb[32].mxu1 }
 0x4f1   :  { %v7566_v13 = vadd.f32 %v5086_v9, %v7563_v7  ;;  %v2492_v49 = vpop.f32.mrb[33].mxu1 }
 0x4f2   :  { %v7569_v34 = vadd.f32 %v7563_v7, %v2492_v49  ;;  %v5087_v32 = vpop.f32.mrb[34].mxu1 }
 0x4f3   :  { %v4575_v48 = vmul.f32 -1.442695, %v7566_v13  ;;  %v7573_v40 = vadd.f32 %v5087_v32, %v7563_v7  ;;  %v2495_v15 = vpop.f32.mrb[35].mxu1 }
 0x4f4   :  { %v4573_v18 = vmul.f32 -1.442695, %v7569_v34  ;;  %v7577_v17 = vadd.f32 %v7563_v7, %v2495_v15 }
 0x4f5   :  { %5506 = vpow2.f32 %v4575_v48  ;;  %v4576_v6 = vmul.f32 -1.442695, %v7573_v40 }
 0x4f6   :  { %5508 = vpow2.f32 %v4573_v18  ;;  %v4574_v25 = vmul.f32 -1.442695, %v7577_v17 }
 0x4f7   :  { %5510 = vpow2.f32 %v4576_v6 }
 0x4f8   :  { %5512 = vpow2.f32 %v4574_v25 }
 0x4fc   :  { %v5090_v5 = vpop.f32.mrb[36].mxu1 }
 0x4fd   :  { %v7582_v23 = vadd.f32 %v5090_v5, %v7563_v7  ;;  %v2508_v22 = vpop.f32.mrb[37].mxu1 }
 0x4fe   :  { %v7585_v56 = vadd.f32 %v7563_v7, %v2508_v22  ;;  %v5091_v36 = vpop.f32.mrb[38].mxu1 }
 0x4ff   :  { %v5507_v30 = vpop.eup %5506  ;;  %v4579_v47 = vmul.f32 -1.442695, %v7582_v23  ;;  %v7589_v0 = vadd.f32 %v5091_v36, %v7563_v7  ;;  %v2511_v1 = vpop.f32.mrb[39].mxu1 }
 0x500   :  { %v5509_v3 = vpop.eup %5508  ;;  %v2717_v16 = vadd.f32 1.0, %v5507_v30  ;;  %v7592_v12 = vadd.f32 %v7563_v7, %v2511_v1  ;;  %v4577_v14 = vmul.f32 -1.442695, %v7585_v56 }
 0x501   :  { %v5511_v27 = vpop.eup %5510  ;;  %v2715_v19 = vadd.f32 1.0, %v5509_v3  ;;  %5514 = vpow2.f32 %v4579_v47  ;;  %v4580_v4 = vmul.f32 -1.442695, %v7589_v0 }
 0x502   :  { %v5513_v54 = vpop.eup %5512  ;;  %5516 = vrcp.f32 %v2717_v16  ;;  %v2718_v21 = vadd.f32 1.0, %v5511_v27  ;;  %v4578_v51 = vmul.f32 -1.442695, %v7592_v12 }
 0x503   :  { %5518 = vrcp.f32 %v2715_v19  ;;  %v2716_v2 = vadd.f32 1.0, %v5513_v54 }
 0x504   :  { %5520 = vrcp.f32 %v2718_v21 }
 0x505   :  { %5522 = vrcp.f32 %v2716_v2  ;;  %v5094_v8 = vpop.f32.mrb[40].mxu1 }
 0x506   :  { %5524 = vpow2.f32 %v4577_v14  ;;  %v7598_v53 = vadd.f32 %v5094_v8, %v7563_v7  ;;  %v2524_v52 = vpop.f32.mrb[41].mxu1 }
 0x507   :  { %5526 = vpow2.f32 %v4580_v4  ;;  %v7601_v43 = vadd.f32 %v7563_v7, %v2524_v52  ;;  %v5095_v29 = vpop.f32.mrb[42].mxu1 }
 0x508   :  { %5528 = vpow2.f32 %v4578_v51  ;;  %v4583_v50 = vmul.f32 -1.442695, %v7598_v53  ;;  %v7605_v41 = vadd.f32 %v5095_v29, %v7563_v7  ;;  %v2527_v11 = vpop.f32.mrb[43].mxu1 }
 0x509   :  { %v4581_v20 = vmul.f32 -1.442695, %v7601_v43  ;;  %v7609_v45 = vadd.f32 %v7563_v7, %v2527_v11 }
 0x50a   :  { %5530 = vpow2.f32 %v4583_v50  ;;  %v4584_v10 = vmul.f32 -1.442695, %v7605_v41 }
 0x50b   :  { %v5515_v24 = vpop.eup %5514  ;;  %5532 = vpow2.f32 %v4581_v20  ;;  %v4582_v46 = vmul.f32 -1.442695, %v7609_v45 }
 0x50c   :  { %v5517_v62 = vpop.eup %5516  ;;  %5534 = vpow2.f32 %v4584_v10  ;;  %v2721_v39 = vadd.f32 1.0, %v5515_v24 }
 0x50d   :  { %v5519_v42 = vpop.eup %5518  ;;  %5536 = vpow2.f32 %v4582_v46  ;;  %v5098_v61 = vpop.f32.mrb[44].mxu1  ;;  %v7630_v22 = vmul.f32 %v5517_v62, %v7566_v13 }
 0x50e   :  { %v5521_v55 = vpop.eup %5520  ;;  %v7614_v60 = vadd.f32 %v5098_v61, %v7563_v7  ;;  %v2540_v63 = vpop.f32.mrb[45].mxu1  ;;  %v7623_v15 = vmul.f32 %v5519_v42, %v7569_v34  ;;  %5538 = vrcp.f32 %v2721_v39 }
 0x50f   :  { %v5523_v38 = vpop.eup %5522  ;;  %v7617_v9 = vmul.f32 %v5521_v55, %v7573_v40  ;;  %v7620_v49 = vadd.f32 %v7563_v7, %v2540_v63  ;;  %v5099_v32 = vpop.f32.mrb[46].mxu1 }
 0x510   :  { %v5525_v48 = vpop.eup %5524  ;;  %v7626_v18 = vmul.f32 %v5523_v38, %v7577_v17  ;;  %v4587_v6 = vmul.f32 -1.442695, %v7614_v60  ;;  %v2543_v25 = vpop.f32.mrb[47].mxu1  ;;  %v7638_v3 = vadd.f32 %v5099_v32, %v7563_v7 }
 0x511   :  { %v5527_v5 = vpop.eup %5526  ;;  %v2719_v40 = vadd.f32 1.0, %v5525_v48  ;;  %v4585_v47 = vmul.f32 -1.442695, %v7620_v49  ;;  %v2844_v17 = vpack.c.bf16 %v7617_v9, %v7630_v22  ;;  %v7641_v16 = vadd.f32 %v7563_v7, %v2543_v25 }
 0x512   :  { %v5529_v36 = vpop.eup %5528  ;;  %v2722_v30 = vadd.f32 1.0, %v5527_v5  ;;  %5540 = vpow2.f32 %v4587_v6  ;;  %v2843_v34 = vpack.c.bf16 %v7626_v18, %v7623_v15  ;;  %v4588_v52 = vmul.f32 -1.442695, %v7638_v3 }
 0x513   :  { %5542 = vrcp.f32 %v2719_v40  ;;  %v2720_v1 = vadd.f32 1.0, %v5529_v36  ;;  %v4586_v20 = vmul.f32 -1.442695, %v7641_v16 }
 0x514   :  { %v5531_v13 = vpop.eup %5530  ;;  %5544 = vrcp.f32 %v2722_v30  ;;  %5132 = vmatprep.mubr.bf16.mxu1 %v2843_v34 }
 0x515   :  { %v5533_v27 = vpop.eup %5532  ;;  %5546 = vrcp.f32 %v2720_v1  ;;  %v2725_v19 = vadd.f32 1.0, %v5531_v13  ;;  %v5102_v54 = vpop.f32.mrb[48].mxu1  ;;  %5133 = vmatmul.mubr.bf16.vlgmr.msra.gmra.mrb[64].mxu1 %v2844_v17 }
 0x516   :  { %v5535_v21 = vpop.eup %5534  ;;  %v2723_v14 = vadd.f32 1.0, %v5533_v27  ;;  %5548 = vpow2.f32 %v4585_v47  ;;  %v7644_v2 = vadd.f32 %v5102_v54, %v7563_v7  ;;  %v2556_v4 = vpop.f32.mrb[49].mxu1 }
 0x517   :  { %v5537_v51 = vpop.eup %5536  ;;  %5550 = vrcp.f32 %v2725_v19  ;;  %v2726_v8 = vadd.f32 1.0, %v5535_v21  ;;  %v7648_v29 = vadd.f32 %v7563_v7, %v2556_v4  ;;  %v5103_v50 = vpop.f32.mrb[50].mxu1 }
 0x518   :  { %5552 = vrcp.f32 %v2723_v14  ;;  %v2724_v11 = vadd.f32 1.0, %v5537_v51  ;;  %v7652_v10 = vadd.f32 %v5103_v50, %v7563_v7  ;;  %v2559_v24 = vpop.f32.mrb[51].mxu1  ;;  %v4591_v46 = vmul.f32 -1.442695, %v7644_v2  ;;  %v5539_v39 = vpop.eup %5538 }
 0x519   :  { %5554 = vrcp.f32 %v2726_v8  ;;  %v7656_v62 = vadd.f32 %v7563_v7, %v2559_v24  ;;  %v4589_v42 = vmul.f32 -1.442695, %v7648_v29 }
 0x51a   :  { %5556 = vrcp.f32 %v2724_v11  ;;  %v4592_v55 = vmul.f32 -1.442695, %v7652_v10 }
 0x51b   :  { %5558 = vpow2.f32 %v4588_v52  ;;  %v4590_v38 = vmul.f32 -1.442695, %v7656_v62 }
 0x51c   :  { %v5541_v61 = vpop.eup %5540  ;;  %5560 = vpow2.f32 %v4586_v20 }
 0x51d   :  { %v5543_v63 = vpop.eup %5542  ;;  %5562 = vpow2.f32 %v4591_v46  ;;  %v5106_v32 = vpop.f32.mrb[52].mxu1  ;;  %v2729_v30 = vadd.f32 1.0, %v5541_v61 }
 0x51e   :  { %v5545_v48 = vpop.eup %5544  ;;  %5564 = vpow2.f32 %v4589_v42  ;;  %v7662_v6 = vadd.f32 %v5106_v32, %v7563_v7  ;;  %v2572_v25 = vpop.f32.mrb[53].mxu1  ;;  %v7665_v40 = vmul.f32 %v5543_v63, %v7585_v56 }
 0x51f   :  { %v5547_v5 = vpop.eup %5546  ;;  %v7668_v36 = vmul.f32 %v5545_v48, %v7589_v0  ;;  %v7671_v47 = vadd.f32 %v7563_v7, %v2572_v25  ;;  %v5107_v34 = vpop.f32.mrb[54].mxu1  ;;  %5566 = vpow2.f32 %v4592_v55  ;;  %v7681_v0 = vmul.f32 %v5539_v39, %v7582_v23 }
 0x520   :  { %v5549_v17 = vpop.eup %5548  ;;  %v7674_v1 = vmul.f32 %v5547_v5, %v7592_v12  ;;  %v4595_v13 = vmul.f32 -1.442695, %v7662_v6  ;;  %v7678_v27 = vadd.f32 %v5107_v34, %v7563_v7  ;;  %v2575_v56 = vpop.f32.mrb[55].mxu1  ;;  %5568 = vpow2.f32 %v4590_v38 }
 0x521   :  { %v5551_v19 = vpop.eup %5550  ;;  %v4593_v54 = vmul.f32 -1.442695, %v7671_v47  ;;  %v7685_v21 = vadd.f32 %v7563_v7, %v2575_v56  ;;  %v2727_v8 = vadd.f32 1.0, %v5549_v17  ;;  %v2846_v23 = vpack.c.bf16 %v7668_v36, %v7681_v0 }
 0x522   :  { %v5553_v14 = vpop.eup %5552  ;;  %5570 = vpow2.f32 %v4595_v13  ;;  %v4596_v12 = vmul.f32 -1.442695, %v7678_v27  ;;  %v2845_v4 = vpack.c.bf16 %v7674_v1, %v7665_v40  ;;  %v7712_v17 = vmul.f32 %v5551_v19, %v7598_v53 }
 0x523   :  { %v5555_v51 = vpop.eup %5554  ;;  %5572 = vrcp.f32 %v2729_v30  ;;  %v4594_v52 = vmul.f32 -1.442695, %v7685_v21  ;;  %v7694_v20 = vmul.f32 %v5553_v14, %v7601_v43 }
 0x524   :  { %v5557_v50 = vpop.eup %5556  ;;  %5574 = vpow2.f32 %v4593_v54  ;;  %5136 = vmatprep.mubr.bf16.mxu1 %v2845_v4  ;;  %v7703_v38 = vmul.f32 %v5555_v51, %v7605_v41  ;;  %8358 = vst [vmem:[#allocation71_spill] sm:$0xff] %v7712_v17 }
 0x525   :  { %v5559_v11 = vpop.eup %5558  ;;  %v7697_v24 = vmul.f32 %v5557_v50, %v7609_v45  ;;  %5576 = vpow2.f32 %v4596_v12  ;;  %5137 = vmatmul.mubr.bf16.gmra.mrb[68].mxu1 %v2846_v23  ;;  %v5110_v46 = vpop.f32.mrb[56].mxu1 }
 0x526   :  { %v5561_v42 = vpop.eup %5560  ;;  %v2730_v39 = vadd.f32 1.0, %v5559_v11  ;;  %5578 = vpow2.f32 %v4594_v52  ;;  %v7700_v61 = vadd.f32 %v5110_v46, %v7563_v7  ;;  %v2588_v55 = vpop.f32.mrb[57].mxu1  ;;  %8357 = vst [vmem:[#allocation70_spill] sm:$0xff] %v7703_v38  ;;  %v2848_v14 = vpack.c.bf16 %v7703_v38, %v7712_v17 }
 0x527   :  { %8356 = vst [vmem:[#allocation69_spill] sm:$0xff] %v7697_v24  ;;  %v5563_v63 = vpop.eup %5562  ;;  %5580 = vrcp.f32 %v2727_v8  ;;  %v2728_v43 = vadd.f32 1.0, %v5561_v42  ;;  %v5111_v32 = vpop.f32.mrb[58].mxu1  ;;  %v2847_v45 = vpack.c.bf16 %v7697_v24, %v7694_v20  ;;  %v7709_v30 = vadd.f32 %v7563_v7, %v2588_v55 }
 0x528   :  { %v5565_v48 = vpop.eup %5564  ;;  %5582 = vrcp.f32 %v2730_v39  ;;  %v2733_v25 = vadd.f32 1.0, %v5563_v63  ;;  %v4599_v5 = vmul.f32 -1.442695, %v7700_v61  ;;  %v2591_v34 = vpop.f32.mrb[59].mxu1  ;;  %v7718_v8 = vadd.f32 %v5111_v32, %v7563_v7 }
 0x529   :  { %5584 = vrcp.f32 %v2728_v43  ;;  %v2731_v41 = vadd.f32 1.0, %v5565_v48  ;;  %5140 = vmatprep.mubr.bf16.mxu1 %v2847_v45  ;;  %v5567_v13 = vpop.eup %5566  ;;  %v4597_v51 = vmul.f32 -1.442695, %v7709_v30  ;;  %v7721_v52 = vadd.f32 %v7563_v7, %v2591_v34 }
 0x52a   :  { %5586 = vrcp.f32 %v2733_v25  ;;  %v5569_v56 = vpop.eup %5568  ;;  %v2734_v54 = vadd.f32 1.0, %v5567_v13  ;;  %v4600_v45 = vmul.f32 -1.442695, %v7718_v8 }
 0x52b   :  { %5588 = vrcp.f32 %v2731_v41  ;;  %v2732_v4 = vadd.f32 1.0, %v5569_v56  ;;  %v4598_v41 = vmul.f32 -1.442695, %v7721_v52 }
 0x52c   :  { %v5571_v12 = vpop.eup %5570  ;;  %5590 = vpow2.f32 %v4599_v5 }
 0x52d   :  { %v5573_v53 = vpop.eup %5572  ;;  %5592 = vrcp.f32 %v2734_v54  ;;  %v2737_v19 = vadd.f32 1.0, %v5571_v12  ;;  %5141 = vmatmul.mubr.bf16.gmra.mrb[72].mxu1 %v2848_v14  ;;  %v5114_v23 = vpop.f32.mrb[60].mxu1 }
 0x52e   :  { %v5575_v50 = vpop.eup %5574  ;;  %5594 = vrcp.f32 %v2732_v4  ;;  %v7724_v11 = vadd.f32 %v5114_v23, %v7563_v7  ;;  %v2604_v46 = vpop.f32.mrb[61].mxu1 }
 0x52f   :  { %v5577_v42 = vpop.eup %5576  ;;  %5596 = vrcp.f32 %v2737_v19  ;;  %v2735_v39 = vadd.f32 1.0, %v5575_v50  ;;  %v7727_v55 = vadd.f32 %v7563_v7, %v2604_v46  ;;  %v5115_v63 = vpop.f32.mrb[62].mxu1  ;;  %v7750_v46 = vmul.f32 %v5573_v53, %v7614_v60 }
 0x530   :  { %v5579_v43 = vpop.eup %5578  ;;  %v2738_v32 = vadd.f32 1.0, %v5577_v42  ;;  %5598 = vpow2.f32 %v4597_v51  ;;  %v7731_v48 = vadd.f32 %v5115_v63, %v7563_v7  ;;  %v2607_v25 = vpop.f32.mrb[63].mxu1  ;;  %v4603_v54 = vmul.f32 -1.442695, %v7724_v11 }
 0x531   :  { %v5581_v5 = vpop.eup %5580  ;;  %5600 = vrcp.f32 %v2735_v39  ;;  %v2736_v34 = vadd.f32 1.0, %v5579_v43  ;;  %v7735_v13 = vadd.f32 %v7563_v7, %v2607_v25  ;;  %v4601_v4 = vmul.f32 -1.442695, %v7727_v55  ;;  %8362 = vst [vmem:[#allocation75_spill] sm:$0xff] %v7750_v46 }
 0x532   :  { %v5583_v56 = vpop.eup %5582  ;;  %5602 = vrcp.f32 %v2738_v32  ;;  %v7743_v19 = vmul.f32 %v5581_v5, %v7620_v49  ;;  %v4604_v7 = vmul.f32 -1.442695, %v7731_v48 }
 0x533   :  { %v5585_v14 = vpop.eup %5584  ;;  %v7739_v12 = vmul.f32 %v5583_v56, %v7638_v3  ;;  %5604 = vrcp.f32 %v2736_v34  ;;  %v4602_v42 = vmul.f32 -1.442695, %v7735_v13 }
 0x534   :  { %v5587_v51 = vpop.eup %5586  ;;  %8360 = vst [vmem:[#allocation73_spill] sm:$0xff] %v7743_v19  ;;  %v7746_v23 = vmul.f32 %v5585_v14, %v7641_v16  ;;  %5606 = vpow2.f32 %v4600_v45 }
 0x535   :  { %8359 = vst [vmem:[#allocation72_spill] sm:$0xff] %v7739_v12  ;;  %v5589_v50 = vpop.eup %5588  ;;  %5608 = vpow2.f32 %v4598_v41  ;;  %v2850_v16 = vpack.c.bf16 %v7739_v12, %v7750_v46 }
 0x536   :  { %8361 = vst [vmem:[#allocation74_spill] sm:$0xff] %v7746_v23  ;;  %v5591_v3 = vpop.eup %5590  ;;  %5610 = vpow2.f32 %v4603_v54  ;;  %v2849_v39 = vpack.c.bf16 %v7746_v23, %v7743_v19  ;;  %v7758_v60 = vmul.f32 %v5589_v50, %v7648_v29  ;;  %v7769_v29 = vmul.f32 %v5587_v51, %v7644_v2 }
 0x537   :  { %v5593_v49 = vpop.eup %5592  ;;  %5612 = vpow2.f32 %v4601_v4  ;;  %v2741_v5 = vadd.f32 1.0, %v5591_v3 }
 0x538   :  { %v5595_v63 = vpop.eup %5594  ;;  %5614 = vpow2.f32 %v4604_v7  ;;  %5144 = vmatprep.mubr.bf16.mxu1 %v2849_v39  ;;  %v7764_v25 = vmul.f32 %v5593_v49, %v7652_v10 }
 0x539   :  { %v5597_v43 = vpop.eup %5596  ;;  %v7761_v53 = vmul.f32 %v5595_v63, %v7656_v62  ;;  %5145 = vmatmul.mubr.bf16.gmra.mrb[76].mxu1 %v2850_v16  ;;  %5616 = vpow2.f32 %v4602_v42 }
 0x53a   :  { %v5599_v32 = vpop.eup %5598  ;;  %5618 = vrcp.f32 %v2741_v5  ;;  %v2852_v50 = vpack.c.bf16 %v7764_v25, %v7769_v29  ;;  %v7785_v63 = vmul.f32 %v5597_v43, %v7662_v6 }
 0x53b   :  { %v5601_v45 = vpop.eup %5600  ;;  %v2851_v34 = vpack.c.bf16 %v7761_v53, %v7758_v60  ;;  %v2739_v56 = vadd.f32 1.0, %v5599_v32 }
 0x53c   :  { %v5603_v41 = vpop.eup %5602  ;;  %v7772_v14 = vmul.f32 %v5601_v45, %v7671_v47 }
 0x53d   :  { %v5605_v54 = vpop.eup %5604  ;;  %5148 = vmatprep.mubr.bf16.mxu1 %v2851_v34  ;;  %5620 = vrcp.f32 %v2739_v56 }
 0x53e   :  { %v5607_v62 = vpop.eup %5606  ;;  %v7775_v4 = vmul.f32 %v5605_v54, %v7685_v21  ;;  %v7782_v21 = vmul.f32 %v5603_v41, %v7678_v27 }
 0x53f   :  { %v5609_v10 = vpop.eup %5608  ;;  %v2742_v7 = vadd.f32 1.0, %v5607_v62 }
 0x540   :  { %v5611_v3 = vpop.eup %5610  ;;  %v2740_v42 = vadd.f32 1.0, %v5609_v10  ;;  %v2853_v2 = vpack.c.bf16 %v7775_v4, %v7772_v14  ;;  %v2854_v5 = vpack.c.bf16 %v7782_v21, %v7785_v63 }
 0x541   :  { %v5613_v51 = vpop.eup %5612  ;;  %5622 = vrcp.f32 %v2742_v7  ;;  %5149 = vmatmul.mubr.bf16.gmra.mrb[80].mxu1 %v2852_v50  ;;  %v2745_v32 = vadd.f32 1.0, %v5611_v3 }
 0x542   :  { %v5615_v47 = vpop.eup %5614  ;;  %5624 = vrcp.f32 %v2740_v42  ;;  %v2743_v39 = vadd.f32 1.0, %v5613_v51  ;;  %5152 = vmatprep.mubr.bf16.mxu1 %v2853_v2 }
 0x543   :  { %v2746_v49 = vadd.f32 1.0, %v5615_v47  ;;  %v5617_v16 = vpop.eup %5616 }
 0x544   :  { %5626 = vrcp.f32 %v2743_v39  ;;  %v2744_v45 = vadd.f32 1.0, %v5617_v16  ;;  %v5619_v34 = vpop.eup %5618 }
 0x545   :  { %5628 = vrcp.f32 %v2746_v49  ;;  %v7799_v62 = vmul.f32 %v5619_v34, %v7700_v61 }
 0x546   :  { %5630 = vrcp.f32 %v2744_v45 }
 0x547   :  { %5632 = vrcp.f32 %v2745_v32  ;;  %v5621_v56 = vpop.eup %5620  ;;  %8365 = vst [vmem:[#allocation78_spill] sm:$0xff] %v7799_v62 }
 0x548   :  { %v7793_v6 = vmul.f32 %v5621_v56, %v7709_v30 }
 0x549   :  { %5153 = vmatmul.mubr.bf16.gmra.mrb[84].mxu1 %v2854_v5 }
 0x54b   :  { %v5623_v54 = vpop.eup %5622 }
 0x54c   :  { %v5625_v27 = vpop.eup %5624  ;;  %v7790_v41 = vmul.f32 %v5623_v54, %v7718_v8 }
 0x54d   :  { %v7796_v43 = vmul.f32 %v5625_v27, %v7721_v52 }
 0x54e   :  { %8363 = vst [vmem:[#allocation76_spill] sm:$0xff] %v7790_v41  ;;  %v5627_v10 = vpop.eup %5626  ;;  %v2856_v3 = vpack.c.bf16 %v7790_v41, %v7799_v62 }
 0x54f   :  { %8364 = vst [vmem:[#allocation77_spill] sm:$0xff] %v7796_v43  ;;  %v2855_v7 = vpack.c.bf16 %v7796_v43, %v7793_v6  ;;  %v5629_v50 = vpop.eup %5628  ;;  %v7806_v8 = vmul.f32 %v5627_v10, %v7727_v55  ;;  %v7821_v55 = vld [vmem:[#allocation24] ss:$0 sm:$0xff] }
 0x550   :  { %v5631_v42 = vpop.eup %5630  ;;  %v7812_v61 = vmul.f32 %v5629_v50, %v7731_v48 }
 0x551   :  { %5156 = vmatprep.mubr.bf16.mxu1 %v2855_v7  ;;  %8366 = vst [vmem:[#allocation79_spill] sm:$0xff] %v7806_v8  ;;  %v7809_v30 = vmul.f32 %v5631_v42, %v7735_v13  ;;  %v5633_v52 = vpop.eup %5632 }
 0x552   :  { %5157 = vmatmul.mubr.bf16.gmra.mrb[88].mxu1 %v2856_v3  ;;  %8368 = vst [vmem:[#allocation81_spill] sm:$0xff] %v7812_v61  ;;  %v7817_v51 = vmul.f32 %v5633_v52, %v7724_v11 }
 0x553   :  { %8367 = vst [vmem:[#allocation80_spill] sm:$0xff] %v7809_v30  ;;  %v2857_v2 = vpack.c.bf16 %v7809_v30, %v7806_v8 }
 0x554   :  { %8369 = vst [vmem:[#allocation82_spill] sm:$0xff] %v7817_v51  ;;  %v2858_v47 = vpack.c.bf16 %v7812_v61, %v7817_v51 }
 0x555   :  { %5160 = vmatprep.mubr.bf16.mxu1 %v2857_v2 }
 0x55a   :  { %5161 = vmatmul.mubr.bf16.gmra.mrb[92].mxu1 %v2858_v47 }
 0x5e8   :  { %v5134_v13 = vpop.f32.mrb[64].mxu1 }
 0x5e9   :  { %v2973_v39 = vadd.f32 %v5134_v13, %v7821_v55  ;;  %v2964_v49 = vpop.f32.mrb[65].mxu1 }
 0x5ea   :  { %v2965_v48 = vadd.f32 %v7821_v55, %v2964_v49  ;;  %v5135_v16 = vpop.f32.mrb[66].mxu1 }
 0x5eb   :  { %v4616_v32 = vmul.f32 -1.442695, %v2973_v39  ;;  %v2976_v45 = vadd.f32 %v5135_v16, %v7821_v55  ;;  %v2967_v5 = vpop.f32.mrb[67].mxu1 }
 0x5ec   :  { %v4614_v11 = vmul.f32 -1.442695, %v2965_v48  ;;  %v2968_v34 = vadd.f32 %v7821_v55, %v2967_v5 }
 0x5ed   :  { %5634 = vpow2.f32 %v4616_v32  ;;  %v4617_v56 = vmul.f32 -1.442695, %v2976_v45 }
 0x5ee   :  { %5636 = vpow2.f32 %v4614_v11  ;;  %v4615_v54 = vmul.f32 -1.442695, %v2968_v34 }
 0x5ef   :  { %5638 = vpow2.f32 %v4617_v56 }
 0x5f0   :  { %5640 = vpow2.f32 %v4615_v54 }
 0x5f7   :  { %v5635_v27 = vpop.eup %5634 }
 0x5f8   :  { %v5637_v10 = vpop.eup %5636  ;;  %v3189_v7 = vadd.f32 1.0, %v5635_v27  ;;  %v5138_v50 = vpop.f32.mrb[68].mxu1 }
 0x5f9   :  { %v5639_v3 = vpop.eup %5638  ;;  %v3187_v42 = vadd.f32 1.0, %v5637_v10  ;;  %v7828_v52 = vadd.f32 %v5138_v50, %v7821_v55  ;;  %v2980_v2 = vpop.f32.mrb[69].mxu1 }
 0x5fa   :  { %v5641_v47 = vpop.eup %5640  ;;  %5642 = vrcp.f32 %v3189_v7  ;;  %v3190_v13 = vadd.f32 1.0, %v5639_v3  ;;  %v7831_v49 = vadd.f32 %v7821_v55, %v2980_v2  ;;  %v5139_v16 = vpop.f32.mrb[70].mxu1 }
 0x5fb   :  { %5644 = vrcp.f32 %v3187_v42  ;;  %v3188_v32 = vadd.f32 1.0, %v5641_v47  ;;  %v4620_v5 = vmul.f32 -1.442695, %v7828_v52  ;;  %v7835_v11 = vadd.f32 %v5139_v16, %v7821_v55  ;;  %v2983_v56 = vpop.f32.mrb[71].mxu1 }
 0x5fc   :  { %5646 = vrcp.f32 %v3190_v13  ;;  %v4618_v54 = vmul.f32 -1.442695, %v7831_v49  ;;  %v7839_v27 = vadd.f32 %v7821_v55, %v2983_v56 }
 0x5fd   :  { %5648 = vrcp.f32 %v3188_v32  ;;  %v4621_v10 = vmul.f32 -1.442695, %v7835_v11 }
 0x5fe   :  { %5650 = vpow2.f32 %v4620_v5  ;;  %v4619_v7 = vmul.f32 -1.442695, %v7839_v27 }
 0x5ff   :  { %5652 = vpow2.f32 %v4618_v54 }
 0x600   :  { %5654 = vpow2.f32 %v4621_v10  ;;  %v5142_v50 = vpop.f32.mrb[72].mxu1  ;;  %v7857_v10 = vld [vmem:[#allocation25] ss:$0 sm:$0xff] }
 0x601   :  { %5656 = vpow2.f32 %v4619_v7  ;;  %v7844_v3 = vadd.f32 %v5142_v50, %v7821_v55  ;;  %v2996_v42 = vpop.f32.mrb[73].mxu1 }
 0x602   :  { %v7847_v2 = vadd.f32 %v7821_v55, %v2996_v42  ;;  %v5143_v47 = vpop.f32.mrb[74].mxu1 }
 0x603   :  { %v4624_v13 = vmul.f32 -1.442695, %v7844_v3  ;;  %v7851_v16 = vadd.f32 %v5143_v47, %v7821_v55  ;;  %v2999_v32 = vpop.f32.mrb[75].mxu1 }
 0x604   :  { %v5643_v5 = vpop.eup %5642  ;;  %v4622_v56 = vmul.f32 -1.442695, %v7847_v2  ;;  %v7855_v54 = vadd.f32 %v7821_v55, %v2999_v32 }
 0x605   :  { %v5645_v7 = vpop.eup %5644  ;;  %v3285_v50 = vmul.f32 %v5643_v5, %v2973_v39  ;;  %5658 = vpow2.f32 %v4624_v13  ;;  %v4625_v42 = vmul.f32 -1.442695, %v7851_v16 }
 0x606   :  { %v5647_v12 = vpop.eup %5646  ;;  %v3283_v46 = vmul.f32 %v5645_v7, %v2965_v48  ;;  %5660 = vpow2.f32 %v4622_v56  ;;  %v4623_v47 = vmul.f32 -1.442695, %v7855_v54 }
 0x607   :  { %v5649_v61 = vpop.eup %5648  ;;  %v3286_v51 = vmul.f32 %v5647_v12, %v2976_v45  ;;  %5662 = vpow2.f32 %v4625_v42  ;;  %v3324_v23 = vmul.f32 %v7857_v10, %v3285_v50 }
 0x608   :  { %v5651_v30 = vpop.eup %5650  ;;  %v3284_v32 = vmul.f32 %v5649_v61, %v2968_v34  ;;  %5664 = vpow2.f32 %v4623_v47  ;;  %v3322_v5 = vmul.f32 %v7857_v10, %v3283_v46 }
 0x609   :  { %v5653_v8 = vpop.eup %5652  ;;  %v3193_v19 = vadd.f32 1.0, %v5651_v30  ;;  %v3360_v39 = vsel %vm2409_vm5, %v3324_v23, 0.0  ;;  %v3325_v13 = vmul.f32 %v7857_v10, %v3286_v51 }
 0x60a   :  { %v5655_v48 = vpop.eup %5654  ;;  %v3191_v56 = vadd.f32 1.0, %v5653_v8  ;;  %3361 = vadd.xlane.f32.xlu0 %v3360_v39  ;;  %v3323_v50 = vmul.f32 %v7857_v10, %v3284_v32  ;;  %v3354_v46 = vsel %vm2409_vm5, %v3322_v5, 0.0 }
 0x60b   :  { %v5657_v7 = vpop.eup %5656  ;;  %5666 = vrcp.f32 %v3193_v19  ;;  %v3194_v12 = vadd.f32 1.0, %v5655_v48  ;;  %v3363_v45 = vsel %vm2409_vm5, %v3325_v13, 0.0 }
 0x60c   :  { %5668 = vrcp.f32 %v3191_v56  ;;  %v3192_v61 = vadd.f32 1.0, %v5657_v7  ;;  %v5146_v34 = vpop.f32.mrb[76].mxu1  ;;  %3364 = vadd.xlane.f32.xlu1 %v3363_v45  ;;  %v3357_v39 = vsel %vm2409_vm5, %v3323_v50, 0.0 }
 0x60d   :  { %5670 = vrcp.f32 %v3194_v12  ;;  %v7868_v23 = vadd.f32 %v5146_v34, %v7821_v55  ;;  %v3012_v30 = vpop.f32.mrb[77].mxu1 }
 0x60e   :  { %5672 = vrcp.f32 %v3192_v61  ;;  %v7872_v8 = vadd.f32 %v7821_v55, %v3012_v30  ;;  %v5147_v19 = vpop.f32.mrb[78].mxu1  ;;  %3355 = vadd.xlane.f32.xlu0 %v3354_v46 }
 0x60f   :  { %v5659_v51 = vpop.eup %5658  ;;  %v4628_v42 = vmul.f32 -1.442695, %v7868_v23  ;;  %v7876_v47 = vadd.f32 %v5147_v19, %v7821_v55  ;;  %v3015_v32 = vpop.f32.mrb[79].mxu1 }
 0x610   :  { %v5661_v13 = vpop.eup %5660  ;;  %v3197_v48 = vadd.f32 1.0, %v5659_v51  ;;  %v7880_v56 = vadd.f32 %v7821_v55, %v3015_v32  ;;  %3358 = vadd.xlane.f32.xlu1 %v3357_v39  ;;  %v4626_v61 = vmul.f32 -1.442695, %v7872_v8 }
 0x611   :  { %v5663_v5 = vpop.eup %5662  ;;  %v3195_v7 = vadd.f32 1.0, %v5661_v13  ;;  %5674 = vpow2.f32 %v4628_v42  ;;  %v4629_v30 = vmul.f32 -1.442695, %v7876_v47 }
 0x612   :  { %v5665_v12 = vpop.eup %5664  ;;  %5676 = vrcp.f32 %v3197_v48  ;;  %v3198_v45 = vadd.f32 1.0, %v5663_v5  ;;  %v4627_v50 = vmul.f32 -1.442695, %v7880_v56 }
 0x613   :  { %5678 = vrcp.f32 %v3195_v7  ;;  %v3196_v34 = vadd.f32 1.0, %v5665_v12 }
 0x614   :  { %5680 = vrcp.f32 %v3198_v45  ;;  %v5150_v46 = vpop.f32.mrb[80].mxu1 }
 0x615   :  { %v5667_v19 = vpop.eup %5666  ;;  %5682 = vrcp.f32 %v3196_v34  ;;  %v7886_v51 = vadd.f32 %v5150_v46, %v7821_v55  ;;  %v3028_v32 = vpop.f32.mrb[81].mxu1 }
 0x616   :  { %v5669_v42 = vpop.eup %5668  ;;  %v3289_v39 = vmul.f32 %v5667_v19, %v7828_v52  ;;  %5684 = vpow2.f32 %v4626_v61  ;;  %v7890_v13 = vadd.f32 %v7821_v55, %v3028_v32  ;;  %v5151_v48 = vpop.f32.mrb[82].mxu1 }
 0x617   :  { %v5671_v5 = vpop.eup %5670  ;;  %v3287_v7 = vmul.f32 %v5669_v42, %v7831_v49  ;;  %5686 = vpow2.f32 %v4629_v30  ;;  %v4632_v12 = vmul.f32 -1.442695, %v7886_v51  ;;  %v7895_v45 = vadd.f32 %v5151_v48, %v7821_v55  ;;  %v3031_v34 = vpop.f32.mrb[83].mxu1 }
 0x618   :  { %v5673_v46 = vpop.eup %5672  ;;  %v3290_v38 = vmul.f32 %v5671_v5, %v7835_v11  ;;  %5688 = vpow2.f32 %v4627_v50  ;;  %v4630_v52 = vmul.f32 -1.442695, %v7890_v13  ;;  %v7900_v61 = vadd.f32 %v7821_v55, %v3031_v34 }
 0x619   :  { %v3288_v19 = vmul.f32 %v5673_v46, %v7839_v27  ;;  %5690 = vpow2.f32 %v4632_v12  ;;  %v4633_v49 = vmul.f32 -1.442695, %v7895_v45  ;;  %v3328_v30 = vmul.f32 %v7857_v10, %v3289_v39 }
 0x61a   :  { %5692 = vpow2.f32 %v4630_v52  ;;  %v4631_v32 = vmul.f32 -1.442695, %v7900_v61  ;;  %v3329_v42 = vmul.f32 %v7857_v10, %v3290_v38  ;;  %v3326_v11 = vmul.f32 %v7857_v10, %v3287_v7 }
 0x61b   :  { %v5675_v50 = vpop.eup %5674  ;;  %5694 = vpow2.f32 %v4633_v49  ;;  %v3372_v48 = vsel %vm2409_vm5, %v3328_v30, 0.0  ;;  %v3327_v39 = vmul.f32 %v7857_v10, %v3288_v19 }
 0x61c   :  { %v5677_v5 = vpop.eup %5676  ;;  %v3201_v34 = vadd.f32 1.0, %v5675_v50  ;;  %5696 = vpow2.f32 %v4631_v32  ;;  %v5154_v27 = vpop.f32.mrb[84].mxu1  ;;  %3373 = vadd.xlane.f32.xlu0 %v3372_v48  ;;  %v3375_v12 = vsel %vm2409_vm5, %v3329_v42, 0.0  ;;  %v3366_v50 = vsel %vm2409_vm5, %v3326_v11, 0.0 }
 0x61d   :  { %v5679_v46 = vpop.eup %5678  ;;  %v3293_v52 = vmul.f32 %v5677_v5, %v7844_v3  ;;  %v7913_v38 = vadd.f32 %v5154_v27, %v7821_v55  ;;  %v3044_v7 = vpop.f32.mrb[85].mxu1  ;;  %3376 = vadd.xlane.f32.xlu1 %v3375_v12 }
 0x61e   :  { %v5681_v49 = vpop.eup %5680  ;;  %5698 = vrcp.f32 %v3201_v34  ;;  %v7916_v30 = vadd.f32 %v7821_v55, %v3044_v7  ;;  %v5155_v32 = vpop.f32.mrb[86].mxu1  ;;  %v3291_v42 = vmul.f32 %v5679_v46, %v7847_v2  ;;  %v3369_v7 = vsel %vm2409_vm5, %v3327_v39, 0.0 }
 0x61f   :  { %v5683_v48 = vpop.eup %5682  ;;  %v3294_v19 = vmul.f32 %v5681_v49, %v7851_v16  ;;  %v4636_v3 = vmul.f32 -1.442695, %v7913_v38  ;;  %v3047_v5 = vpop.f32.mrb[87].mxu1  ;;  %v3332_v27 = vmul.f32 %v7857_v10, %v3293_v52  ;;  %v7927_v2 = vadd.f32 %v5155_v32, %v7821_v55 }
 0x620   :  { %v5685_v17 = vpop.eup %5684  ;;  %v3292_v12 = vmul.f32 %v5683_v48, %v7855_v54  ;;  %v4634_v34 = vmul.f32 -1.442695, %v7916_v30  ;;  %3367 = vadd.xlane.f32.xlu0 %v3366_v50  ;;  %v7931_v52 = vadd.f32 %v7821_v55, %v3047_v5 }
 0x621   :  { %v5687_v41 = vpop.eup %5686  ;;  %v3199_v11 = vadd.f32 1.0, %v5685_v17  ;;  %5700 = vpow2.f32 %v4636_v3  ;;  %3370 = vadd.xlane.f32.xlu1 %v3369_v7  ;;  %v3384_v16 = vsel %vm2409_vm5, %v3332_v27, 0.0  ;;  %v3333_v54 = vmul.f32 %v7857_v10, %v3294_v19 }
 0x622   :  { %v5689_v46 = vpop.eup %5688  ;;  %v3202_v49 = vadd.f32 1.0, %v5687_v41  ;;  %5702 = vpow2.f32 %v4634_v34  ;;  %v3330_v17 = vmul.f32 %v7857_v10, %v3291_v42  ;;  %v3331_v27 = vmul.f32 %v7857_v10, %v3292_v12 }
 0x623   :  { %v5691_v50 = vpop.eup %5690  ;;  %5704 = vrcp.f32 %v3199_v11  ;;  %v3200_v39 = vadd.f32 1.0, %v5689_v46  ;;  %v3387_v3 = vsel %vm2409_vm5, %v3333_v54, 0.0  ;;  %v4637_v5 = vmul.f32 -1.442695, %v7927_v2 }
 0x624   :  { %v5693_v48 = vpop.eup %5692  ;;  %5706 = vrcp.f32 %v3202_v49  ;;  %v3205_v32 = vadd.f32 1.0, %v5691_v50  ;;  %3385 = vadd.xlane.f32.xlu0 %v3384_v16  ;;  %v4635_v42 = vmul.f32 -1.442695, %v7931_v52  ;;  %v3378_v50 = vsel %vm2409_vm5, %v3330_v17, 0.0 }
 0x625   :  { %v5695_v41 = vpop.eup %5694  ;;  %5708 = vrcp.f32 %v3200_v39  ;;  %v3203_v34 = vadd.f32 1.0, %v5693_v48  ;;  %v5158_v7 = vpop.f32.mrb[88].mxu1  ;;  %3388 = vadd.xlane.f32.xlu1 %v3387_v3 }
 0x626   :  { %v5697_v19 = vpop.eup %5696  ;;  %5710 = vrcp.f32 %v3205_v32  ;;  %v3206_v11 = vadd.f32 1.0, %v5695_v41  ;;  %v7940_v46 = vadd.f32 %v5158_v7, %v7821_v55  ;;  %v3060_v16 = vpop.f32.mrb[89].mxu1  ;;  %v3381_v41 = vsel %vm2409_vm5, %v3331_v27, 0.0 }
 0x627   :  { %5712 = vrcp.f32 %v3203_v34  ;;  %v3204_v49 = vadd.f32 1.0, %v5697_v19  ;;  %v7943_v12 = vadd.f32 %v7821_v55, %v3060_v16  ;;  %v5159_v54 = vpop.f32.mrb[90].mxu1 }
 0x628   :  { %v5699_v39 = vpop.eup %5698  ;;  %5714 = vrcp.f32 %v3206_v11  ;;  %v4640_v48 = vmul.f32 -1.442695, %v7940_v46  ;;  %v7948_v32 = vadd.f32 %v5159_v54, %v7821_v55  ;;  %v3063_v3 = vpop.f32.mrb[91].mxu1  ;;  %3379 = vadd.xlane.f32.xlu0 %v3378_v50 }
 0x629   :  { %v3297_v34 = vmul.f32 %v5699_v39, %v7868_v23  ;;  %5716 = vrcp.f32 %v3204_v49  ;;  %v4638_v7 = vmul.f32 -1.442695, %v7943_v12  ;;  %v7954_v19 = vadd.f32 %v7821_v55, %v3063_v3  ;;  %3382 = vadd.xlane.f32.xlu1 %v3381_v41 }
 0x62a   :  { %5718 = vpow2.f32 %v4637_v5  ;;  %v4641_v50 = vmul.f32 -1.442695, %v7948_v32 }
 0x62b   :  { %v5701_v17 = vpop.eup %5700  ;;  %5720 = vpow2.f32 %v4635_v42  ;;  %v3336_v11 = vmul.f32 %v7857_v10, %v3297_v34  ;;  %v4639_v23 = vmul.f32 -1.442695, %v7954_v19 }
 0x62c   :  { %v5703_v16 = vpop.eup %5702  ;;  %v3209_v54 = vadd.f32 1.0, %v5701_v17  ;;  %5722 = vpow2.f32 %v4640_v48 }
 0x62d   :  { %v5705_v27 = vpop.eup %5704  ;;  %v3207_v24 = vadd.f32 1.0, %v5703_v16  ;;  %5724 = vpow2.f32 %v4638_v7  ;;  %v5162_v49 = vpop.f32.mrb[92].mxu1  ;;  %v3396_v39 = vsel %vm2409_vm5, %v3336_v11, 0.0 }
 0x62e   :  { %v5707_v3 = vpop.eup %5706  ;;  %5726 = vrcp.f32 %v3209_v54  ;;  %v7961_v5 = vadd.f32 %v5162_v49, %v7821_v55  ;;  %v3076_v42 = vpop.f32.mrb[93].mxu1  ;;  %3397 = vadd.xlane.f32.xlu0 %v3396_v39  ;;  %v3295_v48 = vmul.f32 %v5705_v27, %v7872_v8 }
 0x62f   :  { %v5709_v41 = vpop.eup %5708  ;;  %v3298_v34 = vmul.f32 %v5707_v3, %v7876_v47  ;;  %5728 = vrcp.f32 %v3207_v24  ;;  %v7966_v7 = vadd.f32 %v7821_v55, %v3076_v42  ;;  %v5163_v17 = vpop.f32.mrb[94].mxu1 }
 0x630   :  { %v5711_v16 = vpop.eup %5710  ;;  %v3296_v11 = vmul.f32 %v5709_v41, %v7880_v56  ;;  %5730 = vpow2.f32 %v4641_v50  ;;  %v4644_v54 = vmul.f32 -1.442695, %v7961_v5  ;;  %v7971_v49 = vadd.f32 %v5163_v17, %v7821_v55  ;;  %v3079_v39 = vpop.f32.mrb[95].mxu1 }
 0x631   :  { %v5713_v43 = vpop.eup %5712  ;;  %v3301_v8 = vmul.f32 %v5711_v16, %v7886_v51  ;;  %5732 = vpow2.f32 %v4639_v23  ;;  %v4642_v24 = vmul.f32 -1.442695, %v7966_v7  ;;  %v7976_v47 = vadd.f32 %v7821_v55, %v3079_v39 }
 0x632   :  { %v5715_v27 = vpop.eup %5714  ;;  %5734 = vpow2.f32 %v4644_v54  ;;  %v4645_v56 = vmul.f32 -1.442695, %v7971_v49  ;;  %v3337_v50 = vmul.f32 %v7857_v10, %v3298_v34  ;;  %v3334_v51 = vmul.f32 %v7857_v10, %v3295_v48 }
 0x633   :  { %v5717_v3 = vpop.eup %5716  ;;  %v3302_v42 = vmul.f32 %v5715_v27, %v7895_v45  ;;  %5736 = vpow2.f32 %v4642_v24  ;;  %v4643_v41 = vmul.f32 -1.442695, %v7976_v47  ;;  %v3299_v17 = vmul.f32 %v5713_v43, %v7890_v13 }
 0x634   :  { %v5719_v23 = vpop.eup %5718  ;;  %5738 = vpow2.f32 %v4645_v56  ;;  %v3399_v55 = vsel %vm2409_vm5, %v3337_v50, 0.0  ;;  %v3335_v16 = vmul.f32 %v7857_v10, %v3296_v11  ;;  %v3390_v34 = vsel %vm2409_vm5, %v3334_v51, 0.0 }
 0x635   :  { %v5721_v54 = vpop.eup %5720  ;;  %v3210_v39 = vadd.f32 1.0, %v5719_v23  ;;  %5740 = vpow2.f32 %v4643_v41  ;;  %3400 = vadd.xlane.f32.xlu1 %v3399_v55  ;;  %v3340_v45 = vmul.f32 %v7857_v10, %v3301_v8  ;;  %3391 = vadd.xlane.f32.xlu0 %v3390_v34  ;;  %v3341_v48 = vmul.f32 %v7857_v10, %v3302_v42 }
 0x636   :  { %v5723_v24 = vpop.eup %5722  ;;  %v3208_v27 = vadd.f32 1.0, %v5721_v54  ;;  %v3300_v11 = vmul.f32 %v5717_v3, %v7900_v61  ;;  %v3393_v41 = vsel %vm2409_vm5, %v3335_v16, 0.0  ;;  %v3338_v23 = vmul.f32 %v7857_v10, %v3299_v17 }
 0x637   :  { %v5725_v62 = vpop.eup %5724  ;;  %5742 = vrcp.f32 %v3210_v39  ;;  %v3213_v43 = vadd.f32 1.0, %v5723_v24  ;;  %v3408_v13 = vsel %vm2409_vm5, %v3340_v45, 0.0  ;;  %v3411_v55 = vsel %vm2409_vm5, %v3341_v48, 0.0 }
 0x638   :  { %v5727_v56 = vpop.eup %5726  ;;  %5744 = vrcp.f32 %v3208_v27  ;;  %v3211_v50 = vadd.f32 1.0, %v5725_v62  ;;  %v3339_v16 = vmul.f32 %v7857_v10, %v3300_v11  ;;  %v3402_v17 = vsel %vm2409_vm5, %v3338_v23, 0.0 }
 0x639   :  { %v5729_v51 = vpop.eup %5728  ;;  %v3305_v8 = vmul.f32 %v5727_v56, %v7913_v38  ;;  %5746 = vrcp.f32 %v3213_v43  ;;  %3394 = vadd.xlane.f32.xlu1 %v3393_v41  ;;  %3409 = vadd.xlane.f32.xlu0 %v3408_v13 }
 0x63a   :  { %v5731_v42 = vpop.eup %5730  ;;  %5748 = vrcp.f32 %v3211_v50  ;;  %v3303_v38 = vmul.f32 %v5729_v51, %v7916_v30  ;;  %v3405_v56 = vsel %vm2409_vm5, %v3339_v16, 0.0 }
 0x63b   :  { %v5733_v54 = vpop.eup %5732  ;;  %v3214_v39 = vadd.f32 1.0, %v5731_v42  ;;  %v3344_v61 = vmul.f32 %v7857_v10, %v3305_v8 }
 0x63c   :  { %v5735_v3 = vpop.eup %5734  ;;  %v3212_v62 = vadd.f32 1.0, %v5733_v54  ;;  %v3342_v50 = vmul.f32 %v7857_v10, %v3303_v38 }
 0x63d   :  { %v5737_v34 = vpop.eup %5736  ;;  %5750 = vrcp.f32 %v3214_v39  ;;  %v3217_v45 = vadd.f32 1.0, %v5735_v3  ;;  %3412 = vadd.xlane.f32.xlu1 %v3411_v55  ;;  %3403 = vadd.xlane.f32.xlu0 %v3402_v17  ;;  %v3420_v13 = vsel %vm2409_vm5, %v3344_v61, 0.0 }
 0x63e   :  { %v5739_v24 = vpop.eup %5738  ;;  %5752 = vrcp.f32 %v3212_v62  ;;  %v3215_v27 = vadd.f32 1.0, %v5737_v34  ;;  %v3414_v61 = vsel %vm2409_vm5, %v3342_v50, 0.0 }
 0x63f   :  { %v5741_v48 = vpop.eup %5740  ;;  %5754 = vrcp.f32 %v3217_v45  ;;  %v3218_v43 = vadd.f32 1.0, %v5739_v24 }
 0x640   :  { %5756 = vrcp.f32 %v3215_v27  ;;  %v3216_v30 = vadd.f32 1.0, %v5741_v48 }
 0x641   :  { %v5743_v11 = vpop.eup %5742  ;;  %5758 = vrcp.f32 %v3218_v43  ;;  %3406 = vadd.xlane.f32.xlu1 %v3405_v56  ;;  %3421 = vadd.xlane.f32.xlu0 %v3420_v13 }
 0x642   :  { %v5745_v41 = vpop.eup %5744  ;;  %v3306_v51 = vmul.f32 %v5743_v11, %v7927_v2  ;;  %5760 = vrcp.f32 %v3216_v30 }
 0x643   :  { %v5747_v8 = vpop.eup %5746  ;;  %v3304_v23 = vmul.f32 %v5745_v41, %v7931_v52 }
 0x644   :  { %v5749_v42 = vpop.eup %5748  ;;  %v3309_v55 = vmul.f32 %v5747_v8, %v7940_v46  ;;  %v3345_v54 = vmul.f32 %v7857_v10, %v3306_v51 }
 0x645   :  { %v3307_v39 = vmul.f32 %v5749_v42, %v7943_v12  ;;  %3415 = vadd.xlane.f32.xlu0 %v3414_v61  ;;  %v3343_v62 = vmul.f32 %v7857_v10, %v3304_v23 }
 0x646   :  { %v3423_v3 = vsel %vm2409_vm5, %v3345_v54, 0.0  ;;  %v3348_v2 = vmul.f32 %v7857_v10, %v3309_v55  ;;  %v8033_v54 = vld [vmem:[#allocation3] ss:$0 sm:$0xff] }
 0x647   :  { %v5751_v16 = vpop.eup %5750  ;;  %3424 = vadd.xlane.f32.xlu1 %v3423_v3  ;;  %v3346_v12 = vmul.f32 %v7857_v10, %v3307_v39  ;;  %v3417_v27 = vsel %vm2409_vm5, %v3343_v62, 0.0 }
 0x648   :  { %v5753_v52 = vpop.eup %5752  ;;  %v3310_v34 = vmul.f32 %v5751_v16, %v7948_v32  ;;  %v3432_v46 = vsel %vm2409_vm5, %v3348_v2, 0.0 }
 0x649   :  { %v5755_v38 = vpop.eup %5754  ;;  %v3308_v17 = vmul.f32 %v5753_v52, %v7954_v19  ;;  %3433 = vadd.xlane.f32.xlu0 %v3432_v46  ;;  %v3426_v30 = vsel %vm2409_vm5, %v3346_v12, 0.0 }
 0x64a   :  { %v5757_v45 = vpop.eup %5756  ;;  %v3313_v24 = vmul.f32 %v5755_v38, %v7961_v5  ;;  %v3349_v48 = vmul.f32 %v7857_v10, %v3310_v34 }
 0x64b   :  { %v5759_v43 = vpop.eup %5758  ;;  %3418 = vadd.xlane.f32.xlu1 %v3417_v27  ;;  %v3311_v11 = vmul.f32 %v5757_v45, %v7966_v7  ;;  %v3347_v19 = vmul.f32 %v7857_v10, %v3308_v17 }
 0x64c   :  { %v3314_v13 = vmul.f32 %v5759_v43, %v7971_v49  ;;  %v3435_v32 = vsel %vm2409_vm5, %v3349_v48, 0.0  ;;  %v3352_v56 = vmul.f32 %v7857_v10, %v3313_v24  ;;  %v5761_v5 = vpop.eup %5760 }
 0x64d   :  { %3427 = vadd.xlane.f32.xlu0 %v3426_v30  ;;  %v3350_v51 = vmul.f32 %v7857_v10, %v3311_v11  ;;  %v3312_v49 = vmul.f32 %v5761_v5, %v7976_v47  ;;  %v3429_v8 = vsel %vm2409_vm5, %v3347_v19, 0.0 }
 0x64e   :  { %v3444_v50 = vsel %vm2409_vm5, %v3352_v56, 0.0  ;;  %v3353_v41 = vmul.f32 %v7857_v10, %v3314_v13 }
 0x64f   :  { %3436 = vadd.xlane.f32.xlu1 %v3435_v32  ;;  %v3438_v23 = vsel %vm2409_vm5, %v3350_v51, 0.0  ;;  %v3351_v42 = vmul.f32 %v7857_v10, %v3312_v49 }
 0x650   :  { %v3447_v7 = vsel %vm2409_vm5, %v3353_v41, 0.0 }
 0x651   :  { %3445 = vadd.xlane.f32.xlu0 %v3444_v50  ;;  %v3441_v55 = vsel %vm2409_vm5, %v3351_v42, 0.0 }
 0x653   :  { %3430 = vadd.xlane.f32.xlu1 %v3429_v8 }
 0x655   :  { %3439 = vadd.xlane.f32.xlu0 %v3438_v23 }
 0x657   :  { %3448 = vadd.xlane.f32.xlu1 %v3447_v7 }
 0x65b   :  { %3442 = vadd.xlane.f32.xlu1 %v3441_v55 }
 0x697   :  { %v3362_v39 = vpop.xlane.xlu0 %3361 }
 0x698   :  { %v3459_v47 = vadd.f32 %v8033_v54, %v3362_v39 }
 0x699   :  { %v3365_v61 = vpop.xlane.xlu1 %3364 }
 0x69a   :  { %3501 = vperm.xlu1 %5328, %v3459_v47   ;;  %v3460_v2 = vadd.f32 %v8033_v54, %v3365_v61 }
 0x69b   :  { %v3356_v3 = vpop.xlane.xlu0 %3355 }
 0x69c   :  { %v3457_v62 = vadd.f32 %v8033_v54, %v3356_v3 }
 0x69d   :  { %v3359_v16 = vpop.xlane.xlu1 %3358 }
 0x69e   :  { %3491 = vperm.xlu1 %5328, %v3457_v62   ;;  %v3458_v10 = vadd.f32 %v8033_v54, %v3359_v16 }
 0x6a2   :  { %3506 = vperm.xlu1 %5328, %v3460_v2  }
 0x6a6   :  { %3496 = vperm.xlu1 %5328, %v3458_v10  }
 0x6a9   :  { %v3374_v52 = vpop.xlane.xlu0 %3373 }
 0x6aa   :  { %v3463_v34 = vadd.f32 %v8033_v54, %v3374_v52  ;;  %v3377_v46 = vpop.xlane.xlu1 %3376 }
 0x6ab   :  { %v3464_v38 = vadd.f32 %v8033_v54, %v3377_v46 }
 0x6ac   :  { %3521 = vperm.xlu1 %5328, %v3463_v34  }
 0x6ad   :  { %v3368_v12 = vpop.xlane.xlu0 %3367  ;;  %3526 = vperm.xlu0 %5329, %v3464_v38  }
 0x6ae   :  { %v3461_v45 = vadd.f32 %v8033_v54, %v3368_v12  ;;  %v3371_v17 = vpop.xlane.xlu1 %3370 }
 0x6af   :  { %v3462_v24 = vadd.f32 %v8033_v54, %v3371_v17 }
 0x6b0   :  { %3511 = vperm.xlu1 %5328, %v3461_v45  }
 0x6b1   :  { %v3386_v27 = vpop.xlane.xlu0 %3385  ;;  %3516 = vperm.xlu0 %5329, %v3462_v24  }
 0x6b2   :  { %v3467_v48 = vadd.f32 %v8033_v54, %v3386_v27  ;;  %v3389_v43 = vpop.xlane.xlu1 %3388 }
 0x6b3   :  { %v3468_v13 = vadd.f32 %v8033_v54, %v3389_v43 }
 0x6b4   :  { %3541 = vperm.xlu1 %5328, %v3467_v48  }
 0x6b5   :  { %v3380_v32 = vpop.xlane.xlu0 %3379  ;;  %3546 = vperm.xlu0 %5329, %v3468_v13  }
 0x6b6   :  { %v3465_v56 = vadd.f32 %v8033_v54, %v3380_v32  ;;  %v3383_v11 = vpop.xlane.xlu1 %3382 }
 0x6b7   :  { %v3466_v30 = vadd.f32 %v8033_v54, %v3383_v11 }
 0x6b8   :  { %3531 = vperm.xlu1 %5328, %v3465_v56  }
 0x6b9   :  { %3536 = vperm.xlu0 %5329, %v3466_v30  }
 0x6bb   :  { %v3398_v19 = vpop.xlane.xlu0 %3397 }
 0x6c2   :  { %v3401_v5 = vpop.xlane.xlu1 %3400  ;;  %v3392_v50 = vpop.xlane.xlu0 %3391 }
 0x6c3   :  { %v3469_v43 = vadd.f32 %v8033_v54, %v3392_v50  ;;  %v3471_v50 = vadd.f32 %v8033_v54, %v3398_v19  ;;  %v3833_v19 = vld [vmem:[#allocation12 + $0x20] sm:$0xff] }
 0x6c6   :  { %v3395_v41 = vpop.xlane.xlu1 %3394  ;;  %v3410_v51 = vpop.xlane.xlu0 %3409 }
 0x6c7   :  { %v3475_v49 = vadd.f32 %v8033_v54, %v3410_v51  ;;  %v3470_v32 = vadd.f32 %v8033_v54, %v3395_v41  ;;  %v3472_v41 = vadd.f32 %v8033_v54, %v3401_v5  ;;  %v6286_v5 = vmov 1.0|1.0  }
 0x6c9   :  { %3581 = vperm.xlu1 %5328, %v3475_v49  }
 0x6ca   :  { %v3413_v8 = vpop.xlane.xlu1 %3412  ;;  %v3404_v7 = vpop.xlane.xlu0 %3403 }
 0x6cb   :  { %v3476_v23 = vadd.f32 %v8033_v54, %v3413_v8  ;;  %v3473_v42 = vadd.f32 %v8033_v54, %v3404_v7  ;;  %v3829_v7 = vld [vmem:[#allocation12] sm:$0xff] }
 0x6cd   :  { %3586 = vperm.xlu1 %5328, %v3476_v23   ;;  %3571 = vperm.xlu0 %5329, %v3473_v42   ;;  %v3830_v23 = vld [vmem:[#allocation12 + $0x8] sm:$0xff]  ;;  %v8370_v42 = vlaneseq }
 0x6ce   :  { %v3407_v55 = vpop.xlane.xlu1 %3406  ;;  %v3422_v39 = vpop.xlane.xlu0 %3421 }
 0x6cf   :  { %v3474_v47 = vadd.f32 %v8033_v54, %v3407_v55  ;;  %v3479_v3 = vadd.f32 %v8033_v54, %v3422_v39  ;;  %v773_v55 = vshrl.u32 %v8370_v42, 7  ;;  %v3831_v39 = vld [vmem:[#allocation12 + $0x10] sm:$0xff] }
 0x6d1   :  { %3576 = vperm.xlu1 %5328, %v3474_v47   ;;  %v788_v47 = vsub.s32 1, %v773_v55 }
 0x6d2   :  { %v3416_v61 = vpop.xlane.xlu0 %3415 }
 0x6d3   :  { %v3477_v10 = vadd.f32 %v8033_v54, %v3416_v61  ;;  %v3832_v61 = vld [vmem:[#allocation12 + $0x18] sm:$0xff] }
 0x6d4   :  { %v3425_v62 = vpop.xlane.xlu1 %3424 }
 0x6d5   :  { %v3480_v2 = vadd.f32 %v8033_v54, %v3425_v62  ;;  %3601 = vperm.xlu1 %5328, %v3479_v3   ;;  %v781_v3 = vld [vmem:[#allocation7] sm:$0x3]  ;;  %v784_v62 = vsub.s32 0, %v773_v55 }
 0x6d6   :  { %v3434_v16 = vpop.xlane.xlu0 %3433 }
 0x6d7   :  { %3606 = vperm.xlu0 %5329, %v3480_v2   ;;  %v3483_v38 = vadd.f32 %v8033_v54, %v3434_v16  ;;  %v774_v2 = vadd.s32 8, %v773_v55  ;;  %v789_v16 = vrot.slane %v781_v3, %v788_v47 }
 0x6d8   :  { %v3419_v52 = vpop.xlane.xlu1 %3418 }
 0x6d9   :  { %v3478_v34 = vadd.f32 %v8033_v54, %v3419_v52  ;;  %3591 = vperm.xlu1 %5328, %v3477_v10   ;;  %v785_v10 = vrot.slane %v781_v3, %v784_v62  ;;  %vm791_vm6 = vcmp.eq.s32.totalorder %v789_v16, %v773_v55  ;;  %vm793_vm7 = vcmp.eq.s32.totalorder %v789_v16, %v774_v2  ;;  %v5365_v52 = vld [vmem:[#allocation28 + $0x28] sm:$0xff]  }
 0x6da   :  { %v3428_v46 = vpop.xlane.xlu0 %3427  ;;  %vm4648_vm9 = vmpackc.low %vm793_vm7, %vm791_vm6 }
 0x6db   :  { %3596 = vperm.xlu0 %5329, %v3478_v34   ;;  %v3481_v24 = vadd.f32 %v8033_v54, %v3428_v46  ;;  %vm792_vm8 = vcmp.eq.s32.totalorder %v785_v10, %v774_v2  ;;  %vm790_vm10 = vcmp.eq.s32.totalorder %v785_v10, %v773_v55  ;;  %4649 = vmatprep.mubr.msk.bf16.mxu0 %vm4648_vm9, %v6286_v5  ;;  %v3835_v34 = vld [vmem:[#allocation12 + $0x30] sm:$0xff]  ;;  %v3836_v46 = vld [vmem:[#allocation12 + $0x38] sm:$0xff] }
 0x6dc   :  { %v3437_v12 = vpop.xlane.xlu1 %3436  ;;  %vm8069_vm11 = vmpackc.low %vm792_vm8, %vm790_vm10 }
 0x6dd   :  { %v3484_v45 = vadd.f32 %v8033_v54, %v3437_v12  ;;  %3621 = vperm.xlu1 %5328, %v3483_v38   ;;  %v775_v38 = vadd.s32 16, %v773_v55  ;;  %v776_v12 = vadd.s32 24, %v773_v55 }
 0x6de   :  { %v3446_v17 = vpop.xlane.xlu0 %3445 }
 0x6df   :  { %3626 = vperm.xlu0 %5329, %v3484_v45   ;;  %v3487_v49 = vadd.f32 %v8033_v54, %v3446_v17  ;;  %vm795_vm12 = vcmp.eq.s32.totalorder %v789_v16, %v775_v38  ;;  %vm797_vm13 = vcmp.eq.s32.totalorder %v789_v16, %v776_v12  ;;  %vm794_vm14 = vcmp.eq.s32.totalorder %v785_v10, %v775_v38  ;;  %v5366_v45 = vld [vmem:[#allocation28 + $0x30] sm:$0xff]  }
 0x6e0   :  { %v3431_v27 = vpop.xlane.xlu1 %3430  ;;  %vm796_vm15 = vcmp.eq.s32.totalorder %v785_v10, %v776_v12  ;;  %vm8073_vm0 = vmpackc.low %vm797_vm13, %vm795_vm12  ;;  %v777_v17 = vadd.s32 32, %v773_v55 }
 0x6e1   :  { %v3482_v48 = vadd.f32 %v8033_v54, %v3431_v27  ;;  %3611 = vperm.xlu1 %5328, %v3481_v24   ;;  %v778_v24 = vadd.s32 40, %v773_v55  ;;  %vm8077_vm1 = vmpackc.low %vm796_vm15, %vm794_vm14  ;;  %v5367_v27 = vld [vmem:[#allocation28 + $0x38] sm:$0xff]  }
 0x6e2   :  { %v3440_v56 = vpop.xlane.xlu0 %3439  ;;  %vm799_vm2 = vcmp.eq.s32.totalorder %v789_v16, %v777_v17  ;;  %vm798_vm6 = vcmp.eq.s32.totalorder %v785_v10, %v777_v17 }
 0x6e3   :  { %3616 = vperm.xlu0 %5329, %v3482_v48   ;;  %v3485_v11 = vadd.f32 %v8033_v54, %v3440_v56  ;;  %vm801_vm3 = vcmp.eq.s32.totalorder %v789_v16, %v778_v24  ;;  %vm800_vm7 = vcmp.eq.s32.totalorder %v785_v10, %v778_v24  ;;  %v5368_v48 = vld [vmem:[#allocation27] sm:$0xff]  }
 0x6e4   :  { %v3449_v13 = vpop.xlane.xlu1 %3448  ;;  %vm8081_vm8 = vmpackc.low %vm801_vm3, %vm799_vm2 }
 0x6e5   :  { %3551 = vperm.xlu1 %5328, %v3469_v43   ;;  %v3488_v8 = vadd.f32 %v8033_v54, %v3449_v13  ;;  %vm8085_vm9 = vmpackc.low %vm800_vm7, %vm798_vm6  ;;  %v779_v13 = vadd.s32 48, %v773_v55 }
 0x6e7   :  { %3556 = vperm.xlu0 %5329, %v3470_v32   ;;  %v780_v32 = vadd.s32 56, %v773_v55  ;;  %vm803_vm10 = vcmp.eq.s32.totalorder %v789_v16, %v779_v13  ;;  %vm802_vm13 = vcmp.eq.s32.totalorder %v785_v10, %v779_v13 }
 0x6e8   :  { %v3443_v30 = vpop.xlane.xlu1 %3442 }
 0x6e9   :  { %v3486_v51 = vadd.f32 %v8033_v54, %v3443_v30  ;;  %3631 = vperm.xlu1 %5328, %v3485_v11   ;;  %v3834_v54 = vld [vmem:[#allocation12 + $0x28] sm:$0xff]  ;;  %vm805_vm12 = vcmp.eq.s32.totalorder %v789_v16, %v780_v32  ;;  %vm804_vm14 = vcmp.eq.s32.totalorder %v785_v10, %v780_v32  ;;  %v5360_v30 = vld [vmem:[#allocation28] sm:$0xff]  }
 0x6ea   :  { %vm8089_vm15 = vmpackc.low %vm805_vm12, %vm803_vm10  ;;  %5164 = vmatprep.subr.bf16.mxu1 %v5360_v30 }
 0x6eb   :  { %3636 = vperm.xlu0 %5329, %v3486_v51   ;;  %vm8093_vm4 = vmpackc.low %vm804_vm14, %vm802_vm13  ;;  %v5361_v51 = vld [vmem:[#allocation28 + $0x8] sm:$0xff]   ;;  %5165 = vmatpush3.bf16.msra.mxu1 %v5360_v30 }
 0x6ec   :  { %5166 = vmatprep.subr.bf16.mxu1 %v5361_v51 }
 0x6ed   :  { %3641 = vperm.xlu1 %5328, %v3487_v49   ;;  %v5362_v49 = vld [vmem:[#allocation28 + $0x10] sm:$0xff]  }
 0x6ef   :  { %3646 = vperm.xlu0 %5329, %v3488_v8   ;;  %5167 = vmatpush3.bf16.msra.mxu1 %v5361_v51 }
 0x6f0   :  { %5168 = vmatprep.subr.bf16.mxu1 %v5362_v49 }
 0x6f1   :  { %3561 = vperm.xlu1 %5328, %v3471_v50   ;;  %v5363_v50 = vld [vmem:[#allocation28 + $0x18] sm:$0xff]  }
 0x6f3   :  { %3566 = vperm.xlu0 %5329, %v3472_v41   ;;  %5169 = vmatpush3.bf16.msra.mxu1 %v5362_v49 }
 0x6f4   :  { %5170 = vmatprep.subr.bf16.mxu1 %v5363_v50 }
 0x6f5   :  { %3839 = vperm.xlu1 %5328, %v3829_v7   ;;  %v5364_v7 = vld [vmem:[#allocation28 + $0x20] sm:$0xff]  }
 0x6f7   :  { %3844 = vperm.xlu0 %5329, %v3830_v23   ;;  %5171 = vmatpush3.bf16.msra.mxu1 %v5363_v50 }
 0x6f8   :  { %5172 = vmatprep.subr.bf16.mxu1 %v5364_v7 }
 0x6f9   :  { %3849 = vperm.xlu1 %5328, %v3831_v39  }
 0x6fb   :  { %3854 = vperm.xlu0 %5329, %v3832_v61   ;;  %5173 = vmatpush3.bf16.msra.mxu1 %v5364_v7 }
 0x6fc   :  { %5174 = vmatprep.subr.bf16.mxu1 %v5365_v52 }
 0x6fd   :  { %3859 = vperm.xlu1 %5328, %v3833_v19  }
 0x6ff   :  { %3864 = vperm.xlu0 %5329, %v3834_v54   ;;  %5175 = vmatpush3.bf16.msra.mxu1 %v5365_v52 }
 0x700   :  { %5176 = vmatprep.subr.bf16.mxu1 %v5366_v45 }
 0x701   :  { %3869 = vperm.xlu1 %5328, %v3835_v34  }
 0x703   :  { %3874 = vperm.xlu0 %5329, %v3836_v46   ;;  %5177 = vmatpush3.bf16.msra.mxu1 %v5366_v45 }
 0x704   :  { %5178 = vmatprep.subr.bf16.mxu1 %v5367_v27 }
 0x707   :  { %5179 = vmatpush3.bf16.msra.mxu1 %v5367_v27 }
 0x708   :  { %5188 = vmatprep.subr.bf16.mxu1 %v5368_v48 }
 0x719   :  { %v3502_v8 = vpop.permute.xlu1 %3501 }
 0x71d   :  { %v3492_v41 = vpop.permute.xlu1 %3491 }
 0x71e   :  { %v3649_v12 = vmul.f32 %v3492_v41, %v7025_v33 }
 0x721   :  { %v3507_v23 = vpop.permute.xlu1 %3506 }
 0x722   :  { %v3652_v32 = vmul.f32 %v3507_v23, %v7035_v26  ;;  %v8386_v23 = vld [vmem:[#allocation58_spill] sm:$0xff] }
 0x725   :  { %v3497_v42 = vpop.permute.xlu1 %3496 }
 0x726   :  { %v3650_v34 = vmul.f32 %v3497_v42, %v7031_v35 }
 0x728   :  { %v3682_v30 = vadd.f32 %v3650_v34, %v7626_v18 }
 0x72b   :  { %v3522_v55 = vpop.permute.xlu1 %3521 }
 0x72c   :  { %v3527_v39 = vpop.permute.xlu0 %3526 }
 0x72f   :  { %v3512_v47 = vpop.permute.xlu1 %3511 }
 0x730   :  { %v3517_v61 = vpop.permute.xlu0 %3516  ;;  %v3653_v18 = vmul.f32 %v3512_v47, %v7053_v31  ;;  %v8389_v31 = vld [vmem:[#allocation48_spill] sm:$0xff] }
 0x731   :  { %v3655_v47 = vmul.f32 %v3522_v55, %v8389_v31 }
 0x732   :  { %v3685_v34 = vadd.f32 %v3653_v18, %v7665_v40  ;;  %v8391_v40 = vld [vmem:[#allocation50_spill] sm:$0xff] }
 0x733   :  { %v8097_v3 = vpop.permute.xlu1 %3541  ;;  %v3687_v55 = vadd.f32 %v3655_v47, %v7681_v0  ;;  %v8405_v47 = vld [vmem:[#allocation70_spill] sm:$0xff] }
 0x734   :  { %v8099_v62 = vpop.permute.xlu0 %3546 }
 0x737   :  { %v3532_v2 = vpop.permute.xlu1 %3531 }
 0x738   :  { %v3537_v16 = vpop.permute.xlu0 %3536 }
 0x748   :  { %v3582_v10 = vpop.permute.xlu1 %3581 }
 0x749   :  { %v3667_v24 = vmul.f32 %v3582_v10, %v7149_v28  ;;  %v8387_v10 = vld [vmem:[#allocation60_spill] sm:$0xff] }
 0x74b   :  { %v3699_v50 = vadd.f32 %v3667_v24, %v7769_v29 }
 0x74c   :  { %v3587_v19 = vpop.permute.xlu1 %3586  ;;  %v3572_v54 = vpop.permute.xlu0 %3571 }
 0x74d   :  { %v3668_v46 = vmul.f32 %v3587_v19, %v7153_v44  ;;  %v3665_v38 = vmul.f32 %v3572_v54, %v7137_v58  ;;  %v3651_v44 = vmul.f32 %v3502_v8, %v7041_v37  ;;  %v3681_v58 = vadd.f32 %v3649_v12, %v7623_v15  ;;  %v8385_v37 = vld [vmem:[#allocation47_spill] sm:$0xff] }
 0x74e   :  { %v3654_v15 = vmul.f32 %v3517_v61, %v8385_v37  ;;  %v8388_v19 = vld [vmem:[#allocation59_spill] sm:$0xff] }
 0x74f   :  { %v3700_v51 = vadd.f32 %v3668_v46, %v7764_v25  ;;  %v3697_v49 = vadd.f32 %v3665_v38, %v7758_v60  ;;  %v3713_v26 = vpack.c.bf16 %v3682_v30, %v3681_v58  ;;  %v3683_v60 = vadd.f32 %v3651_v44, %v7630_v22  ;;  %v8390_v38 = vld [vmem:[#allocation49_spill] sm:$0xff]  ;;  %v8393_v44 = vld [vmem:[#allocation51_spill] sm:$0xff] }
 0x750   :  { %v3577_v17 = vpop.permute.xlu1 %3576  ;;  %v3656_v12 = vmul.f32 %v3527_v39, %v8390_v38  ;;  %v3658_v39 = vmul.f32 %v3537_v16, %v8393_v44  ;;  %v8399_v16 = vld [vmem:[#allocation77_spill] sm:$0xff]  ;;  %v8408_v38 = vld [vmem:[#allocation66_spill] sm:$0xff]  ;;  %v8414_v44 = vld [vmem:[#allocation68_spill] sm:$0xff] }
 0x751   :  { %v3666_v13 = vmul.f32 %v3577_v17, %v7141_v59  ;;  %v3684_v59 = vadd.f32 %v3652_v32, %v7617_v9  ;;  %v3722_v25 = vpack.c.bf16 %v3700_v51, %v3699_v50  ;;  %v3686_v17 = vadd.f32 %v3654_v15, %v7674_v1  ;;  %v8394_v1 = vld [vmem:[#allocation61_spill] sm:$0xff] }
 0x752   :  { %v3657_v51 = vmul.f32 %v3532_v2, %v8391_v40  ;;  %v8397_v2 = vld [vmem:[#allocation52_spill] sm:$0xff]  ;;  %v8401_v15 = vld [vmem:[#allocation69_spill] sm:$0xff] }
 0x753   :  { %v3698_v35 = vadd.f32 %v3666_v13, %v7761_v53  ;;  %v3714_v42 = vpack.c.bf16 %v3684_v59, %v3683_v60  ;;  %v3715_v30 = vpack.c.bf16 %v3686_v17, %v3685_v34  ;;  %v3659_v59 = vmul.f32 %v8097_v3, %v8397_v2  ;;  %v8403_v3 = vld [vmem:[#allocation71_spill] sm:$0xff]  ;;  %v8417_v2 = vld [vmem:[#allocation56_spill] sm:$0xff] }
 0x754   :  { %v3602_v33 = vpop.permute.xlu1 %3601 }
 0x755   :  { %v3721_v41 = vpack.c.bf16 %v3698_v35, %v3697_v49  ;;  %v3671_v53 = vmul.f32 %v3602_v33, %v7177_v57  ;;  %v3688_v35 = vadd.f32 %v3656_v12, %v7668_v36  ;;  %v8398_v36 = vld [vmem:[#allocation78_spill] sm:$0xff] }
 0x756   :  { %v3607_v28 = vpop.permute.xlu0 %3606 }
 0x757   :  { %4834 = vmatprep.subr.bf16.mxu0 %v3721_v41  ;;  %v3672_v9 = vmul.f32 %v3607_v28, %v8387_v10  ;;  %v3703_v57 = vadd.f32 %v3671_v53, %v7785_v63  ;;  %v8396_v28 = vld [vmem:[#allocation62_spill] sm:$0xff]  ;;  %v3716_v41 = vpack.c.bf16 %v3688_v35, %v3687_v55 }
 0x758   :  { %v3592_v7 = vpop.permute.xlu1 %3591  ;;  %4835 = vmatpush3.bf16.msra.mxu0 %v3713_v26  ;;  %v3689_v26 = vadd.f32 %v3657_v51, %v7694_v20 }
 0x759   :  { %v3669_v29 = vmul.f32 %v3592_v7, %v8386_v23  ;;  %4836 = vmatprep.subr.bf16.mxu0 %v3722_v25  ;;  %v3704_v13 = vadd.f32 %v3672_v9, %v7782_v21  ;;  %v8395_v21 = vld [vmem:[#allocation64_spill] sm:$0xff]  ;;  %v8400_v7 = vld [vmem:[#allocation53_spill] sm:$0xff]  ;;  %v3691_v9 = vadd.f32 %v3659_v59, %v8403_v3 }
 0x75a   :  { %v3597_v8 = vpop.permute.xlu0 %3596  ;;  %v3660_v37 = vmul.f32 %v8099_v62, %v8400_v7 }
 0x75b   :  { %v3670_v54 = vmul.f32 %v3597_v8, %v8388_v19  ;;  %v3701_v22 = vadd.f32 %v3669_v29, %v7772_v14  ;;  %v8392_v14 = vld [vmem:[#allocation63_spill] sm:$0xff]  ;;  %v3690_v8 = vadd.f32 %v3658_v39, %v8401_v15  ;;  %v8402_v29 = vld [vmem:[#allocation76_spill] sm:$0xff]  ;;  %v8404_v19 = vld [vmem:[#allocation54_spill] sm:$0xff] }
 0x75c   :  { %v3622_v61 = vpop.permute.xlu1 %3621  ;;  %4837 = vmatpush3.bf16.msra.mxu0 %v3714_v42  ;;  %v3692_v34 = vadd.f32 %v3660_v37, %v8405_v47 }
 0x75d   :  { %v3702_v46 = vadd.f32 %v3670_v54, %v7775_v4  ;;  %v3675_v49 = vmul.f32 %v3622_v61, %v8392_v14  ;;  %v3724_v4 = vpack.c.bf16 %v3704_v13, %v3703_v57  ;;  %v3717_v20 = vpack.c.bf16 %v3690_v8, %v3689_v26  ;;  %v8412_v14 = vld [vmem:[#allocation74_spill] sm:$0xff]  ;;  %v8418_v26 = vld [vmem:[#allocation57_spill] sm:$0xff] }
 0x75e   :  { %v3627_v24 = vpop.permute.xlu0 %3626  ;;  %v3718_v17 = vpack.c.bf16 %v3692_v34, %v3691_v9  ;;  %v5370_v34 = vld [vmem:[#allocation27 + $0x10] sm:$0xff]  }
 0x75f   :  { %v3723_v32 = vpack.c.bf16 %v3702_v46, %v3701_v22  ;;  %v3676_v50 = vmul.f32 %v3627_v24, %v8395_v21  ;;  %v3707_v25 = vadd.f32 %v3675_v49, %v8398_v36  ;;  %v8406_v22 = vld [vmem:[#allocation55_spill] sm:$0xff]  ;;  %v8407_v46 = vld [vmem:[#allocation65_spill] sm:$0xff] }
 0x760   :  { %v3612_v63 = vpop.permute.xlu1 %3611  ;;  %v8409_v24 = vld [vmem:[#allocation73_spill] sm:$0xff] }
 0x761   :  { %4838 = vmatprep.subr.bf16.mxu0 %v3723_v32  ;;  %v3673_v33 = vmul.f32 %v3612_v63, %v8394_v1  ;;  %v3708_v42 = vadd.f32 %v3676_v50, %v8402_v29  ;;  %v8410_v32 = vld [vmem:[#allocation79_spill] sm:$0xff]  ;;  %v8416_v50 = vld [vmem:[#allocation81_spill] sm:$0xff] }
 0x762   :  { %v3617_v58 = vpop.permute.xlu0 %3616  ;;  %4839 = vmatpush3.bf16.msra.mxu0 %v3715_v30  ;;  %v8411_v30 = vld [vmem:[#allocation80_spill] sm:$0xff] }
 0x763   :  { %v3674_v0 = vmul.f32 %v3617_v58, %v8396_v28  ;;  %4840 = vmatprep.subr.bf16.mxu0 %v3724_v4  ;;  %v3705_v18 = vadd.f32 %v3673_v33, %v7793_v6  ;;  %v3726_v31 = vpack.c.bf16 %v3708_v42, %v3707_v25  ;;  %v8413_v4 = vld [vmem:[#allocation67_spill] sm:$0xff]  ;;  %v8415_v33 = vld [vmem:[#allocation82_spill] sm:$0xff] }
 0x764   :  { %v3552_v53 = vpop.permute.xlu1 %3551  ;;  %v8419_v25 = vld [vmem:[#allocation75_spill] sm:$0xff] }
 0x765   :  { %v3706_v60 = vadd.f32 %v3674_v0, %v8399_v16  ;;  %v3661_v6 = vmul.f32 %v3552_v53, %v8404_v19  ;;  %v5369_v19 = vld [vmem:[#allocation27 + $0x8] sm:$0xff]  }
 0x766   :  { %v3557_v23 = vpop.permute.xlu0 %3556  ;;  %4841 = vmatpush3.bf16.msra.mxu0 %v3716_v41 }
 0x767   :  { %v3725_v10 = vpack.c.bf16 %v3706_v60, %v3705_v18  ;;  %v3662_v57 = vmul.f32 %v3557_v23, %v8406_v22  ;;  %v3693_v13 = vadd.f32 %v3661_v6, %v8409_v24  ;;  %v8420_v60 = vld [vmem:[#allocation72_spill] sm:$0xff] }
 0x768   :  { %v3632_v54 = vpop.permute.xlu1 %3631  ;;  %v5372_v24 = vld [vmem:[#allocation27 + $0x20] sm:$0xff]  }
 0x769   :  { %4842 = vmatprep.subr.bf16.mxu0 %v3725_v10  ;;  %v3677_v61 = vmul.f32 %v3632_v54, %v8407_v46  ;;  %v3694_v49 = vadd.f32 %v3662_v57, %v8412_v14  ;;  %v5371_v46 = vld [vmem:[#allocation27 + $0x18] sm:$0xff]  }
 0x76a   :  { %v3637_v62 = vpop.permute.xlu0 %3636  ;;  %4843 = vmatpush3.bf16.msra.mxu0 %v3717_v20  ;;  %v5375_v14 = vld [vmem:[#allocation27 + $0x38] sm:$0xff]  }
 0x76b   :  { %v3678_v12 = vmul.f32 %v3637_v62, %v8408_v38  ;;  %4844 = vmatprep.subr.bf16.mxu0 %v3726_v31  ;;  %v3709_v55 = vadd.f32 %v3677_v61, %v8410_v32  ;;  %v3719_v1 = vpack.c.bf16 %v3694_v49, %v3693_v13  ;;  %v5795_v49 = vld [vmem:[#allocation10 + $0x8] sm:$0xff]  }
 0x76c   :  { %v3642_v51 = vpop.permute.xlu1 %3641 }
 0x76d   :  { %v3710_v40 = vadd.f32 %v3678_v12, %v8411_v30  ;;  %v3679_v35 = vmul.f32 %v3642_v51, %v8413_v4  ;;  %v5373_v30 = vld [vmem:[#allocation27 + $0x28] sm:$0xff]   ;;  %v5374_v51 = vld [vmem:[#allocation27 + $0x30] sm:$0xff]   ;;  %v5797_v4 = vld [vmem:[#allocation10 + $0x18] sm:$0xff]  }
 0x76e   :  { %v3647_v63 = vpop.permute.xlu0 %3646  ;;  %4845 = vmatpush3.bf16.msra.mxu0 %v3718_v17 }
 0x76f   :  { %v3680_v39 = vmul.f32 %v3647_v63, %v8414_v44  ;;  %v3727_v58 = vpack.c.bf16 %v3710_v40, %v3709_v55  ;;  %v3711_v21 = vadd.f32 %v3679_v35, %v8415_v33  ;;  %v5794_v40 = vld [vmem:[#allocation10] sm:$0xff]   ;;  %v5796_v63 = vld [vmem:[#allocation10 + $0x10] sm:$0xff]  }
 0x770   :  { %v3562_v0 = vpop.permute.xlu1 %3561  ;;  %v5376_v35 = vld [vmem:[#allocation31] sm:$0xff]   ;;  %v5377_v44 = vld [vmem:[#allocation31 + $0x8] sm:$0xff]  }
 0x771   :  { %v3712_v28 = vadd.f32 %v3680_v39, %v8416_v50  ;;  %4846 = vmatprep.subr.bf16.mxu0 %v3727_v58  ;;  %v3663_v59 = vmul.f32 %v3562_v0, %v8417_v2  ;;  %v4688_v39 = vld [vmem:[#allocation30] ss:$0 sm:$0xff] }
 0x772   :  { %v3567_v41 = vpop.permute.xlu0 %3566  ;;  %4847 = vmatpush3.bf16.msra.mxu0 %v3719_v1 }
 0x773   :  { %v3664_v18 = vmul.f32 %v3567_v41, %v8418_v26  ;;  %v3728_v36 = vpack.c.bf16 %v3712_v28, %v3711_v21  ;;  %v3695_v16 = vadd.f32 %v3663_v59, %v8419_v25 }
 0x775   :  { %v3696_v53 = vadd.f32 %v3664_v18, %v8420_v60  ;;  %4848 = vmatprep.subr.bf16.mxu0 %v3728_v36 }
 0x777   :  { %v3720_v7 = vpack.c.bf16 %v3696_v53, %v3695_v16 }
 0x779   :  { %4849 = vmatpush3.bf16.msra.mxu0 %v3720_v7 }
 0x77a   :  { %5212 = vmatprep.subr.bf16.mxu0 %v5376_v35 }
 0x77c   :  { %4651 = vmatmul.mubr.msk.bf16.vlgmr.msra.gmra.mrb[64].mxu0 %vm8069_vm11, %v6286_v5 }
 0x77d   :  { %4653 = vmatprep.mubr.msk.bf16.mxu0 %vm8073_vm0, %v6286_v5  ;;  %5213 = vmatpush3.bf16.msra.mxu0 %v5376_v35 }
 0x77e   :  { %5214 = vmatprep.subr.bf16.mxu0 %v5377_v44 }
 0x781   :  { %5215 = vmatpush3.bf16.msra.mxu0 %v5377_v44 }
 0x784   :  { %4655 = vmatmul.mubr.msk.bf16.gmra.mrb[68].mxu0 %vm8077_vm1, %v6286_v5 }
 0x785   :  { %4657 = vmatprep.mubr.msk.bf16.mxu0 %vm8081_vm8, %v6286_v5 }
 0x78c   :  { %4659 = vmatmul.mubr.msk.bf16.gmra.mrb[72].mxu0 %vm8085_vm9, %v6286_v5 }
 0x78d   :  { %4661 = vmatprep.mubr.msk.bf16.mxu0 %vm8089_vm15, %v6286_v5 }
 0x794   :  { %4663 = vmatmul.mubr.msk.bf16.gmra.mrb[76].mxu0 %vm8093_vm4, %v6286_v5 }
 0x84f   :  { %v4850_v43 = vpop.f32.mrb[64].mxu0 }
 0x850   :  { %v4851_v37 = vpop.f32.mrb[65].mxu0 }
 0x851   :  { %v8188_v15 = vadd.f32 %v4851_v37, %v4850_v43  ;;  %v4853_v56 = vpop.f32.mrb[66].mxu0 }
 0x852   :  { %v4854_v8 = vpop.f32.mrb[67].mxu0 }
 0x853   :  { %v8190_v23 = vadd.f32 %v4854_v8, %v4853_v56 }
 0x855   :  { %v3925_v5 = vpack.c.bf16 %v8190_v23, %v8188_v15 }
 0x857   :  { %v4856_v11 = vpop.f32.mrb[68].mxu0  ;;  %5180 = vmatprep.mubr.bf16.mxu1 %v3925_v5 }
 0x858   :  { %v4857_v29 = vpop.f32.mrb[69].mxu0 }
 0x859   :  { %v8194_v42 = vadd.f32 %v4857_v29, %v4856_v11  ;;  %v4859_v10 = vpop.f32.mrb[70].mxu0 }
 0x85a   :  { %v4860_v3 = vpop.f32.mrb[71].mxu0 }
 0x85b   :  { %v8196_v9 = vadd.f32 %v4860_v3, %v4859_v10 }
 0x85d   :  { %v3926_v20 = vpack.c.bf16 %v8196_v9, %v8194_v42 }
 0x85f   :  { %v4862_v6 = vpop.f32.mrb[72].mxu0  ;;  %5181 = vmatmul.mubr.bf16.vlgmr.msra.gmra.mrb[96].mxu1 %v3926_v20 }
 0x860   :  { %5189 = vmatpush3.bf16.msra.mxu1 %v5368_v48  ;;  %v4863_v54 = vpop.f32.mrb[73].mxu0 }
 0x861   :  { %v8200_v31 = vadd.f32 %v4863_v54, %v4862_v6  ;;  %v4865_v47 = vpop.f32.mrb[74].mxu0  ;;  %5190 = vmatprep.subr.bf16.mxu1 %v5369_v19 }
 0x862   :  { %v4866_v22 = vpop.f32.mrb[75].mxu0 }
 0x863   :  { %v8202_v57 = vadd.f32 %v4866_v22, %v4865_v47 }
 0x864   :  { %5191 = vmatpush3.bf16.msra.mxu1 %v5369_v19 }
 0x865   :  { %v3927_v62 = vpack.c.bf16 %v8202_v57, %v8200_v31  ;;  %5192 = vmatprep.subr.bf16.mxu1 %v5370_v34 }
 0x867   :  { %v4868_v61 = vpop.f32.mrb[76].mxu0  ;;  %5184 = vmatprep.mubr.bf16.mxu1 %v3927_v62 }
 0x868   :  { %5193 = vmatpush3.bf16.msra.mxu1 %v5370_v34  ;;  %v4869_v38 = vpop.f32.mrb[77].mxu0 }
 0x869   :  { %v8206_v12 = vadd.f32 %v4869_v38, %v4868_v61  ;;  %v4871_v17 = vpop.f32.mrb[78].mxu0  ;;  %5194 = vmatprep.subr.bf16.mxu1 %v5371_v46 }
 0x86a   :  { %v4872_v13 = vpop.f32.mrb[79].mxu0 }
 0x86b   :  { %v8208_v32 = vadd.f32 %v4872_v13, %v4871_v17 }
 0x86c   :  { %5195 = vmatpush3.bf16.msra.mxu1 %v5371_v46 }
 0x86d   :  { %v3928_v55 = vpack.c.bf16 %v8208_v32, %v8206_v12  ;;  %5196 = vmatprep.subr.bf16.mxu1 %v5372_v24 }
 0x86f   :  { %5185 = vmatmul.mubr.bf16.gmra.mrb[100].mxu1 %v3928_v55 }
 0x870   :  { %5197 = vmatpush3.bf16.msra.mxu1 %v5372_v24  ;;  %5204 = vmatprep.mubr.bf16.mxu1 %v5794_v40 }
 0x871   :  { %5198 = vmatprep.subr.bf16.mxu1 %v5373_v30 }
 0x874   :  { %5199 = vmatpush3.bf16.msra.mxu1 %v5373_v30 }
 0x875   :  { %5200 = vmatprep.subr.bf16.mxu1 %v5374_v51 }
 0x878   :  { %5201 = vmatpush3.bf16.msra.mxu1 %v5374_v51 }
 0x879   :  { %5202 = vmatprep.subr.bf16.mxu1 %v5375_v14 }
 0x87c   :  { %5203 = vmatpush3.bf16.msra.mxu1 %v5375_v14 }
 0x87f   :  { %5205 = vmatmul.mubr.bf16.vlgmr.msra.gmra.mrb[96].mxu1 %v5795_v49 }
 0x880   :  { %5208 = vmatprep.mubr.bf16.mxu1 %v5796_v63 }
 0x887   :  { %5209 = vmatmul.mubr.bf16.gmra.mrb[100].mxu1 %v5797_v4 }
 0x952   :  { %v5206_v58 = vpop.f32.mrb[96].mxu1 }
 0x953   :  { %v4180_v1 = vadd.f32 %v5206_v58, %v4688_v39  ;;  %v4140_v33 = vpop.f32.mrb[97].mxu1 }
 0x954   :  { %v4178_v21 = vadd.f32 %v4688_v39, %v4140_v33  ;;  %v5207_v50 = vpop.f32.mrb[98].mxu1 }
 0x955   :  { %v4691_v28 = vmul.f32 -1.442695, %v4180_v1  ;;  %v4181_v0 = vadd.f32 %v5207_v50, %v4688_v39  ;;  %v4143_v41 = vpop.f32.mrb[99].mxu1 }
 0x956   :  { %v4689_v2 = vmul.f32 -1.442695, %v4178_v21  ;;  %v4179_v59 = vadd.f32 %v4688_v39, %v4143_v41 }
 0x957   :  { %5762 = vpow2.f32 %v4691_v28  ;;  %v4692_v26 = vmul.f32 -1.442695, %v4181_v0 }
 0x958   :  { %5764 = vpow2.f32 %v4689_v2  ;;  %v4690_v18 = vmul.f32 -1.442695, %v4179_v59 }
 0x959   :  { %5766 = vpow2.f32 %v4692_v26 }
 0x95a   :  { %5768 = vpow2.f32 %v4690_v18  ;;  %v5210_v36 = vpop.f32.mrb[100].mxu1 }
 0x95b   :  { %v4184_v25 = vadd.f32 %v5210_v36, %v4688_v39  ;;  %v4156_v16 = vpop.f32.mrb[101].mxu1 }
 0x95c   :  { %v4182_v60 = vadd.f32 %v4688_v39, %v4156_v16  ;;  %v5211_v53 = vpop.f32.mrb[102].mxu1 }
 0x95d   :  { %v4695_v7 = vmul.f32 -1.442695, %v4184_v25  ;;  %v4185_v52 = vadd.f32 %v5211_v53, %v4688_v39  ;;  %v4159_v45 = vpop.f32.mrb[103].mxu1 }
 0x95e   :  { %v4693_v27 = vmul.f32 -1.442695, %v4182_v60  ;;  %v4183_v48 = vadd.f32 %v4688_v39, %v4159_v45 }
 0x95f   :  { %5770 = vpow2.f32 %v4695_v7  ;;  %v4696_v43 = vmul.f32 -1.442695, %v4185_v52 }
 0x960   :  { %5772 = vpow2.f32 %v4693_v27  ;;  %v4694_v37 = vmul.f32 -1.442695, %v4183_v48 }
 0x961   :  { %v5763_v56 = vpop.eup %5762  ;;  %5774 = vpow2.f32 %v4696_v43 }
 0x962   :  { %v5765_v8 = vpop.eup %5764  ;;  %v4212_v5 = vadd.f32 1.0, %v5763_v56  ;;  %5776 = vpow2.f32 %v4694_v37 }
 0x963   :  { %v5767_v11 = vpop.eup %5766  ;;  %v4210_v29 = vadd.f32 1.0, %v5765_v8 }
 0x964   :  { %v5769_v10 = vpop.eup %5768  ;;  %5778 = vrcp.f32 %v4212_v5  ;;  %v4213_v3 = vadd.f32 1.0, %v5767_v11 }
 0x965   :  { %5780 = vrcp.f32 %v4210_v29  ;;  %v4211_v20 = vadd.f32 1.0, %v5769_v10 }
 0x966   :  { %5782 = vrcp.f32 %v4213_v3 }
 0x967   :  { %5784 = vrcp.f32 %v4211_v20 }
 0x969   :  { %v5771_v19 = vpop.eup %5770 }
 0x96a   :  { %v5773_v6 = vpop.eup %5772  ;;  %v4216_v54 = vadd.f32 1.0, %v5771_v19 }
 0x96b   :  { %v5775_v47 = vpop.eup %5774  ;;  %v4214_v34 = vadd.f32 1.0, %v5773_v6 }
 0x96c   :  { %v5777_v22 = vpop.eup %5776  ;;  %5786 = vrcp.f32 %v4216_v54  ;;  %v4217_v62 = vadd.f32 1.0, %v5775_v47 }
 0x96d   :  { %5788 = vrcp.f32 %v4214_v34  ;;  %v4215_v46 = vadd.f32 1.0, %v5777_v22 }
 0x96e   :  { %v5779_v61 = vpop.eup %5778  ;;  %5790 = vrcp.f32 %v4217_v62 }
 0x96f   :  { %v5781_v38 = vpop.eup %5780  ;;  %5792 = vrcp.f32 %v4215_v46  ;;  %v4236_v13 = vmul.f32 %v5779_v61, %v4180_v1  ;;  %v3840_v1 = vpop.permute.xlu1 %3839 }
 0x970   :  { %v5783_v17 = vpop.eup %5782  ;;  %v4234_v30 = vmul.f32 %v5781_v38, %v4178_v21  ;;  %v3845_v21 = vpop.permute.xlu0 %3844  ;;  %v3877_v26 = vmul.f32 %v8188_v15, %v3840_v1 }
 0x971   :  { %v5785_v24 = vpop.eup %5784  ;;  %v4237_v55 = vmul.f32 %v5783_v17, %v4181_v0 }
 0x972   :  { %v4235_v40 = vmul.f32 %v5785_v24, %v4179_v59  ;;  %v4664_v53 = vclamps-f32 %v3877_v26, 100.0 }
 0x973   :  { %v4243_v51 = vpack.c.bf16 %v4237_v55, %v4236_v13  ;;  %v3850_v0 = vpop.permute.xlu1 %3849 }
 0x974   :  { %v4242_v14 = vpack.c.bf16 %v4235_v40, %v4234_v30  ;;  %v3855_v41 = vpop.permute.xlu0 %3854  ;;  %v3879_v2 = vmul.f32 %v8194_v42, %v3850_v0  ;;  %v8421_v42 = vld [vmem:[#allocation46_spill] sm:$0xff] }
 0x975   :  { %v3880_v18 = vmul.f32 %v8196_v9, %v3855_v41  ;;  %vm8422_vm4 = vcmp.lt.s32.totalorder %v8421_v42, 3 }
 0x976   :  { %v5787_v49 = vpop.eup %5786  ;;  %5216 = vmatprep.mubr.msk.bf16.mxu0 %vm2409_vm5, %v4242_v14  ;;  %v4666_v16 = vclamps-f32 %v3879_v2, 100.0  ;;  %vm8424_vm11 = vmmov %vm8422_vm4 }
 0x977   :  { %v5789_v63 = vpop.eup %5788  ;;  %5217 = vmatmul.mubr.msk.bf16.vlgmr.msra.gmra.mrb[80].mxu0 %vm2409_vm5, %v4243_v51  ;;  %v4240_v44 = vmul.f32 %v5787_v49, %v4184_v25  ;;  %v3860_v59 = vpop.permute.xlu1 %3859  ;;  %v3878_v25 = vmul.f32 %v8190_v23, %v3845_v21  ;;  %v4667_v7 = vclamps-f32 %v3880_v18, 100.0  ;;  %vm8425_vm0 = vmmov %vm8422_vm4 }
 0x978   :  { %v5791_v4 = vpop.eup %5790  ;;  %v4238_v58 = vmul.f32 %v5789_v63, %v4182_v60  ;;  %v3865_v36 = vpop.permute.xlu0 %3864  ;;  %v4697_v60 = vld [vmem:[#allocation33] ss:$0 sm:$0xff]  ;;  %v3903_v56 = vsel %vm8422_vm4, %v4666_v16, 0.0  ;;  %v3881_v5 = vmul.f32 %v8200_v31, %v3860_v59  ;;  %vm8426_vm1 = vmmov %vm8425_vm0 }
 0x979   :  { %v5793_v35 = vpop.eup %5792  ;;  %v4241_v39 = vmul.f32 %v5791_v4, %v4185_v52  ;;  %v4665_v27 = vclamps-f32 %v3878_v25, 100.0  ;;  %v3882_v6 = vmul.f32 %v8202_v57, %v3865_v36  ;;  %vm8427_vm2 = vmmov %vm8425_vm0 }
 0x97a   :  { %v4239_v33 = vmul.f32 %v5793_v35, %v4183_v48  ;;  %v4668_v22 = vclamps-f32 %v3881_v5, 100.0  ;;  %vm8428_vm3 = vmmov %vm8425_vm0 }
 0x97b   :  { %v4245_v50 = vpack.c.bf16 %v4241_v39, %v4240_v44  ;;  %v3870_v45 = vpop.permute.xlu1 %3869  ;;  %v3902_v31 = vsel %vm8425_vm0, %v4665_v27, 0.0  ;;  %v4669_v46 = vclamps-f32 %v3882_v6, 100.0  ;;  %vm8429_vm6 = vmmov %vm8425_vm0 }
 0x97c   :  { %v4244_v28 = vpack.c.bf16 %v4239_v33, %v4238_v58  ;;  %v3883_v37 = vmul.f32 %v8206_v12, %v3870_v45  ;;  %v3875_v9 = vpop.permute.xlu0 %3874  ;;  %v3904_v12 = vsel %vm8424_vm11, %v4667_v7, 0.0  ;;  %v3905_v55 = vsel %vm8427_vm2, %v4668_v22, 0.0 }
 0x97d   :  { %v3884_v3 = vmul.f32 %v8208_v32, %v3875_v9  ;;  %v3906_v4 = vsel %vm8429_vm6, %v4669_v46, 0.0 }
 0x97e   :  { %5220 = vmatprep.mubr.msk.bf16.mxu0 %vm2409_vm5, %v4244_v28  ;;  %v4670_v47 = vclamps-f32 %v3883_v37, 100.0 }
 0x97f   :  { %5221 = vmatmul.mubr.msk.bf16.gmra.mrb[84].mxu0 %vm2409_vm5, %v4245_v50  ;;  %vm8423_vm5 = vmmov %vm8422_vm4  ;;  %v4671_v62 = vclamps-f32 %v3884_v3, 100.0 }
 0x980   :  { %v3901_v11 = vsel %vm8423_vm5, %v4664_v53, 0.0  ;;  %v3907_v17 = vsel %vm8426_vm1, %v4670_v47, 0.0 }
 0x981   :  { %v3908_v14 = vsel %vm8428_vm3, %v4671_v62, 0.0 }
 0xa4a   :  { %v5218_v52 = vpop.f32.mrb[80].mxu0 }
 0xa4b   :  { %v4324_v48 = vadd.f32 %v5218_v52, %v4697_v60  ;;  %v4315_v43 = vpop.f32.mrb[81].mxu0 }
 0xa4c   :  { %v4316_v15 = vadd.f32 %v4697_v60, %v4315_v43  ;;  %v5219_v8 = vpop.f32.mrb[82].mxu0 }
 0xa4d   :  { %v4348_v23 = vadd.f32 %v4324_v48, %v3903_v56  ;;  %v4327_v29 = vadd.f32 %v5219_v8, %v4697_v60  ;;  %v4318_v10 = vpop.f32.mrb[83].mxu0 }
 0xa4e   :  { %v4346_v20 = vadd.f32 %v4316_v15, %v3901_v11  ;;  %v4319_v19 = vadd.f32 %v4697_v60, %v4318_v10 }
 0xa4f   :  { %4356 = vst [vmem:[#allocation34 + $0x10] sm:$0xff] %v4348_v23  ;;  %v4349_v54 = vadd.f32 %v4327_v29, %v3904_v12 }
 0xa50   :  { %4354 = vst [vmem:[#allocation34] sm:$0xff] %v4346_v20  ;;  %v4347_v34 = vadd.f32 %v4319_v19, %v3902_v31 }
 0xa51   :  { %4357 = vst [vmem:[#allocation34 + $0x18] sm:$0xff] %v4349_v54 }
 0xa52   :  { %4355 = vst [vmem:[#allocation34 + $0x8] sm:$0xff] %v4347_v34  ;;  %v5222_v32 = vpop.f32.mrb[84].mxu0 }
 0xa53   :  { %v4340_v61 = vadd.f32 %v5222_v32, %v4697_v60  ;;  %v4331_v38 = vpop.f32.mrb[85].mxu0 }
 0xa54   :  { %v4332_v57 = vadd.f32 %v4697_v60, %v4331_v38  ;;  %v5223_v24 = vpop.f32.mrb[86].mxu0 }
 0xa55   :  { %v4352_v13 = vadd.f32 %v4340_v61, %v3907_v17  ;;  %v4343_v30 = vadd.f32 %v5223_v24, %v4697_v60  ;;  %v4334_v40 = vpop.f32.mrb[87].mxu0 }
 0xa56   :  { %v4350_v51 = vadd.f32 %v4332_v57, %v3905_v55  ;;  %v4335_v49 = vadd.f32 %v4697_v60, %v4334_v40 }
 0xa57   :  { %4360 = vst [vmem:[#allocation34 + $0x30] sm:$0xff] %v4352_v13  ;;  %v4353_v63 = vadd.f32 %v4343_v30, %v3908_v14 }
 0xa58   :  { %4358 = vst [vmem:[#allocation34 + $0x20] sm:$0xff] %v4350_v51  ;;  %v4351_v35 = vadd.f32 %v4335_v49, %v3906_v4 }
 0xa59   :  { %4361 = vst [vmem:[#allocation34 + $0x38] sm:$0xff] %v4353_v63 }
 0xa5a   :  { %4359 = vst [vmem:[#allocation34 + $0x28] sm:$0xff] %v4351_v35 }
 0xa5b   :  { %6227 = shalt.err (!%p6224_p2)
}
 0xa5c   :  { %s8430_s28 = sld [smem:[#allocation88_spill]] }
 0xa62   :  { %s6228_s9 = scalar_lea.hbm %s8430_s28, 1024 }
 0xa63   :  { %p6229_p3 = scmp.ne.s32.totalorder %s8430_s28, %s6228_s9  ;;  %p6232_p4 = scmp.lt.u32.totalorder %s6228_s9, %s8430_s28 }
 0xa65   :  { %p6234_p5 = pnand %p6232_p4, %p6229_p3 }
 0xa67   :  { %6237 = shalt.err (!%p6234_p5)
}
 0xa68   :  { %4373 = dma.vmem_to_hbm [thread:$0]  %s4368_s16, 1024, %s8430_s28, [#allocation6], %s6272_s18, %s6272_s18, %s6273_s4  }
 0xa69   :  { %6258 = dma.done.wait [#allocation6], 1024  }
 0xa6a   :  { %6259 = vsyncadd [#allocation6], 4294966272 }
 0xa6b   :  { %4377 = vsyncpa [#allocation5], 1 }
 0xa6c   :  { %4378 = vsyncpa [#allocation8], 1 }
 0xa6d   :  { %4379 = vsyncpa [#allocation11], 1 }
 0xa6e   :  { %4380 = vsyncpa [#allocation14], 1 }
 0xa6f   :  { %4381 = vsyncpa [#allocation17], 1 }
 0xa70   :  { %4382 = vsyncpa [#allocation20], 1 }
 0xa71   :  { %4383 = vsyncpa [#allocation23], 1 }
 0xa72   :  { %4384 = vsyncpa [#allocation26], 1 }
 0xa73   :  { %4385 = vsyncpa [#allocation29], 1 }
 0xa74   :  { %4386 = vsyncpa [#allocation32], 1 }
 0xa75   :  { %4387 = vsyncpa [#allocation6], 1 }

</bundles_post_ra>
